<compile_context>
chip_gen: v6e
topology: v6e:2x2x1
jax: 0.10.0
libtpu: 0.0.40
codegen_flags: <defaults>
</compile_context>

<pallas_src>
import functools

import jax
import jax.numpy as jnp
from jax import lax
from jax.experimental import pallas as pl
from jax.experimental.pallas import tpu as pltpu


def _round_up(x, m):
    return (x + m - 1) // m * m


def _vmem_capacity_bytes():
    try:
        return int(pltpu.get_tpu_info().vmem_capacity_bytes)
    except Exception:
        return 64 * 1024 * 1024   # conservative default (v7x per-core VMEM)


def _vmem_estimate(th, h, w, cp, wp):
    """Rough per-step VMEM working set (bytes) for band height `th`."""
    m1 = (th + 2) * w
    m2 = th * w
    return (2 * (h + 4) * (w + 2) * cp * 2        # double-buffered padded image (bf16)
            + 2 * 2 * 9 * cp * cp * 2             # double-buffered weight packs (bf16)
            + 2 * th * w * cp * 2                 # double-buffered output band (bf16)
            + (th + 2) * wp * cp * 2              # y1 scratch (bf16)
            + m1 * 9 * cp * 2 + m1 * cp * 4       # stage-1 im2col lhs + f32 result
            + m2 * 9 * cp * 2 + m2 * cp * 4)      # stage-2 im2col lhs + f32 result


def _pick_band(h, w, cp, budget):
    """Prefer TH = H (no halo recompute, minimal grid); else largest fitting divisor."""
    wp = _round_up(w + 9, 8)
    if _vmem_estimate(h, h, w, cp, wp) <= budget:
        return h
    best = 1
    for d in range(2, h):
        if h % d == 0 and _vmem_estimate(d, h, w, cp, wp) <= budget:
            best = d
    return best


# ----------------------------------------------------------------------------
# Fused BasicBlock kernel: conv1+BN1+ReLU -> conv2+BN2+residual+ReLU
# ----------------------------------------------------------------------------
def _basic_block_kernel(x_ref, w1_ref, w2_ref, b1_ref, b2_ref, o_ref, y1_ref,
                        *, TH, H, W, Cp, L):
    # x_ref : (1, H+4, W+2, Cp) bf16   spatially + channel padded input image
    # w1_ref: (9*Cp, Cp)        bf16   conv1 weights (BN1 folded), all taps merged
    # w2_ref: (9*Cp, Cp)        bf16   conv2 weights (BN2 folded), all taps merged
    # b1_ref: (1, Cp)           f32    folded BN1 bias
    # b2_ref: (1, Cp)           f32    folded BN2 bias
    # o_ref : (1, TH, W, Cp)    bf16   output row band
    # y1_ref: (TH+2, WP, Cp)    bf16   stage-1 band scratch; interior at cols [L, L+W)
    j = pl.program_id(1)
    r0 = j * TH

    # One-time (per image) zero of the two W-halo columns of the persistent
    # scratch; they are never written by the interior store so they stay zero.
    @pl.when(j == 0)
    def _():
        zcol = jnp.zeros((TH + 2, 1, Cp), y1_ref.dtype)
        y1_ref[:, pl.ds(L - 1, 1), :] = zcol
        y1_ref[:, pl.ds(L + W, 1), :] = zcol

    # ---- stage 1: conv1 + bias1 + ReLU for rows [r0-1, r0+TH]  (one K=9*Cp dot) ----
    m1 = (TH + 2) * W
    lhs1 = jnp.concatenate(
        [x_ref[0, pl.ds(r0 + ky, TH + 2), pl.ds(kx, W), :]
         for ky in range(3) for kx in range(3)],
        axis=-1,
    ).reshape(m1, 9 * Cp)
    y1 = jnp.dot(lhs1, w1_ref[...], preferred_element_type=jnp.float32) + b1_ref[0]
    y1 = jnp.maximum(y1, 0.0).reshape(TH + 2, W, Cp)
    y1_ref[:, pl.ds(L, W), :] = y1.astype(y1_ref.dtype)   # sublane-aligned store

    # Out-of-image halo rows must be conv2's *zero* padding, not conv1 of the
    # zero-padded input.  Only the first / last band pay a single row store.
    @pl.when(j == 0)
    def _():
        y1_ref[pl.ds(0, 1), pl.ds(L, W), :] = jnp.zeros((1, W, Cp), y1_ref.dtype)

    @pl.when(j == pl.num_programs(1) - 1)
    def _():
        y1_ref[pl.ds(TH + 1, 1), pl.ds(L, W), :] = jnp.zeros((1, W, Cp), y1_ref.dtype)

    # ---- stage 2: conv2 + bias2 + residual + ReLU for rows [r0, r0+TH) ----
    m2 = TH * W
    lhs2 = jnp.concatenate(
        [y1_ref[pl.ds(ky, TH), pl.ds(L - 1 + kx, W), :]
         for ky in range(3) for kx in range(3)],
        axis=-1,
    ).reshape(m2, 9 * Cp)
    res = x_ref[0, pl.ds(r0 + 2, TH), pl.ds(1, W), :].astype(jnp.float32)
    out = jnp.dot(lhs2, w2_ref[...], preferred_element_type=jnp.float32) + b2_ref[0]
    out = jnp.maximum(out.reshape(TH, W, Cp) + res, 0.0)
    o_ref[0] = out.astype(o_ref.dtype)


def _basic_block_call(xp, w1m, w2m, b1, b2, *, H, W, TH, Cp, L, WP):
    n = xp.shape[0]
    n_bands = H // TH
    kernel = functools.partial(_basic_block_kernel, TH=TH, H=H, W=W, Cp=Cp, L=L)

    capacity = _vmem_capacity_bytes()
    est = _vmem_estimate(TH, H, W, Cp, WP)
    cp_kwargs = dict(dimension_semantics=("parallel", "arbitrary"))
    if est > 12 * 1024 * 1024:
        # leave headroom below physical VMEM (critical on v7x: 64 MiB total)
        cp_kwargs["vmem_limit_bytes"] = min(int(1.3 * est), int(0.75 * capacity))

    flops = 4 * 9 * Cp * Cp * n * H * W             # two 3x3 convs, 2 flops/MAC
    bytes_accessed = (n * (H + 4) * (W + 2) * Cp * 2
                      + 2 * 9 * Cp * Cp * 2 * 2
                      + 2 * Cp * 4
                      + n * H * W * Cp * 2)

    grid_spec = pltpu.PrefetchScalarGridSpec(
        num_scalar_prefetch=0,
        grid=(n, n_bands),
        in_specs=[
            # whole padded image stays resident across the (sequential) band
            # axis: index map constant in j -> fetched once per image.
            pl.BlockSpec((1, H + 4, W + 2, Cp), lambda i, j: (i, 0, 0, 0)),
            pl.BlockSpec((9 * Cp, Cp), lambda i, j: (0, 0)),
            pl.BlockSpec((9 * Cp, Cp), lambda i, j: (0, 0)),
            pl.BlockSpec((1, Cp), lambda i, j: (0, 0)),
            pl.BlockSpec((1, Cp), lambda i, j: (0, 0)),
        ],
        out_specs=pl.BlockSpec((1, TH, W, Cp), lambda i, j: (i, j, 0, 0)),
        scratch_shapes=[pltpu.VMEM((TH + 2, WP, Cp), jnp.bfloat16)],
    )
    return pl.pallas_call(
        kernel,
        out_shape=jax.ShapeDtypeStruct((n, H, W, Cp), jnp.bfloat16),
        grid_spec=grid_spec,
        compiler_params=pltpu.CompilerParams(**cp_kwargs),
        cost_estimate=pl.CostEstimate(flops=flops, transcendentals=0,
                                      bytes_accessed=bytes_accessed),
    )(xp, w1m, w2m, b1, b2)


# ----------------------------------------------------------------------------
# Parameter init / BN folding / channel padding + fully tap-merged weight pack
# ----------------------------------------------------------------------------
def init_basic_block_params(key, in_channel, out_channel):
    ks = jax.random.split(key, 10)
    p = {}
    p["w1"] = 0.1 * jax.random.normal(ks[0], (3, 3, in_channel, out_channel), jnp.float32)
    p["w2"] = 0.1 * jax.random.normal(ks[1], (3, 3, out_channel, out_channel), jnp.float32)
    p["gamma1"] = 1.0 + 0.1 * jax.random.normal(ks[2], (out_channel,), jnp.float32)
    p["beta1"] = 0.1 * jax.random.normal(ks[3], (out_channel,), jnp.float32)
    p["mean1"] = 0.1 * jax.random.normal(ks[4], (out_channel,), jnp.float32)
    p["var1"] = jnp.abs(jax.random.normal(ks[5], (out_channel,), jnp.float32)) + 0.5
    p["gamma2"] = 1.0 + 0.1 * jax.random.normal(ks[6], (out_channel,), jnp.float32)
    p["beta2"] = 0.1 * jax.random.normal(ks[7], (out_channel,), jnp.float32)
    p["mean2"] = 0.1 * jax.random.normal(ks[8], (out_channel,), jnp.float32)
    p["var2"] = jnp.abs(jax.random.normal(ks[9], (out_channel,), jnp.float32)) + 0.5
    return p


def prepare_kernel_params(raw, eps=1e-5):
    cin, cout = raw["w1"].shape[2], raw["w1"].shape[3]
    assert cin == cout, "identity shortcut requires in_channel == out_channel"
    cp = _round_up(cout, 128)

    def fold(w, gamma, beta, mean, var):
        s = gamma / jnp.sqrt(var + eps)
        return w * s, beta - mean * s

    w1f, b1 = fold(raw["w1"], raw["gamma1"], raw["beta1"], raw["mean1"], raw["var1"])
    w2f, b2 = fold(raw["w2"], raw["gamma2"], raw["beta2"], raw["mean2"], raw["var2"])

    def pack(w):
        # (3 ky, 3 kx, Ci, Co) -> channel-pad -> (9*Cp, Cp) bf16, (ky,kx,ci)-major K
        ci, co = w.shape[2], w.shape[3]
        wpad = jnp.pad(w, ((0, 0), (0, 0), (0, cp - ci), (0, cp - co)))
        return wpad.reshape(9 * cp, cp).astype(jnp.bfloat16)

    def pad_bias(b):
        return jnp.pad(b, (0, cp - b.shape[0])).reshape(1, cp).astype(jnp.float32)

    return {"w1m": pack(w1f), "w2m": pack(w2f), "b1": pad_bias(b1), "b2": pad_bias(b2)}


# ----------------------------------------------------------------------------
# Forward passes
# ----------------------------------------------------------------------------
def basic_block_forward_nhwc(x_nhwc_cp, kparams):
    """Chaining-friendly path: (N, H, W, Cp) bf16 in -> (N, H, W, Cp) bf16 out."""
    n, h, w, cp = x_nhwc_cp.shape
    xp = jnp.pad(x_nhwc_cp, ((0, 0), (2, 2), (1, 1), (0, 0)))     # spatial halo
    budget = int(0.55 * _vmem_capacity_bytes())
    th = _pick_band(h, w, cp, budget)
    wp = _round_up(w + 9, 8)
    return _basic_block_call(xp, kparams["w1m"], kparams["w2m"],
                             kparams["b1"], kparams["b2"],
                             H=h, W=w, TH=th, Cp=cp, L=8, WP=wp)


@jax.jit
def basic_block_forward(x_nchw, kparams):
    """BasicBlock forward (stride=1, downsample=None): NCHW in, NCHW out."""
    n, c, h, w = x_nchw.shape
    cp = kparams["b1"].shape[-1]
    x = jnp.transpose(x_nchw, (0, 2, 3, 1)).astype(jnp.bfloat16)   # NCHW -> NHWC
    x = jnp.pad(x, ((0, 0), (0, 0), (0, 0), (0, cp - c)))          # lane padding
    out = basic_block_forward_nhwc(x, kparams)
    return jnp.transpose(out[..., :c], (0, 3, 1, 2)).astype(x_nchw.dtype)


# ----------------------------------------------------------------------------
# Pure-JAX reference for verification (same bf16 operand / f32-accum recipe)
# ----------------------------------------------------------------------------
def _ref_forward(x_nchw, raw, eps=1e-5):
    x = jnp.transpose(x_nchw, (0, 2, 3, 1)).astype(jnp.bfloat16)
    s1 = raw["gamma1"] / jnp.sqrt(raw["var1"] + eps)
    b1 = raw["beta1"] - raw["mean1"] * s1
    s2 = raw["gamma2"] / jnp.sqrt(raw["var2"] + eps)
    b2 = raw["beta2"] - raw["mean2"] * s2
    w1 = (raw["w1"] * s1).astype(jnp.bfloat16)
    w2 = (raw["w2"] * s2).astype(jnp.bfloat16)
    dn = lax.conv_dimension_numbers(x.shape, w1.shape, ("NHWC", "HWIO", "NHWC"))

    def conv(a, w_):
        return lax.conv_general_dilated(a, w_, (1, 1), ((1, 1), (1, 1)),
                                        dimension_numbers=dn,
                                        preferred_element_type=jnp.float32)

    y = jnp.maximum(conv(x, w1) + b1, 0.0)
    y = jnp.maximum(conv(y.astype(jnp.bfloat16), w2) + b2 + x.astype(jnp.float32), 0.0)
    y = y.astype(jnp.bfloat16)   # match the kernel's bf16 writeback
    return jnp.transpose(y, (0, 3, 1, 2)).astype(x_nchw.dtype)


if __name__ == "__main__":
    key = jax.random.PRNGKey(0)
    k_x, k_p = jax.random.split(key)

    N, C, H, W = 2, 4, 16, 16
    x = jax.random.normal(k_x, (N, C, H, W), jnp.float32)
    raw = init_basic_block_params(k_p, in_channel=C, out_channel=C)
    kparams = prepare_kernel_params(raw)

    out = basic_block_forward(x, kparams)
    out = jax.block_until_ready(out)

    ref = _ref_forward(x, raw)
    assert out.shape == (N, C, H, W)
    max_err = float(jnp.max(jnp.abs(out - ref)))
    assert jnp.allclose(out, ref, atol=3e-2, rtol=3e-2), f"mismatch vs reference: {max_err}"

    print("KERNEL_OK")
</pallas_src>

<mosaic_0001>
module attributes {stable_mosaic.version = 11 : i64} {
  func.func @_basic_block_kernel(%arg0: i32, %arg1: i32, %arg2: memref<1x20x18x128xbf16, #tpu.memory_space<vmem>>, %arg3: memref<1152x128xbf16, #tpu.memory_space<vmem>>, %arg4: memref<1152x128xbf16, #tpu.memory_space<vmem>>, %arg5: memref<1x128xf32, #tpu.memory_space<vmem>>, %arg6: memref<1x128xf32, #tpu.memory_space<vmem>>, %arg7: memref<1x16x16x128xbf16, #tpu.memory_space<vmem>>, %arg8: memref<18x32x128xbf16, #tpu.memory_space<vmem>>) attributes {dimension_semantics = [#tpu.dimension_semantics<parallel>, #tpu.dimension_semantics<arbitrary>], iteration_bounds = array<i64: 2, 1>, scalar_prefetch = 0 : i64, scratch_operands = 1 : i64, tpu.core_type = #tpu.core_type<tc>, window_params = [{transform_indices = @transform_0, window_bounds = array<i64: 1, 20, 18, 128>}, {pipeline_mode = #tpu.pipeline_mode<synchronous>, transform_indices = @transform_1, window_bounds = array<i64: 1152, 128>}, {pipeline_mode = #tpu.pipeline_mode<synchronous>, transform_indices = @transform_2, window_bounds = array<i64: 1152, 128>}, {pipeline_mode = #tpu.pipeline_mode<synchronous>, transform_indices = @transform_3, window_bounds = array<i64: 1, 128>}, {pipeline_mode = #tpu.pipeline_mode<synchronous>, transform_indices = @transform_4, window_bounds = array<i64: 1, 128>}, {transform_indices = @transform_5, window_bounds = array<i64: 1, 16, 16, 128>}]} {
    %c16_i32 = arith.constant 16 : i32
    %0 = arith.muli %arg1, %c16_i32 : i32
    %c0_i32 = arith.constant 0 : i32
    %1 = arith.cmpi eq, %arg1, %c0_i32 : i32
    %2 = arith.extui %1 : i1 to i32
    %c0_i32_0 = arith.constant 0 : i32
    %3 = arith.cmpi ne, %2, %c0_i32_0 : i32
    scf.if %3 {
      %cst_82 = arith.constant 0.000000e+00 : bf16
      %91 = vector.broadcast %cst_82 : bf16 to vector<18x1x128xbf16>
      %c0_83 = arith.constant 0 : index
      %c7_84 = arith.constant 7 : index
      %c0_85 = arith.constant 0 : index
      %92 = vector.load %arg8[%c0_83, %c7_84, %c0_85] : memref<18x32x128xbf16, #tpu.memory_space<vmem>>, vector<18x1x128xbf16>
      tpu.vector_store %arg8[%c0_83, %c7_84, %c0_85], %91 {strides = array<i32>} : memref<18x32x128xbf16, #tpu.memory_space<vmem>>, vector<18x1x128xbf16>,
      %c0_86 = arith.constant 0 : index
      %c24 = arith.constant 24 : index
      %c0_87 = arith.constant 0 : index
      %93 = vector.load %arg8[%c0_86, %c24, %c0_87] : memref<18x32x128xbf16, #tpu.memory_space<vmem>>, vector<18x1x128xbf16>
      tpu.vector_store %arg8[%c0_86, %c24, %c0_87], %91 {strides = array<i32>} : memref<18x32x128xbf16, #tpu.memory_space<vmem>>, vector<18x1x128xbf16>,
    } else {
    }
    %c0_i32_1 = arith.constant 0 : i32
    %4 = arith.addi %0, %c0_i32_1 : i32
    %c0 = arith.constant 0 : index
    %5 = arith.index_cast %4 : i32 to index
    %c0_2 = arith.constant 0 : index
    %c0_3 = arith.constant 0 : index
    %6 = vector.load %arg2[%c0, %5, %c0_2, %c0_3] : memref<1x20x18x128xbf16, #tpu.memory_space<vmem>>, vector<1x18x16x128xbf16>
    %7 = vector.shape_cast %6 : vector<1x18x16x128xbf16> to vector<18x16x128xbf16>
    %c0_i32_4 = arith.constant 0 : i32
    %8 = arith.addi %0, %c0_i32_4 : i32
    %c0_5 = arith.constant 0 : index
    %9 = arith.index_cast %8 : i32 to index
    %c1 = arith.constant 1 : index
    %c0_6 = arith.constant 0 : index
    %10 = vector.load %arg2[%c0_5, %9, %c1, %c0_6] : memref<1x20x18x128xbf16, #tpu.memory_space<vmem>>, vector<1x18x16x128xbf16>
    %11 = vector.shape_cast %10 : vector<1x18x16x128xbf16> to vector<18x16x128xbf16>
    %c0_i32_7 = arith.constant 0 : i32
    %12 = arith.addi %0, %c0_i32_7 : i32
    %c0_8 = arith.constant 0 : index
    %13 = arith.index_cast %12 : i32 to index
    %c2 = arith.constant 2 : index
    %c0_9 = arith.constant 0 : index
    %14 = vector.load %arg2[%c0_8, %13, %c2, %c0_9] : memref<1x20x18x128xbf16, #tpu.memory_space<vmem>>, vector<1x18x16x128xbf16>
    %15 = vector.shape_cast %14 : vector<1x18x16x128xbf16> to vector<18x16x128xbf16>
    %c1_i32 = arith.constant 1 : i32
    %16 = arith.addi %0, %c1_i32 : i32
    %c0_10 = arith.constant 0 : index
    %17 = arith.index_cast %16 : i32 to index
    %c0_11 = arith.constant 0 : index
    %c0_12 = arith.constant 0 : index
    %18 = vector.load %arg2[%c0_10, %17, %c0_11, %c0_12] : memref<1x20x18x128xbf16, #tpu.memory_space<vmem>>, vector<1x18x16x128xbf16>
    %19 = vector.shape_cast %18 : vector<1x18x16x128xbf16> to vector<18x16x128xbf16>
    %c1_i32_13 = arith.constant 1 : i32
    %20 = arith.addi %0, %c1_i32_13 : i32
    %c0_14 = arith.constant 0 : index
    %21 = arith.index_cast %20 : i32 to index
    %c1_15 = arith.constant 1 : index
    %c0_16 = arith.constant 0 : index
    %22 = vector.load %arg2[%c0_14, %21, %c1_15, %c0_16] : memref<1x20x18x128xbf16, #tpu.memory_space<vmem>>, vector<1x18x16x128xbf16>
    %23 = vector.shape_cast %22 : vector<1x18x16x128xbf16> to vector<18x16x128xbf16>
    %c1_i32_17 = arith.constant 1 : i32
    %24 = arith.addi %0, %c1_i32_17 : i32
    %c0_18 = arith.constant 0 : index
    %25 = arith.index_cast %24 : i32 to index
    %c2_19 = arith.constant 2 : index
    %c0_20 = arith.constant 0 : index
    %26 = vector.load %arg2[%c0_18, %25, %c2_19, %c0_20] : memref<1x20x18x128xbf16, #tpu.memory_space<vmem>>, vector<1x18x16x128xbf16>
    %27 = vector.shape_cast %26 : vector<1x18x16x128xbf16> to vector<18x16x128xbf16>
    %c2_i32 = arith.constant 2 : i32
    %28 = arith.addi %0, %c2_i32 : i32
    %c0_21 = arith.constant 0 : index
    %29 = arith.index_cast %28 : i32 to index
    %c0_22 = arith.constant 0 : index
    %c0_23 = arith.constant 0 : index
    %30 = vector.load %arg2[%c0_21, %29, %c0_22, %c0_23] : memref<1x20x18x128xbf16, #tpu.memory_space<vmem>>, vector<1x18x16x128xbf16>
    %31 = vector.shape_cast %30 : vector<1x18x16x128xbf16> to vector<18x16x128xbf16>
    %c2_i32_24 = arith.constant 2 : i32
    %32 = arith.addi %0, %c2_i32_24 : i32
    %c0_25 = arith.constant 0 : index
    %33 = arith.index_cast %32 : i32 to index
    %c1_26 = arith.constant 1 : index
    %c0_27 = arith.constant 0 : index
    %34 = vector.load %arg2[%c0_25, %33, %c1_26, %c0_27] : memref<1x20x18x128xbf16, #tpu.memory_space<vmem>>, vector<1x18x16x128xbf16>
    %35 = vector.shape_cast %34 : vector<1x18x16x128xbf16> to vector<18x16x128xbf16>
    %c2_i32_28 = arith.constant 2 : i32
    %36 = arith.addi %0, %c2_i32_28 : i32
    %c0_29 = arith.constant 0 : index
    %37 = arith.index_cast %36 : i32 to index
    %c2_30 = arith.constant 2 : index
    %c0_31 = arith.constant 0 : index
    %38 = vector.load %arg2[%c0_29, %37, %c2_30, %c0_31] : memref<1x20x18x128xbf16, #tpu.memory_space<vmem>>, vector<1x18x16x128xbf16>
    %39 = vector.shape_cast %38 : vector<1x18x16x128xbf16> to vector<18x16x128xbf16>
    %40 = tpu.concatenate %7, %11, %15, %19, %23, %27, %31, %35, %39 in 2 : vector<18x16x128xbf16>, vector<18x16x128xbf16>, vector<18x16x128xbf16>, vector<18x16x128xbf16>, vector<18x16x128xbf16>, vector<18x16x128xbf16>, vector<18x16x128xbf16>, vector<18x16x128xbf16>, vector<18x16x128xbf16> -> vector<18x16x1152xbf16>
    %41 = vector.shape_cast %40 : vector<18x16x1152xbf16> to vector<288x1152xbf16>
    %c0_32 = arith.constant 0 : index
    %c0_33 = arith.constant 0 : index
    %42 = vector.load %arg3[%c0_32, %c0_33] : memref<1152x128xbf16, #tpu.memory_space<vmem>>, vector<1152x128xbf16>
    %cst = arith.constant dense<0.000000e+00> : vector<288x128xf32>
    %43 = tpu.matmul %41, %42, %cst {dimension_numbers = #tpu.dot_dimension_numbers<[1], [0], [0], [1], [0, 0, 1, 1], [], []>} : vector<288x1152xbf16>, vector<1152x128xbf16>, vector<288x128xf32> -> vector<288x128xf32>
    %c0_34 = arith.constant 0 : index
    %c0_35 = arith.constant 0 : index
    %44 = vector.load %arg5[%c0_34, %c0_35] : memref<1x128xf32, #tpu.memory_space<vmem>>, vector<1x128xf32>
    %45 = vector.shape_cast %44 : vector<1x128xf32> to vector<128xf32>
    %46 = vector.shape_cast %45 : vector<128xf32> to vector<1x128xf32>
    %47 = vector.broadcast %46 : vector<1x128xf32> to vector<288x128xf32>
    %48 = arith.addf %43, %47 : vector<288x128xf32>
    %cst_36 = arith.constant 0.000000e+00 : f32
    %49 = vector.broadcast %cst_36 : f32 to vector<288x128xf32>
    %50 = arith.maximumf %48, %49 : vector<288x128xf32>
    %51 = vector.shape_cast %50 : vector<288x128xf32> to vector<18x16x128xf32>
    %52 = arith.truncf %51 : vector<18x16x128xf32> to vector<18x16x128xbf16>
    %c0_37 = arith.constant 0 : index
    %c8 = arith.constant 8 : index
    %c0_38 = arith.constant 0 : index
    %53 = vector.load %arg8[%c0_37, %c8, %c0_38] : memref<18x32x128xbf16, #tpu.memory_space<vmem>>, vector<18x16x128xbf16>
    tpu.vector_store %arg8[%c0_37, %c8, %c0_38], %52 {strides = array<i32>} : memref<18x32x128xbf16, #tpu.memory_space<vmem>>, vector<18x16x128xbf16>,
    %c0_i32_39 = arith.constant 0 : i32
    %54 = arith.cmpi eq, %arg1, %c0_i32_39 : i32
    %55 = arith.extui %54 : i1 to i32
    %c0_i32_40 = arith.constant 0 : i32
    %56 = arith.cmpi ne, %55, %c0_i32_40 : i32
    scf.if %56 {
      %cst_82 = arith.constant 0.000000e+00 : bf16
      %91 = vector.broadcast %cst_82 : bf16 to vector<1x16x128xbf16>
      %c0_83 = arith.constant 0 : index
      %c8_84 = arith.constant 8 : index
      %c0_85 = arith.constant 0 : index
      %92 = vector.load %arg8[%c0_83, %c8_84, %c0_85] : memref<18x32x128xbf16, #tpu.memory_space<vmem>>, vector<1x16x128xbf16>
      tpu.vector_store %arg8[%c0_83, %c8_84, %c0_85], %91 {strides = array<i32>} : memref<18x32x128xbf16, #tpu.memory_space<vmem>>, vector<1x16x128xbf16>,
    } else {
    }
    %c0_i32_41 = arith.constant 0 : i32
    %57 = arith.cmpi eq, %arg1, %c0_i32_41 : i32
    %58 = arith.extui %57 : i1 to i32
    %c0_i32_42 = arith.constant 0 : i32
    %59 = arith.cmpi ne, %58, %c0_i32_42 : i32
    scf.if %59 {
      %cst_82 = arith.constant 0.000000e+00 : bf16
      %91 = vector.broadcast %cst_82 : bf16 to vector<1x16x128xbf16>
      %c17 = arith.constant 17 : index
      %c8_83 = arith.constant 8 : index
      %c0_84 = arith.constant 0 : index
      %92 = vector.load %arg8[%c17, %c8_83, %c0_84] : memref<18x32x128xbf16, #tpu.memory_space<vmem>>, vector<1x16x128xbf16>
      tpu.vector_store %arg8[%c17, %c8_83, %c0_84], %91 {strides = array<i32>} : memref<18x32x128xbf16, #tpu.memory_space<vmem>>, vector<1x16x128xbf16>,
    } else {
    }
    %c0_43 = arith.constant 0 : index
    %c7 = arith.constant 7 : index
    %c0_44 = arith.constant 0 : index
    %60 = vector.load %arg8[%c0_43, %c7, %c0_44] : memref<18x32x128xbf16, #tpu.memory_space<vmem>>, vector<16x16x128xbf16>
    %c0_45 = arith.constant 0 : index
    %c8_46 = arith.constant 8 : index
    %c0_47 = arith.constant 0 : index
    %61 = vector.load %arg8[%c0_45, %c8_46, %c0_47] : memref<18x32x128xbf16, #tpu.memory_space<vmem>>, vector<16x16x128xbf16>
    %c0_48 = arith.constant 0 : index
    %c9 = arith.constant 9 : index
    %c0_49 = arith.constant 0 : index
    %62 = vector.load %arg8[%c0_48, %c9, %c0_49] : memref<18x32x128xbf16, #tpu.memory_space<vmem>>, vector<16x16x128xbf16>
    %c1_50 = arith.constant 1 : index
    %c7_51 = arith.constant 7 : index
    %c0_52 = arith.constant 0 : index
    %63 = vector.load %arg8[%c1_50, %c7_51, %c0_52] : memref<18x32x128xbf16, #tpu.memory_space<vmem>>, vector<16x16x128xbf16>
    %c1_53 = arith.constant 1 : index
    %c8_54 = arith.constant 8 : index
    %c0_55 = arith.constant 0 : index
    %64 = vector.load %arg8[%c1_53, %c8_54, %c0_55] : memref<18x32x128xbf16, #tpu.memory_space<vmem>>, vector<16x16x128xbf16>
    %c1_56 = arith.constant 1 : index
    %c9_57 = arith.constant 9 : index
    %c0_58 = arith.constant 0 : index
    %65 = vector.load %arg8[%c1_56, %c9_57, %c0_58] : memref<18x32x128xbf16, #tpu.memory_space<vmem>>, vector<16x16x128xbf16>
    %c2_59 = arith.constant 2 : index
    %c7_60 = arith.constant 7 : index
    %c0_61 = arith.constant 0 : index
    %66 = vector.load %arg8[%c2_59, %c7_60, %c0_61] : memref<18x32x128xbf16, #tpu.memory_space<vmem>>, vector<16x16x128xbf16>
    %c2_62 = arith.constant 2 : index
    %c8_63 = arith.constant 8 : index
    %c0_64 = arith.constant 0 : index
    %67 = vector.load %arg8[%c2_62, %c8_63, %c0_64] : memref<18x32x128xbf16, #tpu.memory_space<vmem>>, vector<16x16x128xbf16>
    %c2_65 = arith.constant 2 : index
    %c9_66 = arith.constant 9 : index
    %c0_67 = arith.constant 0 : index
    %68 = vector.load %arg8[%c2_65, %c9_66, %c0_67] : memref<18x32x128xbf16, #tpu.memory_space<vmem>>, vector<16x16x128xbf16>
    %69 = tpu.concatenate %60, %61, %62, %63, %64, %65, %66, %67, %68 in 2 : vector<16x16x128xbf16>, vector<16x16x128xbf16>, vector<16x16x128xbf16>, vector<16x16x128xbf16>, vector<16x16x128xbf16>, vector<16x16x128xbf16>, vector<16x16x128xbf16>, vector<16x16x128xbf16>, vector<16x16x128xbf16> -> vector<16x16x1152xbf16>
    %70 = vector.shape_cast %69 : vector<16x16x1152xbf16> to vector<256x1152xbf16>
    %c2_i32_68 = arith.constant 2 : i32
    %71 = arith.addi %0, %c2_i32_68 : i32
    %c0_69 = arith.constant 0 : index
    %72 = arith.index_cast %71 : i32 to index
    %c1_70 = arith.constant 1 : index
    %c0_71 = arith.constant 0 : index
    %73 = vector.load %arg2[%c0_69, %72, %c1_70, %c0_71] : memref<1x20x18x128xbf16, #tpu.memory_space<vmem>>, vector<1x16x16x128xbf16>
    %74 = vector.shape_cast %73 : vector<1x16x16x128xbf16> to vector<16x16x128xbf16>
    %75 = arith.extf %74 : vector<16x16x128xbf16> to vector<16x16x128xf32>
    %c0_72 = arith.constant 0 : index
    %c0_73 = arith.constant 0 : index
    %76 = vector.load %arg4[%c0_72, %c0_73] : memref<1152x128xbf16, #tpu.memory_space<vmem>>, vector<1152x128xbf16>
    %cst_74 = arith.constant dense<0.000000e+00> : vector<256x128xf32>
    %77 = tpu.matmul %70, %76, %cst_74 {dimension_numbers = #tpu.dot_dimension_numbers<[1], [0], [0], [1], [0, 0, 1, 1], [], []>} : vector<256x1152xbf16>, vector<1152x128xbf16>, vector<256x128xf32> -> vector<256x128xf32>
    %c0_75 = arith.constant 0 : index
    %c0_76 = arith.constant 0 : index
    %78 = vector.load %arg6[%c0_75, %c0_76] : memref<1x128xf32, #tpu.memory_space<vmem>>, vector<1x128xf32>
    %79 = vector.shape_cast %78 : vector<1x128xf32> to vector<128xf32>
    %80 = vector.shape_cast %79 : vector<128xf32> to vector<1x128xf32>
    %81 = vector.broadcast %80 : vector<1x128xf32> to vector<256x128xf32>
    %82 = arith.addf %77, %81 : vector<256x128xf32>
    %83 = vector.shape_cast %82 : vector<256x128xf32> to vector<16x16x128xf32>
    %84 = arith.addf %83, %75 : vector<16x16x128xf32>
    %cst_77 = arith.constant 0.000000e+00 : f32
    %85 = vector.broadcast %cst_77 : f32 to vector<16x16x128xf32>
    %86 = arith.maximumf %84, %85 : vector<16x16x128xf32>
    %87 = arith.truncf %86 : vector<16x16x128xf32> to vector<16x16x128xbf16>
    %c0_78 = arith.constant 0 : index
    %c0_79 = arith.constant 0 : index
    %c0_80 = arith.constant 0 : index
    %c0_81 = arith.constant 0 : index
    %88 = vector.load %arg7[%c0_78, %c0_79, %c0_80, %c0_81] : memref<1x16x16x128xbf16, #tpu.memory_space<vmem>>, vector<1x16x16x128xbf16>
    %89 = vector.shape_cast %88 : vector<1x16x16x128xbf16> to vector<16x16x128xbf16>
    %90 = vector.shape_cast %87 : vector<16x16x128xbf16> to vector<1x16x16x128xbf16>
    tpu.vector_store %arg7[%c0_78, %c0_79, %c0_80, %c0_81], %90 {strides = array<i32>} : memref<1x16x16x128xbf16, #tpu.memory_space<vmem>>, vector<1x16x16x128xbf16>,
    return
  }
  func.func @transform_0(%arg0: i32, %arg1: i32) -> (i32, i32, i32, i32) {
    %c0_i32 = arith.constant 0 : i32
    %c0_i32_0 = arith.constant 0 : i32
    %c0_i32_1 = arith.constant 0 : i32
    %c0_i32_2 = arith.constant 0 : i32
    return %arg0, %c0_i32, %c0_i32_0, %c0_i32_1 : i32, i32, i32, i32
  }
  func.func @transform_1(%arg0: i32, %arg1: i32) -> (i32, i32) {
    %c0_i32 = arith.constant 0 : i32
    %c0_i32_0 = arith.constant 0 : i32
    %c0_i32_1 = arith.constant 0 : i32
    return %c0_i32, %c0_i32_0 : i32, i32
  }
  func.func @transform_2(%arg0: i32, %arg1: i32) -> (i32, i32) {
    %c0_i32 = arith.constant 0 : i32
    %c0_i32_0 = arith.constant 0 : i32
    %c0_i32_1 = arith.constant 0 : i32
    return %c0_i32, %c0_i32_0 : i32, i32
  }
  func.func @transform_3(%arg0: i32, %arg1: i32) -> (i32, i32) {
    %c0_i32 = arith.constant 0 : i32
    %c0_i32_0 = arith.constant 0 : i32
    %c0_i32_1 = arith.constant 0 : i32
    return %c0_i32, %c0_i32_0 : i32, i32
  }
  func.func @transform_4(%arg0: i32, %arg1: i32) -> (i32, i32) {
    %c0_i32 = arith.constant 0 : i32
    %c0_i32_0 = arith.constant 0 : i32
    %c0_i32_1 = arith.constant 0 : i32
    return %c0_i32, %c0_i32_0 : i32, i32
  }
  func.func @transform_5(%arg0: i32, %arg1: i32) -> (i32, i32, i32, i32) {
    %c0_i32 = arith.constant 0 : i32
    %c0_i32_0 = arith.constant 0 : i32
    %c0_i32_1 = arith.constant 0 : i32
    return %arg0, %arg1, %c0_i32, %c0_i32_0 : i32, i32, i32, i32
  }
}

</mosaic_0001>

<bundles_post_ra>
// kernel: basic_block_forward.1
= control target key start
LH: loop header
LB: loop body
LE: loop exit
PB: predicated region body
PF: predicated region fallthrough
CT: control target
= control target key end

     0   :  { %s11506_s18 = smov 0   ;;  %s11508_s19 = smov 0   ;;  %s15147_s0 = inlined_call_operand.vmem [shape: bf16[2,20,18,128], index: 0, kind: input, shape index: {}]   ;;  %s15148_s1 = inlined_call_operand.vmem [shape: bf16[1152,128], index: 1, kind: input, shape index: {}]   ;;  %s15149_s2 = inlined_call_operand.vmem [shape: bf16[1152,128], index: 2, kind: input, shape index: {}]   ;;  %s15150_s3 = inlined_call_operand.vmem [shape: f32[1,128], index: 3, kind: input, shape index: {}]   ;;  %s15151_s4 = inlined_call_operand.vmem [shape: f32[1,128], index: 4, kind: input, shape index: {}]   ;;  %s15152_s5 = inlined_call_operand.vmem [shape: bf16[2,16,16,128], index: 5, kind: output, shape index: {}]  }
   0x1   :  { %s11510_s20 = smov 0  }
   0x2 LB: > { %s27_s21 = sadd.s32 1, %s11469_s19  ;;  %p9335_p0 = scmp.ge.s32.totalorder %s11473_s20, 1  ;;  %s11473_s20 = sphi %s11510_s20, %s15_s20   ;;  %s11469_s19 = sphi %s11508_s19, %s15612_s19   ;;  %s11465_s18 = sphi %s11506_s18, %s15611_s18  }
   0x3   : > { %p29_p1 = scmp.ge.s32.totalorder %s27_s21, 2  ;;  %p201_p2 = scmp.lt.s32.totalorder %s11473_s20, 3 }
   0x5   : > { %s15614_s21 = smov (%p29_p1, %s27_s21), 0  ;;  %p202_p3 = pnand %p9335_p0, %p201_p2 }
   0x7   : > { %205 = sbr.rel (%p202_p3) target bundleno = 1300 (0x514), region = 40 }
   0xc   : > { %v10929_v0 = vld [vmem:[%s15148_s1 + $0x38] sm:$0xff]   ;;  %v15153_v1 = vmov 0   ;;  %v10931_v3 = vld [vmem:[%s15148_s1 + $0x30] sm:$0xff]   ;;  %v10933_v5 = vld [vmem:[%s15148_s1 + $0x28] sm:$0xff]   ;;  %p234_p4 = scmp.lt.s32.totalorder %s11465_s18, 1  ;;  %vm1048_vm1 = vcmask 1046528  }
   0xd   : > { %2748 = vmatprep.subr.bf16.mxu0 %v15153_v1  ;;  %2925 = vmatprep.subr.bf16.mxu1 %v15153_v1  ;;  %v10930_v2 = vld [vmem:[%s15148_s1 + $0xb8] sm:$0xff]   ;;  %v10932_v4 = vld [vmem:[%s15148_s1 + $0xb0] sm:$0xff]   ;;  %v10934_v6 = vld [vmem:[%s15148_s1 + $0xa8] sm:$0xff]   ;;  %vm759_vm0 = vsmask.f32 7424  ;;  %vm256_vm2 = vcmask 1043459  }
   0xe   : > { %2749 = vmatpush1.bf16.msra.mxu0 %v10929_v0  ;;  %2926 = vmatpush1.bf16.msra.mxu1 %v10930_v2  ;;  %v10935_v7 = vld [vmem:[%s15148_s1 + $0x20] sm:$0xff]   ;;  %v10937_v9 = vld [vmem:[%s15148_s1 + $0x18] sm:$0xff]   ;;  %v10939_v11 = vld [vmem:[%s15148_s1 + $0x10] sm:$0xff]   ;;  %s15616_s18 = smov (!%p234_p4, %s11465_s18), 1  ;;  %vm257_vm3 = vsmask.f32 7950 }
   0xf   : > { %2750 = vmatprep.subr.bf16.mxu0 %v15153_v1  ;;  %2927 = vmatprep.subr.bf16.mxu1 %v15153_v1  ;;  %v10936_v8 = vld [vmem:[%s15148_s1 + $0xa0] sm:$0xff]   ;;  %v10938_v10 = vld [vmem:[%s15148_s1 + $0x98] sm:$0xff]   ;;  %v10940_v12 = vld [vmem:[%s15148_s1 + $0x90] sm:$0xff]   ;;  %s10903_s29 = smul.u32 240, %s15616_s18  ;;  %vm313_vm5 = vcmask 1040384   ;;  %vm4371_vm9 = vcmask 1042432  }
  0x10   : > { %v10941_v13 = vld [vmem:[%s15148_s1 + $0x8] sm:$0xff]   ;;  %v10943_v15 = vld [vmem:[%s15148_s1] sm:$0xff]   ;;  %v10945_v17 = vld [vmem:[%s15148_s1 + $0x78] sm:$0xff]   ;;  %vm314_vm6 = vsmask.f32 256  ;;  %s10101_s16 = sshll.u32 %s15616_s18, 7 }
  0x11   : > { %v10942_v14 = vld [vmem:[%s15148_s1 + $0x88] sm:$0xff]   ;;  %v10944_v16 = vld [vmem:[%s15148_s1 + $0x80] sm:$0xff]   ;;  %s11598_s11 = scalar_lea.vmem %s15147_s0, %s10903_s29  ;;  %v10946_v18 = vld [vmem:[%s15148_s1 + $0xf8] sm:$0xff]   ;;  %vm5156_vm8 = vsmask.f32 4352  ;;  %s14953_s22 = scalar_lea.vmem %s15152_s5, %s10101_s16 }
  0x12   : > { %2751 = vmatpush1.bf16.msra.mxu0 %v10931_v3  ;;  %2928 = vmatpush1.bf16.msra.mxu1 %v10932_v4  ;;  %v373_v19 = vld [vmem:[%s11598_s11] sm:$0xf]  ;;  %v11609_v20 = vld [vmem:[%s11598_s11 + $0x4] sm:$0xf]  ;;  %v9339_v23 = vld [vmem:[%s11598_s11 + $0xc] sm:$0xf] }
  0x13   : > { %2752 = vmatprep.subr.bf16.mxu0 %v15153_v1  ;;  %2929 = vmatprep.subr.bf16.mxu1 %v15153_v1  ;;  %v11613_v21 = vcombine.low %v373_v19, %v11609_v20  ;;  %v11616_v22 = vld [vmem:[%s11598_s11 + $0x8] ss:$0 sps:$4 sm:$0x11]   ;;  %v10947_v24 = vld [vmem:[%s15148_s1 + $0x70] sm:$0xff]   ;;  %v10951_v37 = vld [vmem:[%s15148_s1 + $0x60] sm:$0xff]  }
  0x14   : > { %v768_v27 = vshll.u32 %v11616_v22, 16  ;;  %v9340_v28 = vld [vmem:[%s11598_s11 + $0x10] sm:$0xf]  ;;  %v10949_v33 = vld [vmem:[%s15148_s1 + $0x68] sm:$0xff]   ;;  %v10952_v38 = vld [vmem:[%s15148_s1 + $0xe0] sm:$0xff]   ;;  %v1050_v61 = vrot.slane %v11616_v22, 1 }
  0x15   : > { %v761_v25 = vshrl.u32 %v11613_v21, 16  ;;  %v763_v26 = vshll.u32 %v11613_v21, 16  ;;  %v10948_v29 = vld [vmem:[%s15148_s1 + $0xf0] sm:$0xff]   ;;  %v11630_v30 = vcombine.low %v9339_v23, %v9340_v28  ;;  %v10950_v35 = vld [vmem:[%s15148_s1 + $0xe8] sm:$0xff]   ;;  %v10953_v41 = vld [vmem:[%s15148_s1 + $0x58] sm:$0xff]  }
  0x16   : > { %2753 = vmatpush1.bf16.msra.mxu0 %v10933_v5  ;;  %2930 = vmatpush1.bf16.msra.mxu1 %v10934_v6  ;;  %v770_v32 = vrot.slane %v768_v27, 1  ;;  %v375_v39 = vld [vmem:[%s11598_s11 + $0xc] sm:$0xf]  ;;  %v11653_v40 = vld [vmem:[%s11598_s11 + $0x10] sm:$0xf]  ;;  %v10954_v42 = vld [vmem:[%s15148_s1 + $0xd8] sm:$0xff]  }
  0x17   : > { %2754 = vmatprep.subr.bf16.mxu0 %v15153_v1  ;;  %2931 = vmatprep.subr.bf16.mxu1 %v15153_v1  ;;  %v765_v31 = vrot.slane %v763_v26, 1  ;;  %v11663_v43 = vcombine.low %v375_v39, %v11653_v40  ;;  %v10955_v44 = vld [vmem:[%s15148_s1 + $0x50] sm:$0xff]   ;;  %v427_v46 = vld [vmem:[%s11598_s11] sm:$0xe]  ;;  %v377_v49 = vld [vmem:[%s11598_s11 + $0x18] sm:$0xf] }
  0x18   : > { %2957 = vmatprep.mubr.bf16.mxu1 %v11630_v30  ;;  %v10956_v45 = vld [vmem:[%s15148_s1 + $0xd0] sm:$0xff]   ;;  %v11681_v50 = vld [vmem:[%s11598_s11 + $0x1c] sm:$0xf]  ;;  %v9519_v51 = vcombine.low %v427_v46, %v11609_v20  ;;  %v10957_v52 = vld [vmem:[%s15148_s1 + $0x48] sm:$0xff]  }
  0x19   : > { %v766_v34 = vor.u32 %v765_v31, %v761_v25  ;;  %v11675_v47 = vld [vmem:[%s11598_s11 + $0x14] ss:$0 sps:$4 sm:$0x11]   ;;  %v775_v48 = vshll.u32 %v11663_v43, 16  ;;  %v10958_v53 = vld [vmem:[%s15148_s1 + $0xc8] sm:$0xff]   ;;  %v773_v54 = vshrl.u32 %v11663_v43, 16  ;;  %v11693_v55 = vcombine.low %v377_v49, %v11681_v50  ;;  %vm13028_vm4 = vmand %vm256_vm2, %vm257_vm3 }
  0x1a   : > { %2755 = vmatpush1.bf16.msra.mxu0 %v10935_v7  ;;  %2932 = vmatpush1.bf16.msra.mxu1 %v10936_v8  ;;  %v780_v57 = vshll.u32 %v11675_v47, 16  ;;  %v10959_v58 = vld [vmem:[%s15148_s1 + $0x40] sm:$0xff]   ;;  %v1049_v60 = vrot.slane %v9519_v51, 1  ;;  %v9341_v62 = vld [vmem:[%s11598_s11 + $0x18] sm:$0xf]  ;;  %vm13058_vm7 = vmand %vm313_vm5, %vm314_vm6 }
  0x1b   : > { %2756 = vmatprep.subr.bf16.mxu0 %v15153_v1  ;;  %2933 = vmatprep.subr.bf16.mxu1 %v15153_v1  ;;  %v771_v36 = vsel %vm759_vm0, %v766_v34, %v770_v32  ;;  %v777_v56 = vrot.slane %v775_v48, 1  ;;  %v10962_v59 = vld [vmem:[%s15148_s1 + $0xc0] sm:$0xff]   ;;  %v9342_v63 = vld [vmem:[%s11598_s11 + $0x1c] sm:$0xf]  ;;  %v428_v0 = vld [vmem:[%s11598_s11 + $0xc] sm:$0xe] }
  0x1c   : > { %2780 = vmatprep.mubr.bf16.mxu0 %v771_v36  ;;  %v11709_v2 = vld [vmem:[%s11598_s11 + $0x20] ss:$0 sps:$4 sm:$0x11]   ;;  %v787_v3 = vshll.u32 %v11693_v55, 16  ;;  %v782_v5 = vrot.slane %v780_v57, 1  ;;  %v10965_v8 = vld [vmem:[%s15148_s1 + $0x138] sm:$0xff]  }
  0x1d   : > { %v778_v4 = vor.u32 %v777_v56, %v773_v54  ;;  %v379_v6 = vld [vmem:[%s11598_s11 + $0x24] sm:$0xf]  ;;  %v11715_v7 = vld [vmem:[%s11598_s11 + $0x28] sm:$0xf]  ;;  %v429_v20 = vld [vmem:[%s11598_s11 + $0x18] sm:$0xe] }
  0x1e   : > { %2757 = vmatpush1.bf16.msra.mxu0 %v10937_v9  ;;  %2934 = vmatpush1.bf16.msra.mxu1 %v10938_v10  ;;  %v1051_v9 = vsel %vm1048_vm1, %v1049_v60, %v1050_v61  ;;  %v11721_v10 = vcombine.low %v9341_v62, %v9342_v63  ;;  %v9343_v19 = vld [vmem:[%s11598_s11 + $0x24] sm:$0xf]  ;;  %v9344_v23 = vld [vmem:[%s11598_s11 + $0x28] sm:$0xf]  ;;  %v381_v27 = vld [vmem:[%s11598_s11 + $0x30] sm:$0xf]  ;;  %v9521_v28 = vcombine.low %v429_v20, %v11681_v50 }
  0x1f   : > { %2758 = vmatprep.subr.bf16.mxu0 %v15153_v1  ;;  %2935 = vmatprep.subr.bf16.mxu1 %v15153_v1  ;;  %v11752_v32 = vcombine.low %v9343_v19, %v9344_v23  ;;  %v11026_v39 = vld [vmem:[%s15148_s1 + $0x1b8] sm:$0xff]   ;;  %v10984_v46 = vld [vmem:[%s15148_s1 + $0x120] sm:$0xff]   ;;  %v11029_v48 = vld [vmem:[%s15148_s1 + $0x1b0] sm:$0xff]  }
  0x20   : > { %v383_v51 = vld [vmem:[%s11598_s11 + $0x3c] sm:$0xf]  ;;  %v11034_v63 = vld [vmem:[%s15148_s1 + $0x1a8] sm:$0xff]  }
  0x21   : > { %v10990_v62 = vld [vmem:[%s15148_s1 + $0x118] sm:$0xff]  }
  0x22   : > { %2759 = vmatpush1.bf16.msra.mxu0 %v10939_v11  ;;  %2936 = vmatpush1.bf16.msra.mxu1 %v10940_v12  ;;  %v9520_v11 = vcombine.low %v428_v0, %v11653_v40  ;;  %v785_v12 = vshrl.u32 %v11693_v55, 16  ;;  %v1055_v40 = vrot.slane %v9521_v28, 1 }
  0x23   : > { %2760 = vmatprep.subr.bf16.mxu0 %v15153_v1  ;;  %2937 = vmatprep.subr.bf16.mxu1 %v15153_v1 }
  0x24   : > { %v1052_v22 = vrot.slane %v9520_v11, 1  ;;  %v385_v11 = vld [vmem:[%s11598_s11 + $0x48] sm:$0xf] }
  0x26   : > { %2761 = vmatpush1.bf16.msra.mxu0 %v10941_v13  ;;  %2938 = vmatpush1.bf16.msra.mxu1 %v10942_v14  ;;  %v789_v13 = vrot.slane %v787_v3, 1  ;;  %v792_v14 = vshll.u32 %v11709_v2, 16  ;;  %v9347_v3 = vld [vmem:[%s11598_s11 + $0x3c] sm:$0xf] }
  0x27   : > { %2762 = vmatprep.subr.bf16.mxu0 %v15153_v1  ;;  %2939 = vmatprep.subr.bf16.mxu1 %v15153_v1 }
  0x28   : > { %v790_v25 = vor.u32 %v789_v13, %v785_v12  ;;  %v11823_v12 = vld [vmem:[%s11598_s11 + $0x4c] sm:$0xf]  ;;  %v11037_v13 = vld [vmem:[%s15148_s1 + $0x1a0] sm:$0xff]  }
  0x29   : > { %v11837_v23 = vcombine.low %v385_v11, %v11823_v12 }
  0x2a   : > { %2763 = vmatpush1.bf16.msra.mxu0 %v10943_v15  ;;  %2940 = vmatpush1.bf16.msra.mxu1 %v10944_v16  ;;  %v11728_v15 = vcombine.low %v379_v6, %v11715_v7  ;;  %v783_v16 = vsel %vm759_vm0, %v778_v4, %v782_v5  ;;  %v9348_v4 = vld [vmem:[%s11598_s11 + $0x40] sm:$0xf]  ;;  %v11815_v5 = vld [vmem:[%s11598_s11 + $0x44] ss:$0 sps:$4 sm:$0x11]  }
  0x2b   : > { %2764 = vmatprep.subr.bf16.mxu0 %v15153_v1  ;;  %2941 = vmatprep.subr.bf16.mxu1 %v15153_v1 }
  0x2c   : > { %v799_v26 = vshll.u32 %v11728_v15, 16 }
  0x2e   : > { %2765 = vmatpush2.bf16.msra.mxu0 %v10945_v17  ;;  %2942 = vmatpush2.bf16.msra.mxu1 %v10946_v18  ;;  %v1053_v17 = vrot.slane %v11675_v47, 1  ;;  %v10972_v18 = vld [vmem:[%s15148_s1 + $0x130] sm:$0xff]   ;;  %v801_v36 = vrot.slane %v799_v26, 1  ;;  %v11776_v47 = vld [vmem:[%s11598_s11 + $0x38] ss:$0 sps:$4 sm:$0x11]  }
  0x2f   : > { %2766 = vmatprep.subr.bf16.mxu0 %v15153_v1  ;;  %2943 = vmatprep.subr.bf16.mxu1 %v15153_v1  ;;  %v816_v61 = vshll.u32 %v11776_v47, 16  ;;  %v9349_v26 = vld [vmem:[%s11598_s11 + $0x48] sm:$0xf] }
  0x30   : > { %v1054_v31 = vsel %vm1048_vm1, %v1052_v22, %v1053_v17  ;;  %v11834_v22 = vcombine.low %v9347_v3, %v9348_v4 }
  0x32   : > { %2767 = vmatpush2.bf16.msra.mxu0 %v10947_v24  ;;  %2944 = vmatpush2.bf16.msra.mxu1 %v10948_v29  ;;  %v11741_v24 = vld [vmem:[%s11598_s11 + $0x2c] ss:$0 sps:$4 sm:$0x11]   ;;  %v11749_v29 = vld [vmem:[%s11598_s11 + $0x34] sm:$0xf] }
  0x33   : > { %2768 = vmatprep.subr.bf16.mxu0 %v15153_v1  ;;  %2945 = vmatprep.subr.bf16.mxu1 %v15153_v1  ;;  %v1059_v0 = vrot.slane %v11741_v24, 1 }
  0x36   : > { %2769 = vmatpush2.bf16.msra.mxu0 %v10949_v33  ;;  %2946 = vmatpush2.bf16.msra.mxu1 %v10950_v35  ;;  %v797_v33 = vshrl.u32 %v11728_v15, 16  ;;  %v10978_v35 = vld [vmem:[%s15148_s1 + $0x128] sm:$0xff]  }
  0x37   : > { %2770 = vmatprep.subr.bf16.mxu0 %v15153_v1  ;;  %2947 = vmatprep.subr.bf16.mxu1 %v15153_v1 }
  0x3a   : > { %2771 = vmatpush2.bf16.msra.mxu0 %v10951_v37  ;;  %2948 = vmatpush2.bf16.msra.mxu1 %v10952_v38  ;;  %v804_v37 = vshll.u32 %v11741_v24, 16  ;;  %v11762_v38 = vcombine.low %v381_v27, %v11749_v29  ;;  %v11004_v24 = vld [vmem:[%s15148_s1 + $0x108] sm:$0xff]   ;;  %v11010_v27 = vld [vmem:[%s15148_s1 + $0x100] sm:$0xff]  }
  0x3b   : > { %2772 = vmatprep.subr.bf16.mxu0 %v15153_v1  ;;  %2949 = vmatprep.subr.bf16.mxu1 %v15153_v1 }
  0x3c   : > { %v806_v49 = vrot.slane %v804_v37, 1  ;;  %v811_v50 = vshll.u32 %v11762_v38, 16  ;;  %v11862_v37 = vld [vmem:[%s11598_s11 + $0x58] sm:$0xf] }
  0x3e   : > { %2773 = vmatpush2.bf16.msra.mxu0 %v10953_v41  ;;  %2950 = vmatpush2.bf16.msra.mxu1 %v10954_v42  ;;  %v1056_v41 = vrot.slane %v11709_v2, 1  ;;  %v9345_v42 = vld [vmem:[%s11598_s11 + $0x30] sm:$0xf]  ;;  %v813_v60 = vrot.slane %v811_v50, 1  ;;  %v11049_v50 = vld [vmem:[%s15148_s1 + $0x188] sm:$0xff]  }
  0x3f   : > { %2774 = vmatprep.subr.bf16.mxu0 %v15153_v1  ;;  %2951 = vmatprep.subr.bf16.mxu1 %v15153_v1  ;;  %v10996_v2 = vld [vmem:[%s15148_s1 + $0x110] sm:$0xff]  }
  0x42   : > { %2775 = vmatpush2.bf16.msra.mxu0 %v10955_v44  ;;  %2952 = vmatpush2.bf16.msra.mxu1 %v10956_v45  ;;  %v9346_v44 = vld [vmem:[%s11598_s11 + $0x34] sm:$0xf]  ;;  %v430_v45 = vld [vmem:[%s11598_s11 + $0x24] sm:$0xe] }
  0x43   : > { %2776 = vmatprep.subr.bf16.mxu0 %v15153_v1  ;;  %2953 = vmatprep.subr.bf16.mxu1 %v15153_v1  ;;  %v11790_v54 = vcombine.low %v9345_v42, %v9346_v44  ;;  %v9522_v56 = vcombine.low %v430_v45, %v11715_v7  ;;  %v833_v45 = vshrl.u32 %v11837_v23, 16 }
  0x45   : > { %v1058_v7 = vrot.slane %v9522_v56, 1 }
  0x46   : > { %2777 = vmatpush2.bf16.msra.mxu0 %v10957_v52  ;;  %2954 = vmatpush2.bf16.msra.mxu1 %v10958_v53  ;;  %v11785_v52 = vld [vmem:[%s11598_s11 + $0x40] sm:$0xf]  ;;  %v1057_v53 = vsel %vm1048_vm1, %v1055_v40, %v1056_v41 }
  0x47   : > { %2778 = vmatprep.subr.bf16.mxu0 %v15153_v1  ;;  %2955 = vmatprep.subr.bf16.mxu1 %v15153_v1  ;;  %v11794_v57 = vcombine.low %v383_v51, %v11785_v52  ;;  %v1060_v19 = vsel %vm1048_vm1, %v1058_v7, %v1059_v0  ;;  %v9351_v51 = vld [vmem:[%s11598_s11 + $0x54] sm:$0xf]  ;;  %v11903_v0 = vld [vmem:[%s11598_s11 + $0x64] sm:$0xf] }
  0x49   : > { %v823_v6 = vshll.u32 %v11794_v57, 16 }
  0x4a   : > { %2779 = vmatpush2.bf16.msra.mxu0 %v10959_v58  ;;  %2956 = vmatpush2.bf16.msra.mxu1 %v10962_v59  ;;  %v809_v59 = vshrl.u32 %v11762_v38, 16 }
  0x4b   : > { %3102 = vmatprep.subr.bf16.mxu0 %v15153_v1  ;;  %3279 = vmatprep.subr.bf16.mxu1 %v15153_v1  ;;  %v825_v17 = vrot.slane %v823_v6, 1 }
  0x4d   : > { %2781 = vmatmul.mubr.bf16.vlgmr.msra.gmra.mxu0 %v11613_v21  ;;  %2958 = vmatmul.mubr.bf16.vlgmr.msra.gmra.mxu1 %v1051_v9  ;;  %v794_v21 = vrot.slane %v792_v14, 1  ;;  %v431_v9 = vld [vmem:[%s11598_s11 + $0x30] sm:$0xe]  ;;  %v821_v14 = vshrl.u32 %v11794_v57, 16 }
  0x4e   : > { %3103 = vmatpush1.bf16.msra.mxu0 %v10965_v8  ;;  %2788 = vmatprep.mubr.bf16.mxu0 %v783_v16  ;;  %v818_v8 = vrot.slane %v816_v61, 1  ;;  %v9523_v16 = vcombine.low %v431_v9, %v11749_v29  ;;  %v9352_v61 = vld [vmem:[%s11598_s11 + $0x58] sm:$0xf]  ;;  %v11033_v9 = vld [vmem:[%s15148_s1 + $0x168] sm:$0xff]  }
  0x4f   : > { %2965 = vmatprep.mubr.bf16.mxu1 %v11721_v10  ;;  %3104 = vmatprep.subr.bf16.mxu0 %v15153_v1  ;;  %v795_v34 = vsel %vm759_vm0, %v790_v25, %v794_v21  ;;  %v1062_v25 = vrot.slane %v11776_v47, 1  ;;  %v11041_v21 = vld [vmem:[%s15148_s1 + $0x198] sm:$0xff]   ;;  %v826_v29 = vor.u32 %v825_v17, %v821_v14  ;;  %v11911_v4 = vcombine.low %v9351_v51, %v9352_v61  ;;  %v9353_v14 = vld [vmem:[%s11598_s11 + $0x60] sm:$0xf]  ;;  %v434_v17 = vld [vmem:[%s11598_s11 + $0x54] sm:$0xe] }
  0x50   : > { %3280 = vmatpush1.bf16.msra.mxu1 %v11026_v39  ;;  %v1061_v28 = vrot.slane %v9523_v16, 1  ;;  %v11045_v39 = vld [vmem:[%s15148_s1 + $0x190] sm:$0xff]   ;;  %v11930_v16 = vld [vmem:[%s11598_s11 + $0x64] sm:$0xf] }
  0x51   : > { %3281 = vmatprep.subr.bf16.mxu1 %v15153_v1  ;;  %v11058_v51 = vld [vmem:[%s15148_s1 + $0x150] sm:$0xff]  }
  0x52   : > { %3105 = vmatpush1.bf16.msra.mxu0 %v10972_v18  ;;  %v828_v18 = vshll.u32 %v11815_v5, 16  ;;  %v1063_v40 = vsel %vm1048_vm1, %v1061_v28, %v1062_v25  ;;  %v11953_v28 = vcombine.low %v9353_v14, %v11930_v16  ;;  %v12025_v14 = vld [vmem:[%s11598_s11 + $0x88] sm:$0xf] }
  0x53   : > { %3106 = vmatprep.subr.bf16.mxu0 %v15153_v1 }
  0x54   : > { %3282 = vmatpush1.bf16.msra.mxu1 %v11029_v48 }
  0x55   : > { %2789 = vmatmul.mubr.bf16.gmra.mxu0 %v11663_v43  ;;  %2966 = vmatmul.mubr.bf16.gmra.mxu1 %v1054_v31  ;;  %v802_v43 = vor.u32 %v801_v36, %v797_v33  ;;  %v830_v31 = vrot.slane %v828_v18, 1  ;;  %v9350_v33 = vld [vmem:[%s11598_s11 + $0x4c] sm:$0xf]  ;;  %v387_v36 = vld [vmem:[%s11598_s11 + $0x54] sm:$0xf] }
  0x56   : > { %2796 = vmatprep.mubr.bf16.mxu0 %v795_v34  ;;  %2973 = vmatprep.mubr.bf16.mxu1 %v11752_v32  ;;  %v432_v34 = vld [vmem:[%s11598_s11 + $0x3c] sm:$0xe]  ;;  %v11871_v42 = vcombine.low %v9349_v26, %v9350_v33  ;;  %v11877_v48 = vcombine.low %v387_v36, %v11862_v37  ;;  %v11061_v26 = vld [vmem:[%s15148_s1 + $0x1f0] sm:$0xff]  }
  0x57   : > { %3107 = vmatpush1.bf16.msra.mxu0 %v10978_v35  ;;  %3283 = vmatprep.subr.bf16.mxu1 %v15153_v1  ;;  %v807_v58 = vsel %vm759_vm0, %v802_v43, %v806_v49  ;;  %v11857_v35 = vld [vmem:[%s11598_s11 + $0x50] ss:$0 sps:$4 sm:$0x11]   ;;  %v831_v41 = vsel %vm759_vm0, %v826_v29, %v830_v31  ;;  %v9524_v44 = vcombine.low %v432_v34, %v11785_v52  ;;  %v11018_v43 = vld [vmem:[%s15148_s1 + $0x178] sm:$0xff]   ;;  %v1065_v49 = vrot.slane %v11815_v5, 1 }
  0x58   : > { %3108 = vmatprep.subr.bf16.mxu0 %v15153_v1  ;;  %3284 = vmatpush1.bf16.msra.mxu1 %v11034_v63  ;;  %v840_v47 = vshll.u32 %v11857_v35, 16  ;;  %v433_v52 = vld [vmem:[%s11598_s11 + $0x48] sm:$0xe]  ;;  %v845_v7 = vshrl.u32 %v11877_v48, 16  ;;  %v9526_v29 = vcombine.low %v434_v17, %v11862_v37  ;;  %v11050_v36 = vld [vmem:[%s15148_s1 + $0x158] sm:$0xff]   ;;  %v11076_v17 = vld [vmem:[%s15148_s1 + $0x1d0] sm:$0xff]  }
  0x59   : > { %3285 = vmatprep.subr.bf16.mxu1 %v15153_v1  ;;  %v1064_v56 = vrot.slane %v9524_v44, 1  ;;  %v9525_v63 = vcombine.low %v433_v52, %v11823_v12  ;;  %v1068_v12 = vrot.slane %v11857_v35, 1  ;;  %v11065_v37 = vld [vmem:[%s15148_s1 + $0x1e8] sm:$0xff]   ;;  %v435_v44 = vld [vmem:[%s11598_s11 + $0x60] sm:$0xe] }
  0x5a   : > { %v11069_v52 = vld [vmem:[%s15148_s1 + $0x1e0] sm:$0xff]  }
  0x5b   : > { %3109 = vmatpush1.bf16.msra.mxu0 %v10984_v46  ;;  %v1066_v3 = vsel %vm1048_vm1, %v1064_v56, %v1065_v49  ;;  %v1067_v11 = vrot.slane %v9525_v63, 1  ;;  %v11068_v63 = vld [vmem:[%s15148_s1 + $0x148] sm:$0xff]  }
  0x5c   : > { %3110 = vmatprep.subr.bf16.mxu0 %v15153_v1  ;;  %3286 = vmatpush1.bf16.msra.mxu1 %v11037_v13  ;;  %v11057_v13 = vld [vmem:[%s15148_s1 + $0x1f8] sm:$0xff]  }
  0x5d   : > { %2797 = vmatmul.mubr.bf16.gmra.mxu0 %v11693_v55  ;;  %2974 = vmatmul.mubr.bf16.gmra.mxu1 %v1057_v53  ;;  %v814_v55 = vor.u32 %v813_v60, %v809_v59  ;;  %v11025_v53 = vld [vmem:[%s15148_s1 + $0x170] sm:$0xff]   ;;  %v842_v60 = vrot.slane %v840_v47, 1 }
  0x5e   : > { %2804 = vmatprep.mubr.bf16.mxu0 %v807_v58  ;;  %2981 = vmatprep.mubr.bf16.mxu1 %v11790_v54  ;;  %v11895_v58 = vld [vmem:[%s11598_s11 + $0x5c] ss:$0 sps:$4 sm:$0x11]  }
  0x5f   : > { %3111 = vmatpush1.bf16.msra.mxu0 %v10990_v62  ;;  %v819_v20 = vsel %vm759_vm0, %v814_v55, %v818_v8  ;;  %3287 = vmatprep.subr.bf16.mxu1 %v15153_v1  ;;  %v389_v62 = vld [vmem:[%s11598_s11 + $0x60] sm:$0xf]  ;;  %v852_v5 = vshll.u32 %v11895_v58, 16 }
  0x60   : > { %3112 = vmatprep.subr.bf16.mxu0 %v15153_v1  ;;  %3288 = vmatpush1.bf16.msra.mxu1 %v11041_v21  ;;  %v11917_v8 = vcombine.low %v389_v62, %v11903_v0  ;;  %v11941_v21 = vld [vmem:[%s11598_s11 + $0x70] sm:$0xf] }
  0x61   : > { %3289 = vmatprep.subr.bf16.mxu1 %v15153_v1  ;;  %v854_v18 = vrot.slane %v852_v5, 1  ;;  %v9357_v5 = vld [vmem:[%s11598_s11 + $0x78] sm:$0xf] }
  0x62   : > { %v859_v25 = vshll.u32 %v11917_v8, 16  ;;  %v857_v34 = vshrl.u32 %v11917_v8, 16 }
  0x63   : > { %3113 = vmatpush1.bf16.msra.mxu0 %v10996_v2  ;;  %v11053_v2 = vld [vmem:[%s15148_s1 + $0x180] sm:$0xff]  }
  0x64   : > { %3114 = vmatprep.subr.bf16.mxu0 %v15153_v1  ;;  %3290 = vmatpush1.bf16.msra.mxu1 %v11045_v39  ;;  %v861_v35 = vrot.slane %v859_v25, 1  ;;  %v1071_v39 = vrot.slane %v11895_v58, 1  ;;  %v9527_v58 = vcombine.low %v435_v44, %v11903_v0  ;;  %v11073_v0 = vld [vmem:[%s15148_s1 + $0x1d8] sm:$0xff]  }
  0x65   : > { %2805 = vmatmul.mubr.bf16.gmra.mxu0 %v11728_v15  ;;  %2982 = vmatmul.mubr.bf16.gmra.mxu1 %v1060_v19  ;;  %v835_v15 = vshll.u32 %v11837_v23, 16  ;;  %v11935_v19 = vld [vmem:[%s11598_s11 + $0x68] ss:$0 sps:$4 sm:$0x11]  }
  0x66   : > { %2812 = vmatprep.mubr.bf16.mxu0 %v819_v20  ;;  %2989 = vmatprep.mubr.bf16.mxu1 %v11834_v22  ;;  %v391_v20 = vld [vmem:[%s11598_s11 + $0x6c] sm:$0xf]  ;;  %v864_v31 = vshll.u32 %v11935_v19, 16  ;;  %v862_v49 = vor.u32 %v861_v35, %v857_v34  ;;  %v437_v35 = vld [vmem:[%s11598_s11 + $0x78] sm:$0xe] }
  0x67   : > { %3115 = vmatpush1.bf16.msra.mxu0 %v11004_v24  ;;  %v837_v46 = vrot.slane %v835_v15, 1  ;;  %3291 = vmatprep.subr.bf16.mxu1 %v15153_v1  ;;  %v11960_v15 = vcombine.low %v391_v20, %v11941_v21  ;;  %v12040_v20 = vld [vmem:[%s15148_s1 + $0x238] sm:$0xff]  }
  0x68   : > { %3116 = vmatprep.subr.bf16.mxu0 %v15153_v1  ;;  %3292 = vmatpush1.bf16.msra.mxu1 %v11049_v50  ;;  %v866_v47 = vrot.slane %v864_v31, 1  ;;  %v11984_v50 = vld [vmem:[%s11598_s11 + $0x7c] sm:$0xf]  ;;  %v11081_v31 = vld [vmem:[%s15148_s1 + $0x1c8] sm:$0xff]  }
  0x69   : > { %v838_v59 = vor.u32 %v837_v46, %v833_v45  ;;  %3293 = vmatprep.subr.bf16.mxu1 %v15153_v1  ;;  %v11977_v45 = vld [vmem:[%s11598_s11 + $0x74] ss:$0 sps:$4 sm:$0x11]   ;;  %v1070_v46 = vrot.slane %v9526_v29, 1  ;;  %v869_v61 = vshrl.u32 %v11960_v15, 16 }
  0x6a   : > { %v1077_v29 = vrot.slane %v11977_v45, 1 }
  0x6b   : > { %3117 = vmatpush1.bf16.msra.mxu0 %v11010_v27  ;;  %v843_v6 = vsel %vm759_vm0, %v838_v59, %v842_v60  ;;  %v1069_v27 = vsel %vm1048_vm1, %v1067_v11, %v1068_v12  ;;  %v876_v59 = vshll.u32 %v11977_v45, 16  ;;  %v867_v60 = vsel %vm759_vm0, %v862_v49, %v866_v47  ;;  %v395_v11 = vld [vmem:[%s11598_s11 + $0x84] sm:$0xf]  ;;  %v397_v45 = vld [vmem:[%s11598_s11 + $0x90] sm:$0xf] }
  0x6c   : > { %3118 = vmatprep.subr.bf16.mxu0 %v15153_v1  ;;  %3294 = vmatpush1.bf16.msra.mxu1 %v11053_v2  ;;  %v436_v2 = vld [vmem:[%s11598_s11 + $0x6c] sm:$0xe]  ;;  %v12045_v25 = vcombine.low %v395_v11, %v12025_v14  ;;  %v9529_v47 = vcombine.low %v437_v35, %v11984_v50 }
  0x6d   : > { %2813 = vmatmul.mubr.bf16.gmra.mxu0 %v11762_v38  ;;  %2990 = vmatmul.mubr.bf16.gmra.mxu1 %v1063_v40  ;;  %v847_v38 = vshll.u32 %v11877_v48, 16  ;;  %v9355_v40 = vld [vmem:[%s11598_s11 + $0x6c] sm:$0xf] }
  0x6e   : > { %2820 = vmatprep.mubr.bf16.mxu0 %v831_v41  ;;  %2997 = vmatprep.mubr.bf16.mxu1 %v11871_v42  ;;  %v11973_v41 = vld [vmem:[%s11598_s11 + $0x70] sm:$0xf] }
  0x6f   : > { %3119 = vmatpush2.bf16.msra.mxu0 %v11018_v43  ;;  %v849_v55 = vrot.slane %v847_v38, 1  ;;  %3295 = vmatprep.subr.bf16.mxu1 %v15153_v1  ;;  %v393_v43 = vld [vmem:[%s11598_s11 + $0x78] sm:$0xf]  ;;  %v11996_v56 = vcombine.low %v9355_v40, %v11973_v41  ;;  %v895_v40 = vshll.u32 %v12045_v25, 16 }
  0x70   : > { %3120 = vmatprep.subr.bf16.mxu0 %v15153_v1  ;;  %3296 = vmatpush2.bf16.msra.mxu1 %v11057_v13  ;;  %v12003_v62 = vcombine.low %v393_v43, %v11984_v50  ;;  %v893_v43 = vshrl.u32 %v12045_v25, 16  ;;  %v9361_v50 = vld [vmem:[%s11598_s11 + $0x90] sm:$0xf] }
  0x71   : > { %v850_v24 = vor.u32 %v849_v55, %v845_v7  ;;  %3297 = vmatprep.subr.bf16.mxu1 %v15153_v1  ;;  %v12018_v7 = vld [vmem:[%s11598_s11 + $0x80] ss:$0 sps:$4 sm:$0x11]   ;;  %v1073_v55 = vrot.slane %v9527_v58, 1  ;;  %v897_v49 = vrot.slane %v895_v40, 1 }
  0x72   : > { %v883_v13 = vshll.u32 %v12003_v62, 16 }
  0x73   : > { %3121 = vmatpush2.bf16.msra.mxu0 %v11025_v53  ;;  %v855_v33 = vsel %vm759_vm0, %v850_v24, %v854_v18  ;;  %v1072_v53 = vsel %vm1048_vm1, %v1070_v46, %v1071_v39  ;;  %v9528_v18 = vcombine.low %v436_v2, %v11941_v21  ;;  %v11028_v39 = vld [vmem:[%s11598_s11 + $0x8c] ss:$0 sps:$4 sm:$0x11]   ;;  %v12065_v46 = vld [vmem:[%s11598_s11 + $0x94] sm:$0xf] }
  0x74   : > { %3122 = vmatprep.subr.bf16.mxu0 %v15153_v1  ;;  %3298 = vmatpush2.bf16.msra.mxu1 %v11061_v26  ;;  %v881_v26 = vshrl.u32 %v12003_v62, 16  ;;  %v12078_v58 = vcombine.low %v397_v45, %v12065_v46 }
  0x75   : > { %2821 = vmatmul.mubr.bf16.gmra.mxu0 %v11794_v57  ;;  %2998 = vmatmul.mubr.bf16.gmra.mxu1 %v1066_v3  ;;  %v11042_v57 = vld [vmem:[%s15148_s1 + $0x160] sm:$0xff]   ;;  %v1074_v3 = vrot.slane %v11935_v19, 1  ;;  %v888_v19 = vshll.u32 %v12018_v7, 16 }
  0x76   : > { %2828 = vmatprep.mubr.bf16.mxu0 %v843_v6  ;;  %3005 = vmatprep.mubr.bf16.mxu1 %v11911_v4  ;;  %v9358_v6 = vld [vmem:[%s11598_s11 + $0x7c] sm:$0xf]  ;;  %v905_v11 = vshrl.u32 %v12078_v58, 16 }
  0x77   : > { %3123 = vmatpush2.bf16.msra.mxu0 %v11033_v9  ;;  %3299 = vmatprep.subr.bf16.mxu1 %v15153_v1  ;;  %v878_v9 = vrot.slane %v876_v59, 1  ;;  %v12042_v24 = vcombine.low %v9357_v5, %v9358_v6  ;;  %v890_v34 = vrot.slane %v888_v19, 1  ;;  %v1080_v59 = vrot.slane %v12018_v7, 1  ;;  %v399_v5 = vld [vmem:[%s11598_s11 + $0x9c] sm:$0xf] }
  0x78   : > { %3124 = vmatprep.subr.bf16.mxu0 %v15153_v1  ;;  %3300 = vmatpush2.bf16.msra.mxu1 %v11065_v37  ;;  %v9360_v37 = vld [vmem:[%s11598_s11 + $0x88] sm:$0xf]  ;;  %v12090_v6 = vld [vmem:[%s11598_s11 + $0xa0] sm:$0xf] }
  0x79   : > { %3301 = vmatprep.subr.bf16.mxu1 %v15153_v1 }
  0x7b   : > { %3125 = vmatpush2.bf16.msra.mxu0 %v11042_v57  ;;  %v1075_v57 = vsel %vm1048_vm1, %v1073_v55, %v1074_v3  ;;  %v907_v3 = vshll.u32 %v12078_v58, 16 }
  0x7c   : > { %3126 = vmatprep.subr.bf16.mxu0 %v15153_v1  ;;  %3302 = vmatpush2.bf16.msra.mxu1 %v11069_v52 }
  0x7d   : > { %2829 = vmatmul.mubr.bf16.gmra.mxu0 %v11837_v23  ;;  %3006 = vmatmul.mubr.bf16.gmra.mxu1 %v1069_v27  ;;  %v871_v23 = vshll.u32 %v11960_v15, 16  ;;  %v885_v27 = vrot.slane %v883_v13, 1 }
  0x7e   : > { %2836 = vmatprep.mubr.bf16.mxu0 %v855_v33  ;;  %3013 = vmatprep.mubr.bf16.mxu1 %v11953_v28  ;;  %v1076_v33 = vrot.slane %v9528_v18, 1  ;;  %v439_v18 = vld [vmem:[%s11598_s11 + $0x90] sm:$0xe] }
  0x7f   : > { %3127 = vmatpush2.bf16.msra.mxu0 %v11050_v36  ;;  %v873_v38 = vrot.slane %v871_v23, 1  ;;  %3303 = vmatprep.subr.bf16.mxu1 %v15153_v1  ;;  %v9359_v36 = vld [vmem:[%s11598_s11 + $0x84] sm:$0xf]  ;;  %v886_v44 = vor.u32 %v885_v27, %v881_v26  ;;  %v900_v23 = vshll.u32 %v11028_v39, 16  ;;  %v401_v27 = vld [vmem:[%s11598_s11 + $0xa8] sm:$0xf] }
  0x80   : > { %3128 = vmatprep.subr.bf16.mxu0 %v15153_v1  ;;  %3304 = vmatpush2.bf16.msra.mxu1 %v11073_v0  ;;  %v11036_v0 = vld [vmem:[%s11598_s11 + $0x98] ss:$0 sps:$4 sm:$0x11]  }
  0x81   : > { %v874_v12 = vor.u32 %v873_v38, %v869_v61  ;;  %3305 = vmatprep.subr.bf16.mxu1 %v15153_v1  ;;  %v891_v52 = vsel %vm759_vm0, %v886_v44, %v890_v34  ;;  %v438_v61 = vld [vmem:[%s11598_s11 + $0x84] sm:$0xe]  ;;  %v1079_v38 = vrot.slane %v9529_v47, 1  ;;  %v902_v2 = vrot.slane %v900_v23, 1  ;;  %v9366_v47 = vld [vmem:[%s11598_s11 + $0xac] sm:$0xf] }
  0x82   : > { %v912_v13 = vshll.u32 %v11036_v0, 16  ;;  %v9531_v34 = vcombine.low %v439_v18, %v12065_v46  ;;  %v1086_v45 = vrot.slane %v11036_v0, 1  ;;  %v440_v46 = vld [vmem:[%s11598_s11 + $0x9c] sm:$0xe]  ;;  %v405_v18 = vld [vmem:[%s11598_s11 + $0xc0] sm:$0xf] }
  0x83   : > { %3129 = vmatpush2.bf16.msra.mxu0 %v11058_v51  ;;  %v879_v21 = vsel %vm759_vm0, %v874_v12, %v878_v9  ;;  %v1078_v51 = vsel %vm1048_vm1, %v1076_v33, %v1077_v29  ;;  %v9530_v9 = vcombine.low %v438_v61, %v12025_v14  ;;  %v909_v12 = vrot.slane %v907_v3, 1  ;;  %v12108_v29 = vld [vmem:[%s11598_s11 + $0xac] sm:$0xf]  ;;  %v11052_v23 = vld [vmem:[%s11598_s11 + $0xb0] ss:$0 sps:$4 sm:$0x11]  }
  0x84   : > { %3130 = vmatprep.subr.bf16.mxu0 %v15153_v1  ;;  %3306 = vmatpush2.bf16.msra.mxu1 %v11076_v17  ;;  %v1083_v17 = vrot.slane %v11028_v39, 1  ;;  %v9532_v61 = vcombine.low %v440_v46, %v12090_v6  ;;  %v936_v3 = vshll.u32 %v11052_v23, 16  ;;  %v407_v46 = vld [vmem:[%s11598_s11 + $0xcc] sm:$0xf] }
  0x85   : > { %2837 = vmatmul.mubr.bf16.gmra.mxu0 %v11877_v48  ;;  %3014 = vmatmul.mubr.bf16.gmra.mxu1 %v1072_v53  ;;  %v11077_v48 = vld [vmem:[%s15148_s1 + $0x140] sm:$0xff]   ;;  %v12075_v53 = vcombine.low %v9359_v36, %v9360_v37  ;;  %v1082_v19 = vrot.slane %v9530_v9, 1  ;;  %v910_v14 = vor.u32 %v909_v12, %v905_v11  ;;  %v12115_v36 = vcombine.low %v401_v27, %v12108_v29 }
  0x86   : > { %2844 = vmatprep.mubr.bf16.mxu0 %v867_v60  ;;  %3021 = vmatprep.mubr.bf16.mxu1 %v11996_v56  ;;  %v9362_v60 = vld [vmem:[%s11598_s11 + $0x94] sm:$0xf]  ;;  %v1088_v11 = vrot.slane %v9532_v61, 1 }
  0x87   : > { %3131 = vmatpush2.bf16.msra.mxu0 %v11068_v63  ;;  %3307 = vmatprep.subr.bf16.mxu1 %v15153_v1  ;;  %v898_v63 = vor.u32 %v897_v49, %v893_v43  ;;  %v12094_v55 = vcombine.low %v9361_v50, %v9362_v60  ;;  %v1084_v33 = vsel %vm1048_vm1, %v1082_v19, %v1083_v17  ;;  %v1085_v43 = vrot.slane %v9531_v34, 1  ;;  %v12130_v50 = vld [vmem:[%s11598_s11 + $0xb8] sm:$0xf]  ;;  %v441_v17 = vld [vmem:[%s11598_s11 + $0xa8] sm:$0xe] }
  0x88   : > { %3132 = vmatprep.subr.bf16.mxu0 %v15153_v1  ;;  %3308 = vmatpush2.bf16.msra.mxu1 %v11081_v31  ;;  %v9363_v31 = vld [vmem:[%s11598_s11 + $0x9c] sm:$0xf]  ;;  %v12152_v19 = vld [vmem:[%s11598_s11 + $0xc4] sm:$0xf]  ;;  %v9369_v34 = vld [vmem:[%s11598_s11 + $0xc0] sm:$0xf] }
  0x89   : > { %3309 = vmatprep.subr.bf16.mxu1 %v15153_v1  ;;  %v903_v7 = vsel %vm759_vm0, %v898_v63, %v902_v2  ;;  %v929_v2 = vshrl.u32 %v12115_v36, 16  ;;  %v11413_v1 = vld [vmem:[%s11598_s11 + $0x34] sm:$0xf] }
  0x8b   : > { %3133 = vmatpush2.bf16.msra.mxu0 %v11077_v48  ;;  %v12099_v48 = vcombine.low %v399_v5, %v12090_v6  ;;  %v12145_v6 = vld [vmem:[%s11598_s11 + $0xbc] ss:$0 sps:$4 sm:$0x11]  }
  0x8c   : > { %10803 = vmatprep.subr.bf16.mxu0 %v12040_v20 }
  0x8d   : > { %2845 = vmatmul.mubr.bf16.gmra.mxu0 %v11917_v8  ;;  %3022 = vmatmul.mubr.bf16.gmra.mxu1 %v1075_v57  ;;  %v11083_v8 = vld [vmem:[%s15148_s1 + $0x1c0] sm:$0xff]   ;;  %v919_v26 = vshll.u32 %v12099_v48, 16  ;;  %v917_v40 = vshrl.u32 %v12099_v48, 16 }
  0x8e   : > { %2852 = vmatprep.mubr.bf16.mxu0 %v879_v21  ;;  %3029 = vmatprep.mubr.bf16.mxu1 %v12042_v24  ;;  %v11044_v57 = vld [vmem:[%s11598_s11 + $0xa4] ss:$0 sps:$4 sm:$0x11]   ;;  %v914_v21 = vrot.slane %v912_v13, 1  ;;  %v938_v13 = vrot.slane %v936_v3, 1 }
  0x8f   : > { %3310 = vmatpush2.bf16.msra.mxu1 %v11083_v8  ;;  %v924_v35 = vshll.u32 %v11044_v57, 16  ;;  %v921_v44 = vrot.slane %v919_v26, 1  ;;  %v9365_v8 = vld [vmem:[%s11598_s11 + $0xa8] sm:$0xf]  ;;  %v1089_v5 = vrot.slane %v11044_v57, 1 }
  0x90   : > { %v915_v37 = vsel %vm759_vm0, %v910_v14, %v914_v21  ;;  %v12133_v60 = vcombine.low %v9365_v8, %v9366_v47  ;;  %v948_v21 = vshll.u32 %v12145_v6, 16  ;;  %v12171_v8 = vld [vmem:[%s11598_s11 + $0xc8] ss:$0 sps:$4 sm:$0x11]   ;;  %v9394_v3 = vld [vmem:[%s11598_s11 + $0x18] sm:$0xe] }
  0x91   : > { %v926_v49 = vrot.slane %v924_v35, 1  ;;  %v1090_v26 = vsel %vm1048_vm1, %v1088_v11, %v1089_v5  ;;  %v9370_v35 = vld [vmem:[%s11598_s11 + $0xc4] sm:$0xf]  ;;  %v1298_v5 = vshll.u32 %v11721_v10, 16 }
  0x95   : > { %2853 = vmatmul.mubr.bf16.gmra.mxu0 %v11960_v15  ;;  %3030 = vmatmul.mubr.bf16.gmra.mxu1 %v1078_v51  ;;  %v1081_v15 = vsel %vm1048_vm1, %v1079_v38, %v1080_v59  ;;  %v931_v51 = vshll.u32 %v12115_v36, 16  ;;  %v403_v59 = vld [vmem:[%s11598_s11 + $0xb4] sm:$0xf] }
  0x96   : > { %2860 = vmatprep.mubr.bf16.mxu0 %v891_v52  ;;  %3037 = vmatprep.mubr.bf16.mxu1 %v12075_v53  ;;  %v922_v52 = vor.u32 %v921_v44, %v917_v40  ;;  %v12137_v38 = vcombine.low %v403_v59, %v12130_v50  ;;  %v950_v44 = vrot.slane %v948_v21, 1 }
  0x97   : > { %v933_v0 = vrot.slane %v931_v51, 1 }
  0x98   : > { %v927_v63 = vsel %vm759_vm0, %v922_v52, %v926_v49  ;;  %v943_v9 = vshll.u32 %v12137_v38, 16  ;;  %v941_v57 = vshrl.u32 %v12137_v38, 16  ;;  %v12183_v52 = vcombine.low %v9369_v34, %v9370_v35  ;;  %v9372_v34 = vld [vmem:[%s11598_s11 + $0xd0] sm:$0xf] }
  0x99   : > { %v934_v12 = vor.u32 %v933_v0, %v929_v2  ;;  %v960_v2 = vshll.u32 %v12171_v8, 16 }
  0x9a   : > { %v945_v14 = vrot.slane %v943_v9, 1  ;;  %v11099_v9 = vld [vmem:[%s11598_s11 + $0x50] ss:$0 sps:$4 sm:$0x11]  }
  0x9b   : > { %v939_v27 = vsel %vm759_vm0, %v934_v12, %v938_v13  ;;  %v1095_v13 = vrot.slane %v12145_v6, 1  ;;  %v962_v21 = vrot.slane %v960_v2, 1 }
  0x9c   : > { %v946_v40 = vor.u32 %v945_v14, %v941_v57  ;;  %v11089_v57 = vld [vmem:[%s11598_s11 + $0x2c] ss:$0 sps:$4 sm:$0x11]  }
  0x9d   : > { %2861 = vmatmul.mubr.bf16.gmra.mxu0 %v12003_v62  ;;  %3038 = vmatmul.mubr.bf16.gmra.mxu1 %v1081_v15  ;;  %v9364_v62 = vld [vmem:[%s11598_s11 + $0xa0] sm:$0xf]  ;;  %v9367_v15 = vld [vmem:[%s11598_s11 + $0xb4] sm:$0xf] }
  0x9e   : > { %2868 = vmatprep.mubr.bf16.mxu0 %v903_v7  ;;  %3045 = vmatprep.mubr.bf16.mxu1 %v12094_v55  ;;  %v12118_v39 = vcombine.low %v9363_v31, %v9364_v62  ;;  %v9368_v7 = vld [vmem:[%s11598_s11 + $0xb8] sm:$0xf]  ;;  %v12162_v62 = vcombine.low %v405_v18, %v12152_v19  ;;  %v951_v51 = vsel %vm759_vm0, %v946_v40, %v950_v44  ;;  %v443_v18 = vld [vmem:[%s11598_s11 + $0xc0] sm:$0xe]  ;;  %v9412_v40 = vld [vmem:[%s11598_s11 + $0x1c] sm:$0xf] }
  0x9f   : > { %v12159_v31 = vcombine.low %v9367_v15, %v9368_v7  ;;  %v1310_v15 = vshll.u32 %v11752_v32, 16  ;;  %v1322_v7 = vshll.u32 %v11790_v54, 16  ;;  %v9535_v35 = vcombine.low %v443_v18, %v12152_v19  ;;  %v9395_v44 = vld [vmem:[%s11598_s11 + $0x24] sm:$0xe] }
  0xa0   : > { %v955_v47 = vshll.u32 %v12162_v62, 16  ;;  %v953_v61 = vshrl.u32 %v12162_v62, 16 }
  0xa1   : > { %v1097_v18 = vrot.slane %v9535_v35, 1 }
  0xa5   : > { %2869 = vmatmul.mubr.bf16.gmra.mxu0 %v12045_v25  ;;  %3046 = vmatmul.mubr.bf16.gmra.mxu1 %v1084_v33  ;;  %v1087_v25 = vsel %vm1048_vm1, %v1085_v43, %v1086_v45  ;;  %v1092_v33 = vrot.slane %v11052_v23, 1  ;;  %v442_v45 = vld [vmem:[%s11598_s11 + $0xb4] sm:$0xe]  ;;  %v12176_v43 = vld [vmem:[%s11598_s11 + $0xd0] sm:$0xf] }
  0xa6   : > { %2876 = vmatprep.mubr.bf16.mxu0 %v915_v37  ;;  %3053 = vmatprep.mubr.bf16.mxu1 %v12118_v39  ;;  %v9534_v59 = vcombine.low %v442_v45, %v12130_v50  ;;  %v12190_v0 = vcombine.low %v407_v46, %v12176_v43  ;;  %v1334_v50 = vshll.u32 %v11834_v22, 16  ;;  %v9416_v45 = vld [vmem:[%s11598_s11 + $0x34] sm:$0xf] }
  0xa8   : > { %v965_v19 = vshrl.u32 %v12190_v0, 16 }
  0xad   : > { %2877 = vmatmul.mubr.bf16.gmra.mxu0 %v12078_v58  ;;  %3054 = vmatmul.mubr.bf16.gmra.mxu1 %v1087_v25  ;;  %v9533_v58 = vcombine.low %v441_v17, %v12108_v29  ;;  %v1286_v29 = vshll.u32 %v11630_v30, 16  ;;  %v9393_v25 = vld [vmem:[%s11598_s11 + $0xc] sm:$0xe]  ;;  %v1094_v17 = vrot.slane %v9534_v59, 1 }
  0xae   : > { %2884 = vmatprep.mubr.bf16.mxu0 %v927_v63  ;;  %3061 = vmatprep.mubr.bf16.mxu1 %v12133_v60  ;;  %v957_v63 = vrot.slane %v955_v47, 1 }
  0xaf   : > { %v1091_v37 = vrot.slane %v9533_v58, 1  ;;  %v12179_v49 = vrot.slane %v1286_v29, 1  ;;  %v12204_v58 = vld [vmem:[%s11598_s11 + $0xd4] ss:$0 sps:$4 sm:$0x11]   ;;  %v1096_v46 = vsel %vm1048_vm1, %v1094_v17, %v1095_v13 }
  0xb0   : > { %v958_v14 = vor.u32 %v957_v63, %v953_v61  ;;  %v1098_v61 = vrot.slane %v12171_v8, 1  ;;  %v11412_v13 = vld [vmem:[%s11598_s11 + $0x28] sm:$0xf] }
  0xb1   : > { %v1093_v23 = vsel %vm1048_vm1, %v1091_v37, %v1092_v33  ;;  %v9371_v33 = vld [vmem:[%s11598_s11 + $0xcc] sm:$0xf]  ;;  %v9411_v37 = vld [vmem:[%s11598_s11 + $0x18] sm:$0xf]  ;;  %v9575_v17 = vcombine.low %v9395_v44, %v11412_v13 }
  0xb2   : > { %v12222_v59 = vcombine.low %v9371_v33, %v9372_v34  ;;  %v12228_v2 = vcombine.low %v9411_v37, %v9412_v40  ;;  %v9373_v33 = vld [vmem:[%s11598_s11 + $0xd8] sm:$0xf]  ;;  %v9374_v34 = vld [vmem:[%s11598_s11 + $0xdc] sm:$0xf]  ;;  %v1101_v40 = vrot.slane %v12204_v58, 1 }
  0xb3   : > { %v12248_v44 = vld [vmem:[%s11598_s11 + $0x20] ss:$0 sps:$4 sm:$0x11]  }
  0xb4   : > { %15164 = vst [vmem:[#allocation3_spill] sm:$0xff] %v12222_v59  ;;  %v1808_v37 = vshll.u32 %v12228_v2, 16 }
  0xb5   : > { %2885 = vmatmul.mubr.bf16.gmra.mxu0 %v12099_v48  ;;  %3062 = vmatmul.mubr.bf16.gmra.mxu1 %v1090_v26  ;;  %v1284_v48 = vshrl.u32 %v11630_v30, 16  ;;  %v11410_v26 = vld [vmem:[%s11598_s11 + $0x10] sm:$0xf]  ;;  %v12322_v30 = vld [vmem:[%s11598_s11 + $0x44] ss:$0 sps:$4 sm:$0x11]  }
  0xb6   : > { %2892 = vmatprep.mubr.bf16.mxu0 %v939_v27  ;;  %3069 = vmatprep.mubr.bf16.mxu1 %v12159_v31  ;;  %v9573_v6 = vcombine.low %v9393_v25, %v11410_v26  ;;  %v11411_v27 = vld [vmem:[%s11598_s11 + $0x1c] sm:$0xf]  ;;  %v11086_v26 = vld [vmem:[%s11598_s11 + $0x20] ss:$0 sps:$4 sm:$0x11]  }
  0xb7   : > { %v9574_v29 = vcombine.low %v9394_v3, %v11411_v27 }
  0xb8   : > { %v12226_v63 = vrot.slane %v9573_v6, 1  ;;  %v9413_v6 = vld [vmem:[%s11598_s11 + $0x24] sm:$0xf] }
  0xb9   : > { %v12230_v3 = vrot.slane %v9574_v29, 1  ;;  %v9414_v29 = vld [vmem:[%s11598_s11 + $0x28] sm:$0xf] }
  0xba   : > { %v12255_v13 = vcombine.low %v9413_v6, %v9414_v29 }
  0xbd   : > { %2893 = vmatmul.mubr.bf16.gmra.mxu0 %v12115_v36  ;;  %3070 = vmatmul.mubr.bf16.gmra.mxu1 %v1093_v23  ;;  %v967_v36 = vshll.u32 %v12190_v0, 16  ;;  %v972_v23 = vshll.u32 %v12204_v58, 16 }
  0xbe   : > { %2900 = vmatprep.mubr.bf16.mxu0 %v951_v51  ;;  %3077 = vmatprep.mubr.bf16.mxu1 %v12183_v52  ;;  %v963_v51 = vsel %vm759_vm0, %v958_v14, %v962_v21  ;;  %v444_v14 = vld [vmem:[%s11598_s11 + $0xcc] sm:$0xe]  ;;  %v11082_v21 = vld [vmem:[%s11598_s11 + $0x14] ss:$0 sps:$4 sm:$0x11]  }
  0xbf   : > { %v969_v25 = vrot.slane %v967_v36, 1  ;;  %v9396_v36 = vld [vmem:[%s11598_s11 + $0x30] sm:$0xe]  ;;  %v974_v8 = vrot.slane %v972_v23, 1  ;;  %v9536_v35 = vcombine.low %v444_v14, %v12176_v43  ;;  %v12252_v23 = vrot.slane %v9575_v17, 1 }
  0xc0   : > { %v9576_v47 = vcombine.low %v9396_v36, %v11413_v1  ;;  %v1099_v43 = vsel %vm1048_vm1, %v1097_v18, %v1098_v61  ;;  %v12260_v14 = vcombine.low %v9373_v33, %v9374_v34  ;;  %v1810_v17 = vrot.slane %v1808_v37, 1  ;;  %v12270_v18 = vld [vmem:[%s11598_s11 + $0x2c] ss:$0 sps:$4 sm:$0x11]  }
  0xc1   : > { %v970_v27 = vor.u32 %v969_v25, %v965_v19  ;;  %v1806_v19 = vshrl.u32 %v12228_v2, 16  ;;  %v1813_v25 = vshll.u32 %v11086_v26, 16  ;;  %v1303_v26 = vshll.u32 %v12248_v44, 16 }
  0xc2   : > { %15165 = vst [vmem:[#allocation4_spill] sm:$0xff] %v12260_v14  ;;  %v1100_v1 = vrot.slane %v9536_v35, 1  ;;  %v1820_v61 = vshll.u32 %v12255_v13, 16  ;;  %v12274_v36 = vrot.slane %v1310_v15, 1  ;;  %v1575_v33 = vrot.slane %v12248_v44, 1 }
  0xc3   : > { %v975_v58 = vsel %vm759_vm0, %v970_v27, %v974_v8  ;;  %v1572_v27 = vrot.slane %v11082_v21, 1  ;;  %v12281_v34 = vrot.slane %v9576_v47, 1  ;;  %v1811_v37 = vor.u32 %v1810_v17, %v1806_v19  ;;  %v9418_v17 = vld [vmem:[%s11598_s11 + $0x40] sm:$0xf] }
  0xc4   : > { %v1815_v35 = vrot.slane %v1813_v25, 1  ;;  %v1818_v15 = vshrl.u32 %v12255_v13, 16  ;;  %v1315_v12 = vshll.u32 %v12270_v18, 16  ;;  %v1102_v6 = vsel %vm1048_vm1, %v1100_v1, %v1101_v40  ;;  %v9417_v25 = vld [vmem:[%s11598_s11 + $0x3c] sm:$0xf] }
  0xc5   : > { %2901 = vmatmul.mubr.bf16.gmra.mxu0 %v12137_v38  ;;  %3078 = vmatmul.mubr.bf16.gmra.mxu1 %v1096_v46  ;;  %v1296_v38 = vshrl.u32 %v11721_v10, 16  ;;  %v12250_v46 = vrot.slane %v1298_v5, 1  ;;  %v9415_v5 = vld [vmem:[%s11598_s11 + $0x30] sm:$0xf]  ;;  %v1573_v19 = vsel %vm1048_vm1, %v12226_v63, %v1572_v27  ;;  %v1578_v40 = vrot.slane %v12270_v18, 1 }
  0xc6   : > { %2908 = vmatprep.mubr.bf16.mxu0 %v963_v51  ;;  %3085 = vmatprep.mubr.bf16.mxu1 %v12222_v59  ;;  %v1291_v51 = vshll.u32 %v11082_v21, 16  ;;  %v12276_v8 = vcombine.low %v9415_v5, %v9416_v45  ;;  %v12288_v45 = vld [vmem:[%s11598_s11 + $0x38] ss:$0 sps:$4 sm:$0x11]   ;;  %v1825_v5 = vshll.u32 %v11089_v57, 16  ;;  %v1816_v21 = vsel %vm759_vm0, %v1811_v37, %v1815_v35 }
  0xc7   : > { %v12301_v57 = vld [vmem:[%s11598_s11 + $0x44] ss:$0 sps:$4 sm:$0x11]   ;;  %v1327_v63 = vshll.u32 %v12288_v45, 16  ;;  %v1289_v1 = vor.u32 %v12179_v49, %v1284_v48  ;;  %v12309_v27 = vrot.slane %v1315_v12, 1  ;;  %v12311_v37 = vcombine.low %v9417_v25, %v9418_v17 }
  0xc8   : > { %v1293_v29 = vrot.slane %v1291_v51, 1  ;;  %v1822_v51 = vrot.slane %v1820_v61, 1  ;;  %v1832_v47 = vshll.u32 %v12276_v8, 16  ;;  %v9419_v35 = vld [vmem:[%s11598_s11 + $0x48] sm:$0xf]  ;;  %v1830_v18 = vshrl.u32 %v12276_v8, 16 }
  0xc9   : > { %v9399_v48 = vld [vmem:[%s11598_s11 + $0x54] sm:$0xe]  ;;  %v12326_v49 = vld [vmem:[%s11598_s11 + $0x60] sm:$0xe]  ;;  %v1301_v12 = vor.u32 %v12250_v46, %v1296_v38  ;;  %v1844_v46 = vshll.u32 %v12311_v37, 16  ;;  %v1576_v25 = vsel %vm1048_vm1, %v12230_v3, %v1575_v33  ;;  %v11100_v3 = vld [vmem:[%s15148_s1 + $0x228] sm:$0xff]  }
  0xca   : > { %v1294_v10 = vsel %vm759_vm0, %v1289_v1, %v1293_v29  ;;  %v11093_v38 = vld [vmem:[%s15148_s1 + $0x230] sm:$0xff]   ;;  %v9422_v1 = vld [vmem:[%s11598_s11 + $0x58] sm:$0xf]  ;;  %v9423_v44 = vld [vmem:[%s11598_s11 + $0x60] sm:$0xf] }
  0xcb   : > { %v9421_v29 = vld [vmem:[%s11598_s11 + $0x54] sm:$0xf] }
  0xcd   : > { %2909 = vmatmul.mubr.bf16.gmra.mxu0 %v12162_v62  ;;  %3086 = vmatmul.mubr.bf16.gmra.mxu1 %v1099_v43  ;;  %v9397_v62 = vld [vmem:[%s11598_s11 + $0x3c] sm:$0xe]  ;;  %v11092_v43 = vld [vmem:[%s11598_s11 + $0x38] ss:$0 sps:$4 sm:$0x11]  }
  0xce   : > { %2916 = vmatprep.mubr.bf16.mxu0 %v975_v58  ;;  %3093 = vmatprep.mubr.bf16.mxu1 %v12260_v14  ;;  %v12284_v58 = vrot.slane %v1303_v26, 1  ;;  %v11414_v26 = vld [vmem:[%s11598_s11 + $0x40] sm:$0xf]  ;;  %v1837_v61 = vshll.u32 %v11092_v43, 16  ;;  %v9398_v43 = vld [vmem:[%s11598_s11 + $0x48] sm:$0xe] }
  0xcf   : > { %v9577_v11 = vcombine.low %v9397_v62, %v11414_v26  ;;  %v1827_v62 = vrot.slane %v1825_v5, 1  ;;  %v1834_v26 = vrot.slane %v1832_v47, 1  ;;  %v1823_v5 = vor.u32 %v1822_v51, %v1818_v15  ;;  %v12350_v51 = vld [vmem:[%s11598_s11 + $0x50] ss:$0 sps:$4 sm:$0x11]  }
  0xd0   : > { %v1849_v15 = vshll.u32 %v12301_v57, 16  ;;  %v1306_v33 = vsel %vm759_vm0, %v1301_v12, %v12284_v58 }
  0xd1   : > { %v12333_v47 = vrot.slane %v9577_v11, 1  ;;  %v1828_v57 = vsel %vm759_vm0, %v1823_v5, %v1827_v62  ;;  %v11416_v11 = vld [vmem:[%s11598_s11 + $0x58] sm:$0xf]  ;;  %v12381_v62 = vcombine.low %v9421_v29, %v9422_v1 }
  0xd2   : > { %v9579_v14 = vcombine.low %v9399_v48, %v11416_v11  ;;  %v9424_v48 = vld [vmem:[%s11598_s11 + $0x64] sm:$0xf]  ;;  %v1851_v5 = vrot.slane %v1849_v15, 1 }
  0xd3   : > { %v12402_v11 = vcombine.low %v9423_v44, %v9424_v48  ;;  %v1868_v15 = vshll.u32 %v12381_v62, 16  ;;  %v11106_v44 = vld [vmem:[%s11598_s11 + $0x68] ss:$0 sps:$4 sm:$0x11]  }
  0xd4   : > { %v12407_v1 = vrot.slane %v9579_v14, 1 }
  0xd5   : > { %2917 = vmatmul.mubr.bf16.gmra.mxu0 %v12190_v0  ;;  %3094 = vmatmul.mubr.bf16.gmra.mxu1 %v1102_v6  ;;  %v9420_v0 = vld [vmem:[%s11598_s11 + $0x4c] sm:$0xf]  ;;  %v12319_v6 = vrot.slane %v1322_v7, 1  ;;  %v1339_v7 = vshll.u32 %v12322_v30, 16 }
  0xd6   : > { %3134 = vmatprep.mubr.bf16.mxu0 %v1573_v19  ;;  %3311 = vmatprep.mubr.bf16.mxu1 %v1816_v21  ;;  %v12331_v21 = vrot.slane %v1837_v61, 1  ;;  %v12336_v19 = vrot.slane %v1327_v63, 1  ;;  %v12339_v17 = vcombine.low %v9419_v35, %v9420_v0  ;;  %v12355_v63 = vrot.slane %v1334_v50, 1  ;;  %v11415_v35 = vld [vmem:[%s11598_s11 + $0x4c] sm:$0xf] }
  0xd7   : > { %v9578_v0 = vcombine.low %v9398_v43, %v11415_v35  ;;  %v11103_v61 = vld [vmem:[%s11598_s11 + $0x5c] ss:$0 sps:$4 sm:$0x11]   ;;  %v9580_v50 = vcombine.low %v12326_v49, %v11930_v16  ;;  %v1861_v43 = vshll.u32 %v11099_v9, 16  ;;  %v1579_v16 = vsel %vm1048_vm1, %v12252_v23, %v1578_v40 }
  0xd8   : > { %v1856_v59 = vshll.u32 %v12339_v17, 16  ;;  %v1835_v9 = vor.u32 %v1834_v26, %v1830_v18  ;;  %v1846_v49 = vrot.slane %v1844_v46, 1  ;;  %v1854_v58 = vshrl.u32 %v12339_v17, 16  ;;  %v9401_v46 = vld [vmem:[%s11598_s11 + $0x6c] sm:$0xe] }
  0xd9   : > { %v12391_v12 = vrot.slane %v9578_v0, 1  ;;  %v15166_v18 = vshll.u32 %v11871_v42, 16  ;;  %v1873_v29 = vshll.u32 %v11103_v61, 16  ;;  %v1866_v35 = vshrl.u32 %v12381_v62, 16 }
  0xda   : > { %v12394_v40 = vrot.slane %v1856_v59, 1  ;;  %v15167_v61 = vshll.u32 %v11911_v4, 16  ;;  %v9581_v48 = vcombine.low %v9401_v46, %v11973_v41  ;;  %v1880_v0 = vshll.u32 %v12402_v11, 16  ;;  %v12430_v23 = vld [vmem:[%s11598_s11 + $0x68] ss:$0 sps:$4 sm:$0x11]  }
  0xdb   : > { %v12400_v26 = vrot.slane %v15166_v18, 1  ;;  %v12436_v41 = vrot.slane %v9580_v50, 1  ;;  %v15169_v46 = vshll.u32 %v11953_v28, 16  ;;  %v15170_v50 = vshrl.u32 %v12311_v37, 16 }
  0xdc   : > { %v12421_v14 = vrot.slane %v15167_v61, 1  ;;  %v1375_v61 = vshll.u32 %v12430_v23, 16 }
  0xdd   : > { %3135 = vmatmul.mubr.bf16.vlgmr.msra.gmra.mxu0 %v1294_v10  ;;  %3312 = vmatmul.mubr.bf16.vlgmr.msra.gmra.mxu1 %v12228_v2  ;;  %v1351_v10 = vshll.u32 %v12350_v51, 16  ;;  %v12388_v2 = vrot.slane %v1339_v7, 1  ;;  %v1587_v7 = vrot.slane %v12350_v51, 1  ;;  %v15176_v51 = vshrl.u32 %v11871_v42, 16 }
  0xde   : > { %10804 = vmatpush3.bf16.msra.mxu0 %v12040_v20  ;;  %3142 = vmatprep.mubr.bf16.mxu0 %v1576_v25  ;;  %v12386_v20 = vld [vmem:[%s11598_s11 + $0x5c] ss:$0 sps:$4 sm:$0x11]   ;;  %v12396_v25 = vrot.slane %v1861_v43, 1  ;;  %v1840_v43 = vsel %vm759_vm0, %v1835_v9, %v12331_v21  ;;  %v1870_v21 = vrot.slane %v1868_v15, 1  ;;  %v12433_v9 = vrot.slane %v1873_v29, 1 }
  0xdf   : > { %3319 = vmatprep.mubr.bf16.mxu1 %v1828_v57  ;;  %10805 = vmatprep.subr.bf16.mxu0 %v11093_v38  ;;  %v12409_v59 = vrot.slane %v1351_v10, 1  ;;  %v1363_v57 = vshll.u32 %v12386_v20, 16  ;;  %v15168_v10 = vshrl.u32 %v11752_v32, 16  ;;  %v1847_v15 = vor.u32 %v1846_v49, %v15170_v50  ;;  %v9426_v29 = vld [vmem:[%s11598_s11 + $0x70] sm:$0xf] }
  0xe0   : > { %v15171_v49 = vrot.slane %v12288_v45, 1 }
  0xe1   : > { %v1313_v18 = vor.u32 %v12274_v36, %v15168_v10  ;;  %v12438_v32 = vrot.slane %v1363_v57, 1  ;;  %v12453_v57 = vrot.slane %v1880_v0, 1  ;;  %v11124_v36 = vld [vmem:[%s15148_s1 + $0x210] sm:$0xff]   ;;  %v1852_v50 = vsel %vm759_vm0, %v1847_v15, %v1851_v5  ;;  %v11131_v5 = vld [vmem:[%s15148_s1 + $0x208] sm:$0xff]  }
  0xe2   : > { %10806 = vmatpush3.bf16.msra.mxu0 %v11093_v38  ;;  %v11107_v38 = vld [vmem:[%s15148_s1 + $0x220] sm:$0xff]   ;;  %v1582_v0 = vsel %vm1048_vm1, %v12281_v34, %v15171_v49  ;;  %v12476_v10 = vrot.slane %v1375_v61, 1  ;;  %v1380_v61 = vshrl.u32 %v11996_v56, 16  ;;  %v15173_v15 = vrot.slane %v12322_v30, 1  ;;  %v9427_v30 = vld [vmem:[%s11598_s11 + $0x78] sm:$0xf] }
  0xe3   : > { %10807 = vmatprep.subr.bf16.mxu0 %v11100_v3  ;;  %v1588_v49 = vsel %vm1048_vm1, %v12391_v12, %v1587_v7 }
  0xe5   : > { %3143 = vmatmul.mubr.bf16.gmra.mxu0 %v1306_v33  ;;  %3320 = vmatmul.mubr.bf16.gmra.mxu1 %v12255_v13  ;;  %v12444_v13 = vrot.slane %v15169_v46, 1  ;;  %v12456_v33 = vrot.slane %v9581_v48, 1  ;;  %v1318_v46 = vsel %vm759_vm0, %v1313_v18, %v12309_v27  ;;  %v15172_v27 = vshrl.u32 %v11790_v54, 16 }
  0xe6   : > { %3150 = vmatprep.mubr.bf16.mxu0 %v1579_v16  ;;  %3327 = vmatprep.mubr.bf16.mxu1 %v1840_v43  ;;  %v11115_v16 = vld [vmem:[%s15148_s1 + $0x218] sm:$0xff]   ;;  %v1885_v43 = vshll.u32 %v11106_v44, 16  ;;  %v11110_v44 = vld [vmem:[%s11598_s11 + $0x74] ss:$0 sps:$4 sm:$0x11]  }
  0xe7   : > { %10808 = vmatpush3.bf16.msra.mxu0 %v11100_v3  ;;  %v9425_v3 = vld [vmem:[%s11598_s11 + $0x6c] sm:$0xf]  ;;  %v1325_v18 = vor.u32 %v12319_v6, %v15172_v27  ;;  %v1897_v6 = vshll.u32 %v11110_v44, 16 }
  0xe8   : > { %10809 = vmatprep.subr.bf16.mxu0 %v11107_v38  ;;  %v12470_v48 = vcombine.low %v9425_v3, %v9426_v29  ;;  %v1887_v45 = vrot.slane %v1885_v43, 1  ;;  %v9428_v43 = vld [vmem:[%s11598_s11 + $0x7c] sm:$0xf] }
  0xe9   : > { %v1899_v12 = vrot.slane %v1897_v6, 1  ;;  %v15178_v6 = vrot.slane %v12386_v20, 1 }
  0xea   : > { %v1890_v34 = vshrl.u32 %v12470_v48, 16  ;;  %v1892_v54 = vshll.u32 %v12470_v48, 16 }
  0xeb   : > { %10810 = vmatpush3.bf16.msra.mxu0 %v11107_v38  ;;  %v1330_v38 = vsel %vm759_vm0, %v1325_v18, %v12336_v19  ;;  %v15174_v19 = vshrl.u32 %v11834_v22, 16  ;;  %v11113_v18 = vld [vmem:[%s11598_s11 + $0x80] ss:$0 sps:$4 sm:$0x11]  }
  0xec   : > { %10811 = vmatprep.subr.bf16.mxu0 %v11115_v16 }
  0xed   : > { %3151 = vmatmul.mubr.bf16.gmra.mxu0 %v1318_v46  ;;  %3328 = vmatmul.mubr.bf16.gmra.mxu1 %v12276_v8  ;;  %v1859_v8 = vor.u32 %v12394_v40, %v1854_v58  ;;  %v1585_v58 = vsel %vm1048_vm1, %v12333_v47, %v15173_v15  ;;  %v12497_v40 = vld [vmem:[%s11598_s11 + $0x74] ss:$0 sps:$4 sm:$0x11]   ;;  %v1337_v29 = vor.u32 %v12355_v63, %v15174_v19  ;;  %v15179_v15 = vshrl.u32 %v11911_v4, 16 }
  0xee   : > { %3158 = vmatprep.mubr.bf16.mxu0 %v1582_v0  ;;  %3335 = vmatprep.mubr.bf16.mxu1 %v1852_v50  ;;  %v1871_v47 = vor.u32 %v1870_v21, %v1866_v35  ;;  %v1387_v63 = vshll.u32 %v12497_v40, 16  ;;  %v12521_v35 = vcombine.low %v9427_v30, %v9428_v43  ;;  %v9402_v0 = vld [vmem:[%s11598_s11 + $0x78] sm:$0xe]  ;;  %v11117_v19 = vld [vmem:[%s11598_s11 + $0x8c] ss:$0 sps:$4 sm:$0x11]  }
  0xef   : > { %10812 = vmatpush3.bf16.msra.mxu0 %v11115_v16  ;;  %v11138_v16 = vld [vmem:[%s15148_s1 + $0x200] sm:$0xff]   ;;  %v1864_v3 = vsel %vm759_vm0, %v1859_v8, %v12396_v25  ;;  %v1596_v25 = vrot.slane %v12497_v40, 1  ;;  %v1342_v22 = vsel %vm759_vm0, %v1337_v29, %v12388_v2  ;;  %v1349_v2 = vor.u32 %v12400_v26, %v15176_v51  ;;  %v11417_v8 = vld [vmem:[%s11598_s11 + $0x7c] sm:$0xf]  ;;  %v9431_v29 = vld [vmem:[%s11598_s11 + $0x90] sm:$0xf] }
  0xf0   : > { %10813 = vmatprep.subr.bf16.mxu0 %v11124_v36  ;;  %v1876_v21 = vsel %vm759_vm0, %v1871_v47, %v12433_v9  ;;  %v12530_v7 = vrot.slane %v1387_v63, 1  ;;  %v1902_v44 = vshrl.u32 %v12521_v35, 16  ;;  %v1904_v50 = vshll.u32 %v12521_v35, 16  ;;  %v9432_v43 = vld [vmem:[%s11598_s11 + $0x94] sm:$0xf] }
  0xf1   : > { %v15177_v9 = vshrl.u32 %v12402_v11, 16  ;;  %v9582_v42 = vcombine.low %v9402_v0, %v11417_v8  ;;  %v1354_v26 = vsel %vm759_vm0, %v1349_v2, %v12409_v59  ;;  %v1361_v59 = vor.u32 %v12421_v14, %v15179_v15  ;;  %v9433_v40 = vld [vmem:[%s11598_s11 + $0x9c] sm:$0xf] }
  0xf2   : > { %v1906_v4 = vrot.slane %v1904_v50, 1  ;;  %v15180_v47 = vrot.slane %v12430_v23, 1  ;;  %v1921_v23 = vshll.u32 %v11117_v19, 16  ;;  %v12584_v0 = vcombine.low %v9431_v29, %v9432_v43 }
  0xf3   : > { %10814 = vmatpush3.bf16.msra.mxu0 %v11124_v36  ;;  %v15175_v36 = vshll.u32 %v11996_v56, 16  ;;  %v1883_v27 = vor.u32 %v12453_v57, %v15177_v9  ;;  %v1366_v30 = vsel %vm759_vm0, %v1361_v59, %v12438_v32  ;;  %v15182_v51 = vshll.u32 %v12042_v24, 16  ;;  %v11120_v59 = vld [vmem:[%s11598_s11 + $0x98] ss:$0 sps:$4 sm:$0x11]  }
  0xf4   : > { %10815 = vmatprep.subr.bf16.mxu0 %v11131_v5  ;;  %v1907_v9 = vor.u32 %v1906_v4, %v1902_v44  ;;  %v1597_v44 = vsel %vm1048_vm1, %v12456_v33, %v1596_v25 }
  0xf5   : > { %3159 = vmatmul.mubr.bf16.gmra.mxu0 %v1330_v38  ;;  %3336 = vmatmul.mubr.bf16.gmra.mxu1 %v12311_v37  ;;  %v12512_v46 = vrot.slane %v15175_v36, 1  ;;  %v1894_v37 = vrot.slane %v1892_v54, 1  ;;  %v9430_v54 = vld [vmem:[%s11598_s11 + $0x88] sm:$0xf]  ;;  %v1591_v38 = vsel %vm1048_vm1, %v12407_v1, %v15178_v6  ;;  %v1392_v1 = vshrl.u32 %v12042_v24, 16 }
  0xf6   : > { %3166 = vmatprep.mubr.bf16.mxu0 %v1585_v58  ;;  %3343 = vmatprep.mubr.bf16.mxu1 %v1864_v3  ;;  %v1909_v58 = vshll.u32 %v11113_v18, 16  ;;  %v12557_v3 = vrot.slane %v9582_v42, 1  ;;  %v1594_v36 = vsel %vm1048_vm1, %v12436_v41, %v15180_v47  ;;  %v1396_v2 = vrot.slane %v15182_v51, 1  ;;  %v11118_v47 = vld [vmem:[%s11598_s11 + $0x8c] ss:$0 sps:$4 sm:$0x11]  }
  0xf7   : > { %10816 = vmatpush3.bf16.msra.mxu0 %v11131_v5  ;;  %v12539_v5 = vld [vmem:[%s11598_s11 + $0x80] ss:$0 sps:$4 sm:$0x11]   ;;  %v1385_v33 = vor.u32 %v12512_v46, %v1380_v61  ;;  %v15183_v24 = vshll.u32 %v12075_v53, 16 }
  0xf8   : > { %10817 = vmatprep.subr.bf16.mxu0 %v11138_v16  ;;  %v1599_v20 = vrot.slane %v12539_v5, 1  ;;  %v1911_v32 = vrot.slane %v1909_v58, 1  ;;  %v11418_v58 = vld [vmem:[%s11598_s11 + $0x88] sm:$0xf] }
  0xf9   : > { %v1390_v61 = vsel %vm759_vm0, %v1385_v33, %v12530_v7  ;;  %v9404_v7 = vld [vmem:[%s11598_s11 + $0x90] sm:$0xe] }
  0xfa   : > { %v1912_v15 = vsel %vm759_vm0, %v1907_v9, %v1911_v32  ;;  %v1602_v9 = vrot.slane %v11118_v47, 1 }
  0xfb   : > { %10818 = vmatpush3.bf16.msra.mxu0 %v11138_v16  ;;  %v1888_v16 = vsel %vm759_vm0, %v1883_v27, %v1887_v45  ;;  %v1895_v45 = vor.u32 %v1894_v37, %v1890_v34  ;;  %v15181_v37 = vshrl.u32 %v11953_v28, 16  ;;  %v9403_v28 = vld [vmem:[%s11598_s11 + $0x84] sm:$0xe] }
  0xfd   : > { %3167 = vmatmul.mubr.bf16.gmra.mxu0 %v1342_v22  ;;  %3344 = vmatmul.mubr.bf16.gmra.mxu1 %v12339_v17  ;;  %v9429_v17 = vld [vmem:[%s11598_s11 + $0x84] sm:$0xf]  ;;  %v1900_v34 = vsel %vm759_vm0, %v1895_v45, %v1899_v12  ;;  %v1373_v63 = vor.u32 %v12444_v13, %v15181_v37  ;;  %v1399_v12 = vshll.u32 %v12539_v5, 16  ;;  %v1933_v37 = vshll.u32 %v11120_v59, 16 }
  0xfe   : > { %3174 = vmatprep.mubr.bf16.mxu0 %v1588_v49  ;;  %3351 = vmatprep.mubr.bf16.mxu1 %v1876_v21  ;;  %v12551_v57 = vcombine.low %v9429_v17, %v9430_v54  ;;  %v1928_v54 = vshll.u32 %v12584_v0, 16 }
  0xff   : > { %v1378_v42 = vsel %vm759_vm0, %v1373_v63, %v12476_v10  ;;  %v9583_v10 = vcombine.low %v9403_v28, %v11418_v58  ;;  %v12633_v28 = vld [vmem:[%s11598_s11 + $0xa4] ss:$0 sps:$4 sm:$0x11]  }
 0x100   : > { %v1916_v14 = vshll.u32 %v12551_v57, 16  ;;  %v1914_v27 = vshrl.u32 %v12551_v57, 16  ;;  %v1930_v46 = vrot.slane %v1928_v54, 1  ;;  %v9435_v54 = vld [vmem:[%s11598_s11 + $0xa8] sm:$0xf] }
 0x102   : > { %v1918_v18 = vrot.slane %v1916_v14, 1  ;;  %v12613_v14 = vld [vmem:[%s11598_s11 + $0xa0] sm:$0xf] }
 0x104   : > { %v1919_v43 = vor.u32 %v1918_v18, %v1914_v27  ;;  %v1935_v27 = vrot.slane %v1933_v37, 1  ;;  %v12667_v37 = vld [vmem:[%s11598_s11 + $0xb0] ss:$0 sps:$4 sm:$0x11]  }
 0x105   : > { %3175 = vmatmul.mubr.bf16.gmra.mxu0 %v1354_v26  ;;  %3352 = vmatmul.mubr.bf16.gmra.mxu1 %v12381_v62  ;;  %v12567_v62 = vld [vmem:[%s15150_s3] ss:$0 sm:$0xff]  ;;  %v1923_v26 = vrot.slane %v1921_v23, 1 }
 0x106   : > { %3182 = vmatprep.mubr.bf16.mxu0 %v1591_v38  ;;  %3359 = vmatprep.mubr.bf16.mxu1 %v1888_v16 }
 0x10d   : > { %v2782_v22 = vpop.f32.mrf.mxu0  ;;  %3183 = vmatmul.mubr.bf16.gmra.mxu0 %v1366_v30  ;;  %v2959_v21 = vpop.f32.mrf.mxu1  ;;  %3360 = vmatmul.mubr.bf16.gmra.mxu1 %v12402_v11 }
 0x10e   : > { %v2783_v49 = vadd.f32 %v12567_v62, %v2782_v22  ;;  %3190 = vmatprep.mubr.bf16.mxu0 %v1594_v36  ;;  %3367 = vmatprep.mubr.bf16.mxu1 %v1900_v34  ;;  %v1601_v34 = vrot.slane %v9583_v10, 1 }
 0x10f   : > { %v2784_v41 = vpop.f32.mrf.mxu0  ;;  %v2961_v13 = vpop.f32.mrf.mxu1 }
 0x110   : > { %v12590_v50 = vadd.f32 %v2959_v21, %v2783_v49  ;;  %v1600_v49 = vsel %vm1048_vm1, %v12557_v3, %v1599_v20  ;;  %v12627_v21 = vcombine.low %v9433_v40, %v12613_v14  ;;  %v1924_v41 = vsel %vm759_vm0, %v1919_v43, %v1923_v26 }
 0x111   : > { %v2785_v11 = vpop.f32.mrf.mxu0  ;;  %v2962_v8 = vpop.f32.mrf.mxu1  ;;  %v1397_v3 = vor.u32 %v1396_v2, %v1392_v1  ;;  %v1401_v20 = vrot.slane %v1399_v12, 1  ;;  %v1404_v26 = vshrl.u32 %v12075_v53, 16  ;;  %v1408_v1 = vrot.slane %v15183_v24, 1 }
 0x112   : > { %v2786_v17 = vadd.f32 %v12567_v62, %v2785_v11  ;;  %v1940_v18 = vshll.u32 %v12627_v21, 16  ;;  %v1603_v10 = vsel %vm1048_vm1, %v1601_v34, %v1602_v9 }
 0x113   : > { %v2787_v6 = vpop.f32.mrf.mxu0  ;;  %v2964_v16 = vpop.f32.mrf.mxu1 }
 0x114   : > { %v12601_v38 = vadd.f32 %v2962_v8, %v2786_v17  ;;  %v12646_v6 = vld [vmem:[%s11598_s11 + $0xac] sm:$0xf]  ;;  %v1411_v16 = vshll.u32 %v11118_v47, 16  ;;  %v1418_v47 = vshll.u32 %v12094_v55, 16 }
 0x115   : > { %v2790_v45 = vpop.f32.mrf.mxu0  ;;  %3191 = vmatmul.mubr.bf16.gmra.mxu0 %v1378_v42  ;;  %v2967_v4 = vpop.f32.mrf.mxu1  ;;  %3368 = vmatmul.mubr.bf16.gmra.mxu1 %v12470_v48  ;;  %v1926_v48 = vshrl.u32 %v12584_v0, 16 }
 0x116   : > { %v2791_v19 = vadd.f32 %v12567_v62, %v2790_v45  ;;  %3198 = vmatprep.mubr.bf16.mxu0 %v1597_v44  ;;  %3375 = vmatprep.mubr.bf16.mxu1 %v1912_v15  ;;  %v1402_v44 = vsel %vm759_vm0, %v1397_v3, %v1401_v20  ;;  %v11419_v15 = vld [vmem:[%s11598_s11 + $0x94] sm:$0xf]  ;;  %v11121_v45 = vld [vmem:[%s11598_s11 + $0x98] ss:$0 sps:$4 sm:$0x11]   ;;  %v1420_v20 = vrot.slane %v1418_v47, 1 }
 0x117   : > { %v2792_v25 = vpop.f32.mrf.mxu0  ;;  %v2969_v30 = vpop.f32.mrf.mxu1  ;;  %v1931_v42 = vor.u32 %v1930_v46, %v1926_v48  ;;  %v9584_v59 = vcombine.low %v9404_v7, %v11419_v15  ;;  %v1409_v48 = vor.u32 %v1408_v1, %v1404_v26  ;;  %v1605_v46 = vrot.slane %v11121_v45, 1  ;;  %v12676_v3 = vld [vmem:[%s11598_s11 + $0xb8] sm:$0xf] }
 0x118   : > { %v12615_v29 = vadd.f32 %v2967_v4, %v2791_v19  ;;  %v1938_v19 = vshrl.u32 %v12627_v21, 16  ;;  %v1945_v4 = vshll.u32 %v12633_v28, 16  ;;  %v1942_v25 = vrot.slane %v1940_v18, 1 }
 0x119   : > { %v2793_v36 = vpop.f32.mrf.mxu0  ;;  %v2970_v22 = vpop.f32.mrf.mxu1  ;;  %v1936_v40 = vsel %vm759_vm0, %v1931_v42, %v1935_v27  ;;  %v12661_v30 = vcombine.low %v9435_v54, %v12646_v6  ;;  %v1416_v7 = vshrl.u32 %v12094_v55, 16  ;;  %v1423_v18 = vshll.u32 %v11121_v45, 16  ;;  %v11125_v54 = vld [vmem:[%s11598_s11 + $0xa4] ss:$0 sps:$4 sm:$0x11]  }
 0x11a   : > { %v2794_v56 = vadd.f32 %v12567_v62, %v2793_v36  ;;  %v1957_v55 = vshll.u32 %v12667_v37, 16 }
 0x11b   : > { %v2795_v63 = vpop.f32.mrf.mxu0  ;;  %v2972_v23 = vpop.f32.mrf.mxu1  ;;  %v1950_v24 = vshrl.u32 %v12661_v30, 16  ;;  %v1421_v45 = vor.u32 %v1420_v20, %v1416_v7  ;;  %v11421_v7 = vld [vmem:[%s11598_s11 + $0xac] sm:$0xf] }
 0x11c   : > { %v12629_v32 = vadd.f32 %v2970_v22, %v2794_v56  ;;  %v1413_v56 = vrot.slane %v1411_v16, 1  ;;  %v9405_v63 = vld [vmem:[%s11598_s11 + $0x9c] sm:$0xe] }
 0x11d   : > { %v2798_v51 = vpop.f32.mrf.mxu0  ;;  %3199 = vmatmul.mubr.bf16.gmra.mxu0 %v1390_v61  ;;  %v2975_v5 = vpop.f32.mrf.mxu1  ;;  %3376 = vmatmul.mubr.bf16.gmra.mxu1 %v12521_v35  ;;  %v1604_v61 = vrot.slane %v9584_v59, 1  ;;  %v1430_v59 = vshll.u32 %v12118_v39, 16 }
 0x11e   : > { %v2799_v13 = vadd.f32 %v12567_v62, %v2798_v51  ;;  %3206 = vmatprep.mubr.bf16.mxu0 %v1600_v49  ;;  %3383 = vmatprep.mubr.bf16.mxu1 %v1924_v41  ;;  %v1943_v41 = vor.u32 %v1942_v25, %v1938_v19  ;;  %v1947_v51 = vrot.slane %v1945_v4, 1  ;;  %v1414_v27 = vsel %vm759_vm0, %v1409_v48, %v1413_v56  ;;  %v12695_v25 = vld [vmem:[%s11598_s11 + $0xbc] ss:$0 sps:$4 sm:$0x11]  }
 0x11f   : > { %v2800_v11 = vpop.f32.mrf.mxu0  ;;  %v2977_v8 = vpop.f32.mrf.mxu1  ;;  %v1425_v19 = vrot.slane %v1423_v18, 1  ;;  %v1959_v48 = vrot.slane %v1957_v55, 1  ;;  %v1428_v56 = vshrl.u32 %v12118_v39, 16  ;;  %v1969_v39 = vshll.u32 %v12695_v25, 16 }
 0x120   : > { %v12641_v17 = vadd.f32 %v2975_v5, %v2799_v13  ;;  %v9437_v5 = vld [vmem:[%s11598_s11 + $0xb4] sm:$0xf]  ;;  %v11420_v8 = vld [vmem:[%s11598_s11 + $0xa0] sm:$0xf] }
 0x121   : > { %v2801_v35 = vpop.f32.mrf.mxu0  ;;  %v2978_v12 = vpop.f32.mrf.mxu1  ;;  %v9585_v42 = vcombine.low %v9405_v63, %v11420_v8  ;;  %v12689_v16 = vcombine.low %v9437_v5, %v12676_v3  ;;  %v1432_v63 = vrot.slane %v1430_v59, 1 }
 0x122   : > { %v2802_v2 = vadd.f32 %v12567_v62, %v2801_v35  ;;  %v1606_v35 = vsel %vm1048_vm1, %v1604_v61, %v1605_v46  ;;  %v9439_v61 = vld [vmem:[%s11598_s11 + $0xc0] sm:$0xf]  ;;  %v12704_v46 = vld [vmem:[%s11598_s11 + $0xc4] sm:$0xf] }
 0x123   : > { %v2803_v58 = vpop.f32.mrf.mxu0  ;;  %v2980_v53 = vpop.f32.mrf.mxu1 }
 0x124   : > { %v12657_v33 = vadd.f32 %v2978_v12, %v2802_v2  ;;  %v1948_v12 = vsel %vm759_vm0, %v1943_v41, %v1947_v51  ;;  %v1607_v53 = vrot.slane %v9585_v42, 1  ;;  %v1426_v51 = vsel %vm759_vm0, %v1421_v45, %v1425_v19 }
 0x125   : > { %v2806_v43 = vpop.f32.mrf.mxu0  ;;  %3207 = vmatmul.mubr.bf16.gmra.mxu0 %v1402_v44  ;;  %v2983_v34 = vpop.f32.mrf.mxu1  ;;  %3384 = vmatmul.mubr.bf16.gmra.mxu1 %v12551_v57  ;;  %v1952_v57 = vshll.u32 %v12661_v30, 16 }
 0x126   : > { %v2807_v36 = vadd.f32 %v12567_v62, %v2806_v43  ;;  %3214 = vmatprep.mubr.bf16.mxu0 %v1603_v10  ;;  %3391 = vmatprep.mubr.bf16.mxu1 %v1936_v40  ;;  %v1608_v40 = vrot.slane %v11125_v54, 1  ;;  %v9406_v43 = vld [vmem:[%s11598_s11 + $0xa8] sm:$0xe] }
 0x127   : > { %v2808_v22 = vpop.f32.mrf.mxu0  ;;  %v2985_v23 = vpop.f32.mrf.mxu1  ;;  %v1954_v44 = vrot.slane %v1952_v57, 1  ;;  %v1435_v57 = vshll.u32 %v11125_v54, 16  ;;  %v1442_v54 = vshll.u32 %v12133_v60, 16 }
 0x128   : > { %v12670_v49 = vadd.f32 %v2983_v34, %v2807_v36  ;;  %v1609_v20 = vsel %vm1048_vm1, %v1607_v53, %v1608_v40  ;;  %v1971_v53 = vrot.slane %v1969_v39, 1  ;;  %v1440_v40 = vshrl.u32 %v12133_v60, 16 }
 0x129   : > { %v2809_v13 = vpop.f32.mrf.mxu0  ;;  %v2986_v11 = vpop.f32.mrf.mxu1  ;;  %v1955_v34 = vor.u32 %v1954_v44, %v1950_v24 }
 0x12a   : > { %v2810_v9 = vadd.f32 %v12567_v62, %v2809_v13  ;;  %v9586_v13 = vcombine.low %v9406_v43, %v11421_v7 }
 0x12b   : > { %v2811_v26 = vpop.f32.mrf.mxu0  ;;  %v2988_v2 = vpop.f32.mrf.mxu1  ;;  %v1960_v8 = vsel %vm759_vm0, %v1955_v34, %v1959_v48  ;;  %v12732_v34 = vld [vmem:[%s11598_s11 + $0xd0] sm:$0xf]  ;;  %v1444_v48 = vrot.slane %v1442_v54, 1 }
 0x12c   : > { %v12685_v1 = vadd.f32 %v2986_v11, %v2810_v9  ;;  %v11128_v9 = vld [vmem:[%s11598_s11 + $0xb0] ss:$0 sps:$4 sm:$0x11]   ;;  %v1962_v11 = vshrl.u32 %v12689_v16, 16  ;;  %v12717_v26 = vcombine.low %v9439_v61, %v12704_v46  ;;  %v1433_v2 = vor.u32 %v1432_v63, %v1428_v56  ;;  %v11422_v63 = vld [vmem:[%s11598_s11 + $0xb8] sm:$0xf] }
 0x12d   : > { %v2814_v15 = vpop.f32.mrf.mxu0  ;;  %3215 = vmatmul.mubr.bf16.gmra.mxu0 %v1414_v27  ;;  %v2991_v10 = vpop.f32.mrf.mxu1  ;;  %3392 = vmatmul.mubr.bf16.gmra.mxu1 %v12584_v0  ;;  %v1964_v0 = vshll.u32 %v12689_v16, 16  ;;  %v1611_v59 = vrot.slane %v11128_v9, 1  ;;  %v1447_v61 = vshll.u32 %v11128_v9, 16 }
 0x12e   : > { %v2815_v58 = vadd.f32 %v12567_v62, %v2814_v15  ;;  %3222 = vmatprep.mubr.bf16.mxu0 %v1606_v35  ;;  %3399 = vmatprep.mubr.bf16.mxu1 %v1948_v12  ;;  %v1437_v12 = vrot.slane %v1435_v57, 1  ;;  %v1610_v15 = vrot.slane %v9586_v13, 1  ;;  %v11132_v57 = vld [vmem:[%s11598_s11 + $0xbc] ss:$0 sps:$4 sm:$0x11]   ;;  %v1974_v7 = vshrl.u32 %v12717_v26, 16 }
 0x12f   : > { %v2816_v4 = vpop.f32.mrf.mxu0  ;;  %v2993_v36 = vpop.f32.mrf.mxu1  ;;  %v1966_v42 = vrot.slane %v1964_v0, 1  ;;  %v1449_v54 = vrot.slane %v1447_v61, 1  ;;  %v11423_v61 = vld [vmem:[%s11598_s11 + $0xc4] sm:$0xf] }
 0x130   : > { %v12698_v47 = vadd.f32 %v2991_v10, %v2815_v58  ;;  %v12723_v58 = vld [vmem:[%s11598_s11 + $0xc8] ss:$0 sps:$4 sm:$0x11]   ;;  %v9407_v10 = vld [vmem:[%s11598_s11 + $0xb4] sm:$0xe] }
 0x131   : > { %v2817_v22 = vpop.f32.mrf.mxu0  ;;  %v2994_v41 = vpop.f32.mrf.mxu1  ;;  %v1967_v4 = vor.u32 %v1966_v42, %v1962_v11  ;;  %v9441_v36 = vld [vmem:[%s11598_s11 + $0xcc] sm:$0xf]  ;;  %v1981_v60 = vshll.u32 %v12723_v58, 16 }
 0x132   : > { %v2818_v23 = vadd.f32 %v12567_v62, %v2817_v22  ;;  %v1438_v22 = vsel %vm759_vm0, %v1433_v2, %v1437_v12  ;;  %v12745_v9 = vcombine.low %v9441_v36, %v12732_v34  ;;  %v1614_v2 = vrot.slane %v11132_v57, 1  ;;  %v12751_v12 = vld [vmem:[%s11598_s11 + $0xd4] ss:$0 sps:$4 sm:$0x11]  }
 0x133   : > { %v2819_v5 = vpop.f32.mrf.mxu0  ;;  %v2996_v18 = vpop.f32.mrf.mxu1 }
 0x134   : > { %v12713_v27 = vadd.f32 %v2994_v41, %v2818_v23  ;;  %v9587_v23 = vcombine.low %v9407_v10, %v11422_v63  ;;  %v1454_v18 = vshll.u32 %v12159_v31, 16 }
 0x135   : > { %v2822_v35 = vpop.f32.mrf.mxu0  ;;  %3223 = vmatmul.mubr.bf16.gmra.mxu0 %v1426_v51  ;;  %v2999_v55 = vpop.f32.mrf.mxu1  ;;  %3400 = vmatmul.mubr.bf16.gmra.mxu1 %v12627_v21  ;;  %v1976_v21 = vshll.u32 %v12717_v26, 16  ;;  %v1612_v51 = vsel %vm1048_vm1, %v1610_v15, %v1611_v59 }
 0x136   : > { %v2823_v24 = vadd.f32 %v12567_v62, %v2822_v35  ;;  %3230 = vmatprep.mubr.bf16.mxu0 %v1609_v20  ;;  %3407 = vmatprep.mubr.bf16.mxu1 %v1960_v8  ;;  %v1972_v20 = vsel %vm759_vm0, %v1967_v4, %v1971_v53  ;;  %v1445_v35 = vor.u32 %v1444_v48, %v1440_v40  ;;  %v1452_v4 = vshrl.u32 %v12159_v31, 16  ;;  %v12760_v40 = vld [vmem:[%s11598_s11 + $0xdc] sm:$0xf] }
 0x137   : > { %v2824_v44 = vpop.f32.mrf.mxu0  ;;  %v3001_v19 = vpop.f32.mrf.mxu1  ;;  %v1978_v11 = vrot.slane %v1976_v21, 1  ;;  %v9443_v21 = vld [vmem:[%s11598_s11 + $0xd8] sm:$0xf] }
 0x138   : > { %v12726_v45 = vadd.f32 %v2999_v55, %v2823_v24  ;;  %v1613_v55 = vrot.slane %v9587_v23, 1  ;;  %v9408_v44 = vld [vmem:[%s11598_s11 + $0xc0] sm:$0xe]  ;;  %v1983_v19 = vrot.slane %v1981_v60, 1 }
 0x139   : > { %v2825_v43 = vpop.f32.mrf.mxu0  ;;  %v3002_v56 = vpop.f32.mrf.mxu1  ;;  %v1979_v10 = vor.u32 %v1978_v11, %v1974_v7  ;;  %v9588_v63 = vcombine.low %v9408_v44, %v11423_v61  ;;  %v1993_v7 = vshll.u32 %v12751_v12, 16  ;;  %v12776_v11 = vcombine.low %v9443_v21, %v12760_v40 }
 0x13a   : > { %v2826_v0 = vadd.f32 %v12567_v62, %v2825_v43  ;;  %v1456_v43 = vrot.slane %v1454_v18, 1  ;;  %v1615_v31 = vsel %vm1048_vm1, %v1613_v55, %v1614_v2  ;;  %v1464_v21 = vshrl.u32 %v12183_v52, 16 }
 0x13b   : > { %v2827_v41 = vpop.f32.mrf.mxu0  ;;  %v3004_v5 = vpop.f32.mrf.mxu1  ;;  %v1616_v2 = vrot.slane %v9588_v63, 1 }
 0x13c   : > { %v12741_v13 = vadd.f32 %v3002_v56, %v2826_v0  ;;  %v1450_v0 = vsel %vm759_vm0, %v1445_v35, %v1449_v54  ;;  %v1459_v56 = vshll.u32 %v11132_v57, 16  ;;  %v11135_v41 = vld [vmem:[%s11598_s11 + $0xc8] ss:$0 sps:$4 sm:$0x11]   ;;  %v1457_v54 = vor.u32 %v1456_v43, %v1452_v4 }
 0x13d   : > { %v2830_v39 = vpop.f32.mrf.mxu0  ;;  %3231 = vmatmul.mubr.bf16.gmra.mxu0 %v1438_v22  ;;  %v3007_v42 = vpop.f32.mrf.mxu1  ;;  %3408 = vmatmul.mubr.bf16.gmra.mxu1 %v12661_v30  ;;  %v1988_v30 = vshll.u32 %v12745_v9, 16  ;;  %v11163_v22 = vld [vmem:[%s15149_s2 + $0x78] sm:$0xff]   ;;  %v1617_v44 = vrot.slane %v11135_v41, 1  ;;  %v2000_v4 = vshll.u32 %v12776_v11, 16  ;;  %v1471_v63 = vshll.u32 %v11135_v41, 16 }
 0x13e   : > { %v2831_v8 = vadd.f32 %v12567_v62, %v2830_v39  ;;  %3238 = vmatprep.mubr.bf16.mxu0 %v1612_v51  ;;  %3415 = vmatprep.mubr.bf16.mxu1 %v1972_v20  ;;  %v1986_v51 = vshrl.u32 %v12745_v9, 16  ;;  %v1984_v20 = vsel %vm759_vm0, %v1979_v10, %v1983_v19  ;;  %v11164_v39 = vld [vmem:[%s15149_s2 + $0x38] sm:$0xff]   ;;  %v9409_v10 = vld [vmem:[%s11598_s11 + $0xcc] sm:$0xe] }
 0x13f   : > { %v2832_v24 = vpop.f32.mrf.mxu0  ;;  %v3009_v59 = vpop.f32.mrf.mxu1  ;;  %v1990_v57 = vrot.slane %v1988_v30, 1  ;;  %10331 = vmatprep.subr.bf16.mxu1 %v11163_v22 }
 0x140   : > { %v12754_v15 = vadd.f32 %v3007_v42, %v2831_v8  ;;  %v1466_v8 = vshll.u32 %v12183_v52, 16  ;;  %v1461_v24 = vrot.slane %v1459_v56, 1  ;;  %v12785_v59 = vld [vmem:[%s11598_s11 + $0xe0] ss:$0 sps:$4 sm:$0x11]   ;;  %10332 = vmatpush3.bf16.msra.mxu1 %v11164_v39 }
 0x141   : > { %v2833_v53 = vpop.f32.mrf.mxu0  ;;  %v3010_v48 = vpop.f32.mrf.mxu1  ;;  %v2005_v52 = vshll.u32 %v12785_v59, 16 }
 0x142   : > { %v2834_v36 = vadd.f32 %v12567_v62, %v2833_v53  ;;  %v1991_v53 = vor.u32 %v1990_v57, %v1986_v51  ;;  %v1462_v61 = vsel %vm759_vm0, %v1457_v54, %v1461_v24 }
 0x143   : > { %v2835_v23 = vpop.f32.mrf.mxu0  ;;  %v3012_v5 = vpop.f32.mrf.mxu1 }
 0x144   : > { %v12772_v60 = vadd.f32 %v3010_v48, %v2834_v36  ;;  %v9445_v36 = vld [vmem:[%s11598_s11 + $0xe4] sm:$0xf]  ;;  %v12794_v48 = vld [vmem:[%s11598_s11 + $0xe8] sm:$0xf]  ;;  %v11424_v23 = vld [vmem:[%s11598_s11 + $0xd0] sm:$0xf] }
 0x145   : > { %v2838_v18 = vpop.f32.mrf.mxu0  ;;  %3239 = vmatmul.mubr.bf16.gmra.mxu0 %v1450_v0  ;;  %v3015_v35 = vpop.f32.mrf.mxu1  ;;  %3416 = vmatmul.mubr.bf16.gmra.mxu1 %v12689_v16  ;;  %v1995_v16 = vrot.slane %v1993_v7, 1  ;;  %v1468_v0 = vrot.slane %v1466_v8, 1  ;;  %v1618_v7 = vsel %vm1048_vm1, %v1616_v2, %v1617_v44  ;;  %v11139_v5 = vld [vmem:[%s11598_s11 + $0xd4] ss:$0 sps:$4 sm:$0x11]   ;;  %v2002_v8 = vrot.slane %v2000_v4, 1 }
 0x146   : > { %v2839_v42 = vadd.f32 %v12567_v62, %v2838_v18  ;;  %3246 = vmatprep.mubr.bf16.mxu0 %v1615_v31  ;;  %3423 = vmatprep.mubr.bf16.mxu1 %v1984_v20  ;;  %v9589_v31 = vcombine.low %v9409_v10, %v11424_v23  ;;  %v1998_v20 = vshrl.u32 %v12776_v11, 16  ;;  %v1473_v44 = vrot.slane %v1471_v63, 1  ;;  %v9410_v10 = vld [vmem:[%s11598_s11 + $0xd8] sm:$0xe] }
 0x147   : > { %v2840_v55 = vpop.f32.mrf.mxu0  ;;  %v3017_v30 = vpop.f32.mrf.mxu1  ;;  %v1996_v18 = vsel %vm759_vm0, %v1991_v53, %v1995_v16  ;;  %v1469_v2 = vor.u32 %v1468_v0, %v1464_v21  ;;  %v1620_v16 = vrot.slane %v11139_v5, 1 }
 0x148   : > { %v12788_v19 = vadd.f32 %v3015_v35, %v2839_v42  ;;  %v12807_v42 = vcombine.low %v9445_v36, %v12794_v48  ;;  %v15184_v35 = vld [vmem:[#allocation3_spill] sm:$0xff]  ;;  %v1619_v53 = vrot.slane %v9589_v31, 1  ;;  %v2003_v36 = vor.u32 %v2002_v8, %v1998_v20 }
 0x149   : > { %v2841_v43 = vpop.f32.mrf.mxu0  ;;  %v3018_v22 = vpop.f32.mrf.mxu1  ;;  %v1478_v54 = vshll.u32 %v15184_v35, 16  ;;  %v1474_v31 = vsel %vm759_vm0, %v1469_v2, %v1473_v44  ;;  %v15185_v44 = vld [vmem:[#allocation4_spill] sm:$0xff] }
 0x14a   : > { %v2842_v56 = vadd.f32 %v12567_v62, %v2841_v43  ;;  %v1621_v20 = vsel %vm1048_vm1, %v1619_v53, %v1620_v16  ;;  %v2010_v8 = vshrl.u32 %v12807_v42, 16 }
 0x14b   : > { %v2843_v51 = vpop.f32.mrf.mxu0  ;;  %v3020_v39 = vpop.f32.mrf.mxu1  ;;  %v1480_v0 = vrot.slane %v1478_v54, 1 }
 0x14c   : > { %v12803_v57 = vadd.f32 %v3018_v22, %v2842_v56  ;;  %v2007_v56 = vrot.slane %v2005_v52, 1  ;;  %v12816_v22 = vld [vmem:[%s11598_s11 + $0xec] ss:$0 sps:$4 sm:$0x11]   ;;  %v1483_v51 = vshll.u32 %v11139_v5, 16  ;;  %v11165_v5 = vld [vmem:[%s15149_s2 + $0x70] sm:$0xff]  }
 0x14d   : > { %v2846_v41 = vpop.f32.mrf.mxu0  ;;  %3247 = vmatmul.mubr.bf16.gmra.mxu0 %v1462_v61  ;;  %v3023_v55 = vpop.f32.mrf.mxu1  ;;  %3424 = vmatmul.mubr.bf16.gmra.mxu1 %v12717_v26  ;;  %v2012_v61 = vshll.u32 %v12807_v42, 16  ;;  %v1476_v26 = vshrl.u32 %v15184_v35, 16  ;;  %v11142_v52 = vld [vmem:[%s11598_s11 + $0xe0] ss:$0 sps:$4 sm:$0x11]  }
 0x14e   : > { %v2847_v24 = vadd.f32 %v12567_v62, %v2846_v41  ;;  %3254 = vmatprep.mubr.bf16.mxu0 %v1618_v7  ;;  %3431 = vmatprep.mubr.bf16.mxu1 %v1996_v18  ;;  %v11425_v7 = vld [vmem:[%s11598_s11 + $0xdc] sm:$0xf]  ;;  %v2008_v35 = vsel %vm759_vm0, %v2003_v36, %v2007_v56  ;;  %v11166_v36 = vld [vmem:[%s15149_s2 + $0x30] sm:$0xff]  }
 0x14f   : > { %v2848_v30 = vpop.f32.mrf.mxu0  ;;  %v3025_v43 = vpop.f32.mrf.mxu1  ;;  %v9590_v39 = vcombine.low %v9410_v10, %v11425_v7  ;;  %v2014_v54 = vrot.slane %v2012_v61, 1  ;;  %v1490_v10 = vshll.u32 %v15185_v44, 16  ;;  %v1481_v16 = vor.u32 %v1480_v0, %v1476_v26  ;;  %10333 = vmatprep.subr.bf16.mxu1 %v11165_v5 }
 0x150   : > { %v12813_v4 = vadd.f32 %v3023_v55, %v2847_v24  ;;  %v2017_v55 = vshll.u32 %v12816_v22, 16  ;;  %v1485_v43 = vrot.slane %v1483_v51, 1  ;;  %10334 = vmatpush3.bf16.msra.mxu1 %v11166_v36 }
 0x151   : > { %v2849_v21 = vpop.f32.mrf.mxu0  ;;  %v3026_v23 = vpop.f32.mrf.mxu1  ;;  %v1622_v61 = vrot.slane %v9590_v39, 1  ;;  %v1492_v0 = vrot.slane %v1490_v10, 1  ;;  %v1495_v39 = vshll.u32 %v11142_v52, 16 }
 0x152   : > { %v2850_v63 = vadd.f32 %v12567_v62, %v2849_v21  ;;  %v1623_v21 = vrot.slane %v11142_v52, 1  ;;  %v2019_v7 = vrot.slane %v2017_v55, 1 }
 0x153   : > { %v2851_v18 = vpop.f32.mrf.mxu0  ;;  %v3028_v24 = vpop.f32.mrf.mxu1 }
 0x154   : > { %v12826_v41 = vadd.f32 %v3026_v23, %v2850_v63  ;;  %v9465_v18 = vld [vmem:[%s11598_s11 + $0x18] sm:$0xe]  ;;  %v1486_v24 = vsel %vm759_vm0, %v1481_v16, %v1485_v43  ;;  %v1624_v5 = vsel %vm1048_vm1, %v1622_v61, %v1623_v21  ;;  %v1497_v16 = vrot.slane %v1495_v39, 1  ;;  %v9466_v21 = vld [vmem:[%s11598_s11 + $0x24] sm:$0xe] }
 0x155   : > { %v2854_v2 = vpop.f32.mrf.mxu0  ;;  %3255 = vmatmul.mubr.bf16.gmra.mxu0 %v1474_v31  ;;  %v3031_v53 = vpop.f32.mrf.mxu1  ;;  %3432 = vmatmul.mubr.bf16.gmra.mxu1 %v12745_v9  ;;  %v2015_v31 = vor.u32 %v2014_v54, %v2010_v8  ;;  %v1488_v9 = vshrl.u32 %v15185_v44, 16  ;;  %v11429_v39 = vld [vmem:[%s11598_s11 + $0x34] sm:$0xf] }
 0x156   : > { %v2855_v30 = vadd.f32 %v12567_v62, %v2854_v2  ;;  %3262 = vmatprep.mubr.bf16.mxu0 %v1621_v20  ;;  %3439 = vmatprep.mubr.bf16.mxu1 %v2008_v35  ;;  %v11426_v2 = vld [vmem:[%s11598_s11 + $0x1c] sm:$0xf] }
 0x157   : > { %v2856_v56 = vpop.f32.mrf.mxu0  ;;  %v3033_v23 = vpop.f32.mrf.mxu1  ;;  %v2020_v55 = vsel %vm759_vm0, %v2015_v31, %v2019_v7  ;;  %v1493_v52 = vor.u32 %v1492_v0, %v1488_v9  ;;  %v9467_v7 = vld [vmem:[%s11598_s11 + $0x30] sm:$0xe]  ;;  %v11428_v9 = vld [vmem:[%s11598_s11 + $0x28] sm:$0xf] }
 0x158   : > { %v12839_v63 = vadd.f32 %v3031_v53, %v2855_v30  ;;  %v9627_v30 = vcombine.low %v9465_v18, %v11426_v2  ;;  %v11427_v56 = vld [vmem:[%s11598_s11 + $0x20] ss:$0 sps:$4 sm:$0x11]   ;;  %v9628_v0 = vcombine.low %v9466_v21, %v11428_v9 }
 0x159   : > { %v2857_v26 = vpop.f32.mrf.mxu0  ;;  %v3034_v20 = vpop.f32.mrf.mxu1  ;;  %v2094_v61 = vrot.slane %v11427_v56, 1  ;;  %v11432_v9 = vld [vmem:[%s11598_s11 + $0x40] sm:$0xf] }
 0x15a   : > { %v2858_v51 = vadd.f32 %v12567_v62, %v2857_v26  ;;  %v2093_v36 = vrot.slane %v9627_v30, 1 }
 0x15b   : > { %v2859_v35 = vpop.f32.mrf.mxu0  ;;  %v3036_v54 = vpop.f32.mrf.mxu1 }
 0x15c   : > { %v12847_v8 = vadd.f32 %v3034_v20, %v2858_v51  ;;  %v1498_v51 = vsel %vm759_vm0, %v1493_v52, %v1497_v16  ;;  %v9629_v35 = vcombine.low %v9467_v7, %v11429_v39  ;;  %v11430_v54 = vld [vmem:[%s11598_s11 + $0x2c] ss:$0 sps:$4 sm:$0x11]   ;;  %v9469_v7 = vld [vmem:[%s11598_s11 + $0x48] sm:$0xe] }
 0x15d   : > { %v2862_v44 = vpop.f32.mrf.mxu0  ;;  %3263 = vmatmul.mubr.bf16.gmra.mxu0 %v1486_v24  ;;  %v3039_v53 = vpop.f32.mrf.mxu1  ;;  %3440 = vmatmul.mubr.bf16.gmra.mxu1 %v12776_v11  ;;  %v2095_v24 = vsel %vm1048_vm1, %v2093_v36, %v2094_v61  ;;  %v11167_v52 = vld [vmem:[%s15149_s2 + $0x68] sm:$0xff]   ;;  %v11431_v36 = vld [vmem:[%s11598_s11 + $0x38] ss:$0 sps:$4 sm:$0x11]   ;;  %v9468_v61 = vld [vmem:[%s11598_s11 + $0x3c] sm:$0xe] }
 0x15e   : > { %v2863_v10 = vadd.f32 %v12567_v62, %v2862_v44  ;;  %3270 = vmatprep.mubr.bf16.mxu0 %v1624_v5  ;;  %3447 = vmatprep.mubr.bf16.mxu1 %v2020_v55  ;;  %v2097_v55 = vrot.slane %v11430_v54, 1  ;;  %v2100_v56 = vrot.slane %v11431_v36, 1  ;;  %v11433_v39 = vld [vmem:[%s11598_s11 + $0x4c] sm:$0xf] }
 0x15f   : > { %v2864_v43 = vpop.f32.mrf.mxu0  ;;  %v3041_v31 = vpop.f32.mrf.mxu1  ;;  %10335 = vmatprep.subr.bf16.mxu1 %v11167_v52 }
 0x160   : > { %v12854_v23 = vadd.f32 %v3039_v53, %v2863_v10  ;;  %v2096_v53 = vrot.slane %v9628_v0, 1  ;;  %v2099_v43 = vrot.slane %v9629_v35, 1  ;;  %v9630_v0 = vcombine.low %v9468_v61, %v11432_v9  ;;  %v9470_v61 = vld [vmem:[%s11598_s11 + $0x54] sm:$0xe]  ;;  %v11437_v9 = vld [vmem:[%s11598_s11 + $0x58] sm:$0xf] }
 0x161   : > { %v2865_v18 = vpop.f32.mrf.mxu0  ;;  %v3042_v11 = vpop.f32.mrf.mxu1  ;;  %v9631_v35 = vcombine.low %v9469_v7, %v11433_v39  ;;  %v11438_v39 = vld [vmem:[%s11598_s11 + $0x64] sm:$0xf] }
 0x162   : > { %v2866_v26 = vadd.f32 %v12567_v62, %v2865_v18 }
 0x163   : > { %v2867_v20 = vpop.f32.mrf.mxu0  ;;  %v3044_v2 = vpop.f32.mrf.mxu1  ;;  %v2105_v36 = vrot.slane %v9631_v35, 1 }
 0x164   : > { %v12862_v5 = vadd.f32 %v3042_v11, %v2866_v26 }
 0x165   : > { %v2870_v30 = vpop.f32.mrf.mxu0  ;;  %3271 = vmatmul.mubr.bf16.gmra.mxu0 %v1498_v51  ;;  %v3047_v10 = vpop.f32.mrf.mxu1  ;;  %3448 = vmatmul.mubr.bf16.gmra.mxu1 %v12807_v42  ;;  %v11168_v42 = vld [vmem:[%s15149_s2 + $0x28] sm:$0xff]   ;;  %v2098_v51 = vsel %vm1048_vm1, %v2096_v53, %v2097_v55  ;;  %v11434_v53 = vld [vmem:[%s11598_s11 + $0x44] ss:$0 sps:$4 sm:$0x11]  }
 0x166   : > { %v2871_v44 = vadd.f32 %v12567_v62, %v2870_v30  ;;  %10819 = vmatprep.mubr.bf16.mxu0 %v2095_v24  ;;  %10336 = vmatpush3.bf16.msra.mxu1 %v11168_v42  ;;  %v2101_v24 = vsel %vm1048_vm1, %v2099_v43, %v2100_v56  ;;  %v2103_v52 = vrot.slane %v11434_v53, 1  ;;  %v11435_v43 = vld [vmem:[%s11598_s11 + $0x50] ss:$0 sps:$4 sm:$0x11]   ;;  %v9471_v42 = vld [vmem:[%s11598_s11 + $0x60] sm:$0xe] }
 0x167   : > { %v2872_v16 = vpop.f32.mrf.mxu0  ;;  %v3049_v31 = vpop.f32.mrf.mxu1  ;;  %v2106_v56 = vrot.slane %v11435_v43, 1  ;;  %v9633_v35 = vcombine.low %v9471_v42, %v11438_v39 }
 0x168   : > { %v12872_v21 = vadd.f32 %v3047_v10, %v2871_v44  ;;  %v2102_v10 = vrot.slane %v9630_v0, 1  ;;  %v9632_v0 = vcombine.low %v9470_v61, %v11437_v9 }
 0x169   : > { %v2873_v18 = vpop.f32.mrf.mxu0  ;;  %v3050_v11 = vpop.f32.mrf.mxu1  ;;  %v2111_v61 = vrot.slane %v9633_v35, 1  ;;  %v11170_v35 = vld [vmem:[%s15149_s2 + $0x20] sm:$0xff]  }
 0x16a   : > { %v2874_v26 = vadd.f32 %v12567_v62, %v2873_v18 }
 0x16b   : > { %v2875_v20 = vpop.f32.mrf.mxu0  ;;  %v3052_v30 = vpop.f32.mrf.mxu1 }
 0x16c   : > { %v12883_v2 = vadd.f32 %v3050_v11, %v2874_v26 }
 0x16d   : > { %v2878_v54 = vpop.f32.mrf.mxu0  ;;  %10820 = vmatmul.mubr.bf16.vlgmr.msra.gmra.mxu0 %v2098_v51  ;;  %v3055_v55 = vpop.f32.mrf.mxu1  ;;  %v2104_v51 = vsel %vm1048_vm1, %v2102_v10, %v2103_v52  ;;  %v2108_v10 = vrot.slane %v9632_v0, 1  ;;  %v11439_v52 = vld [vmem:[%s11598_s11 + $0x5c] ss:$0 sps:$4 sm:$0x11]  }
 0x16e   : > { %v2879_v44 = vadd.f32 %v12567_v62, %v2878_v54  ;;  %10823 = vmatprep.mubr.bf16.mxu0 %v2101_v24  ;;  %v12895_v62 = vld [vmem:[%s15150_s3] ss:$0 sm:$0xff]  ;;  %v2107_v24 = vsel %vm1048_vm1, %v2105_v36, %v2106_v56  ;;  %v11440_v36 = vld [vmem:[%s11598_s11 + $0x68] ss:$0 sps:$4 sm:$0x11]  }
 0x16f   : > { %v2880_v16 = vpop.f32.mrf.mxu0  ;;  %v3057_v7 = vpop.f32.mrf.mxu1  ;;  %v2112_v56 = vrot.slane %v11440_v36, 1 }
 0x170   : > { %v12889_v31 = vadd.f32 %v3055_v55, %v2879_v44  ;;  %v2109_v16 = vrot.slane %v11439_v52, 1  ;;  %v9472_v7 = vld [vmem:[%s11598_s11 + $0x6c] sm:$0xe] }
 0x171   : > { %v2881_v18 = vpop.f32.mrf.mxu0  ;;  %v3058_v11 = vpop.f32.mrf.mxu1 }
 0x172   : > { %v2882_v26 = vadd.f32 %v12895_v62, %v2881_v18 }
 0x173   : > { %v2883_v20 = vpop.f32.mrf.mxu0  ;;  %v3060_v54 = vpop.f32.mrf.mxu1 }
 0x174   : > { %v12902_v30 = vadd.f32 %v3058_v11, %v2882_v26  ;;  %v9473_v26 = vld [vmem:[%s11598_s11 + $0x78] sm:$0xe]  ;;  %v11169_v11 = vld [vmem:[%s15149_s2 + $0x60] sm:$0xff]   ;;  %v2110_v20 = vsel %vm1048_vm1, %v2108_v10, %v2109_v16 }
 0x175   : > { %v2886_v44 = vpop.f32.mrf.mxu0  ;;  %10824 = vmatmul.mubr.bf16.gmra.mxu0 %v2104_v51  ;;  %v3063_v53 = vpop.f32.mrf.mxu1  ;;  %10337 = vmatprep.subr.bf16.mxu1 %v11169_v11 }
 0x176   : > { %v2887_v55 = vadd.f32 %v12895_v62, %v2886_v44  ;;  %10827 = vmatprep.mubr.bf16.mxu0 %v2107_v24  ;;  %v11441_v24 = vld [vmem:[%s11598_s11 + $0x70] sm:$0xf]  ;;  %v2113_v44 = vsel %vm1048_vm1, %v2111_v61, %v2112_v56  ;;  %10338 = vmatpush3.bf16.msra.mxu1 %v11170_v35 }
 0x177   : > { %v2888_v43 = vpop.f32.mrf.mxu0  ;;  %v3065_v18 = vpop.f32.mrf.mxu1  ;;  %v9634_v39 = vcombine.low %v9472_v7, %v11441_v24  ;;  %v9475_v35 = vld [vmem:[%s11598_s11 + $0x90] sm:$0xe] }
 0x178   : > { %v12908_v42 = vadd.f32 %v3063_v53, %v2887_v55  ;;  %v11442_v55 = vld [vmem:[%s11598_s11 + $0x7c] sm:$0xf]  ;;  %v11443_v18 = vld [vmem:[%s11598_s11 + $0x74] ss:$0 sps:$4 sm:$0x11]  }
 0x179   : > { %v2889_v51 = vpop.f32.mrf.mxu0  ;;  %v3066_v0 = vpop.f32.mrf.mxu1  ;;  %v9635_v53 = vcombine.low %v9473_v26, %v11442_v55  ;;  %v2114_v7 = vrot.slane %v9634_v39, 1  ;;  %v2115_v11 = vrot.slane %v11443_v18, 1  ;;  %v11444_v26 = vld [vmem:[%s11598_s11 + $0x80] ss:$0 sps:$4 sm:$0x11]  }
 0x17a   : > { %v2890_v9 = vadd.f32 %v12895_v62, %v2889_v51  ;;  %v2118_v51 = vrot.slane %v11444_v26, 1  ;;  %v11445_v39 = vld [vmem:[%s11598_s11 + $0x88] sm:$0xf]  ;;  %v11446_v18 = vld [vmem:[%s11598_s11 + $0x94] sm:$0xf] }
 0x17b   : > { %v2891_v54 = vpop.f32.mrf.mxu0  ;;  %v3068_v43 = vpop.f32.mrf.mxu1  ;;  %v2117_v56 = vrot.slane %v9635_v53, 1 }
 0x17c   : > { %v12922_v52 = vadd.f32 %v3066_v0, %v2890_v9  ;;  %v9474_v9 = vld [vmem:[%s11598_s11 + $0x84] sm:$0xe] }
 0x17d   : > { %v2894_v10 = vpop.f32.mrf.mxu0  ;;  %10828 = vmatmul.mubr.bf16.gmra.mxu0 %v2110_v20  ;;  %v3071_v36 = vpop.f32.mrf.mxu1  ;;  %v9636_v43 = vcombine.low %v9474_v9, %v11445_v39  ;;  %v2119_v53 = vsel %vm1048_vm1, %v2117_v56, %v2118_v51  ;;  %v9476_v51 = vld [vmem:[%s11598_s11 + $0x9c] sm:$0xe] }
 0x17e   : > { %15186 = vst [vmem:[#allocation3_spill] sm:$0xff] %v12922_v52  ;;  %v2895_v16 = vadd.f32 %v12895_v62, %v2894_v10  ;;  %10831 = vmatprep.mubr.bf16.mxu0 %v2113_v44  ;;  %v2116_v44 = vsel %vm1048_vm1, %v2114_v7, %v2115_v11  ;;  %v11447_v11 = vld [vmem:[%s11598_s11 + $0x8c] ss:$0 sps:$4 sm:$0x11]  }
 0x17f   : > { %v2896_v61 = vpop.f32.mrf.mxu0  ;;  %v3073_v24 = vpop.f32.mrf.mxu1  ;;  %v2120_v7 = vrot.slane %v9636_v43, 1  ;;  %v2121_v9 = vrot.slane %v11447_v11, 1  ;;  %v11171_v43 = vld [vmem:[%s15149_s2 + $0x58] sm:$0xff]  }
 0x180   : > { %v12928_v0 = vadd.f32 %v3071_v36, %v2895_v16  ;;  %v9637_v61 = vcombine.low %v9475_v35, %v11446_v18  ;;  %10339 = vmatprep.subr.bf16.mxu1 %v11171_v43 }
 0x181   : > { %v2897_v54 = vpop.f32.mrf.mxu0  ;;  %v3074_v55 = vpop.f32.mrf.mxu1 }
 0x182   : > { %15187 = vst [vmem:[#allocation4_spill] sm:$0xff] %v12928_v0  ;;  %v2898_v20 = vadd.f32 %v12895_v62, %v2897_v54  ;;  %v11448_v0 = vld [vmem:[%s11598_s11 + $0x98] ss:$0 sps:$4 sm:$0x11]  }
 0x183   : > { %v2899_v10 = vpop.f32.mrf.mxu0  ;;  %v3076_v36 = vpop.f32.mrf.mxu1  ;;  %v2124_v56 = vrot.slane %v11448_v0, 1 }
 0x184   : > { %v12936_v16 = vadd.f32 %v3074_v55, %v2898_v20  ;;  %v2123_v10 = vrot.slane %v9637_v61, 1  ;;  %v9477_v20 = vld [vmem:[%s11598_s11 + $0xa8] sm:$0xe]  ;;  %v2122_v36 = vsel %vm1048_vm1, %v2120_v7, %v2121_v9  ;;  %v11172_v7 = vld [vmem:[%s15149_s2 + $0x18] sm:$0xff]  }
 0x185   : > { %v2902_v26 = vpop.f32.mrf.mxu0  ;;  %10832 = vmatmul.mubr.bf16.gmra.mxu0 %v2116_v44  ;;  %v3079_v54 = vpop.f32.mrf.mxu1  ;;  %10340 = vmatpush3.bf16.msra.mxu1 %v11172_v7 }
 0x186   : > { %v2903_v24 = vadd.f32 %v12895_v62, %v2902_v26  ;;  %10835 = vmatprep.mubr.bf16.mxu0 %v2119_v53  ;;  %v9638_v53 = vcombine.low %v9476_v51, %v12613_v14  ;;  %v2125_v0 = vsel %vm1048_vm1, %v2123_v10, %v2124_v56  ;;  %v9639_v26 = vcombine.low %v9477_v20, %v12646_v6 }
 0x187   : > { %v2904_v39 = vpop.f32.mrf.mxu0  ;;  %v3081_v35 = vpop.f32.mrf.mxu1  ;;  %v2127_v10 = vrot.slane %v12633_v28, 1  ;;  %v2130_v51 = vrot.slane %v12667_v37, 1 }
 0x188   : > { %v12942_v52 = vadd.f32 %v3079_v54, %v2903_v24  ;;  %v2126_v39 = vrot.slane %v9638_v53, 1  ;;  %v2129_v56 = vrot.slane %v9639_v26, 1  ;;  %v9478_v35 = vld [vmem:[%s11598_s11 + $0xb4] sm:$0xe] }
 0x189   : > { %v2905_v55 = vpop.f32.mrf.mxu0  ;;  %v3082_v44 = vpop.f32.mrf.mxu1  ;;  %v9640_v53 = vcombine.low %v9478_v35, %v12676_v3  ;;  %v9481_v35 = vld [vmem:[%s11598_s11 + $0xd8] sm:$0xe] }
 0x18a   : > { %v2906_v18 = vadd.f32 %v12895_v62, %v2905_v55 }
 0x18b   : > { %v2907_v61 = vpop.f32.mrf.mxu0  ;;  %v3084_v54 = vpop.f32.mrf.mxu1 }
 0x18c   : > { %v12953_v24 = vadd.f32 %v3082_v44, %v2906_v18  ;;  %v9479_v18 = vld [vmem:[%s11598_s11 + $0xc0] sm:$0xe]  ;;  %v2128_v61 = vsel %vm1048_vm1, %v2126_v39, %v2127_v10  ;;  %v2133_v39 = vrot.slane %v12695_v25, 1 }
 0x18d   : > { %v2910_v14 = vpop.f32.mrf.mxu0  ;;  %10836 = vmatmul.mubr.bf16.gmra.mxu0 %v2122_v36  ;;  %v3087_v9 = vpop.f32.mrf.mxu1  ;;  %v9641_v26 = vcombine.low %v9479_v18, %v12704_v46 }
 0x18e   : > { %v2911_v11 = vadd.f32 %v12895_v62, %v2910_v14  ;;  %10839 = vmatprep.mubr.bf16.mxu0 %v2125_v0  ;;  %v2131_v0 = vsel %vm1048_vm1, %v2129_v56, %v2130_v51  ;;  %v9480_v56 = vld [vmem:[%s11598_s11 + $0xcc] sm:$0xe] }
 0x18f   : > { %v2912_v6 = vpop.f32.mrf.mxu0  ;;  %v3089_v55 = vpop.f32.mrf.mxu1  ;;  %v2135_v10 = vrot.slane %v9641_v26, 1 }
 0x190   : > { %v12962_v20 = vadd.f32 %v3087_v9, %v2911_v11  ;;  %v2132_v9 = vrot.slane %v9640_v53, 1  ;;  %v2136_v6 = vrot.slane %v12723_v58, 1  ;;  %v9643_v53 = vcombine.low %v9481_v35, %v12760_v40  ;;  %v11174_v40 = vld [vmem:[%s15149_s2 + $0x10] sm:$0xff]  }
 0x191   : > { %v2913_v44 = vpop.f32.mrf.mxu0  ;;  %v3090_v43 = vpop.f32.mrf.mxu1 }
 0x192   : > { %v2914_v36 = vadd.f32 %v12895_v62, %v2913_v44  ;;  %v2137_v25 = vsel %vm1048_vm1, %v2135_v10, %v2136_v6 }
 0x193   : > { %v2915_v28 = vpop.f32.mrf.mxu0  ;;  %v3092_v54 = vpop.f32.mrf.mxu1 }
 0x194   : > { %v12970_v37 = vadd.f32 %v3090_v43, %v2914_v36  ;;  %v2134_v36 = vsel %vm1048_vm1, %v2132_v9, %v2133_v39  ;;  %v9642_v43 = vcombine.low %v9480_v56, %v12732_v34  ;;  %v2142_v9 = vrot.slane %v12785_v59, 1  ;;  %v9482_v39 = vld [vmem:[%s11598_s11 + $0xe4] sm:$0xe] }
 0x195   : > { %v2918_v7 = vpop.f32.mrf.mxu0  ;;  %10840 = vmatmul.mubr.bf16.gmra.mxu0 %v2128_v61  ;;  %v3095_v11 = vpop.f32.mrf.mxu1 }
 0x196   : > { %v2919_v14 = vadd.f32 %v12895_v62, %v2918_v7  ;;  %10843 = vmatprep.mubr.bf16.mxu0 %v2131_v0  ;;  %v11173_v0 = vld [vmem:[%s15149_s2 + $0x50] sm:$0xff]   ;;  %v2138_v34 = vrot.slane %v9642_v43, 1  ;;  %v2139_v7 = vrot.slane %v12751_v12, 1 }
 0x197   : > { %v2920_v3 = vpop.f32.mrf.mxu0  ;;  %v3097_v46 = vpop.f32.mrf.mxu1  ;;  %10341 = vmatprep.subr.bf16.mxu1 %v11173_v0 }
 0x198   : > { %v12976_v51 = vadd.f32 %v3095_v11, %v2919_v14  ;;  %v2141_v11 = vrot.slane %v9643_v53, 1  ;;  %10342 = vmatpush3.bf16.msra.mxu1 %v11174_v40  ;;  %v2140_v12 = vsel %vm1048_vm1, %v2138_v34, %v2139_v7  ;;  %v9644_v46 = vcombine.low %v9482_v39, %v12794_v48 }
 0x199   : > { %v2921_v55 = vpop.f32.mrf.mxu0  ;;  %v3098_v44 = vpop.f32.mrf.mxu1 }
 0x19a   : > { %v2922_v18 = vadd.f32 %v12895_v62, %v2921_v55  ;;  %v2143_v55 = vsel %vm1048_vm1, %v2141_v11, %v2142_v9 }
 0x19b   : > { %v2923_v61 = vpop.f32.mrf.mxu0  ;;  %v3100_v28 = vpop.f32.mrf.mxu1 }
 0x19c   : > { %v12984_v58 = vadd.f32 %v3098_v44, %v2922_v18  ;;  %v2144_v61 = vrot.slane %v9644_v46, 1  ;;  %v262_v46 = vld [vmem:[#allocation2 + $0x10] sm:$0x8] }
 0x19d   : > { %v3136_v26 = vpop.f32.mrf.mxu0  ;;  %10844 = vmatmul.mubr.bf16.gmra.mxu0 %v2134_v36  ;;  %v3313_v54 = vpop.f32.mrf.mxu1 }
 0x19e   : > { %v3137_v62 = vadd.f32 %v3136_v26, %v12590_v50  ;;  %10847 = vmatprep.mubr.bf16.mxu0 %v2137_v25 }
 0x19f   : > { %v3138_v14 = vpop.f32.mrf.mxu0  ;;  %v3315_v10 = vpop.f32.mrf.mxu1 }
 0x1a0   : > { %v12996_v3 = vadd.f32 %v3313_v54, %v3137_v62 }
 0x1a1   : > { %v3139_v50 = vpop.f32.mrf.mxu0  ;;  %v3316_v56 = vpop.f32.mrf.mxu1 }
 0x1a2   : > { %v3140_v6 = vadd.f32 %v3139_v50, %v12601_v38  ;;  %v2145_v38 = vrot.slane %v12816_v22, 1  ;;  %v11177_v22 = vld [vmem:[%s15149_s2 + $0xf8] sm:$0xff]   ;;  %v11179_v50 = vld [vmem:[%s15149_s2 + $0xf0] sm:$0xff]  }
 0x1a3   : > { %v3141_v35 = vpop.f32.mrf.mxu0  ;;  %v3318_v44 = vpop.f32.mrf.mxu1  ;;  %10443 = vmatprep.subr.bf16.mxu0 %v11177_v22 }
 0x1a4   : > { %v13002_v18 = vadd.f32 %v3316_v56, %v3140_v6  ;;  %v2146_v62 = vsel %vm1048_vm1, %v2144_v61, %v2145_v38  ;;  %v11180_v56 = vld [vmem:[%s15149_s2 + $0xb0] sm:$0xff]  }
 0x1a5   : > { %v3144_v59 = vpop.f32.mrf.mxu0  ;;  %10848 = vmatmul.mubr.bf16.gmra.mxu0 %v2140_v12  ;;  %v3321_v43 = vpop.f32.mrf.mxu1  ;;  %v15188_v12 = vmov 0 }
 0x1a6   : > { %v3145_v36 = vadd.f32 %v3144_v59, %v12615_v29  ;;  %10851 = vmatprep.mubr.bf16.mxu0 %v2143_v55  ;;  %v15189_v12 = vsel %vm13028_vm4, 4294967295, %v15188_v12  ;;  %v263_v55 = vsel %vm13028_vm4, 0, %v262_v46 }
 0x1a7   : > { %v3146_v25 = vpop.f32.mrf.mxu0  ;;  %v3323_v28 = vpop.f32.mrf.mxu1  ;;  %15190 = vst [vmem:[#allocation5_spill] sm:$0xff] %v15189_v12  ;;  %264 = vst [vmem:[#allocation2 + $0x10] sm:$0x8] %v263_v55 }
 0x1a8   : > { %v13006_v53 = vadd.f32 %v3321_v43, %v3145_v36  ;;  %v11181_v43 = vld [vmem:[%s15149_s2 + $0xe8] sm:$0xff]  }
 0x1a9   : > { %v3147_v48 = vpop.f32.mrf.mxu0  ;;  %v3324_v26 = vpop.f32.mrf.mxu1  ;;  %v11182_v25 = vld [vmem:[%s15149_s2 + $0xa8] sm:$0xff]  }
 0x1aa   : > { %v3148_v0 = vadd.f32 %v3147_v48, %v12629_v32  ;;  %v11178_v32 = vld [vmem:[%s15149_s2 + $0xb8] sm:$0xff]   ;;  %v11176_v48 = vld [vmem:[%s15149_s2 + $0x8] sm:$0xff]  }
 0x1ab   : > { %v3149_v54 = vpop.f32.mrf.mxu0  ;;  %v3326_v7 = vpop.f32.mrf.mxu1  ;;  %10444 = vmatpush3.bf16.msra.mxu0 %v11178_v32 }
 0x1ac   : > { %v13010_v34 = vadd.f32 %v3324_v26, %v3148_v0  ;;  %10445 = vmatprep.subr.bf16.mxu0 %v11179_v50 }
 0x1ad   : > { %v3152_v29 = vpop.f32.mrf.mxu0  ;;  %10852 = vmatmul.mubr.bf16.gmra.mxu0 %v2146_v62  ;;  %v3329_v14 = vpop.f32.mrf.mxu1 }
 0x1ae   : > { %v3153_v40 = vadd.f32 %v3152_v29, %v12641_v17  ;;  %v11184_v29 = vld [vmem:[%s15149_s2 + $0xa0] sm:$0xff]  }
 0x1af   : > { %v3154_v11 = vpop.f32.mrf.mxu0  ;;  %v3331_v39 = vpop.f32.mrf.mxu1  ;;  %10446 = vmatpush3.bf16.msra.mxu0 %v11180_v56 }
 0x1b0   : > { %v13019_v9 = vadd.f32 %v3329_v14, %v3153_v40  ;;  %10447 = vmatprep.subr.bf16.mxu0 %v11181_v43  ;;  %v15191_v40 = vmov 0  ;;  %v316_v14 = vld [vmem:[#allocation2 + $0xc] sm:$0x1] }
 0x1b1   : > { %v3155_v10 = vpop.f32.mrf.mxu0  ;;  %v3332_v6 = vpop.f32.mrf.mxu1  ;;  %v15192_v40 = vsel %vm13058_vm7, 4294967295, %v15191_v40  ;;  %v317_v39 = vsel %vm13058_vm7, 0, %v316_v14 }
 0x1b2   : > { %v3156_v17 = vadd.f32 %v3155_v10, %v12657_v33  ;;  %v11175_v33 = vld [vmem:[%s15149_s2 + $0x48] sm:$0xff]   ;;  %15193 = vst [vmem:[#allocation6_spill] sm:$0xff] %v15192_v40  ;;  %v11185_v10 = vld [vmem:[%s15149_s2 + $0xd8] sm:$0xff]   ;;  %318 = vst [vmem:[#allocation2 + $0xc] sm:$0x1] %v317_v39 }
 0x1b3   : > { %v3157_v35 = vpop.f32.mrf.mxu0  ;;  %v3334_v59 = vpop.f32.mrf.mxu1  ;;  %10343 = vmatprep.subr.bf16.mxu1 %v11175_v33  ;;  %10448 = vmatpush3.bf16.msra.mxu0 %v11182_v25 }
 0x1b4   : > { %v13034_v44 = vadd.f32 %v3332_v6, %v3156_v17  ;;  %10344 = vmatpush3.bf16.msra.mxu1 %v11176_v48  ;;  %v11187_v6 = vld [vmem:[%s15149_s2 + $0x98] sm:$0xff]   ;;  %v11189_v59 = vld [vmem:[%s15149_s2 + $0xd0] sm:$0xff]  }
 0x1b5   : > { %v3160_v36 = vpop.f32.mrf.mxu0  ;;  %v3337_v38 = vpop.f32.mrf.mxu1 }
 0x1b6   : > { %v3161_v61 = vadd.f32 %v3160_v36, %v12670_v49  ;;  %v11183_v49 = vld [vmem:[%s15149_s2 + $0xe0] sm:$0xff]  }
 0x1b7   : > { %v3162_v28 = vpop.f32.mrf.mxu0  ;;  %v3339_v26 = vpop.f32.mrf.mxu1  ;;  %10449 = vmatprep.subr.bf16.mxu0 %v11183_v49  ;;  %v259_v49 = vld [vmem:[#allocation2] sm:$0x8] }
 0x1b8   : > { %v13049_v0 = vadd.f32 %v3337_v38, %v3161_v61  ;;  %10450 = vmatpush3.bf16.msra.mxu0 %v11184_v29  ;;  %v11191_v28 = vld [vmem:[%s15149_s2 + $0xc8] sm:$0xff]  }
 0x1b9   : > { %v3163_v62 = vpop.f32.mrf.mxu0  ;;  %v3340_v7 = vpop.f32.mrf.mxu1  ;;  %10451 = vmatprep.subr.bf16.mxu0 %v11185_v10  ;;  %v319_v10 = vld [vmem:[#allocation2 + $0x1c] sm:$0x1] }
 0x1ba   : > { %v3164_v54 = vadd.f32 %v3163_v62, %v12685_v1  ;;  %v11192_v62 = vld [vmem:[%s15149_s2 + $0x88] sm:$0xff]  }
 0x1bb   : > { %v3165_v22 = vpop.f32.mrf.mxu0  ;;  %v3342_v11 = vpop.f32.mrf.mxu1 }
 0x1bc   : > { %v13062_v32 = vadd.f32 %v3340_v7, %v3164_v54  ;;  %10452 = vmatpush3.bf16.msra.mxu0 %v11187_v6  ;;  %v260_v7 = vsel %vm13028_vm4, 0, %v259_v49  ;;  %v320_v6 = vsel %vm13058_vm7, 0, %v319_v10  ;;  %v268_v49 = vld [vmem:[#allocation2 + $0x30] sm:$0x8] }
 0x1bd   : > { %v3168_v1 = vpop.f32.mrf.mxu0  ;;  %v3345_v17 = vpop.f32.mrf.mxu1  ;;  %10453 = vmatprep.subr.bf16.mxu0 %v11189_v59  ;;  %261 = vst [vmem:[#allocation2] sm:$0x8] %v260_v7  ;;  %321 = vst [vmem:[#allocation2 + $0x1c] sm:$0x1] %v320_v6 }
 0x1be   : > { %v3169_v50 = vadd.f32 %v3168_v1, %v12698_v47  ;;  %v11190_v47 = vld [vmem:[%s15149_s2 + $0x90] sm:$0xff]   ;;  %v11196_v1 = vld [vmem:[%s15149_s2 + $0xc0] sm:$0xff]  }
 0x1bf   : > { %v3170_v56 = vpop.f32.mrf.mxu0  ;;  %v3347_v35 = vpop.f32.mrf.mxu1 }
 0x1c0   : > { %v13073_v46 = vadd.f32 %v3345_v17, %v3169_v50  ;;  %10454 = vmatpush3.bf16.msra.mxu0 %v11190_v47  ;;  %v11197_v17 = vld [vmem:[%s15149_s2 + $0x80] sm:$0xff]  }
 0x1c1   : > { %v3171_v55 = vpop.f32.mrf.mxu0  ;;  %v3348_v36 = vpop.f32.mrf.mxu1  ;;  %10455 = vmatprep.subr.bf16.mxu0 %v11191_v28 }
 0x1c2   : > { %v3172_v33 = vadd.f32 %v3171_v55, %v12713_v27  ;;  %v11186_v27 = vld [vmem:[%s15149_s2 + $0x40] sm:$0xff]  }
 0x1c3   : > { %v3173_v43 = vpop.f32.mrf.mxu0  ;;  %v3350_v38 = vpop.f32.mrf.mxu1  ;;  %10345 = vmatprep.subr.bf16.mxu1 %v11186_v27 }
 0x1c4   : > { %v13082_v61 = vadd.f32 %v3348_v36, %v3172_v33  ;;  %10456 = vmatpush3.bf16.msra.mxu0 %v11192_v62  ;;  %v265_v36 = vld [vmem:[#allocation2 + $0x20] sm:$0x8] }
 0x1c5   : > { %v3176_v25 = vpop.f32.mrf.mxu0  ;;  %v3353_v26 = vpop.f32.mrf.mxu1  ;;  %10457 = vmatprep.subr.bf16.mxu0 %v11196_v1  ;;  %v266_v38 = vsel %vm13028_vm4, 0, %v265_v36 }
 0x1c6   : > { %v3177_v48 = vadd.f32 %v3176_v25, %v12726_v45  ;;  %v11188_v45 = vld [vmem:[%s15149_s2] sm:$0xff]   ;;  %267 = vst [vmem:[#allocation2 + $0x20] sm:$0x8] %v266_v38 }
 0x1c7   : > { %v3178_v54 = vpop.f32.mrf.mxu0  ;;  %v3355_v22 = vpop.f32.mrf.mxu1  ;;  %10346 = vmatpush3.bf16.msra.mxu1 %v11188_v45 }
 0x1c8   : > { %v13096_v29 = vadd.f32 %v3353_v26, %v3177_v48  ;;  %10458 = vmatpush3.bf16.msra.mxu0 %v11197_v17  ;;  %v269_v54 = vsel %vm13028_vm4, 0, %v268_v49 }
 0x1c9   : > { %v3179_v14 = vpop.f32.mrf.mxu0  ;;  %v3356_v39 = vpop.f32.mrf.mxu1  ;;  %270 = vst [vmem:[#allocation2 + $0x30] sm:$0x8] %v269_v54 }
 0x1ca   : > { %v3180_v11 = vadd.f32 %v3179_v14, %v12741_v13 }
 0x1cb   : > { %v3181_v50 = vpop.f32.mrf.mxu0  ;;  %v3358_v35 = vpop.f32.mrf.mxu1 }
 0x1cc   : > { %v13110_v56 = vadd.f32 %v3356_v39, %v3180_v11 }
 0x1cd   : > { %v3184_v13 = vpop.f32.mrf.mxu0  ;;  %v3361_v59 = vpop.f32.mrf.mxu1 }
 0x1ce   : > { %v3185_v55 = vadd.f32 %v3184_v13, %v12754_v15 }
 0x1cf   : > { %v3186_v33 = vpop.f32.mrf.mxu0  ;;  %v3363_v43 = vpop.f32.mrf.mxu1 }
 0x1d0   : > { %v13113_v47 = vadd.f32 %v3361_v59, %v3185_v55 }
 0x1d1   : > { %v3187_v25 = vpop.f32.mrf.mxu0  ;;  %v3364_v48 = vpop.f32.mrf.mxu1 }
 0x1d2   : > { %v3188_v28 = vadd.f32 %v3187_v25, %v12772_v60  ;;  %v11201_v60 = vld [vmem:[%s15149_s2 + $0x178] sm:$0xff]  }
 0x1d3   : > { %v3189_v26 = vpop.f32.mrf.mxu0  ;;  %v3366_v62 = vpop.f32.mrf.mxu1  ;;  %10555 = vmatprep.subr.bf16.mxu1 %v11201_v60 }
 0x1d4   : > { %v13118_v27 = vadd.f32 %v3364_v48, %v3188_v28 }
 0x1d5   : > { %v3192_v15 = vpop.f32.mrf.mxu0  ;;  %v3369_v22 = vpop.f32.mrf.mxu1 }
 0x1d6   : > { %v3193_v7 = vadd.f32 %v3192_v15, %v12788_v19  ;;  %v322_v15 = vld [vmem:[#allocation2 + $0x2c] sm:$0x1] }
 0x1d7   : > { %v3194_v45 = vpop.f32.mrf.mxu0  ;;  %v3371_v11 = vpop.f32.mrf.mxu1 }
 0x1d8   : > { %v13123_v14 = vadd.f32 %v3369_v22, %v3193_v7  ;;  %v323_v7 = vsel %vm13058_vm7, 0, %v322_v15  ;;  %v271_v11 = vld [vmem:[#allocation2 + $0x40] sm:$0x8] }
 0x1d9   : > { %v3195_v39 = vpop.f32.mrf.mxu0  ;;  %v3372_v10 = vpop.f32.mrf.mxu1  ;;  %324 = vst [vmem:[#allocation2 + $0x2c] sm:$0x1] %v323_v7 }
 0x1da   : > { %v3196_v1 = vadd.f32 %v3195_v39, %v12803_v57  ;;  %v272_v39 = vsel %vm13028_vm4, 0, %v271_v11 }
 0x1db   : > { %v3197_v50 = vpop.f32.mrf.mxu0  ;;  %v3374_v6 = vpop.f32.mrf.mxu1  ;;  %273 = vst [vmem:[#allocation2 + $0x40] sm:$0x8] %v272_v39 }
 0x1dc   : > { %v13129_v17 = vadd.f32 %v3372_v10, %v3196_v1  ;;  %v325_v50 = vld [vmem:[#allocation2 + $0x3c] sm:$0x1] }
 0x1dd   : > { %v3200_v19 = vpop.f32.mrf.mxu0  ;;  %v3377_v13 = vpop.f32.mrf.mxu1 }
 0x1de   : > { %v3201_v35 = vadd.f32 %v3200_v19, %v12813_v4 }
 0x1df   : > { %v3202_v55 = vpop.f32.mrf.mxu0  ;;  %v3379_v33 = vpop.f32.mrf.mxu1 }
 0x1e0   : > { %v13132_v59 = vadd.f32 %v3377_v13, %v3201_v35  ;;  %v326_v35 = vsel %vm13058_vm7, 0, %v325_v50 }
 0x1e1   : > { %v3203_v36 = vpop.f32.mrf.mxu0  ;;  %v3380_v38 = vpop.f32.mrf.mxu1  ;;  %327 = vst [vmem:[#allocation2 + $0x3c] sm:$0x1] %v326_v35 }
 0x1e2   : > { %v3204_v43 = vadd.f32 %v3203_v36, %v12826_v41 }
 0x1e3   : > { %v3205_v25 = vpop.f32.mrf.mxu0  ;;  %v3382_v28 = vpop.f32.mrf.mxu1 }
 0x1e4   : > { %v13135_v57 = vadd.f32 %v3380_v38, %v3204_v43  ;;  %v274_v38 = vld [vmem:[#allocation2 + $0x50] sm:$0x8] }
 0x1e5   : > { %v3208_v48 = vpop.f32.mrf.mxu0  ;;  %v3385_v62 = vpop.f32.mrf.mxu1  ;;  %v275_v28 = vsel %vm13028_vm4, 0, %v274_v38 }
 0x1e6   : > { %v3209_v26 = vadd.f32 %v3208_v48, %v12839_v63  ;;  %276 = vst [vmem:[#allocation2 + $0x50] sm:$0x8] %v275_v28  ;;  %v328_v28 = vld [vmem:[#allocation2 + $0x4c] sm:$0x1] }
 0x1e7   : > { %v3210_v49 = vpop.f32.mrf.mxu0  ;;  %v3387_v54 = vpop.f32.mrf.mxu1 }
 0x1e8   : > { %v13138_v4 = vadd.f32 %v3385_v62, %v3209_v26 }
 0x1e9   : > { %v3211_v22 = vpop.f32.mrf.mxu0  ;;  %v3388_v45 = vpop.f32.mrf.mxu1 }
 0x1ea   : > { %v3212_v41 = vadd.f32 %v3211_v22, %v12847_v8 }
 0x1eb   : > { %v3213_v60 = vpop.f32.mrf.mxu0  ;;  %v3390_v1 = vpop.f32.mrf.mxu1 }
 0x1ec   : > { %v13145_v63 = vadd.f32 %v3388_v45, %v3212_v41 }
 0x1ed   : > { %v3216_v10 = vpop.f32.mrf.mxu0  ;;  %v3393_v19 = vpop.f32.mrf.mxu1 }
 0x1ee   : > { %v3217_v6 = vadd.f32 %v3216_v10, %v12854_v23 }
 0x1ef   : > { %v3218_v13 = vpop.f32.mrf.mxu0  ;;  %v3395_v55 = vpop.f32.mrf.mxu1 }
 0x1f0   : > { %v13150_v8 = vadd.f32 %v3393_v19, %v3217_v6 }
 0x1f1   : > { %v3219_v33 = vpop.f32.mrf.mxu0  ;;  %v3396_v43 = vpop.f32.mrf.mxu1 }
 0x1f2   : > { %v3220_v36 = vadd.f32 %v3219_v33, %v12862_v5 }
 0x1f3   : > { %v3221_v25 = vpop.f32.mrf.mxu0  ;;  %v3398_v23 = vpop.f32.mrf.mxu1 }
 0x1f4   : > { %v13155_v48 = vadd.f32 %v3396_v43, %v3220_v36 }
 0x1f5   : > { %v3224_v26 = vpop.f32.mrf.mxu0  ;;  %v3401_v49 = vpop.f32.mrf.mxu1 }
 0x1f6   : > { %v3225_v62 = vadd.f32 %v3224_v26, %v12872_v21  ;;  %v329_v26 = vsel %vm13058_vm7, 0, %v328_v28 }
 0x1f7   : > { %v3226_v15 = vpop.f32.mrf.mxu0  ;;  %v3403_v7 = vpop.f32.mrf.mxu1  ;;  %330 = vst [vmem:[#allocation2 + $0x4c] sm:$0x1] %v329_v26 }
 0x1f8   : > { %v13158_v54 = vadd.f32 %v3401_v49, %v3225_v62  ;;  %v277_v7 = vld [vmem:[#allocation2 + $0x60] sm:$0x8] }
 0x1f9   : > { %v3227_v22 = vpop.f32.mrf.mxu0  ;;  %v3404_v41 = vpop.f32.mrf.mxu1 }
 0x1fa   : > { %v3228_v5 = vadd.f32 %v3227_v22, %v12883_v2 }
 0x1fb   : > { %v3229_v45 = vpop.f32.mrf.mxu0  ;;  %v3406_v60 = vpop.f32.mrf.mxu1 }
 0x1fc   : > { %v13161_v11 = vadd.f32 %v3404_v41, %v3228_v5  ;;  %v278_v5 = vsel %vm13028_vm4, 0, %v277_v7  ;;  %v331_v45 = vld [vmem:[#allocation2 + $0x5c] sm:$0x1] }
 0x1fd   : > { %v3232_v39 = vpop.f32.mrf.mxu0  ;;  %v3409_v10 = vpop.f32.mrf.mxu1  ;;  %279 = vst [vmem:[#allocation2 + $0x60] sm:$0x8] %v278_v5 }
 0x1fe   : > { %v3233_v1 = vadd.f32 %v3232_v39, %v12889_v31  ;;  %v332_v39 = vsel %vm13058_vm7, 0, %v331_v45 }
 0x1ff   : > { %v3234_v50 = vpop.f32.mrf.mxu0  ;;  %v3411_v21 = vpop.f32.mrf.mxu1  ;;  %333 = vst [vmem:[#allocation2 + $0x5c] sm:$0x1] %v332_v39 }
 0x200   : > { %v13164_v6 = vadd.f32 %v3409_v10, %v3233_v1  ;;  %v15195_v1 = vld [vmem:[#allocation4_spill] sm:$0xff] }
 0x201   : > { %v3235_v19 = vpop.f32.mrf.mxu0  ;;  %v3412_v13 = vpop.f32.mrf.mxu1 }
 0x202   : > { %v3236_v35 = vadd.f32 %v3235_v19, %v12902_v30  ;;  %v15194_v30 = vld [vmem:[#allocation3_spill] sm:$0xff] }
 0x203   : > { %v3237_v55 = vpop.f32.mrf.mxu0  ;;  %v3414_v2 = vpop.f32.mrf.mxu1 }
 0x204   : > { %v13167_v33 = vadd.f32 %v3412_v13, %v3236_v35  ;;  %v280_v55 = vld [vmem:[#allocation2 + $0x70] sm:$0x8] }
 0x205   : > { %v3240_v36 = vpop.f32.mrf.mxu0  ;;  %v3417_v38 = vpop.f32.mrf.mxu1 }
 0x206   : > { %v3241_v43 = vadd.f32 %v3240_v36, %v12908_v42 }
 0x207   : > { %v3242_v25 = vpop.f32.mrf.mxu0  ;;  %v3419_v23 = vpop.f32.mrf.mxu1 }
 0x208   : > { %v13170_v31 = vadd.f32 %v3417_v38, %v3241_v43  ;;  %v281_v43 = vsel %vm13028_vm4, 0, %v280_v55 }
 0x209   : > { %v3243_v62 = vpop.f32.mrf.mxu0  ;;  %v3420_v15 = vpop.f32.mrf.mxu1  ;;  %282 = vst [vmem:[#allocation2 + $0x70] sm:$0x8] %v281_v43 }
 0x20a   : > { %v3244_v49 = vadd.f32 %v3243_v62, %v15194_v30 }
 0x20b   : > { %v3245_v22 = vpop.f32.mrf.mxu0  ;;  %v3422_v41 = vpop.f32.mrf.mxu1 }
 0x20c   : > { %v13177_v42 = vadd.f32 %v3420_v15, %v3244_v49 }
 0x20d   : > { %v3248_v60 = vpop.f32.mrf.mxu0  ;;  %v3425_v50 = vpop.f32.mrf.mxu1 }
 0x20e   : > { %v3249_v10 = vadd.f32 %v3248_v60, %v15195_v1 }
 0x20f   : > { %v3250_v21 = vpop.f32.mrf.mxu0  ;;  %v3427_v35 = vpop.f32.mrf.mxu1 }
 0x210   : > { %v13182_v19 = vadd.f32 %v3425_v50, %v3249_v10 }
 0x211   : > { %v3251_v13 = vpop.f32.mrf.mxu0  ;;  %v3428_v36 = vpop.f32.mrf.mxu1 }
 0x212   : > { %v3252_v2 = vadd.f32 %v3251_v13, %v12936_v16 }
 0x213   : > { %v3253_v38 = vpop.f32.mrf.mxu0  ;;  %v3430_v28 = vpop.f32.mrf.mxu1 }
 0x214   : > { %v13187_v25 = vadd.f32 %v3428_v36, %v3252_v2  ;;  %v334_v36 = vld [vmem:[#allocation2 + $0x6c] sm:$0x1]  ;;  %v337_v28 = vld [vmem:[#allocation2 + $0x7c] sm:$0x1] }
 0x215   : > { %v3256_v23 = vpop.f32.mrf.mxu0  ;;  %v3433_v62 = vpop.f32.mrf.mxu1  ;;  %v335_v38 = vsel %vm13058_vm7, 0, %v334_v36 }
 0x216   : > { %v3257_v26 = vadd.f32 %v3256_v23, %v12942_v52  ;;  %336 = vst [vmem:[#allocation2 + $0x6c] sm:$0x1] %v335_v38 }
 0x217   : > { %v3258_v30 = vpop.f32.mrf.mxu0  ;;  %v3435_v15 = vpop.f32.mrf.mxu1 }
 0x218   : > { %v13190_v49 = vadd.f32 %v3433_v62, %v3257_v26  ;;  %v338_v26 = vsel %vm13058_vm7, 0, %v337_v28 }
 0x219   : > { %v3259_v7 = vpop.f32.mrf.mxu0  ;;  %v3436_v22 = vpop.f32.mrf.mxu1  ;;  %339 = vst [vmem:[#allocation2 + $0x7c] sm:$0x1] %v338_v26  ;;  %v13221_v26 = vld [vmem:[#allocation2 + $0x1c] ss:$0 sps:$4 sm:$0x11]  }
 0x21a   : > { %v3260_v16 = vadd.f32 %v3259_v7, %v12953_v24 }
 0x21b   : > { %v3261_v5 = vpop.f32.mrf.mxu0  ;;  %v3438_v45 = vpop.f32.mrf.mxu1 }
 0x21c   : > { %v13193_v41 = vadd.f32 %v3436_v22, %v3260_v16  ;;  %v286_v22 = vld [vmem:[#allocation2 + $0x90] sm:$0x8] }
 0x21d   : > { %v3264_v60 = vpop.f32.mrf.mxu0  ;;  %v3441_v1 = vpop.f32.mrf.mxu1  ;;  %v287_v45 = vsel %vm13028_vm4, 0, %v286_v22  ;;  %v13228_v22 = vld [vmem:[#allocation2 + $0x3c] ss:$0 sps:$4 sm:$0x11]  }
 0x21e   : > { %v3265_v39 = vadd.f32 %v3264_v60, %v12962_v20  ;;  %288 = vst [vmem:[#allocation2 + $0x90] sm:$0x8] %v287_v45 }
 0x21f   : > { %v3266_v10 = vpop.f32.mrf.mxu0  ;;  %v3443_v52 = vpop.f32.mrf.mxu1 }
 0x220   : > { %v13196_v50 = vadd.f32 %v3441_v1, %v3265_v39 }
 0x221   : > { %v3267_v21 = vpop.f32.mrf.mxu0  ;;  %v3444_v13 = vpop.f32.mrf.mxu1 }
 0x222   : > { %v3268_v35 = vadd.f32 %v3267_v21, %v12970_v37  ;;  %v283_v37 = vld [vmem:[#allocation2 + $0x80] sm:$0x8] }
 0x223   : > { %v3269_v55 = vpop.f32.mrf.mxu0  ;;  %v3446_v24 = vpop.f32.mrf.mxu1  ;;  %v284_v7 = vsel %vm13028_vm4, 0, %v283_v37 }
 0x224   : > { %v13199_v2 = vadd.f32 %v3444_v13, %v3268_v35  ;;  %285 = vst [vmem:[#allocation2 + $0x80] sm:$0x8] %v284_v7  ;;  %v13225_v7 = vld [vmem:[#allocation2 + $0x2c] ss:$0 sps:$4 sm:$0x11]  }
 0x225   : > { %v3272_v43 = vpop.f32.mrf.mxu0  ;;  %v3449_v23 = vpop.f32.mrf.mxu1 }
 0x226   : > { %v3273_v20 = vadd.f32 %v3272_v43, %v12976_v51  ;;  %v13218_v43 = vld [vmem:[#allocation2 + $0xc] ss:$0 sps:$4 sm:$0x11]  }
 0x227   : > { %v3274_v62 = vpop.f32.mrf.mxu0  ;;  %v3451_v15 = vpop.f32.mrf.mxu1 }
 0x228   : > { %v13206_v30 = vadd.f32 %v3449_v23, %v3273_v20 }
 0x229   : > { %v3275_v16 = vpop.f32.mrf.mxu0  ;;  %v3452_v51 = vpop.f32.mrf.mxu1 }
 0x22a   : > { %v3276_v5 = vadd.f32 %v3275_v16, %v12984_v58 }
 0x22b   : > { %v3277_v60 = vpop.f32.mrf.mxu0  ;;  %v3454_v1 = vpop.f32.mrf.mxu1 }
 0x22c   : > { %v13213_v39 = vadd.f32 %v3452_v51, %v3276_v5  ;;  %v13230_v5 = vld [vmem:[#allocation2 + $0x4c] ss:$0 sps:$4 sm:$0x11]   ;;  %v3922_v60 = vld [vmem:[#allocation2 + $0x10] sm:$0x8] }
 0x22d   : > { %v10821_v10 = vpop.f32.mrf.mxu0 }
 0x22e   : > { %v3499_v52 = vadd.f32 %v10821_v10, %v13006_v53 }
 0x22f   : > { %v3490_v21 = vpop.f32.mrf.mxu0 }
 0x230   : > { %v3635_v35 = vmax.f32 %v3499_v52, 0.0  ;;  %v3491_v13 = vadd.f32 %v3490_v21, %v12996_v3  ;;  %v13234_v52 = vld [vmem:[#allocation2 + $0x5c] ss:$0 sps:$4 sm:$0x11]  }
 0x231   : > { %v10822_v55 = vpop.f32.mrf.mxu0  ;;  %v13236_v21 = vld [vmem:[#allocation2 + $0x6c] ss:$0 sps:$4 sm:$0x11]  }
 0x232   : > { %v10104_v24 = vpack.c.bf16 %v3635_v35, %v3635_v35  ;;  %v3633_v36 = vmax.f32 %v3491_v13, 0.0  ;;  %v3502_v58 = vadd.f32 %v10822_v55, %v13010_v34  ;;  %v15196_v34 = vmov 0  }
 0x233   : > { %v3493_v38 = vpop.f32.mrf.mxu0 }
 0x234   : > { %3815 = vst [vmem:[#allocation2 + $0x14] sm:$0xf] %v10104_v24  ;;  %v10102_v28 = vpack.c.bf16 %v3633_v36, %v3633_v36  ;;  %v3636_v20 = vmax.f32 %v3502_v58, 0.0  ;;  %v3494_v23 = vadd.f32 %v3493_v38, %v13002_v18  ;;  %v13240_v36 = vld [vmem:[#allocation2 + $0x7c] ss:$0 sps:$4 sm:$0x11]  }
 0x235   : > { %v10825_v53 = vpop.f32.mrf.mxu0  ;;  %15197 = vst [vmem:[#allocation3_spill] sm:$0xff] %v13240_v36 }
 0x236   : > { %3813 = vst [vmem:[#allocation2 + $0x4] sm:$0xf] %v10102_v28  ;;  %v10105_v62 = vpack.c.bf16 %v3636_v20, %v3636_v20  ;;  %v3634_v37 = vmax.f32 %v3494_v23, 0.0  ;;  %v3515_v3 = vadd.f32 %v10825_v53, %v13049_v0  ;;  %v3860_v0 = vld [vmem:[#allocation2 + $0x10] sm:$0x8] }
 0x237   : > { %3852 = vst [vmem:[#allocation2 + $0x4] sm:$0xf] %v15196_v34  ;;  %v3506_v16 = vpop.f32.mrf.mxu0 }
 0x238   : > { %3816 = vst [vmem:[#allocation2 + $0x18] sm:$0xf] %v10105_v62  ;;  %v10103_v18 = vpack.c.bf16 %v3634_v37, %v3634_v37  ;;  %v3639_v51 = vmax.f32 %v3515_v3, 0.0  ;;  %v3507_v45 = vadd.f32 %v3506_v16, %v13019_v9  ;;  %v3857_v37 = vld [vmem:[#allocation2] sm:$0x8] }
 0x239   : > { %v10826_v10 = vpop.f32.mrf.mxu0  ;;  %v343_v3 = vld [vmem:[#allocation2 + $0x9c] sm:$0x1] }
 0x23a   : > { %3814 = vst [vmem:[#allocation2 + $0x8] sm:$0xf] %v10103_v18  ;;  %v10108_v35 = vpack.c.bf16 %v3639_v51, %v3639_v51  ;;  %v3637_v13 = vmax.f32 %v3507_v45, 0.0  ;;  %v3518_v55 = vadd.f32 %v10826_v10, %v13062_v32  ;;  %v344_v10 = vsel %vm13058_vm7, 0, %v343_v3 }
 0x23b   : > { %3853 = vst [vmem:[#allocation2 + $0x8] sm:$0xf] %v15196_v34  ;;  %v3509_v9 = vpop.f32.mrf.mxu0  ;;  %v3923_v58 = vld [vmem:[#allocation2 + $0x14] sm:$0xf]  ;;  %345 = vst [vmem:[#allocation2 + $0x9c] sm:$0x1] %v344_v10 }
 0x23c   : > { %v13243_v38 = vld [vmem:[#allocation2 + $0x14] sm:$0xf]  ;;  %3819 = vst [vmem:[#allocation2 + $0x34] sm:$0xf] %v10108_v35  ;;  %v10106_v23 = vpack.c.bf16 %v3637_v13, %v3637_v13  ;;  %v3640_v53 = vmax.f32 %v3518_v55, 0.0  ;;  %v3510_v62 = vadd.f32 %v3509_v9, %v13034_v44  ;;  %v9818_v32 = vcombine.low %v3922_v60, %v3923_v58 }
 0x23d   : > { %v10829_v16 = vpop.f32.mrf.mxu0  ;;  %v13249_v18 = vcombine.low %v3860_v0, %v13243_v38 }
 0x23e   : > { %3817 = vst [vmem:[#allocation2 + $0x24] sm:$0xf] %v10106_v23  ;;  %v10109_v35 = vpack.c.bf16 %v3640_v53, %v3640_v53  ;;  %v3638_v13 = vmax.f32 %v3510_v62, 0.0  ;;  %v3531_v55 = vadd.f32 %v10829_v16, %v13096_v29  ;;  %v5201_v44 = vshrl.u32 %v9818_v32, 16  ;;  %v3858_v60 = vld [vmem:[#allocation2 + $0x4] sm:$0xf] }
 0x23f   : > { %v3522_v9 = vpop.f32.mrf.mxu0  ;;  %v3924_v20 = vld [vmem:[#allocation2 + $0x18] sm:$0xf]  ;;  %v5204_v0 = vshll.u32 %v9818_v32, 16  ;;  %v13256_v28 = vcombine.low %v3857_v37, %v3858_v60 }
 0x240   : > { %3820 = vst [vmem:[#allocation2 + $0x38] sm:$0xf] %v10109_v35  ;;  %v10107_v3 = vpack.c.bf16 %v3638_v13, %v3638_v13  ;;  %v3643_v23 = vmax.f32 %v3531_v55, 0.0  ;;  %v3523_v53 = vadd.f32 %v3522_v9, %v13073_v46  ;;  %v9819_v62 = vcombine.low %v3924_v20, %v3924_v20 }
 0x241   : > { %v10830_v29 = vpop.f32.mrf.mxu0  ;;  %v13261_v16 = vcombine.low %v3923_v58, %v3924_v20  ;;  %v5203_v10 = vrot.slane %v5201_v44, 3  ;;  %v5206_v24 = vrot.slane %v5204_v0, 4 }
 0x242   : > { %3818 = vst [vmem:[#allocation2 + $0x28] sm:$0xf] %v10107_v3  ;;  %v10112_v37 = vpack.c.bf16 %v3643_v23, %v3643_v23  ;;  %v3641_v1 = vmax.f32 %v3523_v53, 0.0  ;;  %v3534_v51 = vadd.f32 %v10830_v29, %v13110_v56  ;;  %v5209_v45 = vshrl.u32 %v9819_v62, 16  ;;  %v3859_v35 = vld [vmem:[#allocation2 + $0x8] sm:$0xf] }
 0x243   : > { %v3525_v13 = vpop.f32.mrf.mxu0  ;;  %v4565_v55 = vshrl.u32 %v13261_v16, 16  ;;  %v4568_v46 = vshll.u32 %v13261_v16, 16  ;;  %v5207_v9 = vor.u32 %v5206_v24, %v5203_v10  ;;  %v5212_v15 = vshll.u32 %v9819_v62, 16 }
 0x244   : > { %3823 = vst [vmem:[#allocation2 + $0x54] sm:$0xf] %v10112_v37  ;;  %v10110_v58 = vpack.c.bf16 %v3641_v1, %v3641_v1  ;;  %v3644_v20 = vmax.f32 %v3534_v51, 0.0  ;;  %v3526_v44 = vadd.f32 %v3525_v13, %v13082_v61  ;;  %v5211_v0 = vrot.slane %v5209_v45, 3 }
 0x245   : > { %v10833_v3 = vpop.f32.mrf.mxu0  ;;  %v4567_v23 = vrot.slane %v4565_v55, 4  ;;  %v4570_v53 = vrot.slane %v4568_v46, 5  ;;  %v5214_v32 = vrot.slane %v5212_v15, 4  ;;  %v9786_v56 = vcombine.low %v3858_v60, %v3859_v35  ;;  %v11255_v60 = vld [vmem:[%s15149_s2 + $0x1f8] sm:$0xff]  }
 0x246   : > { %3821 = vst [vmem:[#allocation2 + $0x44] sm:$0xf] %v10110_v58  ;;  %v10113_v29 = vpack.c.bf16 %v3644_v20, %v3644_v20  ;;  %v3642_v12 = vmax.f32 %v3526_v44, 0.0  ;;  %v3547_v40 = vadd.f32 %v10833_v3, %v13123_v14  ;;  %v13269_v36 = vcombine.low %v3859_v35, %v3859_v35  ;;  %10667 = vmatprep.subr.bf16.mxu0 %v11255_v60 }
 0x247   : > { %v3538_v24 = vpop.f32.mrf.mxu0  ;;  %v13271_v62 = vor.u32 %v4570_v53, %v4567_v23  ;;  %v5215_v1 = vor.u32 %v5214_v32, %v5211_v0  ;;  %v4372_v51 = vrot.slane %v9786_v56, 5  ;;  %v4196_v10 = vshrl.u32 %v9786_v56, 16 }
 0x248   : > { %3824 = vst [vmem:[#allocation2 + $0x58] sm:$0xf] %v10113_v29  ;;  %v10111_v61 = vpack.c.bf16 %v3642_v12, %v3642_v12  ;;  %v3647_v45 = vmax.f32 %v3547_v40, 0.0  ;;  %v3539_v37 = vadd.f32 %v3538_v24, %v13113_v47  ;;  %v4199_v15 = vshll.u32 %v9786_v56, 16 }
 0x249   : > { %v10834_v13 = vpop.f32.mrf.mxu0  ;;  %v5216_v14 = vsel %vm5156_vm8, %v5207_v9, %v5215_v1  ;;  %v15198_v35 = vrot.slane %v13218_v43, 5  ;;  %v5184_v32 = vshrl.u32 %v4372_v51, 16  ;;  %v5187_v46 = vshll.u32 %v4372_v51, 16 }
 0x24a   : > { %3822 = vst [vmem:[#allocation2 + $0x48] sm:$0xf] %v10111_v61  ;;  %v10116_v58 = vpack.c.bf16 %v3647_v45, %v3647_v45  ;;  %v3645_v12 = vmax.f32 %v3539_v37, 0.0  ;;  %v3550_v40 = vadd.f32 %v10834_v13, %v13129_v17  ;;  %8237 = vmatprep.mubr.bf16.mxu0 %v5216_v14  ;;  %v4198_v23 = vrot.slane %v4196_v10, 4 }
 0x24b   : > { %v4374_v55 = vsel %vm4371_vm9, %v4372_v51, %v15198_v35  ;;  %v3541_v20 = vpop.f32.mrf.mxu0  ;;  %v5186_v44 = vrot.slane %v5184_v32, 3  ;;  %v5189_v0 = vrot.slane %v5187_v46, 4  ;;  %v4201_v51 = vrot.slane %v4199_v15, 5 }
 0x24c   : > { %v5192_v47 = vshrl.u32 %v4374_v55, 16  ;;  %v5195_v3 = vshll.u32 %v4374_v55, 16  ;;  %3827 = vst [vmem:[#allocation2 + $0x74] sm:$0xf] %v10116_v58  ;;  %v10114_v9 = vpack.c.bf16 %v3645_v12, %v3645_v12  ;;  %v3648_v43 = vmax.f32 %v3550_v40, 0.0 }
 0x24d   : > { %v3542_v53 = vadd.f32 %v3541_v20, %v13118_v27  ;;  %v10837_v29 = vpop.f32.mrf.mxu0  ;;  %v5190_v24 = vor.u32 %v5189_v0, %v5186_v44  ;;  %v15199_v17 = vshrl.u32 %v13256_v28, 16  ;;  %v5161_v10 = vshll.u32 %v13256_v28, 16  ;;  %v13290_v12 = vld [vmem:[#allocation2 + $0x18] sm:$0xf]  ;;  %v3925_v40 = vld [vmem:[#allocation2 + $0x20] sm:$0x8] }
 0x24e   : > { %v5194_v56 = vrot.slane %v5192_v47, 3  ;;  %v5197_v1 = vrot.slane %v5195_v3, 4  ;;  %3825 = vst [vmem:[#allocation2 + $0x64] sm:$0xf] %v10114_v9  ;;  %v10117_v45 = vpack.c.bf16 %v3648_v43, %v3648_v43  ;;  %v3563_v60 = vadd.f32 %v10837_v29, %v13138_v4  ;;  %v3926_v0 = vld [vmem:[#allocation2 + $0x24] sm:$0xf] }
 0x24f   : > { %v5160_v61 = vrot.slane %v15199_v17, 3  ;;  %v3646_v37 = vmax.f32 %v3542_v53, 0.0  ;;  %v3554_v13 = vpop.f32.mrf.mxu0  ;;  %v4202_v35 = vor.u32 %v4201_v51, %v4198_v23  ;;  %v5166_v27 = vshrl.u32 %v13269_v36, 16 }
 0x250   : > { %v5198_v14 = vor.u32 %v5197_v1, %v5194_v56  ;;  %v5169_v55 = vshll.u32 %v13269_v36, 16  ;;  %3828 = vst [vmem:[#allocation2 + $0x78] sm:$0xf] %v10117_v45  ;;  %v3651_v15 = vmax.f32 %v3563_v60, 0.0  ;;  %v3555_v46 = vadd.f32 %v3554_v13, %v13132_v59  ;;  %v11257_v36 = vld [vmem:[%s15149_s2 + $0x1b8] sm:$0xff]  }
 0x251   : > { %v10115_v32 = vpack.c.bf16 %v3646_v37, %v3646_v37  ;;  %v5163_v58 = vrot.slane %v5161_v10, 4  ;;  %v10838_v47 = vpop.f32.mrf.mxu0  ;;  %v5175_v28 = vshrl.u32 %v4202_v35, 16  ;;  %v5178_v20 = vshll.u32 %v4202_v35, 16  ;;  %v3927_v1 = vld [vmem:[#allocation2 + $0x28] sm:$0xf] }
 0x252   : > { %v5199_v4 = vsel %vm5156_vm8, %v5190_v24, %v5198_v14  ;;  %v5168_v44 = vrot.slane %v5166_v27, 3  ;;  %v10120_v3 = vpack.c.bf16 %v3651_v15, %v3651_v15  ;;  %v3649_v23 = vmax.f32 %v3555_v46, 0.0 }
 0x253   : > { %3826 = vst [vmem:[#allocation2 + $0x68] sm:$0xf] %v10115_v32  ;;  %8238 = vmatmul.mubr.bf16.vlgmr.msra.gmra.mxu0 %v5199_v4  ;;  %v3566_v59 = vadd.f32 %v10838_v47, %v13145_v63  ;;  %v5164_v9 = vor.u32 %v5163_v58, %v5160_v61  ;;  %v5177_v43 = vrot.slane %v5175_v28, 3  ;;  %v5180_v53 = vrot.slane %v5178_v20, 4  ;;  %v3557_v29 = vpop.f32.mrf.mxu0  ;;  %v11206_v61 = vld [vmem:[%s15149_s2 + $0x138] sm:$0xff]  }
 0x254   : > { %v5171_v56 = vrot.slane %v5169_v55, 4  ;;  %v9787_v24 = vcombine.low %v13243_v38, %v13290_v12  ;;  %10668 = vmatpush3.bf16.msra.mxu0 %v11257_v36  ;;  %3831 = vst [vmem:[#allocation2 + $0x94] sm:$0xf] %v10120_v3  ;;  %v10118_v51 = vpack.c.bf16 %v3649_v23, %v3649_v23  ;;  %v3558_v45 = vadd.f32 %v3557_v29, %v13135_v57  ;;  %v11218_v57 = vld [vmem:[%s15149_s2 + $0x170] sm:$0xff]   ;;  %v11232_v29 = vld [vmem:[%s15149_s2 + $0x168] sm:$0xff]  }
 0x255   : > { %v3652_v17 = vmax.f32 %v3566_v59, 0.0  ;;  %v9820_v37 = vcombine.low %v3925_v40, %v3926_v0  ;;  %v5181_v60 = vor.u32 %v5180_v53, %v5177_v43  ;;  %v10841_v14 = vpop.f32.mrf.mxu0  ;;  %v9821_v27 = vcombine.low %v3927_v1, %v3927_v1  ;;  %v11220_v59 = vld [vmem:[%s15149_s2 + $0x130] sm:$0xff]  }
 0x256   : > { %v5172_v10 = vor.u32 %v5171_v56, %v5168_v44  ;;  %v4204_v13 = vshrl.u32 %v9787_v24, 16  ;;  %v4207_v63 = vshll.u32 %v9787_v24, 16  ;;  %3829 = vst [vmem:[#allocation2 + $0x84] sm:$0xf] %v10118_v51  ;;  %v3650_v38 = vmax.f32 %v3558_v45, 0.0 }
 0x257   : > { %v10121_v35 = vpack.c.bf16 %v3652_v17, %v3652_v17  ;;  %v13303_v55 = vcombine.low %v3926_v0, %v3927_v1  ;;  %8076 = vmatprep.mubr.bf16.mxu1 %v5181_v60  ;;  %v5330_v58 = vshrl.u32 %v9820_v37, 16  ;;  %v3570_v40 = vpop.f32.mrf.mxu0  ;;  %v5333_v47 = vshll.u32 %v9820_v37, 16 }
 0x258   : > { %v5173_v32 = vsel %vm5156_vm8, %v5164_v9, %v5172_v10  ;;  %v4206_v15 = vrot.slane %v4204_v13, 4  ;;  %v4209_v46 = vrot.slane %v4207_v63, 5  ;;  %v10119_v4 = vpack.c.bf16 %v3650_v38, %v3650_v38  ;;  %v3929_v63 = vld [vmem:[#allocation2 + $0x34] sm:$0xf] }
 0x259   : > { %3832 = vst [vmem:[#allocation2 + $0x98] sm:$0xf] %v10121_v35  ;;  %8077 = vmatmul.mubr.bf16.vlgmr.msra.gmra.mxu1 %v5173_v32  ;;  %v5338_v28 = vshrl.u32 %v9821_v27, 16  ;;  %v5341_v20 = vshll.u32 %v9821_v27, 16  ;;  %v5332_v0 = vrot.slane %v5330_v58, 3  ;;  %v3579_v36 = vadd.f32 %v10841_v14, %v13158_v54  ;;  %v10842_v23 = vpop.f32.mrf.mxu0  ;;  %v11246_v58 = vld [vmem:[%s15149_s2 + $0x160] sm:$0xff]  }
 0x25a   : > { %v4210_v44 = vor.u32 %v4209_v46, %v4206_v15  ;;  %10556 = vmatpush3.bf16.msra.mxu1 %v11206_v61  ;;  %v3571_v3 = vadd.f32 %v3570_v40, %v13150_v8  ;;  %3830 = vst [vmem:[#allocation2 + $0x88] sm:$0xf] %v10119_v4  ;;  %v5335_v9 = vrot.slane %v5333_v47, 4  ;;  %v4375_v56 = vrot.slane %v9787_v24, 5  ;;  %v3928_v8 = vld [vmem:[#allocation2 + $0x30] sm:$0x8] }
 0x25b   : > { %v5340_v43 = vrot.slane %v5338_v28, 3  ;;  %v5343_v53 = vrot.slane %v5341_v20, 4  ;;  %10557 = vmatprep.subr.bf16.mxu1 %v11218_v57  ;;  %v3655_v54 = vmax.f32 %v3579_v36, 0.0  ;;  %v15200_v60 = vrot.slane %v13221_v26, 5  ;;  %v3930_v61 = vld [vmem:[#allocation2 + $0x38] sm:$0xf]  ;;  %v3573_v24 = vpop.f32.mrf.mxu0 }
 0x25c   : > { %v5304_v1 = vshrl.u32 %v4210_v44, 16  ;;  %v5307_v51 = vshll.u32 %v4210_v44, 16  ;;  %v3653_v17 = vmax.f32 %v3571_v3, 0.0  ;;  %v5336_v45 = vor.u32 %v5335_v9, %v5332_v0  ;;  %v11234_v57 = vld [vmem:[%s15149_s2 + $0x128] sm:$0xff]  }
 0x25d   : > { %v5344_v37 = vor.u32 %v5343_v53, %v5340_v43  ;;  %v4377_v10 = vsel %vm4371_vm9, %v4375_v56, %v15200_v60  ;;  %v5313_v13 = vshrl.u32 %v4375_v56, 16  ;;  %v10124_v38 = vpack.c.bf16 %v3655_v54, %v3655_v54  ;;  %v10845_v3 = vpop.f32.mrf.mxu0  ;;  %v11271_v60 = vld [vmem:[%s15149_s2 + $0x1f0] sm:$0xff]  }
 0x25e   : > { %v5306_v14 = vrot.slane %v5304_v1, 3  ;;  %v5309_v35 = vrot.slane %v5307_v51, 4  ;;  %v10122_v27 = vpack.c.bf16 %v3653_v17, %v3653_v17  ;;  %10558 = vmatpush3.bf16.msra.mxu1 %v11220_v59  ;;  %v5316_v46 = vshll.u32 %v4375_v56, 16  ;;  %v11248_v56 = vld [vmem:[%s15149_s2 + $0x120] sm:$0xff]   ;;  %10669 = vmatprep.subr.bf16.mxu0 %v11271_v60 }
 0x25f   : > { %v5345_v32 = vsel %vm5156_vm8, %v5336_v45, %v5344_v37  ;;  %v5315_v15 = vrot.slane %v5313_v13, 3  ;;  %v5321_v26 = vshrl.u32 %v4377_v10, 16  ;;  %10559 = vmatprep.subr.bf16.mxu1 %v11232_v29  ;;  %3835 = vst [vmem:[#allocation2 + $0xb4] sm:$0xf] %v10124_v38  ;;  %v5324_v4 = vshll.u32 %v4377_v10, 16 }
 0x260   : > { %v5310_v40 = vor.u32 %v5309_v35, %v5306_v14  ;;  %8245 = vmatprep.mubr.bf16.mxu0 %v5345_v32  ;;  %3833 = vst [vmem:[#allocation2 + $0xa4] sm:$0xf] %v10122_v27  ;;  %v9822_v47 = vcombine.low %v3928_v8, %v3929_v63  ;;  %v9823_v28 = vcombine.low %v3930_v61, %v3930_v61  ;;  %v5318_v20 = vrot.slane %v5316_v46, 4  ;;  %v13338_v37 = vld [vmem:[#allocation2 + $0x28] sm:$0xf]  ;;  %v3586_v14 = vpop.f32.mrf.mxu0 }
 0x261   : > { %v5323_v44 = vrot.slane %v5321_v26, 3  ;;  %v13327_v0 = vcombine.low %v3929_v63, %v3930_v61  ;;  %v3582_v36 = vadd.f32 %v10842_v23, %v13161_v11  ;;  %v5326_v59 = vrot.slane %v5324_v4, 4  ;;  %v11262_v11 = vld [vmem:[%s15149_s2 + $0x158] sm:$0xff]   ;;  %v13347_v32 = vld [vmem:[#allocation2 + $0x24] sm:$0xf] }
 0x262   : > { %8084 = vmatprep.mubr.bf16.mxu1 %v5310_v40  ;;  %v5459_v9 = vshrl.u32 %v9822_v47, 16  ;;  %v5462_v43 = vshll.u32 %v9822_v47, 16  ;;  %v5467_v53 = vshrl.u32 %v9823_v28, 16  ;;  %10560 = vmatpush3.bf16.msra.mxu1 %v11234_v57  ;;  %v5319_v29 = vor.u32 %v5318_v20, %v5315_v15  ;;  %v11264_v15 = vld [vmem:[%s15149_s2 + $0x118] sm:$0xff]   ;;  %v3931_v40 = vld [vmem:[#allocation2 + $0x40] sm:$0x8] }
 0x263   : > { %v5470_v1 = vshll.u32 %v9823_v28, 16  ;;  %v3656_v51 = vmax.f32 %v3582_v36, 0.0  ;;  %v9757_v54 = vcombine.low %v13290_v12, %v13290_v12  ;;  %10561 = vmatprep.subr.bf16.mxu1 %v11246_v58  ;;  %v5327_v23 = vor.u32 %v5326_v59, %v5323_v44  ;;  %v3932_v44 = vld [vmem:[#allocation2 + $0x44] sm:$0xf]  ;;  %v11273_v36 = vld [vmem:[%s15149_s2 + $0x1b0] sm:$0xff]  }
 0x264   : > { %v5461_v17 = vrot.slane %v5459_v9, 3  ;;  %v5464_v8 = vrot.slane %v5462_v43, 4  ;;  %v5469_v45 = vrot.slane %v5467_v53, 3  ;;  %v15201_v63 = vshrl.u32 %v13249_v18, 16  ;;  %10670 = vmatpush3.bf16.msra.mxu0 %v11273_v36 }
 0x265   : > { %v5472_v10 = vrot.slane %v5470_v1, 4  ;;  %v10125_v13 = vpack.c.bf16 %v3656_v51, %v3656_v51  ;;  %v5290_v61 = vshll.u32 %v13249_v18, 16  ;;  %v5328_v35 = vsel %vm5156_vm8, %v5319_v29, %v5327_v23  ;;  %v3933_v1 = vld [vmem:[#allocation2 + $0x48] sm:$0xf]  ;;  %v10846_v51 = vpop.f32.mrf.mxu0 }
 0x266   : > { %v5289_v12 = vrot.slane %v15201_v63, 3  ;;  %v5465_v38 = vor.u32 %v5464_v8, %v5461_v17  ;;  %v5295_v27 = vshrl.u32 %v9757_v54, 16  ;;  %v5298_v57 = vshll.u32 %v9757_v54, 16  ;;  %10562 = vmatpush3.bf16.msra.mxu1 %v11248_v56  ;;  %8246 = vmatmul.mubr.bf16.gmra.mxu0 %v5328_v35 }
 0x267   : > { %v5473_v46 = vor.u32 %v5472_v10, %v5469_v45  ;;  %3836 = vst [vmem:[#allocation2 + $0xb8] sm:$0xf] %v10125_v13  ;;  %v5292_v26 = vrot.slane %v5290_v61, 4  ;;  %v3574_v18 = vadd.f32 %v3573_v24, %v13155_v48  ;;  %v9788_v58 = vcombine.low %v13347_v32, %v13338_v37  ;;  %10563 = vmatprep.subr.bf16.mxu1 %v11262_v11  ;;  %v11278_v11 = vld [vmem:[%s15149_s2 + $0x150] sm:$0xff]  }
 0x268   : > { %v5297_v4 = vrot.slane %v5295_v27, 3  ;;  %v5300_v47 = vrot.slane %v5298_v57, 4  ;;  %v3595_v28 = vadd.f32 %v10845_v3, %v13170_v31  ;;  %v3587_v20 = vadd.f32 %v3586_v14, %v13164_v6  ;;  %v3589_v27 = vpop.f32.mrf.mxu0 }
 0x269   : > { %v5474_v59 = vsel %vm5156_vm8, %v5465_v38, %v5473_v46  ;;  %v5293_v9 = vor.u32 %v5292_v26, %v5289_v12  ;;  %v3654_v48 = vmax.f32 %v3574_v18, 0.0  ;;  %v4212_v24 = vshrl.u32 %v9788_v58, 16 }
 0x26a   : > { %8253 = vmatprep.mubr.bf16.mxu0 %v5474_v59  ;;  %v5301_v43 = vor.u32 %v5300_v47, %v5297_v4  ;;  %v4215_v53 = vshll.u32 %v9788_v58, 16  ;;  %v3659_v56 = vmax.f32 %v3595_v28, 0.0  ;;  %v3657_v29 = vmax.f32 %v3587_v20, 0.0  ;;  %10564 = vmatpush3.bf16.msra.mxu1 %v11264_v15  ;;  %v3863_v4 = vld [vmem:[#allocation2 + $0x20] sm:$0x8] }
 0x26b   : > { %v10123_v31 = vpack.c.bf16 %v3654_v48, %v3654_v48  ;;  %v4214_v6 = vrot.slane %v4212_v24, 4  ;;  %v4378_v3 = vrot.slane %v9788_v58, 5  ;;  %v9824_v54 = vcombine.low %v3931_v40, %v3932_v44  ;;  %10565 = vmatprep.subr.bf16.mxu1 %v11278_v11 }
 0x26c   : > { %v5302_v23 = vsel %vm5156_vm8, %v5293_v9, %v5301_v43  ;;  %v4217_v17 = vrot.slane %v4215_v53, 5  ;;  %v10128_v8 = vpack.c.bf16 %v3659_v56, %v3659_v56  ;;  %v10126_v45 = vpack.c.bf16 %v3657_v29, %v3657_v29 }
 0x26d   : > { %8085 = vmatmul.mubr.bf16.gmra.mxu1 %v5302_v23  ;;  %3834 = vst [vmem:[#allocation2 + $0xa8] sm:$0xf] %v10123_v31  ;;  %v15202_v60 = vrot.slane %v13225_v7, 5  ;;  %v5442_v13 = vshrl.u32 %v4378_v3, 16  ;;  %v5445_v63 = vshll.u32 %v4378_v3, 16  ;;  %v9825_v12 = vcombine.low %v3933_v1, %v3933_v1  ;;  %v11280_v31 = vld [vmem:[%s15149_s2 + $0x110] sm:$0xff]  }
 0x26e   : > { %v4218_v61 = vor.u32 %v4217_v17, %v4214_v6  ;;  %3839 = vst [vmem:[#allocation2 + $0xd4] sm:$0xf] %v10128_v8  ;;  %3837 = vst [vmem:[#allocation2 + $0xc4] sm:$0xf] %v10126_v45  ;;  %v13368_v38 = vcombine.low %v3932_v44, %v3933_v1  ;;  %v5588_v46 = vshrl.u32 %v9824_v54, 16  ;;  %v5591_v26 = vshll.u32 %v9824_v54, 16  ;;  %v10849_v44 = vpop.f32.mrf.mxu0  ;;  %10566 = vmatpush3.bf16.msra.mxu1 %v11280_v31 }
 0x26f   : > { %v4380_v10 = vsel %vm4371_vm9, %v4378_v3, %v15202_v60  ;;  %v5444_v57 = vrot.slane %v5442_v13, 3  ;;  %v5447_v15 = vrot.slane %v5445_v63, 4  ;;  %v5596_v36 = vshrl.u32 %v9825_v12, 16  ;;  %v13372_v1 = vld [vmem:[#allocation2 + $0x38] sm:$0xf] }
 0x270   : > { %v5450_v14 = vshrl.u32 %v4380_v10, 16  ;;  %v5453_v35 = vshll.u32 %v4380_v10, 16  ;;  %v5433_v18 = vshrl.u32 %v4218_v61, 16  ;;  %v5436_v7 = vshll.u32 %v4218_v61, 16  ;;  %v3602_v13 = vpop.f32.mrf.mxu0  ;;  %v3934_v63 = vld [vmem:[#allocation2 + $0x50] sm:$0x8] }
 0x271   : > { %v5448_v47 = vor.u32 %v5447_v15, %v5444_v57  ;;  %v5590_v28 = vrot.slane %v5588_v46, 3  ;;  %v5593_v20 = vrot.slane %v5591_v26, 4  ;;  %v5599_v24 = vshll.u32 %v9825_v12, 16  ;;  %v3936_v46 = vld [vmem:[#allocation2 + $0x58] sm:$0xf] }
 0x272   : > { %v5452_v58 = vrot.slane %v5450_v14, 3  ;;  %v5455_v40 = vrot.slane %v5453_v35, 4  ;;  %v5435_v59 = vrot.slane %v5433_v18, 3  ;;  %v5438_v9 = vrot.slane %v5436_v7, 4  ;;  %v3935_v35 = vld [vmem:[#allocation2 + $0x54] sm:$0xf] }
 0x273   : > { %v5594_v43 = vor.u32 %v5593_v20, %v5590_v28  ;;  %v5598_v53 = vrot.slane %v5596_v36, 3  ;;  %v3598_v56 = vadd.f32 %v10846_v51, %v13177_v42  ;;  %v9758_v29 = vcombine.low %v3863_v4, %v13347_v32  ;;  %v13381_v32 = vld [vmem:[#allocation2 + $0x34] sm:$0xf]  ;;  %v10850_v20 = vpop.f32.mrf.mxu0 }
 0x274   : > { %v5456_v48 = vor.u32 %v5455_v40, %v5452_v58  ;;  %v5439_v6 = vor.u32 %v5438_v9, %v5435_v59  ;;  %v5601_v54 = vrot.slane %v5599_v24, 4  ;;  %v9759_v11 = vcombine.low %v13338_v37, %v13338_v37 }
 0x275   : > { %v3660_v23 = vmax.f32 %v3598_v56, 0.0  ;;  %v5416_v17 = vshrl.u32 %v9758_v29, 16  ;;  %v5419_v8 = vshll.u32 %v9758_v29, 16  ;;  %v3590_v42 = vadd.f32 %v3589_v27, %v13167_v33 }
 0x276   : > { %v5457_v3 = vsel %vm5156_vm8, %v5448_v47, %v5456_v48  ;;  %8092 = vmatprep.mubr.bf16.mxu1 %v5439_v6  ;;  %v5602_v51 = vor.u32 %v5601_v54, %v5598_v53  ;;  %v5424_v45 = vshrl.u32 %v9759_v11, 16  ;;  %v5427_v60 = vshll.u32 %v9759_v11, 16 }
 0x277   : > { %8254 = vmatmul.mubr.bf16.gmra.mxu0 %v5457_v3  ;;  %v9789_v10 = vcombine.low %v13381_v32, %v13372_v1  ;;  %v10129_v12 = vpack.c.bf16 %v3660_v23, %v3660_v23  ;;  %v5418_v37 = vrot.slane %v5416_v17, 3  ;;  %v5421_v61 = vrot.slane %v5419_v8, 4  ;;  %v3605_v23 = vpop.f32.mrf.mxu0  ;;  %v11287_v17 = vld [vmem:[%s15149_s2 + $0x1e8] sm:$0xff]  }
 0x278   : > { %v3658_v14 = vmax.f32 %v3590_v42, 0.0  ;;  %v5603_v57 = vsel %vm5156_vm8, %v5594_v43, %v5602_v51  ;;  %v5426_v33 = vrot.slane %v5424_v45, 3  ;;  %v5429_v27 = vrot.slane %v5427_v60, 4  ;;  %10671 = vmatprep.subr.bf16.mxu0 %v11287_v17  ;;  %v11294_v17 = vld [vmem:[%s15149_s2 + $0x148] sm:$0xff]  }
 0x279   : > { %v4220_v15 = vshrl.u32 %v9789_v10, 16  ;;  %8261 = vmatprep.mubr.bf16.mxu0 %v5603_v57  ;;  %3840 = vst [vmem:[#allocation2 + $0xd8] sm:$0xf] %v10129_v12  ;;  %v5422_v26 = vor.u32 %v5421_v61, %v5418_v37  ;;  %v4223_v7 = vshll.u32 %v9789_v10, 16  ;;  %v3611_v58 = vadd.f32 %v10849_v44, %v13190_v49  ;;  %10567 = vmatprep.subr.bf16.mxu1 %v11294_v17 }
 0x27a   : > { %v10127_v18 = vpack.c.bf16 %v3658_v14, %v3658_v14  ;;  %v5430_v40 = vor.u32 %v5429_v27, %v5426_v33  ;;  %v3603_v47 = vadd.f32 %v3602_v13, %v13182_v19  ;;  %v4381_v28 = vrot.slane %v9789_v10, 5 }
 0x27b   : > { %v4222_v4 = vrot.slane %v4220_v15, 4  ;;  %v4225_v36 = vrot.slane %v4223_v7, 5  ;;  %v3663_v59 = vmax.f32 %v3611_v58, 0.0  ;;  %v9826_v9 = vcombine.low %v3934_v63, %v3935_v35  ;;  %v3866_v63 = vld [vmem:[#allocation2 + $0x30] sm:$0x8]  ;;  %v10853_v15 = vpop.f32.mrf.mxu0 }
 0x27c   : > { %3838 = vst [vmem:[#allocation2 + $0xc8] sm:$0xf] %v10127_v18  ;;  %v9827_v48 = vcombine.low %v3936_v46, %v3936_v46  ;;  %v5431_v24 = vsel %vm5156_vm8, %v5422_v26, %v5430_v40  ;;  %v3661_v43 = vmax.f32 %v3603_v47, 0.0  ;;  %v15203_v53 = vrot.slane %v13228_v22, 5  ;;  %v13399_v58 = vld [vmem:[#allocation2 + $0x48] sm:$0xf] }
 0x27d   : > { %v5571_v29 = vshrl.u32 %v4381_v28, 16  ;;  %8093 = vmatmul.mubr.bf16.gmra.mxu1 %v5431_v24  ;;  %v4226_v49 = vor.u32 %v4225_v36, %v4222_v4  ;;  %v10132_v44 = vpack.c.bf16 %v3663_v59, %v3663_v59  ;;  %v5574_v31 = vshll.u32 %v4381_v28, 16  ;;  %v13405_v24 = vld [vmem:[#allocation2 + $0x44] sm:$0xf] }
 0x27e   : > { %v4383_v56 = vsel %vm4371_vm9, %v4381_v28, %v15203_v53  ;;  %v10130_v6 = vpack.c.bf16 %v3661_v43, %v3661_v43  ;;  %v13392_v11 = vcombine.low %v3935_v35, %v3936_v46  ;;  %v5717_v60 = vshrl.u32 %v9826_v9, 16  ;;  %v3618_v53 = vpop.f32.mrf.mxu0 }
 0x27f   : > { %v5579_v19 = vshrl.u32 %v4383_v56, 16  ;;  %v5573_v3 = vrot.slane %v5571_v29, 3  ;;  %v5582_v54 = vshll.u32 %v4383_v56, 16  ;;  %v5562_v8 = vshrl.u32 %v4226_v49, 16  ;;  %3843 = vst [vmem:[#allocation2 + $0xf4] sm:$0xf] %v10132_v44 }
 0x280   : > { %v5565_v22 = vshll.u32 %v4226_v49, 16  ;;  %v5576_v42 = vrot.slane %v5574_v31, 4  ;;  %3841 = vst [vmem:[#allocation2 + $0xe4] sm:$0xf] %v10130_v6  ;;  %v5720_v10 = vshll.u32 %v9826_v9, 16  ;;  %v5725_v13 = vshrl.u32 %v9827_v48, 16 }
 0x281   : > { %v5581_v51 = vrot.slane %v5579_v19, 3  ;;  %v5584_v45 = vrot.slane %v5582_v54, 4  ;;  %v5564_v12 = vrot.slane %v5562_v8, 3  ;;  %v5728_v14 = vshll.u32 %v9827_v48, 16  ;;  %v3937_v56 = vld [vmem:[#allocation2 + $0x60] sm:$0x8] }
 0x282   : > { %v5567_v37 = vrot.slane %v5565_v22, 4  ;;  %v5577_v61 = vor.u32 %v5576_v42, %v5573_v3  ;;  %v5719_v57 = vrot.slane %v5717_v60, 3  ;;  %v5722_v33 = vrot.slane %v5720_v10, 4  ;;  %v3938_v44 = vld [vmem:[#allocation2 + $0x64] sm:$0xf]  ;;  %v11289_v31 = vld [vmem:[%s15149_s2 + $0x1a8] sm:$0xff]  }
 0x283   : > { %v5585_v35 = vor.u32 %v5584_v45, %v5581_v51  ;;  %v5727_v27 = vrot.slane %v5725_v13, 3  ;;  %v5730_v26 = vrot.slane %v5728_v14, 4  ;;  %v3614_v18 = vadd.f32 %v10850_v20, %v13193_v41  ;;  %10672 = vmatpush3.bf16.msra.mxu0 %v11289_v31  ;;  %v11296_v14 = vld [vmem:[%s15149_s2 + $0x108] sm:$0xff]  }
 0x284   : > { %v5568_v46 = vor.u32 %v5567_v37, %v5564_v12  ;;  %v9760_v7 = vcombine.low %v3866_v63, %v13381_v32  ;;  %v5723_v4 = vor.u32 %v5722_v33, %v5719_v57  ;;  %v9761_v47 = vcombine.low %v13372_v1, %v13372_v1  ;;  %10568 = vmatpush3.bf16.msra.mxu1 %v11296_v14 }
 0x285   : > { %v5586_v40 = vsel %vm5156_vm8, %v5577_v61, %v5585_v35  ;;  %v3606_v28 = vadd.f32 %v3605_v23, %v13187_v25  ;;  %v5731_v36 = vor.u32 %v5730_v26, %v5727_v27  ;;  %v3664_v59 = vmax.f32 %v3614_v18, 0.0  ;;  %v3939_v23 = vld [vmem:[#allocation2 + $0x68] sm:$0xf]  ;;  %v10854_v18 = vpop.f32.mrf.mxu0 }
 0x286   : > { %8100 = vmatprep.mubr.bf16.mxu1 %v5568_v46  ;;  %8262 = vmatmul.mubr.bf16.gmra.mxu0 %v5586_v40  ;;  %v5545_v9 = vshrl.u32 %v9760_v7, 16  ;;  %v5548_v48 = vshll.u32 %v9760_v7, 16  ;;  %v5553_v41 = vshrl.u32 %v9761_v47, 16  ;;  %v5556_v32 = vshll.u32 %v9761_v47, 16 }
 0x287   : > { %v3662_v20 = vmax.f32 %v3606_v28, 0.0  ;;  %v9790_v43 = vcombine.low %v13405_v24, %v13399_v58  ;;  %v5732_v1 = vsel %vm5156_vm8, %v5723_v4, %v5731_v36  ;;  %v10133_v29 = vpack.c.bf16 %v3664_v59, %v3664_v59 }
 0x288   : > { %v5547_v25 = vrot.slane %v5545_v9, 3  ;;  %v5550_v49 = vrot.slane %v5548_v48, 4  ;;  %8269 = vmatprep.mubr.bf16.mxu0 %v5732_v1  ;;  %v5555_v19 = vrot.slane %v5553_v41, 3  ;;  %v5558_v6 = vrot.slane %v5556_v32, 4 }
 0x289   : > { %v10131_v3 = vpack.c.bf16 %v3662_v20, %v3662_v20  ;;  %v4228_v54 = vshrl.u32 %v9790_v43, 16  ;;  %3844 = vst [vmem:[#allocation2 + $0xf8] sm:$0xf] %v10133_v29  ;;  %v4231_v22 = vshll.u32 %v9790_v43, 16  ;;  %v3627_v42 = vadd.f32 %v10853_v15, %v13206_v30  ;;  %v3869_v20 = vld [vmem:[#allocation2 + $0x40] sm:$0x8]  ;;  %v3621_v29 = vpop.f32.mrf.mxu0 }
 0x28a   : > { %v5551_v8 = vor.u32 %v5550_v49, %v5547_v25  ;;  %v3619_v51 = vadd.f32 %v3618_v53, %v13196_v50  ;;  %v5559_v45 = vor.u32 %v5558_v6, %v5555_v19  ;;  %v4384_v10 = vrot.slane %v9790_v43, 5 }
 0x28b   : > { %3842 = vst [vmem:[#allocation2 + $0xe8] sm:$0xf] %v10131_v3  ;;  %v4230_v60 = vrot.slane %v4228_v54, 4  ;;  %v9828_v13 = vcombine.low %v3937_v56, %v3938_v44  ;;  %v4233_v63 = vrot.slane %v4231_v22, 5  ;;  %v3667_v12 = vmax.f32 %v3627_v42, 0.0 }
 0x28c   : > { %v3665_v37 = vmax.f32 %v3619_v51, 0.0  ;;  %v9829_v61 = vcombine.low %v3939_v23, %v3939_v23  ;;  %v5560_v35 = vsel %vm5156_vm8, %v5551_v8, %v5559_v45  ;;  %v15204_v30 = vrot.slane %v13230_v5, 5  ;;  %v3940_v51 = vld [vmem:[#allocation2 + $0x70] sm:$0x8] }
 0x28d   : > { %v5700_v57 = vshrl.u32 %v4384_v10, 16  ;;  %v5703_v33 = vshll.u32 %v4384_v10, 16  ;;  %8101 = vmatmul.mubr.bf16.gmra.mxu1 %v5560_v35  ;;  %v4234_v27 = vor.u32 %v4233_v63, %v4230_v60  ;;  %v10136_v15 = vpack.c.bf16 %v3667_v12, %v3667_v12 }
 0x28e   : > { %v4386_v50 = vsel %vm4371_vm9, %v4384_v10, %v15204_v30  ;;  %v10134_v46 = vpack.c.bf16 %v3665_v37, %v3665_v37  ;;  %v13425_v47 = vcombine.low %v3938_v44, %v3939_v23  ;;  %v5846_v59 = vshrl.u32 %v9828_v13, 16  ;;  %v13432_v23 = vld [vmem:[#allocation2 + $0x58] sm:$0xf]  ;;  %v3941_v37 = vld [vmem:[#allocation2 + $0x74] sm:$0xf] }
 0x28f   : > { %v5708_v26 = vshrl.u32 %v4386_v50, 16  ;;  %v5702_v7 = vrot.slane %v5700_v57, 3  ;;  %v5705_v40 = vrot.slane %v5703_v33, 4  ;;  %v5711_v4 = vshll.u32 %v4386_v50, 16  ;;  %3847 = vst [vmem:[#allocation2 + $0x114] sm:$0xf] %v10136_v15 }
 0x290   : > { %v5691_v28 = vshrl.u32 %v4234_v27, 16  ;;  %v5694_v36 = vshll.u32 %v4234_v27, 16  ;;  %3845 = vst [vmem:[#allocation2 + $0x104] sm:$0xf] %v10134_v46  ;;  %3855 = vst [vmem:[#allocation2 + $0x114] sm:$0xf] %v15196_v34  ;;  %v3630_v31 = vadd.f32 %v10854_v18, %v13213_v39  ;;  %v9762_v3 = vcombine.low %v3869_v20, %v13405_v24 }
 0x291   : > { %v5710_v5 = vrot.slane %v5708_v26, 3  ;;  %v5706_v9 = vor.u32 %v5705_v40, %v5702_v7  ;;  %v5713_v48 = vrot.slane %v5711_v4, 4  ;;  %v5849_v41 = vshll.u32 %v9828_v13, 16  ;;  %v3873_v13 = vld [vmem:[#allocation2 + $0x54] sm:$0xf]  ;;  %v11303_v7 = vld [vmem:[%s15149_s2 + $0x1e0] sm:$0xff]  }
 0x292   : > { %v5854_v32 = vshrl.u32 %v9829_v61, 16  ;;  %v5693_v43 = vrot.slane %v5691_v28, 3  ;;  %v5696_v53 = vrot.slane %v5694_v36, 4  ;;  %v5848_v56 = vrot.slane %v5846_v59, 3  ;;  %v11304_v40 = vld [vmem:[%s15149_s2 + $0x1a0] sm:$0xff]   ;;  %10673 = vmatprep.subr.bf16.mxu0 %v11303_v7 }
 0x293   : > { %v5857_v1 = vshll.u32 %v9829_v61, 16  ;;  %v5714_v25 = vor.u32 %v5713_v48, %v5710_v5  ;;  %v5851_v49 = vrot.slane %v5849_v41, 4  ;;  %v9763_v54 = vcombine.low %v13399_v58, %v13399_v58  ;;  %v3942_v61 = vld [vmem:[#allocation2 + $0x78] sm:$0xf]  ;;  %10674 = vmatpush3.bf16.msra.mxu0 %v11304_v40 }
 0x294   : > { %v5856_v44 = vrot.slane %v5854_v32, 3  ;;  %v5697_v19 = vor.u32 %v5696_v53, %v5693_v43  ;;  %v3668_v22 = vmax.f32 %v3630_v31, 0.0  ;;  %v3622_v42 = vadd.f32 %v3621_v29, %v13199_v2 }
 0x295   : > { %v5859_v6 = vrot.slane %v5857_v1, 4  ;;  %v5715_v17 = vsel %vm5156_vm8, %v5706_v9, %v5714_v25  ;;  %v5852_v8 = vor.u32 %v5851_v49, %v5848_v56  ;;  %v5674_v39 = vshrl.u32 %v9762_v3, 16  ;;  %v3872_v49 = vld [vmem:[#allocation2 + $0x50] sm:$0x8] }
 0x296   : > { %8108 = vmatprep.mubr.bf16.mxu1 %v5697_v19  ;;  %8270 = vmatmul.mubr.bf16.gmra.mxu0 %v5715_v17  ;;  %v5677_v60 = vshll.u32 %v9762_v3, 16  ;;  %v5682_v10 = vshrl.u32 %v9763_v54, 16  ;;  %v10137_v24 = vpack.c.bf16 %v3668_v22, %v3668_v22  ;;  %v5685_v63 = vshll.u32 %v9763_v54, 16  ;;  %v3943_v22 = vld [vmem:[#allocation2 + $0x80] sm:$0x8] }
 0x297   : > { %v5860_v45 = vor.u32 %v5859_v6, %v5856_v44  ;;  %v3666_v12 = vmax.f32 %v3622_v42, 0.0  ;;  %v9791_v58 = vcombine.low %v3873_v13, %v13432_v23  ;;  %v5676_v35 = vrot.slane %v5674_v39, 3 }
 0x298   : > { %v5679_v30 = vrot.slane %v5677_v60, 4  ;;  %v5684_v2 = vrot.slane %v5682_v10, 3  ;;  %3848 = vst [vmem:[#allocation2 + $0x118] sm:$0xf] %v10137_v24  ;;  %v5687_v50 = vrot.slane %v5685_v63, 4  ;;  %v9830_v26 = vcombine.low %v3940_v51, %v3941_v37  ;;  %v11306_v10 = vld [vmem:[%s15149_s2 + $0x1d8] sm:$0xff]  }
 0x299   : > { %v5861_v14 = vsel %vm5156_vm8, %v5852_v8, %v5860_v45  ;;  %v10135_v57 = vpack.c.bf16 %v3666_v12, %v3666_v12  ;;  %v4236_v33 = vshrl.u32 %v9791_v58, 16  ;;  %v4239_v27 = vshll.u32 %v9791_v58, 16  ;;  %3856 = vst [vmem:[#allocation2 + $0x118] sm:$0xf] %v15196_v34  ;;  %v13451_v8 = vld [vmem:[#allocation2 + $0x68] sm:$0xf]  ;;  %10675 = vmatprep.subr.bf16.mxu0 %v11306_v10 }
 0x29a   : > { %8277 = vmatprep.mubr.bf16.mxu0 %v5861_v14  ;;  %v5680_v15 = vor.u32 %v5679_v30, %v5676_v35  ;;  %v4387_v46 = vrot.slane %v9791_v58, 5  ;;  %v9831_v18 = vcombine.low %v3942_v61, %v3942_v61  ;;  %v5688_v4 = vor.u32 %v5687_v50, %v5684_v2  ;;  %v3944_v60 = vld [vmem:[#allocation2 + $0x84] sm:$0xf] }
 0x29b   : > { %3846 = vst [vmem:[#allocation2 + $0x108] sm:$0xf] %v10135_v57  ;;  %v4238_v28 = vrot.slane %v4236_v33, 4  ;;  %v4241_v36 = vrot.slane %v4239_v27, 5  ;;  %v13445_v5 = vcombine.low %v3941_v37, %v3942_v61  ;;  %v15205_v34 = vrot.slane %v13234_v52, 5  ;;  %v11310_v61 = vld [vmem:[%s15149_s2 + $0x198] sm:$0xff]  }
 0x29c   : > { %v5829_v9 = vshrl.u32 %v4387_v46, 16  ;;  %v5832_v48 = vshll.u32 %v4387_v46, 16  ;;  %v5975_v41 = vshrl.u32 %v9830_v26, 16  ;;  %v5689_v32 = vsel %vm5156_vm8, %v5680_v15, %v5688_v4  ;;  %v3945_v37 = vld [vmem:[#allocation2 + $0x88] sm:$0xf]  ;;  %10676 = vmatpush3.bf16.msra.mxu0 %v11310_v61 }
 0x29d   : > { %v4389_v59 = vsel %vm4371_vm9, %v4387_v46, %v15205_v34  ;;  %v4242_v20 = vor.u32 %v4241_v36, %v4238_v28  ;;  %8109 = vmatmul.mubr.bf16.gmra.mxu1 %v5689_v32  ;;  %v5978_v25 = vshll.u32 %v9830_v26, 16  ;;  %v5983_v54 = vshrl.u32 %v9831_v18, 16  ;;  %v3876_v50 = vld [vmem:[#allocation2 + $0x64] sm:$0xf] }
 0x29e   : > { %v5837_v43 = vshrl.u32 %v4389_v59, 16  ;;  %v5840_v53 = vshll.u32 %v4389_v59, 16  ;;  %v5831_v56 = vrot.slane %v5829_v9, 3  ;;  %v5834_v1 = vrot.slane %v5832_v48, 4 }
 0x29f   : > { %v5977_v29 = vrot.slane %v5975_v41, 3  ;;  %v5820_v44 = vshrl.u32 %v4242_v20, 16  ;;  %v5823_v52 = vshll.u32 %v4242_v20, 16  ;;  %v5980_v3 = vrot.slane %v5978_v25, 4  ;;  %v11314_v25 = vld [vmem:[%s15149_s2 + $0x100] sm:$0xff]  }
 0x2a0   : > { %v5839_v31 = vrot.slane %v5837_v43, 3  ;;  %v5842_v19 = vrot.slane %v5840_v53, 4  ;;  %v5835_v6 = vor.u32 %v5834_v1, %v5831_v56  ;;  %v5986_v17 = vshll.u32 %v9831_v18, 16 }
 0x2a1   : > { %v5822_v42 = vrot.slane %v5820_v44, 3  ;;  %v5825_v51 = vrot.slane %v5823_v52, 4  ;;  %v9764_v39 = vcombine.low %v3872_v49, %v3873_v13  ;;  %v5981_v24 = vor.u32 %v5980_v3, %v5977_v29  ;;  %v11312_v13 = vld [vmem:[%s15149_s2 + $0x140] sm:$0xff]   ;;  %v11315_v49 = vld [vmem:[%s15149_s2 + $0x1d0] sm:$0xff]  }
 0x2a2   : > { %v5843_v45 = vor.u32 %v5842_v19, %v5839_v31  ;;  %v5985_v63 = vrot.slane %v5983_v54, 3  ;;  %v5988_v12 = vrot.slane %v5986_v17, 4  ;;  %v9765_v58 = vcombine.low %v13432_v23, %v13432_v23  ;;  %10569 = vmatprep.subr.bf16.mxu1 %v11312_v13  ;;  %v11316_v44 = vld [vmem:[%s15149_s2 + $0x190] sm:$0xff]   ;;  %10677 = vmatprep.subr.bf16.mxu0 %v11315_v49 }
 0x2a3   : > { %v5826_v14 = vor.u32 %v5825_v51, %v5822_v42  ;;  %v5803_v30 = vshrl.u32 %v9764_v39, 16  ;;  %v5806_v2 = vshll.u32 %v9764_v39, 16  ;;  %v9792_v27 = vcombine.low %v3876_v50, %v13451_v8  ;;  %10570 = vmatpush3.bf16.msra.mxu1 %v11314_v25  ;;  %10678 = vmatpush3.bf16.msra.mxu0 %v11316_v44  ;;  %v11323_v25 = vld [vmem:[%s15149_s2 + $0x1c0] sm:$0xff]  }
 0x2a4   : > { %v5844_v35 = vsel %vm5156_vm8, %v5835_v6, %v5843_v45  ;;  %v5989_v57 = vor.u32 %v5988_v12, %v5985_v63  ;;  %v5811_v33 = vshrl.u32 %v9765_v58, 16  ;;  %v5814_v23 = vshll.u32 %v9765_v58, 16  ;;  %v15207_v44 = vld [vmem:[#allocation3_spill] sm:$0xff] }
 0x2a5   : > { %8278 = vmatmul.mubr.bf16.gmra.mxu0 %v5844_v35  ;;  %8116 = vmatprep.mubr.bf16.mxu1 %v5826_v14  ;;  %v5805_v15 = vrot.slane %v5803_v30, 3  ;;  %v5808_v46 = vrot.slane %v5806_v2, 4  ;;  %v9832_v26 = vcombine.low %v3943_v22, %v3944_v60  ;;  %v9833_v18 = vcombine.low %v3945_v37, %v3945_v37  ;;  %v3875_v22 = vld [vmem:[#allocation2 + $0x60] sm:$0x8]  ;;  %v13484_v14 = vld [vmem:[#allocation2 + $0x74] sm:$0xf] }
 0x2a6   : > { %v5990_v7 = vsel %vm5156_vm8, %v5981_v24, %v5989_v57  ;;  %v5813_v40 = vrot.slane %v5811_v33, 3  ;;  %v5816_v4 = vrot.slane %v5814_v23, 4  ;;  %v4244_v28 = vshrl.u32 %v9792_v27, 16 }
 0x2a7   : > { %8285 = vmatprep.mubr.bf16.mxu0 %v5990_v7  ;;  %v5809_v36 = vor.u32 %v5808_v46, %v5805_v15  ;;  %v4247_v34 = vshll.u32 %v9792_v27, 16  ;;  %v4390_v59 = vrot.slane %v9792_v27, 5  ;;  %v13467_v9 = vcombine.low %v3944_v60, %v3945_v37  ;;  %v13482_v60 = vld [vmem:[#allocation2 + $0x78] sm:$0xf]  ;;  %v3946_v46 = vld [vmem:[#allocation2 + $0x90] sm:$0x8] }
 0x2a8   : > { %v5817_v48 = vor.u32 %v5816_v4, %v5813_v40  ;;  %v4246_v41 = vrot.slane %v4244_v28, 4  ;;  %v6104_v32 = vshrl.u32 %v9832_v26, 16  ;;  %v6107_v20 = vshll.u32 %v9832_v26, 16  ;;  %v3947_v26 = vld [vmem:[#allocation2 + $0x94] sm:$0xf] }
 0x2a9   : > { %v4249_v43 = vrot.slane %v4247_v34, 5  ;;  %v15206_v53 = vrot.slane %v13236_v21, 5  ;;  %v5958_v1 = vshrl.u32 %v4390_v59, 16  ;;  %v5961_v29 = vshll.u32 %v4390_v59, 16  ;;  %v3948_v4 = vld [vmem:[#allocation2 + $0x98] sm:$0xf] }
 0x2aa   : > { %v5818_v52 = vsel %vm5156_vm8, %v5809_v36, %v5817_v48  ;;  %v6106_v19 = vrot.slane %v6104_v32, 3  ;;  %v6109_v17 = vrot.slane %v6107_v20, 4  ;;  %v6112_v45 = vshrl.u32 %v9833_v18, 16  ;;  %v11319_v48 = vld [vmem:[%s15149_s2 + $0x188] sm:$0xff]  }
 0x2ab   : > { %v4392_v56 = vsel %vm4371_vm9, %v4390_v59, %v15206_v53  ;;  %8117 = vmatmul.mubr.bf16.gmra.mxu1 %v5818_v52  ;;  %v4250_v6 = vor.u32 %v4249_v43, %v4246_v41  ;;  %v5960_v3 = vrot.slane %v5958_v1, 3  ;;  %v5963_v54 = vrot.slane %v5961_v29, 4  ;;  %v11318_v59 = vld [vmem:[%s15149_s2 + $0x1c8] sm:$0xff]  }
 0x2ac   : > { %v5966_v31 = vshrl.u32 %v4392_v56, 16  ;;  %v5969_v21 = vshll.u32 %v4392_v56, 16  ;;  %v6115_v39 = vshll.u32 %v9833_v18, 16  ;;  %v6110_v12 = vor.u32 %v6109_v17, %v6106_v19  ;;  %10679 = vmatprep.subr.bf16.mxu0 %v11318_v59 }
 0x2ad   : > { %v5949_v10 = vshrl.u32 %v4250_v6, 16  ;;  %v5952_v24 = vshll.u32 %v4250_v6, 16  ;;  %v5964_v63 = vor.u32 %v5963_v54, %v5960_v3  ;;  %v6114_v37 = vrot.slane %v6112_v45, 3  ;;  %10680 = vmatpush3.bf16.msra.mxu0 %v11319_v48  ;;  %v11324_v6 = vld [vmem:[%s15149_s2 + $0x180] sm:$0xff]  }
 0x2ae   : > { %v5968_v42 = vrot.slane %v5966_v31, 3  ;;  %v5971_v51 = vrot.slane %v5969_v21, 4  ;;  %v6117_v61 = vrot.slane %v6115_v39, 4  ;;  %v9766_v13 = vcombine.low %v3875_v22, %v3876_v50  ;;  %10681 = vmatprep.subr.bf16.mxu0 %v11323_v25 }
 0x2af   : > { %v5951_v35 = vrot.slane %v5949_v10, 3  ;;  %v5954_v30 = vrot.slane %v5952_v24, 4  ;;  %v9767_v2 = vcombine.low %v13451_v8, %v13451_v8  ;;  %v9793_v57 = vcombine.low %v13484_v14, %v13482_v60 }
 0x2b0   : > { %v5972_v58 = vor.u32 %v5971_v51, %v5968_v42  ;;  %v6118_v23 = vor.u32 %v6117_v61, %v6114_v37  ;;  %v5932_v27 = vshrl.u32 %v9766_v13, 16  ;;  %v5935_v15 = vshll.u32 %v9766_v13, 16 }
 0x2b1   : > { %v5955_v18 = vor.u32 %v5954_v30, %v5951_v35  ;;  %v5940_v50 = vshrl.u32 %v9767_v2, 16  ;;  %v5943_v7 = vshll.u32 %v9767_v2, 16  ;;  %v4252_v40 = vshrl.u32 %v9793_v57, 16  ;;  %v3883_v30 = vld [vmem:[#allocation2 + $0x88] sm:$0xf]  ;;  %10682 = vmatpush3.bf16.msra.mxu0 %v11324_v6 }
 0x2b2   : > { %v5973_v33 = vsel %vm5156_vm8, %v5964_v63, %v5972_v58  ;;  %v6119_v28 = vsel %vm5156_vm8, %v6110_v12, %v6118_v23  ;;  %v5934_v36 = vrot.slane %v5932_v27, 3  ;;  %v5937_v8 = vrot.slane %v5935_v15, 4  ;;  %v3878_v58 = vld [vmem:[#allocation2 + $0x70] sm:$0x8] }
 0x2b3   : > { %8286 = vmatmul.mubr.bf16.gmra.mxu0 %v5973_v33  ;;  %v4255_v34 = vshll.u32 %v9793_v57, 16  ;;  %8124 = vmatprep.mubr.bf16.mxu1 %v5955_v18  ;;  %v5942_v41 = vrot.slane %v5940_v50, 3  ;;  %v5945_v32 = vrot.slane %v5943_v7, 4  ;;  %v4254_v20 = vrot.slane %v4252_v40, 4  ;;  %v3882_v18 = vld [vmem:[#allocation2 + $0x84] sm:$0xf] }
 0x2b4   : > { %8293 = vmatprep.mubr.bf16.mxu0 %v6119_v28  ;;  %v4393_v43 = vrot.slane %v9793_v57, 5  ;;  %v5938_v53 = vor.u32 %v5937_v8, %v5934_v36  ;;  %v9834_v1 = vcombine.low %v3946_v46, %v3947_v26  ;;  %v9835_v29 = vcombine.low %v3948_v4, %v3948_v4  ;;  %v340_v28 = vld [vmem:[#allocation2 + $0x8c] sm:$0x1]  ;;  %v11328_v36 = vld [vmem:[%s15149_s2 + $0x238] sm:$0xff]  }
 0x2b5   : > { %v4257_v56 = vrot.slane %v4255_v34, 5  ;;  %v5946_v49 = vor.u32 %v5945_v32, %v5942_v41  ;;  %v15208_v52 = vrot.slane %v15207_v44, 5  ;;  %v13507_v22 = vcombine.low %v3947_v26, %v3948_v4  ;;  %10855 = vmatprep.subr.bf16.mxu1 %v11328_v36 }
 0x2b6   : > { %v6087_v21 = vshrl.u32 %v4393_v43, 16  ;;  %v6090_v19 = vshll.u32 %v4393_v43, 16  ;;  %v6233_v39 = vshrl.u32 %v9834_v1, 16  ;;  %v6236_v13 = vshll.u32 %v9834_v1, 16 }
 0x2b7   : > { %v4395_v31 = vsel %vm4371_vm9, %v4393_v43, %v15208_v52  ;;  %v4258_v3 = vor.u32 %v4257_v56, %v4254_v20  ;;  %v5947_v42 = vsel %vm5156_vm8, %v5938_v53, %v5946_v49  ;;  %v6241_v35 = vshrl.u32 %v9835_v29, 16  ;;  %v3951_v43 = vld [vmem:[#allocation2 + $0xa8] sm:$0xf]  ;;  %v3881_v49 = vld [vmem:[#allocation2 + $0x80] sm:$0x8] }
 0x2b8   : > { %v6095_v54 = vshrl.u32 %v4395_v31, 16  ;;  %v6098_v17 = vshll.u32 %v4395_v31, 16  ;;  %v6089_v51 = vrot.slane %v6087_v21, 3  ;;  %v6092_v45 = vrot.slane %v6090_v19, 4  ;;  %8125 = vmatmul.mubr.bf16.gmra.mxu1 %v5947_v42 }
 0x2b9   : > { %v6078_v10 = vshrl.u32 %v4258_v3, 16  ;;  %v6081_v24 = vshll.u32 %v4258_v3, 16  ;;  %v6235_v61 = vrot.slane %v6233_v39, 3  ;;  %v6244_v23 = vshll.u32 %v9835_v29, 16 }
 0x2ba   : > { %v6097_v63 = vrot.slane %v6095_v54, 3  ;;  %v6100_v12 = vrot.slane %v6098_v17, 4  ;;  %v6093_v37 = vor.u32 %v6092_v45, %v6089_v51  ;;  %v6238_v27 = vrot.slane %v6236_v13, 4  ;;  %v3950_v17 = vld [vmem:[#allocation2 + $0xa4] sm:$0xf] }
 0x2bb   : > { %v6080_v2 = vrot.slane %v6078_v10, 3  ;;  %v6083_v57 = vrot.slane %v6081_v24, 4  ;;  %v6243_v15 = vrot.slane %v6241_v35, 3  ;;  %v9768_v46 = vcombine.low %v3878_v58, %v13484_v14  ;;  %v289_v14 = vld [vmem:[#allocation2 + $0xa0] sm:$0x8] }
 0x2bc   : > { %v6101_v33 = vor.u32 %v6100_v12, %v6097_v63  ;;  %v9769_v26 = vcombine.low %v13482_v60, %v13482_v60  ;;  %v6246_v40 = vrot.slane %v6244_v23, 4  ;;  %v9794_v4 = vcombine.low %v3882_v18, %v3883_v30 }
 0x2bd   : > { %v6084_v50 = vor.u32 %v6083_v57, %v6080_v2  ;;  %v6239_v8 = vor.u32 %v6238_v27, %v6235_v61  ;;  %v6061_v34 = vshrl.u32 %v9768_v46, 16  ;;  %v6064_v59 = vshll.u32 %v9768_v46, 16  ;;  %v13525_v2 = vld [vmem:[#allocation2 + $0x98] sm:$0xf] }
 0x2be   : > { %v6102_v7 = vsel %vm5156_vm8, %v6093_v37, %v6101_v33  ;;  %v6069_v48 = vshrl.u32 %v9769_v26, 16  ;;  %v6247_v41 = vor.u32 %v6246_v40, %v6243_v15  ;;  %v6072_v60 = vshll.u32 %v9769_v26, 16  ;;  %v11265_v15 = vld [vmem:[#allocation2 + $0x9c] ss:$0 sps:$4 sm:$0x11]  }
 0x2bf   : > { %8294 = vmatmul.mubr.bf16.gmra.mxu0 %v6102_v7  ;;  %8132 = vmatprep.mubr.bf16.mxu1 %v6084_v50  ;;  %v4260_v32 = vshrl.u32 %v9794_v4, 16  ;;  %v4263_v20 = vshll.u32 %v9794_v4, 16  ;;  %v6063_v53 = vrot.slane %v6061_v34, 3  ;;  %v6066_v56 = vrot.slane %v6064_v59, 4  ;;  %v13533_v7 = vld [vmem:[#allocation2 + $0x94] sm:$0xf] }
 0x2c0   : > { %v6071_v1 = vrot.slane %v6069_v48, 3  ;;  %v341_v25 = vsel %vm13058_vm7, 0, %v340_v28  ;;  %v6248_v44 = vsel %vm5156_vm8, %v6239_v8, %v6247_v41  ;;  %v6074_v52 = vrot.slane %v6072_v60, 4 }
 0x2c1   : > { %v4262_v31 = vrot.slane %v4260_v32, 4  ;;  %v4265_v21 = vrot.slane %v4263_v20, 5  ;;  %342 = vst [vmem:[#allocation2 + $0x8c] sm:$0x1] %v341_v25  ;;  %8301 = vmatprep.mubr.bf16.mxu0 %v6248_v44  ;;  %v6067_v19 = vor.u32 %v6066_v56, %v6063_v53  ;;  %v4396_v6 = vrot.slane %v9794_v4, 5 }
 0x2c2   : > { %v290_v54 = vsel %vm13028_vm4, 0, %v289_v14  ;;  %v9837_v42 = vcombine.low %v3951_v43, %v3951_v43  ;;  %v6075_v51 = vor.u32 %v6074_v52, %v6071_v1  ;;  %v13522_v39 = vcombine.low %v3950_v17, %v3951_v43 }
 0x2c3   : > { %v4266_v45 = vor.u32 %v4265_v21, %v4262_v31  ;;  %291 = vst [vmem:[#allocation2 + $0xa0] sm:$0x8] %v290_v54  ;;  %v9770_v10 = vcombine.low %v3881_v49, %v3882_v18  ;;  %v6216_v24 = vshrl.u32 %v4396_v6, 16  ;;  %v6219_v63 = vshll.u32 %v4396_v6, 16 }
 0x2c4   : > { %v6370_v12 = vshrl.u32 %v9837_v42, 16  ;;  %v6373_v58 = vshll.u32 %v9837_v42, 16  ;;  %v6076_v37 = vsel %vm5156_vm8, %v6067_v19, %v6075_v51  ;;  %v9771_v35 = vcombine.low %v3883_v30, %v3883_v30 }
 0x2c5   : > { %v6207_v61 = vshrl.u32 %v4266_v45, 16  ;;  %v6210_v13 = vshll.u32 %v4266_v45, 16  ;;  %8133 = vmatmul.mubr.bf16.gmra.mxu1 %v6076_v37  ;;  %v13527_v57 = vrot.slane %v6216_v24, 3  ;;  %v13529_v33 = vrot.slane %v6219_v63, 4 }
 0x2c6   : > { %v13531_v23 = vrot.slane %v6370_v12, 3  ;;  %v6375_v27 = vrot.slane %v6373_v58, 4  ;;  %v6190_v18 = vshrl.u32 %v9770_v10, 16  ;;  %v6193_v50 = vshll.u32 %v9770_v10, 16  ;;  %v292_v58 = vld [vmem:[#allocation2 + $0xb0] sm:$0x8] }
 0x2c7   : > { %v6209_v46 = vrot.slane %v6207_v61, 3  ;;  %v6212_v26 = vrot.slane %v6210_v13, 4  ;;  %v6222_v30 = vor.u32 %v13529_v33, %v13527_v57  ;;  %v6198_v28 = vshrl.u32 %v9771_v35, 16 }
 0x2c8   : > { %v11256_v40 = vld [vmem:[#allocation2 + $0x8c] ss:$0 sps:$4 sm:$0x11]   ;;  %v6376_v4 = vor.u32 %v6375_v27, %v13531_v23  ;;  %v9795_v36 = vcombine.low %v13533_v7, %v13525_v2  ;;  %v6192_v34 = vrot.slane %v6190_v18, 3  ;;  %v6195_v59 = vrot.slane %v6193_v50, 4 }
 0x2c9   : > { %v6213_v8 = vor.u32 %v6212_v26, %v6209_v46  ;;  %v6201_v48 = vshll.u32 %v9771_v35, 16  ;;  %v4397_v14 = vrot.slane %v11256_v40, 5  ;;  %v6200_v60 = vrot.slane %v6198_v28, 3  ;;  %v3954_v27 = vld [vmem:[#allocation2 + $0xb8] sm:$0xf] }
 0x2ca   : > { %v3949_v41 = vld [vmem:[#allocation2 + $0xa0] sm:$0x8]  ;;  %v4268_v32 = vshrl.u32 %v9795_v36, 16  ;;  %v4271_v20 = vshll.u32 %v9795_v36, 16  ;;  %v6196_v53 = vor.u32 %v6195_v59, %v6192_v34  ;;  %v4399_v1 = vrot.slane %v9795_v36, 5 }
 0x2cb   : > { %8140 = vmatprep.mubr.bf16.mxu1 %v6213_v8  ;;  %v9836_v43 = vcombine.low %v3949_v41, %v3950_v17  ;;  %v6203_v56 = vrot.slane %v6201_v48, 4  ;;  %v4398_v25 = vsel %vm4371_vm9, %v4396_v6, %v4397_v14  ;;  %v4400_v52 = vrot.slane %v11265_v15, 5  ;;  %v3884_v15 = vld [vmem:[#allocation2 + $0x90] sm:$0x8]  ;;  %v13545_v40 = vld [vmem:[#allocation2 + $0xa8] sm:$0xf] }
 0x2cc   : > { %v4270_v49 = vrot.slane %v4268_v32, 4  ;;  %v4273_v44 = vrot.slane %v4271_v20, 5  ;;  %v6224_v31 = vshrl.u32 %v4398_v25, 16  ;;  %v6227_v21 = vshll.u32 %v4398_v25, 16  ;;  %v3953_v59 = vld [vmem:[#allocation2 + $0xb4] sm:$0xf] }
 0x2cd   : > { %v6362_v19 = vshrl.u32 %v9836_v43, 16  ;;  %v6365_v54 = vshll.u32 %v9836_v43, 16  ;;  %v6204_v42 = vor.u32 %v6203_v56, %v6200_v60  ;;  %v4401_v45 = vsel %vm4371_vm9, %v4399_v1, %v4400_v52  ;;  %v346_v48 = vld [vmem:[#allocation2 + $0xac] sm:$0x1]  ;;  %v3888_v20 = vld [vmem:[#allocation2 + $0xa4] sm:$0xf] }
 0x2ce   : > { %v4274_v51 = vor.u32 %v4273_v44, %v4270_v49  ;;  %v6345_v10 = vshrl.u32 %v4399_v1, 16  ;;  %v6226_v24 = vrot.slane %v6224_v31, 3  ;;  %v6229_v63 = vrot.slane %v6227_v21, 4 }
 0x2cf   : > { %v6364_v17 = vrot.slane %v6362_v19, 3  ;;  %v6367_v12 = vrot.slane %v6365_v54, 4  ;;  %v6205_v37 = vsel %vm5156_vm8, %v6196_v53, %v6204_v42  ;;  %v6348_v33 = vshll.u32 %v4399_v1, 16 }
 0x2d0   : > { %v6336_v6 = vshrl.u32 %v4274_v51, 16  ;;  %v6339_v61 = vshll.u32 %v4274_v51, 16  ;;  %v6347_v13 = vrot.slane %v6345_v10, 3  ;;  %v6230_v35 = vor.u32 %v6229_v63, %v6226_v24  ;;  %8141 = vmatmul.mubr.bf16.gmra.mxu1 %v6205_v37  ;;  %v3957_v63 = vld [vmem:[#allocation2 + $0xc8] sm:$0xf] }
 0x2d1   : > { %v6368_v57 = vor.u32 %v6367_v12, %v6364_v17  ;;  %v6353_v23 = vshrl.u32 %v4401_v45, 16  ;;  %v6356_v18 = vshll.u32 %v4401_v45, 16  ;;  %v293_v50 = vsel %vm13028_vm4, 0, %v292_v58 }
 0x2d2   : > { %v6338_v46 = vrot.slane %v6336_v6, 3  ;;  %v6341_v26 = vrot.slane %v6339_v61, 4  ;;  %v6231_v28 = vsel %vm5156_vm8, %v6222_v30, %v6230_v35  ;;  %v6350_v8 = vrot.slane %v6348_v33, 4  ;;  %294 = vst [vmem:[#allocation2 + $0xb0] sm:$0x8] %v293_v50 }
 0x2d3   : > { %v6377_v36 = vsel %vm5156_vm8, %v6368_v57, %v6376_v4  ;;  %v6355_v34 = vrot.slane %v6353_v23, 3  ;;  %8302 = vmatmul.mubr.bf16.gmra.mxu0 %v6231_v28  ;;  %v6358_v41 = vrot.slane %v6356_v18, 4  ;;  %v9839_v60 = vcombine.low %v3954_v27, %v3954_v27  ;;  %v3887_v33 = vld [vmem:[#allocation2 + $0xa0] sm:$0x8] }
 0x2d4   : > { %v6342_v14 = vor.u32 %v6341_v26, %v6338_v46  ;;  %v13549_v32 = vcombine.low %v3953_v59, %v3954_v27  ;;  %8309 = vmatprep.mubr.bf16.mxu0 %v6377_v36  ;;  %v6351_v43 = vor.u32 %v6350_v8, %v6347_v13  ;;  %v9772_v53 = vcombine.low %v3884_v15, %v13533_v7  ;;  %v3956_v46 = vld [vmem:[#allocation2 + $0xc4] sm:$0xf] }
 0x2d5   : > { %v9773_v30 = vcombine.low %v13525_v2, %v13525_v2  ;;  %v9796_v4 = vcombine.low %v3888_v20, %v13545_v40  ;;  %v6359_v56 = vor.u32 %v6358_v41, %v6355_v34  ;;  %v6499_v1 = vshrl.u32 %v9839_v60, 16  ;;  %v295_v2 = vld [vmem:[#allocation2 + $0xc0] sm:$0x8] }
 0x2d6   : > { %8148 = vmatprep.mubr.bf16.mxu1 %v6342_v14  ;;  %v6502_v25 = vshll.u32 %v9839_v60, 16  ;;  %v347_v49 = vsel %vm13058_vm7, 0, %v346_v48  ;;  %v6319_v44 = vshrl.u32 %v9772_v53, 16  ;;  %v6322_v52 = vshll.u32 %v9772_v53, 16 }
 0x2d7   : > { %v6327_v31 = vshrl.u32 %v9773_v30, 16  ;;  %v6330_v21 = vshll.u32 %v9773_v30, 16  ;;  %348 = vst [vmem:[#allocation2 + $0xac] sm:$0x1] %v347_v49  ;;  %v6360_v19 = vsel %vm5156_vm8, %v6351_v43, %v6359_v56  ;;  %v6501_v7 = vrot.slane %v6499_v1, 3 }
 0x2d8   : > { %v6504_v54 = vrot.slane %v6502_v25, 4  ;;  %v4276_v42 = vshrl.u32 %v9796_v4, 16  ;;  %v6321_v51 = vrot.slane %v6319_v44, 3  ;;  %v6324_v45 = vrot.slane %v6322_v52, 4 }
 0x2d9   : > { %v6329_v10 = vrot.slane %v6327_v31, 3  ;;  %v6332_v24 = vrot.slane %v6330_v21, 4  ;;  %v3952_v17 = vld [vmem:[#allocation2 + $0xb0] sm:$0x8]  ;;  %v4279_v37 = vshll.u32 %v9796_v4, 16  ;;  %v4402_v6 = vrot.slane %v9796_v4, 5 }
 0x2da   : > { %v6505_v12 = vor.u32 %v6504_v54, %v6501_v7  ;;  %v4278_v58 = vrot.slane %v4276_v42, 4  ;;  %v9838_v61 = vcombine.low %v3952_v17, %v3953_v59  ;;  %v6325_v13 = vor.u32 %v6324_v45, %v6321_v51  ;;  %v3892_v7 = vld [vmem:[#allocation2 + $0xb8] sm:$0xf]  ;;  %v349_v17 = vld [vmem:[#allocation2 + $0xbc] sm:$0x1] }
 0x2db   : > { %v6333_v35 = vor.u32 %v6332_v24, %v6329_v10  ;;  %v296_v57 = vsel %vm13028_vm4, 0, %v295_v2  ;;  %8310 = vmatmul.mubr.bf16.gmra.mxu0 %v6360_v19  ;;  %v4281_v23 = vrot.slane %v4279_v37, 5  ;;  %v6474_v27 = vshrl.u32 %v4402_v6, 16 }
 0x2dc   : > { %v6477_v15 = vshll.u32 %v4402_v6, 16  ;;  %297 = vst [vmem:[#allocation2 + $0xc0] sm:$0x8] %v296_v57  ;;  %v9841_v26 = vcombine.low %v3957_v63, %v3957_v63  ;;  %v6491_v18 = vshrl.u32 %v9838_v61, 16  ;;  %v6494_v50 = vshll.u32 %v9838_v61, 16 }
 0x2dd   : > { %v6334_v28 = vsel %vm5156_vm8, %v6325_v13, %v6333_v35  ;;  %v13561_v36 = vcombine.low %v3956_v46, %v3957_v63  ;;  %v4282_v8 = vor.u32 %v4281_v23, %v4278_v58  ;;  %v6476_v59 = vrot.slane %v6474_v27, 3  ;;  %v3891_v35 = vld [vmem:[#allocation2 + $0xb4] sm:$0xf]  ;;  %v298_v23 = vld [vmem:[#allocation2 + $0xd0] sm:$0x8] }
 0x2de   : > { %8149 = vmatmul.mubr.bf16.gmra.mxu1 %v6334_v28  ;;  %v11272_v34 = vld [vmem:[#allocation2 + $0xac] ss:$0 sps:$4 sm:$0x11]   ;;  %v9774_v48 = vcombine.low %v3887_v33, %v3888_v20  ;;  %v9775_v14 = vcombine.low %v13545_v40, %v13545_v40  ;;  %v6493_v41 = vrot.slane %v6491_v18, 3  ;;  %v6496_v60 = vrot.slane %v6494_v50, 4 }
 0x2df   : > { %v6479_v43 = vrot.slane %v6477_v15, 4  ;;  %v6628_v53 = vshrl.u32 %v9841_v26, 16  ;;  %v6465_v30 = vshrl.u32 %v4282_v8, 16  ;;  %v6468_v4 = vshll.u32 %v4282_v8, 16  ;;  %v3960_v18 = vld [vmem:[#allocation2 + $0xd8] sm:$0xf] }
 0x2e0   : > { %v4403_v56 = vrot.slane %v11272_v34, 5  ;;  %v6631_v1 = vshll.u32 %v9841_v26, 16  ;;  %v6497_v25 = vor.u32 %v6496_v60, %v6493_v41  ;;  %v6448_v52 = vshrl.u32 %v9774_v48, 16 }
 0x2e1   : > { %v6480_v49 = vor.u32 %v6479_v43, %v6476_v59  ;;  %v6630_v44 = vrot.slane %v6628_v53, 3  ;;  %v6467_v31 = vrot.slane %v6465_v30, 3  ;;  %v6470_v21 = vrot.slane %v6468_v4, 4  ;;  %v3959_v30 = vld [vmem:[#allocation2 + $0xd4] sm:$0xf] }
 0x2e2   : > { %v4404_v19 = vsel %vm4371_vm9, %v4402_v6, %v4403_v56  ;;  %v6633_v20 = vrot.slane %v6631_v1, 4  ;;  %v6506_v40 = vsel %vm5156_vm8, %v6497_v25, %v6505_v12  ;;  %v6450_v51 = vrot.slane %v6448_v52, 3  ;;  %v3890_v56 = vld [vmem:[#allocation2 + $0xb0] sm:$0x8] }
 0x2e3   : > { %v6482_v54 = vshrl.u32 %v4404_v19, 16  ;;  %v6485_v42 = vshll.u32 %v4404_v19, 16  ;;  %v3955_v2 = vld [vmem:[#allocation2 + $0xc0] sm:$0x8]  ;;  %8317 = vmatprep.mubr.bf16.mxu0 %v6506_v40  ;;  %v6471_v45 = vor.u32 %v6470_v21, %v6467_v31  ;;  %v6451_v63 = vshll.u32 %v9774_v48, 16 }
 0x2e4   : > { %v9840_v10 = vcombine.low %v3955_v2, %v3956_v46  ;;  %v6634_v24 = vor.u32 %v6633_v20, %v6630_v44  ;;  %v6456_v61 = vshrl.u32 %v9775_v14, 16  ;;  %v6459_v13 = vshll.u32 %v9775_v14, 16  ;;  %v13573_v31 = vld [vmem:[#allocation2 + $0xc8] sm:$0xf] }
 0x2e5   : > { %v6484_v58 = vrot.slane %v6482_v54, 3  ;;  %v6487_v37 = vrot.slane %v6485_v42, 4  ;;  %8156 = vmatprep.mubr.bf16.mxu1 %v6471_v45  ;;  %v6453_v33 = vrot.slane %v6451_v63, 4  ;;  %v9797_v12 = vcombine.low %v3891_v35, %v3892_v7 }
 0x2e6   : > { %v6620_v6 = vshrl.u32 %v9840_v10, 16  ;;  %v6623_v57 = vshll.u32 %v9840_v10, 16  ;;  %v6458_v15 = vrot.slane %v6456_v61, 3  ;;  %v6461_v26 = vrot.slane %v6459_v13, 4 }
 0x2e7   : > { %v6488_v27 = vor.u32 %v6487_v37, %v6484_v58  ;;  %v350_v46 = vsel %vm13058_vm7, 0, %v349_v17  ;;  %v6454_v8 = vor.u32 %v6453_v33, %v6450_v51  ;;  %v4284_v34 = vshrl.u32 %v9797_v12, 16  ;;  %v3894_v51 = vld [vmem:[#allocation2 + $0xc4] sm:$0xf] }
 0x2e8   : > { %v6622_v50 = vrot.slane %v6620_v6, 3  ;;  %v6625_v28 = vrot.slane %v6623_v57, 4  ;;  %351 = vst [vmem:[#allocation2 + $0xbc] sm:$0x1] %v350_v46  ;;  %v6462_v48 = vor.u32 %v6461_v26, %v6458_v15  ;;  %v4287_v14 = vshll.u32 %v9797_v12, 16 }
 0x2e9   : > { %v6489_v59 = vsel %vm5156_vm8, %v6480_v49, %v6488_v27  ;;  %v4405_v41 = vrot.slane %v9797_v12, 5  ;;  %v4286_v43 = vrot.slane %v4284_v34, 4  ;;  %v299_v53 = vsel %vm13028_vm4, 0, %v298_v23 }
 0x2ea   : > { %8318 = vmatmul.mubr.bf16.gmra.mxu0 %v6489_v59  ;;  %v6626_v60 = vor.u32 %v6625_v28, %v6622_v50  ;;  %v9843_v4 = vcombine.low %v3960_v18, %v3960_v18  ;;  %v6463_v1 = vsel %vm5156_vm8, %v6454_v8, %v6462_v48  ;;  %v4289_v25 = vrot.slane %v4287_v14, 5  ;;  %300 = vst [vmem:[#allocation2 + $0xd0] sm:$0x8] %v299_v53  ;;  %v301_v14 = vld [vmem:[#allocation2 + $0xe0] sm:$0x8] }
 0x2eb   : > { %v6603_v44 = vshrl.u32 %v4405_v41, 16  ;;  %v6606_v52 = vshll.u32 %v4405_v41, 16  ;;  %8157 = vmatmul.mubr.bf16.gmra.mxu1 %v6463_v1  ;;  %v13576_v21 = vcombine.low %v3959_v30, %v3960_v18  ;;  %v9776_v2 = vcombine.low %v3890_v56, %v3891_v35  ;;  %v3963_v56 = vld [vmem:[#allocation2 + $0xe8] sm:$0xf] }
 0x2ec   : > { %v6635_v49 = vsel %vm5156_vm8, %v6626_v60, %v6634_v24  ;;  %v6757_v19 = vshrl.u32 %v9843_v4, 16  ;;  %v6760_v20 = vshll.u32 %v9843_v4, 16  ;;  %v4290_v40 = vor.u32 %v4289_v25, %v4286_v43 }
 0x2ed   : > { %8325 = vmatprep.mubr.bf16.mxu0 %v6635_v49  ;;  %v13578_v54 = vrot.slane %v6603_v44, 3  ;;  %v13580_v42 = vrot.slane %v6606_v52, 4  ;;  %v9777_v63 = vcombine.low %v3892_v7, %v3892_v7  ;;  %v9798_v24 = vcombine.low %v3894_v51, %v13573_v31  ;;  %v352_v7 = vld [vmem:[#allocation2 + $0xcc] sm:$0x1]  ;;  %v3893_v49 = vld [vmem:[#allocation2 + $0xc0] sm:$0x8] }
 0x2ee   : > { %v13582_v45 = vrot.slane %v6757_v19, 3  ;;  %v13584_v10 = vrot.slane %v6760_v20, 4  ;;  %v6594_v17 = vshrl.u32 %v4290_v40, 16  ;;  %v6597_v58 = vshll.u32 %v4290_v40, 16 }
 0x2ef   : > { %v6609_v37 = vor.u32 %v13580_v42, %v13578_v54  ;;  %v6577_v61 = vshrl.u32 %v9776_v2, 16  ;;  %v11281_v13 = vld [vmem:[#allocation2 + $0xbc] ss:$0 sps:$4 sm:$0x11]   ;;  %v6580_v57 = vshll.u32 %v9776_v2, 16  ;;  %v6585_v35 = vshrl.u32 %v9777_v63, 16 }
 0x2f0   : > { %v6763_v6 = vor.u32 %v13584_v10, %v13582_v45  ;;  %v6588_v33 = vshll.u32 %v9777_v63, 16  ;;  %v6596_v12 = vrot.slane %v6594_v17, 3  ;;  %v6599_v23 = vrot.slane %v6597_v58, 4  ;;  %v3962_v17 = vld [vmem:[#allocation2 + $0xe4] sm:$0xf] }
 0x2f1   : > { %v6579_v27 = vrot.slane %v6577_v61, 3  ;;  %v4292_v15 = vshrl.u32 %v9798_v24, 16  ;;  %v4406_v26 = vrot.slane %v11281_v13, 5  ;;  %v3958_v46 = vld [vmem:[#allocation2 + $0xd0] sm:$0x8]  ;;  %v6582_v18 = vrot.slane %v6580_v57, 4 }
 0x2f2   : > { %v6587_v50 = vrot.slane %v6585_v35, 3  ;;  %v6590_v28 = vrot.slane %v6588_v33, 4  ;;  %v6600_v8 = vor.u32 %v6599_v23, %v6596_v12  ;;  %v9842_v34 = vcombine.low %v3958_v46, %v3959_v30 }
 0x2f3   : > { %v4294_v59 = vrot.slane %v4292_v15, 4  ;;  %v4295_v48 = vshll.u32 %v9798_v24, 16  ;;  %v4407_v60 = vsel %vm4371_vm9, %v4405_v41, %v4406_v26  ;;  %v6583_v43 = vor.u32 %v6582_v18, %v6579_v27  ;;  %v13603_v27 = vld [vmem:[#allocation2 + $0xd8] sm:$0xf]  ;;  %v3897_v18 = vld [vmem:[#allocation2 + $0xd4] sm:$0xf] }
 0x2f4   : > { %v6591_v53 = vor.u32 %v6590_v28, %v6587_v50  ;;  %v353_v4 = vsel %vm13058_vm7, 0, %v352_v7  ;;  %8164 = vmatprep.mubr.bf16.mxu1 %v6600_v8  ;;  %v6611_v1 = vshrl.u32 %v4407_v60, 16  ;;  %v6614_v25 = vshll.u32 %v4407_v60, 16 }
 0x2f5   : > { %v6749_v44 = vshrl.u32 %v9842_v34, 16  ;;  %v6752_v52 = vshll.u32 %v9842_v34, 16  ;;  %354 = vst [vmem:[#allocation2 + $0xcc] sm:$0x1] %v353_v4  ;;  %v4297_v19 = vrot.slane %v4295_v48, 5  ;;  %v4408_v20 = vrot.slane %v9798_v24, 5 }
 0x2f6   : > { %v6592_v30 = vsel %vm5156_vm8, %v6583_v43, %v6591_v53  ;;  %v302_v41 = vsel %vm13028_vm4, 0, %v301_v14  ;;  %v6613_v40 = vrot.slane %v6611_v1, 3  ;;  %v6616_v54 = vrot.slane %v6614_v25, 4 }
 0x2f7   : > { %v6751_v42 = vrot.slane %v6749_v44, 3  ;;  %v6754_v2 = vrot.slane %v6752_v52, 4  ;;  %8165 = vmatmul.mubr.bf16.gmra.mxu1 %v6592_v30  ;;  %303 = vst [vmem:[#allocation2 + $0xe0] sm:$0x8] %v302_v41  ;;  %v4298_v45 = vor.u32 %v4297_v19, %v4294_v59  ;;  %v6732_v10 = vshrl.u32 %v4408_v20, 16 }
 0x2f8   : > { %v6735_v63 = vshll.u32 %v4408_v20, 16  ;;  %v9845_v58 = vcombine.low %v3963_v56, %v3963_v56  ;;  %v6617_v61 = vor.u32 %v6616_v54, %v6613_v40  ;;  %v13597_v57 = vcombine.low %v3962_v17, %v3963_v56 }
 0x2f9   : > { %v6755_v13 = vor.u32 %v6754_v2, %v6751_v42  ;;  %v9778_v35 = vcombine.low %v3893_v49, %v3894_v51  ;;  %v6723_v24 = vshrl.u32 %v4298_v45, 16  ;;  %v6726_v33 = vshll.u32 %v4298_v45, 16  ;;  %v355_v42 = vld [vmem:[#allocation2 + $0xdc] sm:$0x1] }
 0x2fa   : > { %v13599_v12 = vrot.slane %v6732_v10, 3  ;;  %v13601_v23 = vrot.slane %v6735_v63, 4  ;;  %v6618_v15 = vsel %vm5156_vm8, %v6609_v37, %v6617_v61  ;;  %v6886_v26 = vshrl.u32 %v9845_v58, 16  ;;  %v3966_v61 = vld [vmem:[#allocation2 + $0xf8] sm:$0xf] }
 0x2fb   : > { %v6764_v7 = vsel %vm5156_vm8, %v6755_v13, %v6763_v6  ;;  %v6889_v46 = vshll.u32 %v9845_v58, 16  ;;  %8326 = vmatmul.mubr.bf16.gmra.mxu0 %v6618_v15  ;;  %v6725_v50 = vrot.slane %v6723_v24, 3  ;;  %v6728_v28 = vrot.slane %v6726_v33, 4  ;;  %v304_v58 = vld [vmem:[#allocation2 + $0xf0] sm:$0x8] }
 0x2fc   : > { %v6738_v51 = vor.u32 %v13601_v23, %v13599_v12  ;;  %v9779_v8 = vcombine.low %v13573_v31, %v13573_v31  ;;  %8333 = vmatprep.mubr.bf16.mxu0 %v6764_v7  ;;  %v11288_v34 = vld [vmem:[#allocation2 + $0xcc] ss:$0 sps:$4 sm:$0x11]   ;;  %v6888_v59 = vrot.slane %v6886_v26, 3  ;;  %v6706_v14 = vshrl.u32 %v9778_v35, 16 }
 0x2fd   : > { %v6891_v48 = vrot.slane %v6889_v46, 4  ;;  %v9799_v37 = vcombine.low %v3897_v18, %v13603_v27  ;;  %v6729_v6 = vor.u32 %v6728_v28, %v6725_v50  ;;  %v6709_v43 = vshll.u32 %v9778_v35, 16  ;;  %v3896_v33 = vld [vmem:[#allocation2 + $0xd0] sm:$0x8]  ;;  %v3965_v28 = vld [vmem:[#allocation2 + $0xf4] sm:$0xf] }
 0x2fe   : > { %v3961_v60 = vld [vmem:[#allocation2 + $0xe0] sm:$0x8]  ;;  %v6714_v53 = vshrl.u32 %v9779_v8, 16  ;;  %v6717_v4 = vshll.u32 %v9779_v8, 16  ;;  %v4409_v56 = vrot.slane %v11288_v34, 5  ;;  %v6708_v44 = vrot.slane %v6706_v14, 3 }
 0x2ff   : > { %v9844_v1 = vcombine.low %v3961_v60, %v3962_v17  ;;  %v6892_v25 = vor.u32 %v6891_v48, %v6888_v59  ;;  %8172 = vmatprep.mubr.bf16.mxu1 %v6729_v6  ;;  %v6711_v52 = vrot.slane %v6709_v43, 4  ;;  %v4300_v30 = vshrl.u32 %v9799_v37, 16 }
 0x300   : > { %v6716_v49 = vrot.slane %v6714_v53, 3  ;;  %v6719_v31 = vrot.slane %v6717_v4, 4  ;;  %v4410_v19 = vsel %vm4371_vm9, %v4408_v20, %v4409_v56  ;;  %v4303_v54 = vshll.u32 %v9799_v37, 16 }
 0x301   : > { %v6878_v41 = vshrl.u32 %v9844_v1, 16  ;;  %v6881_v40 = vshll.u32 %v9844_v1, 16  ;;  %v6740_v2 = vshrl.u32 %v4410_v19, 16  ;;  %v6743_v45 = vshll.u32 %v4410_v19, 16  ;;  %v358_v1 = vld [vmem:[#allocation2 + $0xec] sm:$0x1] }
 0x302   : > { %v6712_v10 = vor.u32 %v6711_v52, %v6708_v44  ;;  %v6720_v63 = vor.u32 %v6719_v31, %v6716_v49  ;;  %v4302_v35 = vrot.slane %v4300_v30, 4  ;;  %v4305_v24 = vrot.slane %v4303_v54, 5 }
 0x303   : > { %v6880_v17 = vrot.slane %v6878_v41, 3  ;;  %v6883_v13 = vrot.slane %v6881_v40, 4  ;;  %v6742_v12 = vrot.slane %v6740_v2, 3  ;;  %v6745_v23 = vrot.slane %v6743_v45, 4  ;;  %v307_v41 = vld [vmem:[#allocation2 + $0x100] sm:$0x8] }
 0x304   : > { %v6721_v15 = vsel %vm5156_vm8, %v6712_v10, %v6720_v63  ;;  %v356_v20 = vsel %vm13058_vm7, 0, %v355_v42  ;;  %v4306_v26 = vor.u32 %v4305_v24, %v4302_v35  ;;  %v4411_v46 = vrot.slane %v9799_v37, 5  ;;  %v3900_v45 = vld [vmem:[#allocation2 + $0xe4] sm:$0xf] }
 0x305   : > { %v6884_v7 = vor.u32 %v6883_v13, %v6880_v17  ;;  %8173 = vmatmul.mubr.bf16.gmra.mxu1 %v6721_v15  ;;  %357 = vst [vmem:[#allocation2 + $0xdc] sm:$0x1] %v356_v20  ;;  %v305_v50 = vsel %vm13028_vm4, 0, %v304_v58  ;;  %v6746_v8 = vor.u32 %v6745_v23, %v6742_v12  ;;  %v9847_v34 = vcombine.low %v3966_v61, %v3966_v61 }
 0x306   : > { %306 = vst [vmem:[#allocation2 + $0xf0] sm:$0x8] %v305_v50  ;;  %v13618_v59 = vcombine.low %v3965_v28, %v3966_v61  ;;  %v9780_v48 = vcombine.low %v3896_v33, %v3897_v18  ;;  %v6852_v6 = vshrl.u32 %v4306_v26, 16  ;;  %v6855_v60 = vshll.u32 %v4306_v26, 16  ;;  %v13626_v18 = vld [vmem:[#allocation2 + $0xe8] sm:$0xf] }
 0x307   : > { %v6893_v14 = vsel %vm5156_vm8, %v6884_v7, %v6892_v25  ;;  %v6861_v43 = vshrl.u32 %v4411_v46, 16  ;;  %v6747_v53 = vsel %vm5156_vm8, %v6738_v51, %v6746_v8  ;;  %v6864_v4 = vshll.u32 %v4411_v46, 16 }
 0x308   : > { %v7015_v56 = vshrl.u32 %v9847_v34, 16  ;;  %v7018_v37 = vshll.u32 %v9847_v34, 16  ;;  %8334 = vmatmul.mubr.bf16.gmra.mxu0 %v6747_v53  ;;  %v6854_v44 = vrot.slane %v6852_v6, 3  ;;  %v6857_v52 = vrot.slane %v6855_v60, 4  ;;  %v3969_v34 = vld [vmem:[#allocation2 + $0x108] sm:$0xf] }
 0x309   : > { %v13622_v49 = vrot.slane %v6861_v43, 3  ;;  %v9781_v31 = vcombine.low %v13603_v27, %v13603_v27  ;;  %8341 = vmatprep.mubr.bf16.mxu0 %v6893_v14  ;;  %v13628_v25 = vrot.slane %v6864_v4, 4  ;;  %v6835_v51 = vshrl.u32 %v9780_v48, 16 }
 0x30a   : > { %v7017_v30 = vrot.slane %v7015_v56, 3  ;;  %v7020_v19 = vrot.slane %v7018_v37, 4  ;;  %v6858_v40 = vor.u32 %v6857_v52, %v6854_v44  ;;  %v6838_v54 = vshll.u32 %v9780_v48, 16 }
 0x30b   : > { %v6843_v42 = vshrl.u32 %v9781_v31, 16  ;;  %v6846_v2 = vshll.u32 %v9781_v31, 16  ;;  %v6867_v63 = vor.u32 %v13628_v25, %v13622_v49  ;;  %v6837_v27 = vrot.slane %v6835_v51, 3  ;;  %v3968_v25 = vld [vmem:[#allocation2 + $0x104] sm:$0xf] }
 0x30c   : > { %v11297_v10 = vld [vmem:[#allocation2 + $0xdc] ss:$0 sps:$4 sm:$0x11]   ;;  %v7021_v58 = vor.u32 %v7020_v19, %v7017_v30  ;;  %v9800_v61 = vcombine.low %v3900_v45, %v13626_v18  ;;  %8180 = vmatprep.mubr.bf16.mxu1 %v6858_v40  ;;  %v6840_v13 = vrot.slane %v6838_v54, 4  ;;  %v359_v33 = vsel %vm13058_vm7, 0, %v358_v1 }
 0x30d   : > { %v3964_v17 = vld [vmem:[#allocation2 + $0xf0] sm:$0x8]  ;;  %v6845_v35 = vrot.slane %v6843_v42, 3  ;;  %v6848_v24 = vrot.slane %v6846_v2, 4  ;;  %v4412_v12 = vrot.slane %v11297_v10, 5  ;;  %v308_v8 = vsel %vm13028_vm4, 0, %v307_v41 }
 0x30e   : > { %v9846_v23 = vcombine.low %v3964_v17, %v3965_v28  ;;  %v4308_v15 = vshrl.u32 %v9800_v61, 16  ;;  %v4311_v20 = vshll.u32 %v9800_v61, 16  ;;  %360 = vst [vmem:[#allocation2 + $0xec] sm:$0x1] %v359_v33  ;;  %v6841_v7 = vor.u32 %v6840_v13, %v6837_v27  ;;  %309 = vst [vmem:[#allocation2 + $0x100] sm:$0x8] %v308_v8 }
 0x30f   : > { %v6849_v26 = vor.u32 %v6848_v24, %v6845_v35  ;;  %v4414_v50 = vrot.slane %v9800_v61, 5  ;;  %v4413_v48 = vsel %vm4371_vm9, %v4411_v46, %v4412_v12  ;;  %v9849_v30 = vcombine.low %v3969_v34, %v3969_v34  ;;  %v3899_v46 = vld [vmem:[#allocation2 + $0xe0] sm:$0x8]  ;;  %v13645_v54 = vld [vmem:[#allocation2 + $0xf8] sm:$0xf] }
 0x310   : > { %v7007_v14 = vshrl.u32 %v9846_v23, 16  ;;  %v7010_v6 = vshll.u32 %v9846_v23, 16  ;;  %v4310_v60 = vrot.slane %v4308_v15, 4  ;;  %v6869_v43 = vshrl.u32 %v4413_v48, 16 }
 0x311   : > { %v6872_v53 = vshll.u32 %v4413_v48, 16  ;;  %v6850_v28 = vsel %vm5156_vm8, %v6841_v7, %v6849_v26  ;;  %v4313_v4 = vrot.slane %v4311_v20, 5  ;;  %v6990_v1 = vshrl.u32 %v4414_v50, 16 }
 0x312   : > { %v7009_v56 = vrot.slane %v7007_v14, 3  ;;  %v7012_v37 = vrot.slane %v7010_v6, 4  ;;  %8181 = vmatmul.mubr.bf16.gmra.mxu1 %v6850_v28  ;;  %v6993_v44 = vshll.u32 %v4414_v50, 16  ;;  %v6871_v52 = vrot.slane %v6869_v43, 3 }
 0x313   : > { %v6874_v49 = vrot.slane %v6872_v53, 4  ;;  %v4314_v31 = vor.u32 %v4313_v4, %v4310_v60  ;;  %v13639_v51 = vrot.slane %v6990_v1, 3  ;;  %v13643_v40 = vcombine.low %v3968_v25, %v3969_v34  ;;  %v13654_v60 = vpop.f32.mrf.mxu0 }
 0x314   : > { %v7013_v19 = vor.u32 %v7012_v37, %v7009_v56  ;;  %v13641_v41 = vrot.slane %v6993_v44, 4  ;;  %v7144_v27 = vshrl.u32 %v9849_v30, 16  ;;  %v7147_v35 = vshll.u32 %v9849_v30, 16 }
 0x315   : > { %v6875_v42 = vor.u32 %v6874_v49, %v6871_v52  ;;  %v6981_v2 = vshrl.u32 %v4314_v31, 16  ;;  %v6984_v10 = vshll.u32 %v4314_v31, 16  ;;  %v11305_v17 = vld [vmem:[#allocation2 + $0xec] ss:$0 sps:$4 sm:$0x11]   ;;  %v9782_v24 = vcombine.low %v3899_v46, %v3900_v45 }
 0x316   : > { %v7022_v61 = vsel %vm5156_vm8, %v7013_v19, %v7021_v58  ;;  %v6996_v13 = vor.u32 %v13641_v41, %v13639_v51  ;;  %v3967_v15 = vld [vmem:[#allocation2 + $0x100] sm:$0x8]  ;;  %v7146_v20 = vrot.slane %v7144_v27, 3  ;;  %v4415_v7 = vrot.slane %v11305_v17, 5  ;;  %v3903_v58 = vld [vmem:[#allocation2 + $0xf4] sm:$0xf]  ;;  %v13657_v41 = vpop.f32.mrf.mxu0 }
 0x317   : > { %v6876_v33 = vsel %vm5156_vm8, %v6867_v63, %v6875_v42  ;;  %v6983_v12 = vrot.slane %v6981_v2, 3  ;;  %v6986_v23 = vrot.slane %v6984_v10, 4  ;;  %v9848_v26 = vcombine.low %v3967_v15, %v3968_v25  ;;  %v361_v31 = vld [vmem:[#allocation2 + $0xfc] sm:$0x1]  ;;  %v3989_v51 = vld [vmem:[#allocation2 + $0x28] sm:$0xf] }
 0x318   : > { %8342 = vmatmul.mubr.bf16.gmra.mxu0 %v6876_v33  ;;  %v7149_v8 = vrot.slane %v7147_v35, 4  ;;  %v9783_v34 = vcombine.low %v13626_v18, %v13626_v18  ;;  %v6964_v14 = vshrl.u32 %v9782_v24, 16  ;;  %v6967_v6 = vshll.u32 %v9782_v24, 16  ;;  %v3902_v27 = vld [vmem:[#allocation2 + $0xf0] sm:$0x8] }
 0x319   : > { %8349 = vmatprep.mubr.bf16.mxu0 %v7022_v61  ;;  %v6987_v48 = vor.u32 %v6986_v23, %v6983_v12  ;;  %v9801_v45 = vcombine.low %v3903_v58, %v13645_v54  ;;  %v4416_v63 = vsel %vm4371_vm9, %v4414_v50, %v4415_v7  ;;  %v7136_v43 = vshrl.u32 %v9848_v26, 16  ;;  %v3988_v33 = vld [vmem:[#allocation2 + $0x24] sm:$0xf]  ;;  %v13663_v12 = vpop.f32.mrf.mxu1 }
 0x31a   : > { %v7139_v53 = vshll.u32 %v9848_v26, 16  ;;  %v7150_v28 = vor.u32 %v7149_v8, %v7146_v20  ;;  %v6998_v4 = vshrl.u32 %v4416_v63, 16  ;;  %v7001_v56 = vshll.u32 %v4416_v63, 16 }
 0x31b   : > { %8188 = vmatprep.mubr.bf16.mxu1 %v6987_v48  ;;  %v6966_v37 = vrot.slane %v6964_v14, 3  ;;  %v6969_v1 = vrot.slane %v6967_v6, 4  ;;  %v7138_v18 = vrot.slane %v7136_v43, 3  ;;  %v6972_v52 = vshrl.u32 %v9783_v34, 16  ;;  %v13671_v14 = vpop.f32.mrf.mxu0 }
 0x31c   : > { %v7141_v44 = vrot.slane %v7139_v53, 4  ;;  %v6975_v49 = vshll.u32 %v9783_v34, 16  ;;  %v7000_v25 = vrot.slane %v6998_v4, 3  ;;  %v7003_v30 = vrot.slane %v7001_v56, 4  ;;  %v3987_v4 = vld [vmem:[#allocation2 + $0x20] sm:$0x8]  ;;  %v13682_v56 = vpop.f32.mrf.mxu1 }
 0x31d   : > { %v6970_v46 = vor.u32 %v6969_v1, %v6966_v37  ;;  %v4316_v19 = vshrl.u32 %v9801_v45, 16  ;;  %v6974_v42 = vrot.slane %v6972_v52, 3  ;;  %v4319_v10 = vshll.u32 %v9801_v45, 16  ;;  %v13684_v52 = vld [vmem:[#allocation2 + $0x38] sm:$0xf] }
 0x31e   : > { %v7142_v50 = vor.u32 %v7141_v44, %v7138_v18  ;;  %v6977_v2 = vrot.slane %v6975_v49, 4  ;;  %v7004_v61 = vor.u32 %v7003_v30, %v7000_v25  ;;  %v362_v35 = vsel %vm13058_vm7, 0, %v361_v31 }
 0x31f   : > { %v4318_v17 = vrot.slane %v4316_v19, 4  ;;  %v13661_v24 = vrot.slane %v9801_v45, 5  ;;  %v4321_v20 = vrot.slane %v4319_v10, 5  ;;  %363 = vst [vmem:[#allocation2 + $0xfc] sm:$0x1] %v362_v35  ;;  %v13666_v7 = vcombine.low %v3988_v33, %v3989_v51  ;;  %v13688_v19 = vpop.f32.mrf.mxu0 }
 0x320   : > { %v7151_v23 = vsel %vm5156_vm8, %v7142_v50, %v7150_v28  ;;  %v6978_v15 = vor.u32 %v6977_v2, %v6974_v42  ;;  %v7005_v26 = vsel %vm5156_vm8, %v6996_v13, %v7004_v61  ;;  %v9784_v48 = vcombine.low %v3902_v27, %v3903_v58  ;;  %v13690_v10 = vld [vmem:[#allocation2 + $0x34] sm:$0xf] }
 0x321   : > { %v7119_v8 = vshrl.u32 %v13661_v24, 16  ;;  %v7122_v34 = vshll.u32 %v13661_v24, 16  ;;  %8350 = vmatmul.mubr.bf16.gmra.mxu0 %v7005_v26  ;;  %v4322_v45 = vor.u32 %v4321_v20, %v4318_v17  ;;  %v4933_v63 = vshrl.u32 %v13666_v7, 16 }
 0x322   : > { %v6979_v6 = vsel %vm5156_vm8, %v6970_v46, %v6978_v15  ;;  %v4936_v43 = vshll.u32 %v13666_v7, 16  ;;  %8357 = vmatprep.mubr.bf16.mxu0 %v7151_v23  ;;  %v9785_v28 = vcombine.low %v13645_v54, %v13645_v54  ;;  %v7093_v58 = vshrl.u32 %v9784_v48, 16  ;;  %v11322_v46 = vld [vmem:[#allocation2 + $0x1c] ss:$0 sps:$4 sm:$0x11]   ;;  %v13696_v15 = vpop.f32.mrf.mxu1 }
 0x323   : > { %8189 = vmatmul.mubr.bf16.gmra.mxu1 %v6979_v6  ;;  %v13676_v53 = vrot.slane %v7119_v8, 3  ;;  %v13678_v13 = vrot.slane %v7122_v34, 4  ;;  %v7110_v37 = vshrl.u32 %v4322_v45, 16  ;;  %v7113_v1 = vshll.u32 %v4322_v45, 16 }
 0x324   : > { %v4935_v18 = vrot.slane %v4933_v63, 4  ;;  %v4938_v44 = vrot.slane %v4936_v43, 5  ;;  %v7095_v31 = vrot.slane %v7093_v58, 3  ;;  %v7096_v25 = vshll.u32 %v9784_v48, 16 }
 0x325   : > { %v7125_v49 = vor.u32 %v13678_v13, %v13676_v53  ;;  %v7101_v30 = vshrl.u32 %v9785_v28, 16  ;;  %v7112_v54 = vrot.slane %v7110_v37, 3  ;;  %v7115_v50 = vrot.slane %v7113_v1, 4 }
 0x326   : > { %v4939_v42 = vor.u32 %v4938_v44, %v4935_v18  ;;  %v7104_v2 = vshll.u32 %v9785_v28, 16  ;;  %v11317_v27 = vld [vmem:[#allocation2 + $0xfc] ss:$0 sps:$4 sm:$0x11]   ;;  %v7098_v61 = vrot.slane %v7096_v25, 4  ;;  %v9882_v17 = vcombine.low %v3987_v4, %v3988_v33  ;;  %v13699_v43 = vpop.f32.mrf.mxu0  ;;  %v13703_v44 = vpop.f32.mrf.mxu1 }
 0x327   : > { %v9883_v35 = vcombine.low %v3989_v51, %v3989_v51  ;;  %v13694_v23 = vcombine.low %v13690_v10, %v13684_v52  ;;  %v7116_v20 = vor.u32 %v7115_v50, %v7112_v54  ;;  %v7103_v34 = vrot.slane %v7101_v30, 3  ;;  %15211 = vst [vmem:[#allocation4_spill] sm:$0xff] %v13699_v43 }
 0x328   : > { %v5261_v26 = vshrl.u32 %v4939_v42, 16  ;;  %v5264_v8 = vshll.u32 %v4939_v42, 16  ;;  %v4418_v48 = vrot.slane %v11317_v27, 5  ;;  %v7099_v6 = vor.u32 %v7098_v61, %v7095_v31  ;;  %v13705_v25 = vpop.f32.mrf.mxu0 }
 0x329   : > { %v7106_v45 = vrot.slane %v7104_v2, 4  ;;  %v4740_v63 = vrot.slane %v13261_v16, 5  ;;  %8196 = vmatprep.mubr.bf16.mxu1 %v7116_v20  ;;  %v4741_v28 = vrot.slane %v11322_v46, 5  ;;  %v5244_v58 = vshrl.u32 %v9882_v17, 16  ;;  %15212 = vst [vmem:[#allocation3_spill] sm:$0xff] %v13705_v25 }
 0x32a   : > { %v5263_v33 = vrot.slane %v5261_v26, 3  ;;  %v5266_v51 = vrot.slane %v5264_v8, 4  ;;  %v4419_v4 = vsel %vm4371_vm9, %v13661_v24, %v4418_v48  ;;  %v5252_v48 = vshrl.u32 %v9883_v35, 16 }
 0x32b   : > { %v7107_v37 = vor.u32 %v7106_v45, %v7103_v34  ;;  %v5227_v1 = vshrl.u32 %v4740_v63, 16  ;;  %v5230_v18 = vshll.u32 %v4740_v63, 16  ;;  %v7127_v31 = vshrl.u32 %v4419_v4, 16 }
 0x32c   : > { %v7130_v30 = vshll.u32 %v4419_v4, 16  ;;  %v5267_v16 = vor.u32 %v5266_v51, %v5263_v33  ;;  %v4742_v54 = vsel %vm4371_vm9, %v4740_v63, %v4741_v28  ;;  %v5246_v20 = vrot.slane %v5244_v58, 3  ;;  %v13711_v4 = vpop.f32.mrf.mxu0  ;;  %v11329_v28 = vld [vmem:[#allocation2 + $0x2c] ss:$0 sps:$4 sm:$0x11]  }
 0x32d   : > { %v7108_v50 = vsel %vm5156_vm8, %v7099_v6, %v7107_v37  ;;  %v5229_v42 = vrot.slane %v5227_v1, 3  ;;  %v5232_v46 = vrot.slane %v5230_v18, 4  ;;  %v5235_v2 = vshrl.u32 %v4742_v54, 16  ;;  %v13709_v45 = vpop.f32.mrf.mxu1  ;;  %15213 = vst [vmem:[#allocation6_spill] sm:$0xff] %v13711_v4 }
 0x32e   : > { %v7129_v27 = vrot.slane %v7127_v31, 3  ;;  %v7132_v61 = vrot.slane %v7130_v30, 4  ;;  %8197 = vmatmul.mubr.bf16.gmra.mxu1 %v7108_v50  ;;  %v5238_v24 = vshll.u32 %v4742_v54, 16  ;;  %v5247_v34 = vshll.u32 %v9882_v17, 16  ;;  %v3990_v50 = vld [vmem:[#allocation2 + $0x30] sm:$0x8] }
 0x32f   : > { %v5233_v26 = vor.u32 %v5232_v46, %v5229_v42  ;;  %v5237_v8 = vrot.slane %v5235_v2, 3  ;;  %v5255_v51 = vshll.u32 %v9883_v35, 16  ;;  %v4941_v6 = vshrl.u32 %v13694_v23, 16 }
 0x330   : > { %v7133_v33 = vor.u32 %v7132_v61, %v7129_v27  ;;  %v5240_v63 = vrot.slane %v5238_v24, 4  ;;  %v5249_v37 = vrot.slane %v5247_v34, 4  ;;  %v5254_v1 = vrot.slane %v5252_v48, 3  ;;  %v13721_v27 = vpop.f32.mrf.mxu1  ;;  %v13723_v61 = vpop.f32.mrf.mxu0 }
 0x331   : > { %v4944_v18 = vshll.u32 %v13694_v23, 16  ;;  %v5218_v58 = vshrl.u32 %v13271_v62, 16  ;;  %v5257_v30 = vrot.slane %v5255_v51, 4  ;;  %v4943_v54 = vrot.slane %v4941_v6, 4  ;;  %15214 = vst [vmem:[#allocation5_spill] sm:$0xff] %v13723_v61 }
 0x332   : > { %v7134_v17 = vsel %vm5156_vm8, %v7125_v49, %v7133_v33  ;;  %v5241_v31 = vor.u32 %v5240_v63, %v5237_v8  ;;  %v5250_v35 = vor.u32 %v5249_v37, %v5246_v20  ;;  %v5221_v2 = vshll.u32 %v13271_v62, 16 }
 0x333   : > { %8358 = vmatmul.mubr.bf16.gmra.mxu0 %v7134_v17  ;;  %v4946_v42 = vrot.slane %v4944_v18, 5  ;;  %v5220_v46 = vrot.slane %v5218_v58, 3  ;;  %v5258_v53 = vor.u32 %v5257_v30, %v5254_v1  ;;  %v4743_v13 = vrot.slane %v13303_v55, 5  ;;  %v13735_v1 = vpop.f32.mrf.mxu1 }
 0x334   : > { %8559 = vmatprep.mubr.bf16.mxu0 %v5267_v16  ;;  %v5242_v24 = vsel %vm5156_vm8, %v5233_v26, %v5241_v31  ;;  %v4744_v49 = vrot.slane %v11329_v28, 5  ;;  %v5223_v34 = vrot.slane %v5221_v2, 4  ;;  %v9884_v20 = vcombine.low %v3990_v50, %v13690_v10  ;;  %v11337_v28 = vld [vmem:[%s15149_s2 + $0x230] sm:$0xff]   ;;  %v3995_v31 = vld [vmem:[#allocation2 + $0x48] sm:$0xf]  ;;  %v11449_v2 = vld [vmem:[%s15149_s2 + $0x238] sm:$0xff]  }
 0x335   : > { %8398 = vmatprep.mubr.bf16.mxu1 %v5242_v24  ;;  %v4947_v8 = vor.u32 %v4946_v42, %v4943_v54  ;;  %v9885_v48 = vcombine.low %v13684_v52, %v13684_v52  ;;  %v5259_v62 = vsel %vm5156_vm8, %v5250_v35, %v5258_v53  ;;  %v5356_v63 = vshrl.u32 %v4743_v13, 16 }
 0x336   : > { %v4745_v33 = vsel %vm4371_vm9, %v4743_v13, %v4744_v49  ;;  %v5359_v16 = vshll.u32 %v4743_v13, 16  ;;  %v5224_v6 = vor.u32 %v5223_v34, %v5220_v46  ;;  %v5373_v17 = vshrl.u32 %v9884_v20, 16  ;;  %v3994_v13 = vld [vmem:[#allocation2 + $0x44] sm:$0xf] }
 0x337   : > { %v5390_v51 = vshrl.u32 %v4947_v8, 16  ;;  %v5393_v26 = vshll.u32 %v4947_v8, 16  ;;  %v5364_v37 = vshrl.u32 %v4745_v33, 16  ;;  %v13737_v10 = vpop.f32.mrf.mxu0  ;;  %v5358_v18 = vrot.slane %v5356_v63, 3 }
 0x338   : > { %15215 = vst [vmem:[#allocation7_spill] sm:$0xff] %v13737_v10  ;;  %v5361_v52 = vrot.slane %v5359_v16, 4  ;;  %v5367_v58 = vshll.u32 %v4745_v33, 16  ;;  %8399 = vmatmul.mubr.bf16.vlgmr.msra.gmra.mxu1 %v5224_v6  ;;  %v5376_v35 = vshll.u32 %v9884_v20, 16  ;;  %v5375_v24 = vrot.slane %v5373_v17, 3  ;;  %v11346_v20 = vld [vmem:[%s15149_s2 + $0x228] sm:$0xff]   ;;  %v13747_v16 = vpop.f32.mrf.mxu1 }
 0x339   : > { %v5392_v30 = vrot.slane %v5390_v51, 3  ;;  %v5395_v54 = vrot.slane %v5393_v26, 4  ;;  %v5366_v50 = vrot.slane %v5364_v37, 3  ;;  %10856 = vmatpush3.bf16.msra.mxu1 %v11449_v2  ;;  %v5381_v53 = vshrl.u32 %v9885_v48, 16  ;;  %v13749_v51 = vpop.f32.mrf.mxu0  ;;  %v3993_v17 = vld [vmem:[#allocation2 + $0x40] sm:$0x8] }
 0x33a   : > { %v5362_v42 = vor.u32 %v5361_v52, %v5358_v18  ;;  %v5369_v46 = vrot.slane %v5367_v58, 4  ;;  %v5378_v8 = vrot.slane %v5376_v35, 4  ;;  %v5384_v34 = vshll.u32 %v9885_v48, 16  ;;  %v11333_v63 = vld [vmem:[#allocation2 + $0x3c] ss:$0 sps:$4 sm:$0x11]   ;;  %10857 = vmatprep.subr.bf16.mxu1 %v11337_v28 }
 0x33b   : > { %8560 = vmatmul.mubr.bf16.vlgmr.msra.gmra.mxu0 %v5259_v62  ;;  %v5396_v49 = vor.u32 %v5395_v54, %v5392_v30  ;;  %v13742_v33 = vcombine.low %v3994_v13, %v3995_v31  ;;  %15216 = vst [vmem:[#allocation8_spill] sm:$0xff] %v13749_v51  ;;  %v5383_v6 = vrot.slane %v5381_v53, 3  ;;  %v4573_v37 = vshrl.u32 %v13303_v55, 16 }
 0x33c   : > { %v5370_v26 = vor.u32 %v5369_v46, %v5366_v50  ;;  %v4576_v62 = vshll.u32 %v13303_v55, 16  ;;  %v5379_v48 = vor.u32 %v5378_v8, %v5375_v24  ;;  %v5386_v18 = vrot.slane %v5384_v34, 4  ;;  %v11355_v24 = vld [vmem:[%s15149_s2 + $0x220] sm:$0xff]   ;;  %v13762_v8 = vpop.f32.mrf.mxu0 }
 0x33d   : > { %8567 = vmatprep.mubr.bf16.mxu0 %v5396_v49  ;;  %v4949_v52 = vshrl.u32 %v13742_v33, 16  ;;  %v4952_v58 = vshll.u32 %v13742_v33, 16  ;;  %v4575_v54 = vrot.slane %v4573_v37, 4  ;;  %v4746_v2 = vrot.slane %v13327_v0, 5  ;;  %10858 = vmatpush3.bf16.msra.mxu1 %v11337_v28  ;;  %v13760_v49 = vpop.f32.mrf.mxu1  ;;  %15217 = vst [vmem:[#allocation9_spill] sm:$0xff] %v13762_v8 }
 0x33e   : > { %v5371_v30 = vsel %vm5156_vm8, %v5362_v42, %v5370_v26  ;;  %v4578_v35 = vrot.slane %v4576_v62, 5  ;;  %v5387_v50 = vor.u32 %v5386_v18, %v5383_v6  ;;  %v4747_v55 = vrot.slane %v11333_v63, 5  ;;  %10859 = vmatprep.subr.bf16.mxu1 %v11346_v20 }
 0x33f   : > { %8406 = vmatprep.mubr.bf16.mxu1 %v5371_v30  ;;  %v4951_v46 = vrot.slane %v4949_v52, 4  ;;  %v4954_v53 = vrot.slane %v4952_v58, 5  ;;  %v5485_v34 = vshrl.u32 %v4746_v2, 16  ;;  %v5488_v26 = vshll.u32 %v4746_v2, 16 }
 0x340   : > { %v4579_v42 = vor.u32 %v4578_v35, %v4575_v54  ;;  %v9886_v37 = vcombine.low %v3993_v17, %v3994_v13  ;;  %v5388_v28 = vsel %vm5156_vm8, %v5379_v48, %v5387_v50  ;;  %v4748_v6 = vsel %vm4371_vm9, %v4746_v2, %v4747_v55  ;;  %v11364_v13 = vld [vmem:[%s15149_s2 + $0x218] sm:$0xff]   ;;  %v13769_v48 = vpop.f32.mrf.mxu1  ;;  %v13771_v17 = vpop.f32.mrf.mxu0 }
 0x341   : > { %v4955_v62 = vor.u32 %v4954_v53, %v4951_v46  ;;  %v9887_v18 = vcombine.low %v3995_v31, %v3995_v31  ;;  %v5487_v58 = vrot.slane %v5485_v34, 3  ;;  %v5490_v30 = vrot.slane %v5488_v26, 4  ;;  %10860 = vmatpush3.bf16.msra.mxu1 %v11346_v20  ;;  %15218 = vst [vmem:[#allocation10_spill] sm:$0xff] %v13769_v48  ;;  %15219 = vst [vmem:[#allocation11_spill] sm:$0xff] %v13771_v17  ;;  %v3998_v50 = vld [vmem:[#allocation2 + $0x58] sm:$0xf] }
 0x342   : > { %v5347_v63 = vshrl.u32 %v4579_v42, 16  ;;  %v5350_v52 = vshll.u32 %v4579_v42, 16  ;;  %v5493_v61 = vshrl.u32 %v4748_v6, 16  ;;  %v5496_v8 = vshll.u32 %v4748_v6, 16  ;;  %10861 = vmatprep.subr.bf16.mxu1 %v11355_v24 }
 0x343   : > { %8568 = vmatmul.mubr.bf16.gmra.mxu0 %v5388_v28  ;;  %v5519_v51 = vshrl.u32 %v4955_v62, 16  ;;  %v5522_v10 = vshll.u32 %v4955_v62, 16  ;;  %v5491_v35 = vor.u32 %v5490_v30, %v5487_v58  ;;  %v5502_v2 = vshrl.u32 %v9886_v37, 16  ;;  %v3997_v62 = vld [vmem:[#allocation2 + $0x54] sm:$0xf] }
 0x344   : > { %v5349_v31 = vrot.slane %v5347_v63, 3  ;;  %v5352_v54 = vrot.slane %v5350_v52, 4  ;;  %v5495_v53 = vrot.slane %v5493_v61, 3  ;;  %v5498_v55 = vrot.slane %v5496_v8, 4 }
 0x345   : > { %v5521_v20 = vrot.slane %v5519_v51, 3  ;;  %v5524_v46 = vrot.slane %v5522_v10, 4  ;;  %v5504_v34 = vrot.slane %v5502_v2, 3  ;;  %v5505_v26 = vshll.u32 %v9886_v37, 16  ;;  %10862 = vmatpush3.bf16.msra.mxu1 %v11355_v24  ;;  %v11373_v51 = vld [vmem:[%s15149_s2 + $0x210] sm:$0xff]   ;;  %v13778_v10 = vpop.f32.mrf.mxu1 }
 0x346   : > { %v5353_v42 = vor.u32 %v5352_v54, %v5349_v31  ;;  %v5510_v28 = vshrl.u32 %v9887_v18, 16  ;;  %v5499_v4 = vor.u32 %v5498_v55, %v5495_v53  ;;  %v5513_v25 = vshll.u32 %v9887_v18, 16  ;;  %v11338_v63 = vld [vmem:[#allocation2 + $0x4c] ss:$0 sps:$4 sm:$0x11]   ;;  %10863 = vmatprep.subr.bf16.mxu1 %v11364_v13  ;;  %15220 = vst [vmem:[#allocation12_spill] sm:$0xff] %v13778_v10  ;;  %v13780_v61 = vpop.f32.mrf.mxu0 }
 0x347   : > { %v5525_v6 = vor.u32 %v5524_v46, %v5521_v20  ;;  %v13773_v43 = vcombine.low %v3997_v62, %v3998_v50  ;;  %15221 = vst [vmem:[#allocation13_spill] sm:$0xff] %v13780_v61  ;;  %v5507_v8 = vrot.slane %v5505_v26, 4  ;;  %v4581_v24 = vshrl.u32 %v13327_v0, 16  ;;  %v3996_v54 = vld [vmem:[#allocation2 + $0x50] sm:$0x8] }
 0x348   : > { %8407 = vmatmul.mubr.bf16.gmra.mxu1 %v5353_v42  ;;  %v5512_v37 = vrot.slane %v5510_v28, 3  ;;  %v4584_v52 = vshll.u32 %v13327_v0, 16  ;;  %v5500_v18 = vsel %vm5156_vm8, %v5491_v35, %v5499_v4  ;;  %v5515_v58 = vrot.slane %v5513_v25, 4  ;;  %v13788_v28 = vpop.f32.mrf.mxu1  ;;  %v13790_v25 = vpop.f32.mrf.mxu0 }
 0x349   : > { %8575 = vmatprep.mubr.bf16.mxu0 %v5525_v6  ;;  %v4957_v30 = vshrl.u32 %v13773_v43, 16  ;;  %v4960_v31 = vshll.u32 %v13773_v43, 16  ;;  %8414 = vmatprep.mubr.bf16.mxu1 %v5500_v18  ;;  %v5508_v2 = vor.u32 %v5507_v8, %v5504_v34  ;;  %v4583_v20 = vrot.slane %v4581_v24, 4  ;;  %15222 = vst [vmem:[#allocation14_spill] sm:$0xff] %v13788_v28  ;;  %15223 = vst [vmem:[#allocation15_spill] sm:$0xff] %v13790_v25 }
 0x34a   : > { %v4586_v46 = vrot.slane %v4584_v52, 5  ;;  %v4749_v53 = vrot.slane %v13368_v38, 5  ;;  %10864 = vmatpush3.bf16.msra.mxu1 %v11364_v13  ;;  %v5516_v55 = vor.u32 %v5515_v58, %v5512_v37  ;;  %v4750_v0 = vrot.slane %v11338_v63, 5 }
 0x34b   : > { %v4959_v42 = vrot.slane %v4957_v30, 4  ;;  %v4962_v26 = vrot.slane %v4960_v31, 5  ;;  %10865 = vmatprep.subr.bf16.mxu1 %v11373_v51  ;;  %v9888_v61 = vcombine.low %v3996_v54, %v3997_v62  ;;  %v9889_v52 = vcombine.low %v3998_v50, %v3998_v50 }
 0x34c   : > { %v4587_v4 = vor.u32 %v4586_v46, %v4583_v20  ;;  %v5614_v35 = vshrl.u32 %v4749_v53, 16  ;;  %v5617_v6 = vshll.u32 %v4749_v53, 16  ;;  %v5517_v34 = vsel %vm5156_vm8, %v5508_v2, %v5516_v55  ;;  %v13796_v46 = vpop.f32.mrf.mxu0 }
 0x34d   : > { %v4963_v8 = vor.u32 %v4962_v26, %v4959_v42  ;;  %v4751_v24 = vsel %vm4371_vm9, %v4749_v53, %v4750_v0  ;;  %8576 = vmatmul.mubr.bf16.gmra.mxu0 %v5517_v34  ;;  %v13794_v20 = vpop.f32.mrf.mxu1  ;;  %15225 = vst [vmem:[#allocation17_spill] sm:$0xff] %v13796_v46  ;;  %v5631_v55 = vshrl.u32 %v9888_v61, 16  ;;  %v4001_v53 = vld [vmem:[#allocation2 + $0x68] sm:$0xf]  ;;  %v4000_v34 = vld [vmem:[#allocation2 + $0x64] sm:$0xf] }
 0x34e   : > { %v5476_v13 = vshrl.u32 %v4587_v4, 16  ;;  %v5479_v37 = vshll.u32 %v4587_v4, 16  ;;  %v5616_v18 = vrot.slane %v5614_v35, 3  ;;  %v5619_v63 = vrot.slane %v5617_v6, 4  ;;  %10866 = vmatpush3.bf16.msra.mxu1 %v11373_v51  ;;  %15224 = vst [vmem:[#allocation16_spill] sm:$0xff] %v13794_v20 }
 0x34f   : > { %v5648_v58 = vshrl.u32 %v4963_v8, 16  ;;  %v5651_v30 = vshll.u32 %v4963_v8, 16  ;;  %v5622_v31 = vshrl.u32 %v4751_v24, 16  ;;  %v5625_v25 = vshll.u32 %v4751_v24, 16 }
 0x350   : > { %v5478_v62 = vrot.slane %v5476_v13, 3  ;;  %v5481_v54 = vrot.slane %v5479_v37, 4  ;;  %v5620_v2 = vor.u32 %v5619_v63, %v5616_v18  ;;  %v5633_v35 = vrot.slane %v5631_v55, 3  ;;  %v11342_v46 = vld [vmem:[#allocation2 + $0x5c] ss:$0 sps:$4 sm:$0x11]   ;;  %v13800_v13 = vpop.f32.mrf.mxu1  ;;  %v13802_v37 = vpop.f32.mrf.mxu0 }
 0x351   : > { %v5650_v50 = vrot.slane %v5648_v58, 3  ;;  %v5653_v42 = vrot.slane %v5651_v30, 4  ;;  %v5624_v26 = vrot.slane %v5622_v31, 3  ;;  %v5627_v0 = vrot.slane %v5625_v25, 4  ;;  %15226 = vst [vmem:[#allocation18_spill] sm:$0xff] %v13800_v13  ;;  %15227 = vst [vmem:[#allocation19_spill] sm:$0xff] %v13802_v37 }
 0x352   : > { %v5482_v4 = vor.u32 %v5481_v54, %v5478_v62  ;;  %v5634_v51 = vshll.u32 %v9888_v61, 16  ;;  %v5639_v6 = vshrl.u32 %v9889_v52, 16  ;;  %v5642_v17 = vshll.u32 %v9889_v52, 16  ;;  %v11382_v61 = vld [vmem:[%s15149_s2 + $0x208] sm:$0xff]   ;;  %v3999_v54 = vld [vmem:[#allocation2 + $0x60] sm:$0x8] }
 0x353   : > { %v5654_v8 = vor.u32 %v5653_v42, %v5650_v50  ;;  %v5628_v24 = vor.u32 %v5627_v0, %v5624_v26  ;;  %v13798_v20 = vcombine.low %v4000_v34, %v4001_v53  ;;  %v4589_v25 = vshrl.u32 %v13368_v38, 16  ;;  %10867 = vmatprep.subr.bf16.mxu1 %v11382_v61 }
 0x354   : > { %8415 = vmatmul.mubr.bf16.gmra.mxu1 %v5482_v4  ;;  %v5636_v18 = vrot.slane %v5634_v51, 4  ;;  %v5641_v63 = vrot.slane %v5639_v6, 3  ;;  %v4592_v58 = vshll.u32 %v13368_v38, 16  ;;  %v5644_v30 = vrot.slane %v5642_v17, 4  ;;  %v13813_v6 = vpop.f32.mrf.mxu1 }
 0x355   : > { %8583 = vmatprep.mubr.bf16.mxu0 %v5654_v8  ;;  %v5629_v52 = vsel %vm5156_vm8, %v5620_v2, %v5628_v24  ;;  %v4965_v31 = vshrl.u32 %v13798_v20, 16  ;;  %v4968_v62 = vshll.u32 %v13798_v20, 16  ;;  %v4591_v50 = vrot.slane %v4589_v25, 4  ;;  %15228 = vst [vmem:[#allocation20_spill] sm:$0xff] %v13813_v6  ;;  %10868 = vmatpush3.bf16.msra.mxu1 %v11382_v61 }
 0x356   : > { %8422 = vmatprep.mubr.bf16.mxu1 %v5629_v52  ;;  %v5637_v55 = vor.u32 %v5636_v18, %v5633_v35  ;;  %v4594_v42 = vrot.slane %v4592_v58, 5  ;;  %v4752_v26 = vrot.slane %v13392_v11, 5  ;;  %v5645_v38 = vor.u32 %v5644_v30, %v5641_v63  ;;  %v13815_v2 = vpop.f32.mrf.mxu0 }
 0x357   : > { %v4967_v0 = vrot.slane %v4965_v31, 4  ;;  %v4970_v4 = vrot.slane %v4968_v62, 5  ;;  %v4753_v51 = vrot.slane %v11342_v46, 5  ;;  %15229 = vst [vmem:[#allocation21_spill] sm:$0xff] %v13815_v2  ;;  %v9890_v37 = vcombine.low %v3999_v54, %v4000_v34 }
 0x358   : > { %v4595_v17 = vor.u32 %v4594_v42, %v4591_v50  ;;  %v5743_v8 = vshrl.u32 %v4752_v26, 16  ;;  %v5746_v24 = vshll.u32 %v4752_v26, 16  ;;  %v5646_v35 = vsel %vm5156_vm8, %v5637_v55, %v5645_v38  ;;  %v13819_v52 = vpop.f32.mrf.mxu0  ;;  %v13821_v42 = vpop.f32.mrf.mxu1 }
 0x359   : > { %v4971_v18 = vor.u32 %v4970_v4, %v4967_v0  ;;  %v4754_v25 = vsel %vm4371_vm9, %v4752_v26, %v4753_v51  ;;  %v9891_v58 = vcombine.low %v4001_v53, %v4001_v53  ;;  %15230 = vst [vmem:[#allocation22_spill] sm:$0xff] %v13819_v52  ;;  %8584 = vmatmul.mubr.bf16.gmra.mxu0 %v5646_v35  ;;  %15231 = vst [vmem:[#allocation23_spill] sm:$0xff] %v13821_v42  ;;  %v4004_v0 = vld [vmem:[#allocation2 + $0x78] sm:$0xf] }
 0x35a   : > { %v5605_v63 = vshrl.u32 %v4595_v17, 16  ;;  %v5608_v46 = vshll.u32 %v4595_v17, 16  ;;  %v5745_v30 = vrot.slane %v5743_v8, 3  ;;  %v5748_v31 = vrot.slane %v5746_v24, 4  ;;  %v13823_v35 = vpop.f32.mrf.mxu0 }
 0x35b   : > { %v5777_v62 = vshrl.u32 %v4971_v18, 16  ;;  %v5780_v2 = vshll.u32 %v4971_v18, 16  ;;  %v5751_v61 = vshrl.u32 %v4754_v25, 16  ;;  %v5754_v50 = vshll.u32 %v4754_v25, 16  ;;  %15232 = vst [vmem:[#allocation24_spill] sm:$0xff] %v13823_v35 }
 0x35c   : > { %v5607_v34 = vrot.slane %v5605_v63, 3  ;;  %v5610_v54 = vrot.slane %v5608_v46, 4  ;;  %v5749_v55 = vor.u32 %v5748_v31, %v5745_v30  ;;  %v5760_v38 = vshrl.u32 %v9890_v37, 16  ;;  %v4003_v18 = vld [vmem:[#allocation2 + $0x74] sm:$0xf] }
 0x35d   : > { %v5779_v26 = vrot.slane %v5777_v62, 3  ;;  %v5782_v53 = vrot.slane %v5780_v2, 4  ;;  %v5753_v4 = vrot.slane %v5751_v61, 3  ;;  %v5756_v51 = vrot.slane %v5754_v50, 4  ;;  %v13827_v46 = vpop.f32.mrf.mxu1 }
 0x35e   : > { %v5611_v17 = vor.u32 %v5610_v54, %v5607_v34  ;;  %v5762_v8 = vrot.slane %v5760_v38, 3  ;;  %v5763_v24 = vshll.u32 %v9890_v37, 16  ;;  %v5768_v52 = vshrl.u32 %v9891_v58, 16  ;;  %v11347_v63 = vld [vmem:[#allocation2 + $0x6c] ss:$0 sps:$4 sm:$0x11]   ;;  %v13836_v38 = vpop.f32.mrf.mxu0 }
 0x35f   : > { %v5783_v6 = vor.u32 %v5782_v53, %v5779_v26  ;;  %v5757_v25 = vor.u32 %v5756_v51, %v5753_v4  ;;  %v5771_v13 = vshll.u32 %v9891_v58, 16  ;;  %v13825_v42 = vcombine.low %v4003_v18, %v4004_v0  ;;  %15233 = vst [vmem:[#allocation25_spill] sm:$0xff] %v13827_v46  ;;  %v4002_v34 = vld [vmem:[#allocation2 + $0x70] sm:$0x8]  ;;  %v13834_v54 = vpop.f32.mrf.mxu1  ;;  %15235 = vst [vmem:[#allocation27_spill] sm:$0xff] %v13836_v38 }
 0x360   : > { %8423 = vmatmul.mubr.bf16.gmra.mxu1 %v5611_v17  ;;  %v5765_v30 = vrot.slane %v5763_v24, 4  ;;  %v5770_v2 = vrot.slane %v5768_v52, 3  ;;  %v4597_v31 = vshrl.u32 %v13392_v11, 16  ;;  %v4600_v62 = vshll.u32 %v13392_v11, 16  ;;  %15234 = vst [vmem:[#allocation26_spill] sm:$0xff] %v13834_v54 }
 0x361   : > { %8591 = vmatprep.mubr.bf16.mxu0 %v5783_v6  ;;  %v5758_v37 = vsel %vm5156_vm8, %v5749_v55, %v5757_v25  ;;  %v5773_v61 = vrot.slane %v5771_v13, 4  ;;  %v4973_v50 = vshrl.u32 %v13825_v42, 16  ;;  %v4976_v58 = vshll.u32 %v13825_v42, 16  ;;  %v13839_v35 = vpop.f32.mrf.mxu1 }
 0x362   : > { %8430 = vmatprep.mubr.bf16.mxu1 %v5758_v37  ;;  %v5766_v26 = vor.u32 %v5765_v30, %v5762_v8  ;;  %v4599_v52 = vrot.slane %v4597_v31, 4  ;;  %v4602_v53 = vrot.slane %v4600_v62, 5  ;;  %v4755_v4 = vrot.slane %v13425_v47, 5  ;;  %15236 = vst [vmem:[#allocation28_spill] sm:$0xff] %v13839_v35 }
 0x363   : > { %v5774_v11 = vor.u32 %v5773_v61, %v5770_v2  ;;  %v4975_v6 = vrot.slane %v4973_v50, 4  ;;  %v4978_v51 = vrot.slane %v4976_v58, 5  ;;  %v4756_v55 = vrot.slane %v11347_v63, 5 }
 0x364   : > { %v4603_v13 = vor.u32 %v4602_v53, %v4599_v52  ;;  %v5872_v17 = vshrl.u32 %v4755_v4, 16  ;;  %v5875_v24 = vshll.u32 %v4755_v4, 16  ;;  %v9892_v25 = vcombine.low %v4002_v34, %v4003_v18 }
 0x365   : > { %v5775_v54 = vsel %vm5156_vm8, %v5766_v26, %v5774_v11  ;;  %v4979_v46 = vor.u32 %v4978_v51, %v4975_v6  ;;  %v4757_v37 = vsel %vm4371_vm9, %v4755_v4, %v4756_v55  ;;  %v9893_v8 = vcombine.low %v4004_v0, %v4004_v0  ;;  %v13843_v30 = vpop.f32.mrf.mxu0  ;;  %v4007_v26 = vld [vmem:[#allocation2 + $0x88] sm:$0xf]  ;;  %v13845_v11 = vpop.f32.mrf.mxu1 }
 0x366   : > { %15237 = vst [vmem:[#allocation29_spill] sm:$0xff] %v13843_v30  ;;  %8592 = vmatmul.mubr.bf16.gmra.mxu0 %v5775_v54  ;;  %v5734_v31 = vshrl.u32 %v4603_v13, 16  ;;  %v5737_v2 = vshll.u32 %v4603_v13, 16  ;;  %v5874_v62 = vrot.slane %v5872_v17, 3  ;;  %v5877_v61 = vrot.slane %v5875_v24, 4  ;;  %15238 = vst [vmem:[#allocation30_spill] sm:$0xff] %v13845_v11 }
 0x367   : > { %v5906_v63 = vshrl.u32 %v4979_v46, 16  ;;  %v5909_v50 = vshll.u32 %v4979_v46, 16  ;;  %v5880_v58 = vshrl.u32 %v4757_v37, 16  ;;  %v5883_v52 = vshll.u32 %v4757_v37, 16  ;;  %v13847_v4 = vpop.f32.mrf.mxu0  ;;  %v4006_v46 = vld [vmem:[#allocation2 + $0x84] sm:$0xf] }
 0x368   : > { %v5736_v18 = vrot.slane %v5734_v31, 3  ;;  %v5739_v34 = vrot.slane %v5737_v2, 4  ;;  %v5878_v53 = vor.u32 %v5877_v61, %v5874_v62  ;;  %v5889_v38 = vshrl.u32 %v9892_v25, 16  ;;  %15239 = vst [vmem:[#allocation31_spill] sm:$0xff] %v13847_v4 }
 0x369   : > { %v5908_v0 = vrot.slane %v5906_v63, 3  ;;  %v5911_v6 = vrot.slane %v5909_v50, 4  ;;  %v5882_v54 = vrot.slane %v5880_v58, 3  ;;  %v5885_v51 = vrot.slane %v5883_v52, 4  ;;  %v13855_v58 = vpop.f32.mrf.mxu0 }
 0x36a   : > { %v5740_v55 = vor.u32 %v5739_v34, %v5736_v18  ;;  %v5891_v13 = vrot.slane %v5889_v38, 3  ;;  %v5892_v17 = vshll.u32 %v9892_v25, 16  ;;  %v5897_v24 = vshrl.u32 %v9893_v8, 16  ;;  %v11351_v62 = vld [vmem:[#allocation2 + $0x7c] ss:$0 sps:$4 sm:$0x11]  }
 0x36b   : > { %v5912_v30 = vor.u32 %v5911_v6, %v5908_v0  ;;  %v5886_v37 = vor.u32 %v5885_v51, %v5882_v54  ;;  %v5900_v31 = vshll.u32 %v9893_v8, 16  ;;  %v13849_v2 = vcombine.low %v4006_v46, %v4007_v26  ;;  %v13853_v50 = vpop.f32.mrf.mxu1  ;;  %15241 = vst [vmem:[#allocation33_spill] sm:$0xff] %v13855_v58  ;;  %v4005_v18 = vld [vmem:[#allocation2 + $0x80] sm:$0x8] }
 0x36c   : > { %8431 = vmatmul.mubr.bf16.gmra.mxu1 %v5740_v55  ;;  %v5894_v61 = vrot.slane %v5892_v17, 4  ;;  %v5899_v11 = vrot.slane %v5897_v24, 3  ;;  %v4605_v4 = vshrl.u32 %v13425_v47, 16  ;;  %v4608_v63 = vshll.u32 %v13425_v47, 16  ;;  %15240 = vst [vmem:[#allocation32_spill] sm:$0xff] %v13853_v50  ;;  %v11390_v34 = vld [vmem:[%s15149_s2 + $0x200] sm:$0xff]   ;;  %v13866_v50 = vpop.f32.mrf.mxu0 }
 0x36d   : > { %8599 = vmatprep.mubr.bf16.mxu0 %v5912_v30  ;;  %v5887_v38 = vsel %vm5156_vm8, %v5878_v53, %v5886_v37  ;;  %v5902_v25 = vrot.slane %v5900_v31, 4  ;;  %v4981_v8 = vshrl.u32 %v13849_v2, 16  ;;  %v4984_v52 = vshll.u32 %v13849_v2, 16  ;;  %v13864_v51 = vpop.f32.mrf.mxu1  ;;  %10869 = vmatprep.subr.bf16.mxu1 %v11390_v34  ;;  %15243 = vst [vmem:[#allocation35_spill] sm:$0xff] %v13866_v50 }
 0x36e   : > { %8438 = vmatprep.mubr.bf16.mxu1 %v5887_v38  ;;  %v5895_v0 = vor.u32 %v5894_v61, %v5891_v13  ;;  %v4607_v47 = vrot.slane %v4605_v4, 4  ;;  %v4610_v6 = vrot.slane %v4608_v63, 5  ;;  %v4758_v54 = vrot.slane %v13445_v5, 5  ;;  %15242 = vst [vmem:[#allocation34_spill] sm:$0xff] %v13864_v51  ;;  %10870 = vmatpush3.bf16.msra.mxu1 %v11390_v34 }
 0x36f   : > { %v5903_v30 = vor.u32 %v5902_v25, %v5899_v11  ;;  %v4983_v53 = vrot.slane %v4981_v8, 4  ;;  %v4986_v55 = vrot.slane %v4984_v52, 5  ;;  %v4759_v17 = vrot.slane %v11351_v62, 5  ;;  %v13870_v38 = vpop.f32.mrf.mxu1 }
 0x370   : > { %v4611_v24 = vor.u32 %v4610_v6, %v4607_v47  ;;  %v6001_v37 = vshrl.u32 %v4758_v54, 16  ;;  %v6004_v31 = vshll.u32 %v4758_v54, 16  ;;  %v9894_v58 = vcombine.low %v4005_v18, %v4006_v46  ;;  %15244 = vst [vmem:[#allocation36_spill] sm:$0xff] %v13870_v38 }
 0x371   : > { %v5904_v13 = vsel %vm5156_vm8, %v5895_v0, %v5903_v30  ;;  %v4987_v4 = vor.u32 %v4986_v55, %v4983_v53  ;;  %v4760_v61 = vsel %vm4371_vm9, %v4758_v54, %v4759_v17  ;;  %v9895_v63 = vcombine.low %v4007_v26, %v4007_v26  ;;  %v4010_v0 = vld [vmem:[#allocation2 + $0x98] sm:$0xf]  ;;  %v13874_v17 = vpop.f32.mrf.mxu1 }
 0x372   : > { %8600 = vmatmul.mubr.bf16.gmra.mxu0 %v5904_v13  ;;  %v5863_v11 = vshrl.u32 %v4611_v24, 16  ;;  %v5866_v25 = vshll.u32 %v4611_v24, 16  ;;  %v6003_v62 = vrot.slane %v6001_v37, 3  ;;  %v6006_v8 = vrot.slane %v6004_v31, 4  ;;  %15246 = vst [vmem:[#allocation38_spill] sm:$0xff] %v13874_v17 }
 0x373   : > { %v6035_v52 = vshrl.u32 %v4987_v4, 16  ;;  %v6038_v47 = vshll.u32 %v4987_v4, 16  ;;  %v6009_v6 = vshrl.u32 %v4760_v61, 16  ;;  %v6012_v46 = vshll.u32 %v4760_v61, 16  ;;  %v13872_v30 = vpop.f32.mrf.mxu0  ;;  %v4009_v4 = vld [vmem:[#allocation2 + $0x94] sm:$0xf] }
 0x374   : > { %v5865_v18 = vrot.slane %v5863_v11, 3  ;;  %v5868_v50 = vrot.slane %v5866_v25, 4  ;;  %v6007_v34 = vor.u32 %v6006_v8, %v6003_v62  ;;  %v6018_v51 = vshrl.u32 %v9894_v58, 16  ;;  %15245 = vst [vmem:[#allocation37_spill] sm:$0xff] %v13872_v30 }
 0x375   : > { %v6037_v54 = vrot.slane %v6035_v52, 3  ;;  %v6040_v26 = vrot.slane %v6038_v47, 4  ;;  %v6011_v53 = vrot.slane %v6009_v6, 3  ;;  %v6014_v55 = vrot.slane %v6012_v46, 4  ;;  %v13880_v6 = vpop.f32.mrf.mxu0  ;;  %v4008_v46 = vld [vmem:[#allocation2 + $0x90] sm:$0x8] }
 0x376   : > { %v5869_v24 = vor.u32 %v5868_v50, %v5865_v18  ;;  %v6020_v37 = vrot.slane %v6018_v51, 3  ;;  %v6021_v31 = vshll.u32 %v9894_v58, 16  ;;  %v6026_v13 = vshrl.u32 %v9895_v63, 16  ;;  %v11356_v62 = vld [vmem:[#allocation2 + $0x8c] ss:$0 sps:$4 sm:$0x11]  }
 0x377   : > { %v6041_v38 = vor.u32 %v6040_v26, %v6037_v54  ;;  %v6015_v61 = vor.u32 %v6014_v55, %v6011_v53  ;;  %v6029_v11 = vshll.u32 %v9895_v63, 16  ;;  %v13876_v25 = vcombine.low %v4009_v4, %v4010_v0  ;;  %15247 = vst [vmem:[#allocation39_spill] sm:$0xff] %v13880_v6  ;;  %v13890_v17 = vpop.f32.mrf.mxu0 }
 0x378   : > { %8439 = vmatmul.mubr.bf16.gmra.mxu1 %v5869_v24  ;;  %v6023_v8 = vrot.slane %v6021_v31, 4  ;;  %v6028_v30 = vrot.slane %v6026_v13, 3  ;;  %v4613_v52 = vshrl.u32 %v13445_v5, 16  ;;  %v4616_v47 = vshll.u32 %v13445_v5, 16  ;;  %v13885_v18 = vpop.f32.mrf.mxu1  ;;  %15250 = vst [vmem:[#allocation42_spill] sm:$0xff] %v13890_v17 }
 0x379   : > { %8607 = vmatprep.mubr.bf16.mxu0 %v6041_v38  ;;  %v6016_v50 = vsel %vm5156_vm8, %v6007_v34, %v6015_v61  ;;  %v6031_v58 = vrot.slane %v6029_v11, 4  ;;  %v4989_v51 = vshrl.u32 %v13876_v25, 16  ;;  %v4992_v63 = vshll.u32 %v13876_v25, 16  ;;  %15248 = vst [vmem:[#allocation40_spill] sm:$0xff] %v13885_v18 }
 0x37a   : > { %8446 = vmatprep.mubr.bf16.mxu1 %v6016_v50  ;;  %v6024_v54 = vor.u32 %v6023_v8, %v6020_v37  ;;  %v4615_v26 = vrot.slane %v4613_v52, 4  ;;  %v4618_v53 = vrot.slane %v4616_v47, 5  ;;  %v4761_v55 = vrot.slane %v13467_v9, 5  ;;  %v13888_v13 = vpop.f32.mrf.mxu1 }
 0x37b   : > { %v6032_v5 = vor.u32 %v6031_v58, %v6028_v30  ;;  %v4991_v24 = vrot.slane %v4989_v51, 4  ;;  %v4994_v31 = vrot.slane %v4992_v63, 5  ;;  %v4762_v38 = vrot.slane %v11356_v62, 5  ;;  %15249 = vst [vmem:[#allocation41_spill] sm:$0xff] %v13888_v13 }
 0x37c   : > { %v4619_v34 = vor.u32 %v4618_v53, %v4615_v26  ;;  %v6130_v61 = vshrl.u32 %v4761_v55, 16  ;;  %v6133_v11 = vshll.u32 %v4761_v55, 16  ;;  %v9896_v6 = vcombine.low %v4008_v46, %v4009_v4  ;;  %v13894_v62 = vpop.f32.mrf.mxu1 }
 0x37d   : > { %v6033_v18 = vsel %vm5156_vm8, %v6024_v54, %v6032_v5  ;;  %v4995_v50 = vor.u32 %v4994_v31, %v4991_v24  ;;  %v4763_v37 = vsel %vm4371_vm9, %v4761_v55, %v4762_v38  ;;  %v9897_v8 = vcombine.low %v4010_v0, %v4010_v0  ;;  %15251 = vst [vmem:[#allocation43_spill] sm:$0xff] %v13894_v62  ;;  %v4013_v54 = vld [vmem:[#allocation2 + $0xa8] sm:$0xf]  ;;  %v13896_v5 = vpop.f32.mrf.mxu0 }
 0x37e   : > { %8608 = vmatmul.mubr.bf16.gmra.mxu0 %v6033_v18  ;;  %v5992_v52 = vshrl.u32 %v4619_v34, 16  ;;  %v5995_v30 = vshll.u32 %v4619_v34, 16  ;;  %v6132_v47 = vrot.slane %v6130_v61, 3  ;;  %v6135_v58 = vrot.slane %v6133_v11, 4  ;;  %15252 = vst [vmem:[#allocation44_spill] sm:$0xff] %v13896_v5  ;;  %v13898_v62 = vpop.f32.mrf.mxu1 }
 0x37f   : > { %v6164_v51 = vshrl.u32 %v4995_v50, 16  ;;  %v6167_v63 = vshll.u32 %v4995_v50, 16  ;;  %v6138_v26 = vshrl.u32 %v4763_v37, 16  ;;  %v6141_v53 = vshll.u32 %v4763_v37, 16  ;;  %v4012_v11 = vld [vmem:[#allocation2 + $0xa4] sm:$0xf] }
 0x380   : > { %v5994_v4 = vrot.slane %v5992_v52, 3  ;;  %v5997_v46 = vrot.slane %v5995_v30, 4  ;;  %v6136_v17 = vor.u32 %v6135_v58, %v6132_v47  ;;  %v6147_v13 = vshrl.u32 %v9896_v6, 16  ;;  %15253 = vst [vmem:[#allocation45_spill] sm:$0xff] %v13898_v62 }
 0x381   : > { %v6166_v55 = vrot.slane %v6164_v51, 3  ;;  %v6169_v0 = vrot.slane %v6167_v63, 4  ;;  %v6140_v18 = vrot.slane %v6138_v26, 3  ;;  %v6143_v24 = vrot.slane %v6141_v53, 4  ;;  %v13904_v26 = vpop.f32.mrf.mxu0 }
 0x382   : > { %v5998_v31 = vor.u32 %v5997_v46, %v5994_v4  ;;  %v6149_v38 = vrot.slane %v6147_v13, 3  ;;  %v6150_v34 = vshll.u32 %v9896_v6, 16  ;;  %v6155_v61 = vshrl.u32 %v9897_v8, 16  ;;  %v11360_v47 = vld [vmem:[#allocation2 + $0x9c] ss:$0 sps:$4 sm:$0x11]  }
 0x383   : > { %v6170_v50 = vor.u32 %v6169_v0, %v6166_v55  ;;  %v6144_v37 = vor.u32 %v6143_v24, %v6140_v18  ;;  %v6158_v52 = vshll.u32 %v9897_v8, 16  ;;  %v13900_v30 = vcombine.low %v4012_v11, %v4013_v54  ;;  %15254 = vst [vmem:[#allocation46_spill] sm:$0xff] %v13904_v26  ;;  %v4011_v4 = vld [vmem:[#allocation2 + $0xa0] sm:$0x8]  ;;  %v13912_v26 = vpop.f32.mrf.mxu0 }
 0x384   : > { %8447 = vmatmul.mubr.bf16.gmra.mxu1 %v5998_v31  ;;  %v6152_v58 = vrot.slane %v6150_v34, 4  ;;  %v6157_v5 = vrot.slane %v6155_v61, 3  ;;  %v4621_v51 = vshrl.u32 %v13467_v9, 16  ;;  %v4624_v63 = vshll.u32 %v13467_v9, 16  ;;  %15256 = vst [vmem:[#allocation48_spill] sm:$0xff] %v13912_v26 }
 0x385   : > { %8615 = vmatprep.mubr.bf16.mxu0 %v6170_v50  ;;  %v6145_v6 = vsel %vm5156_vm8, %v6136_v17, %v6144_v37  ;;  %v6160_v13 = vrot.slane %v6158_v52, 4  ;;  %v4997_v53 = vshrl.u32 %v13900_v30, 16  ;;  %v5000_v8 = vshll.u32 %v13900_v30, 16  ;;  %v13910_v24 = vpop.f32.mrf.mxu1 }
 0x386   : > { %8454 = vmatprep.mubr.bf16.mxu1 %v6145_v6  ;;  %v6153_v46 = vor.u32 %v6152_v58, %v6149_v38  ;;  %v4623_v55 = vrot.slane %v4621_v51, 4  ;;  %v4626_v0 = vrot.slane %v4624_v63, 5  ;;  %v4764_v18 = vrot.slane %v13507_v22, 5  ;;  %15255 = vst [vmem:[#allocation47_spill] sm:$0xff] %v13910_v24 }
 0x387   : > { %v6161_v9 = vor.u32 %v6160_v13, %v6157_v5  ;;  %v4999_v31 = vrot.slane %v4997_v53, 4  ;;  %v5002_v34 = vrot.slane %v5000_v8, 5  ;;  %v4765_v61 = vrot.slane %v11360_v47, 5  ;;  %v13914_v62 = vpop.f32.mrf.mxu1 }
 0x388   : > { %v4627_v50 = vor.u32 %v4626_v0, %v4623_v55  ;;  %v6259_v17 = vshrl.u32 %v4764_v18, 16  ;;  %v6262_v37 = vshll.u32 %v4764_v18, 16  ;;  %v9898_v52 = vcombine.low %v4011_v4, %v4012_v11  ;;  %15257 = vst [vmem:[#allocation49_spill] sm:$0xff] %v13914_v62 }
 0x389   : > { %v6162_v38 = vsel %vm5156_vm8, %v6153_v46, %v6161_v9  ;;  %v5003_v58 = vor.u32 %v5002_v34, %v4999_v31  ;;  %v4766_v51 = vsel %vm4371_vm9, %v4764_v18, %v4765_v61  ;;  %v9899_v63 = vcombine.low %v4013_v54, %v4013_v54  ;;  %v13918_v47 = vpop.f32.mrf.mxu1  ;;  %v13920_v46 = vld [vmem:[#allocation2 + $0xb8] sm:$0xf]  ;;  %v13922_v9 = vpop.f32.mrf.mxu0 }
 0x38a   : > { %8616 = vmatmul.mubr.bf16.gmra.mxu0 %v6162_v38  ;;  %v6121_v6 = vshrl.u32 %v4627_v50, 16  ;;  %v6124_v5 = vshll.u32 %v4627_v50, 16  ;;  %v6261_v13 = vrot.slane %v6259_v17, 3  ;;  %v6264_v53 = vrot.slane %v6262_v37, 4  ;;  %15258 = vst [vmem:[#allocation50_spill] sm:$0xff] %v13918_v47  ;;  %15259 = vst [vmem:[#allocation51_spill] sm:$0xff] %v13922_v9 }
 0x38b   : > { %v6293_v8 = vshrl.u32 %v5003_v58, 16  ;;  %v6296_v55 = vshll.u32 %v5003_v58, 16  ;;  %v6267_v11 = vshrl.u32 %v4766_v51, 16  ;;  %v6270_v4 = vshll.u32 %v4766_v51, 16  ;;  %v13924_v61 = vpop.f32.mrf.mxu1  ;;  %v4015_v58 = vld [vmem:[#allocation2 + $0xb4] sm:$0xf] }
 0x38c   : > { %v6123_v0 = vrot.slane %v6121_v6, 3  ;;  %v6126_v26 = vrot.slane %v6124_v5, 4  ;;  %v6265_v62 = vor.u32 %v6264_v53, %v6261_v13  ;;  %v6276_v24 = vshrl.u32 %v9898_v52, 16  ;;  %15260 = vst [vmem:[#allocation52_spill] sm:$0xff] %v13924_v61 }
 0x38d   : > { %v6295_v54 = vrot.slane %v6293_v8, 3  ;;  %v6298_v18 = vrot.slane %v6296_v55, 4  ;;  %v6269_v31 = vrot.slane %v6267_v11, 3  ;;  %v6272_v34 = vrot.slane %v6270_v4, 4  ;;  %v13930_v11 = vpop.f32.mrf.mxu0 }
 0x38e   : > { %v6127_v50 = vor.u32 %v6126_v26, %v6123_v0  ;;  %v6278_v17 = vrot.slane %v6276_v24, 3  ;;  %v6279_v37 = vshll.u32 %v9898_v52, 16  ;;  %v6284_v38 = vshrl.u32 %v9899_v63, 16  ;;  %v11365_v53 = vld [vmem:[#allocation2 + $0xac] ss:$0 sps:$4 sm:$0x11]  }
 0x38f   : > { %v6299_v51 = vor.u32 %v6298_v18, %v6295_v54  ;;  %v6273_v6 = vor.u32 %v6272_v34, %v6269_v31  ;;  %v6287_v5 = vshll.u32 %v9899_v63, 16  ;;  %v13927_v13 = vcombine.low %v4015_v58, %v13920_v46  ;;  %15261 = vst [vmem:[#allocation53_spill] sm:$0xff] %v13930_v11 }
 0x390   : > { %8455 = vmatmul.mubr.bf16.gmra.mxu1 %v6127_v50  ;;  %v6281_v9 = vrot.slane %v6279_v37, 4  ;;  %v6286_v8 = vrot.slane %v6284_v38, 3  ;;  %v4629_v55 = vshrl.u32 %v13507_v22, 16  ;;  %v13935_v63 = vpop.f32.mrf.mxu1  ;;  %v4632_v18 = vshll.u32 %v13507_v22, 16 }
 0x391   : > { %8623 = vmatprep.mubr.bf16.mxu0 %v6299_v51  ;;  %v6274_v26 = vsel %vm5156_vm8, %v6265_v62, %v6273_v6  ;;  %v6289_v24 = vrot.slane %v6287_v5, 4  ;;  %v5005_v52 = vshrl.u32 %v13927_v13, 16  ;;  %v5008_v4 = vshll.u32 %v13927_v13, 16  ;;  %15262 = vst [vmem:[#allocation54_spill] sm:$0xff] %v13935_v63 }
 0x392   : > { %8462 = vmatprep.mubr.bf16.mxu1 %v6274_v26  ;;  %v6282_v0 = vor.u32 %v6281_v9, %v6278_v17  ;;  %v4631_v54 = vrot.slane %v4629_v55, 4  ;;  %v4767_v31 = vrot.slane %v13522_v39, 5  ;;  %v4768_v38 = vrot.slane %v11365_v53, 5  ;;  %v13939_v51 = vpop.f32.mrf.mxu1 }
 0x393   : > { %v6290_v34 = vor.u32 %v6289_v24, %v6286_v8  ;;  %v5007_v50 = vrot.slane %v5005_v52, 4  ;;  %v5010_v37 = vrot.slane %v5008_v4, 5  ;;  %15263 = vst [vmem:[#allocation55_spill] sm:$0xff] %v13939_v51  ;;  %v4634_v62 = vrot.slane %v4632_v18, 5  ;;  %v13941_v11 = vpop.f32.mrf.mxu0  ;;  %v4014_v24 = vld [vmem:[#allocation2 + $0xb0] sm:$0x8] }
 0x394   : > { %v6388_v6 = vshrl.u32 %v4767_v31, 16  ;;  %v6391_v5 = vshll.u32 %v4767_v31, 16  ;;  %15264 = vst [vmem:[#allocation56_spill] sm:$0xff] %v13941_v11  ;;  %v4769_v9 = vsel %vm4371_vm9, %v4767_v31, %v4768_v38  ;;  %v13947_v53 = vpop.f32.mrf.mxu1  ;;  %v5111_v3 = vrot.slane %v13694_v23, 5 }
 0x395   : > { %v6291_v63 = vsel %vm5156_vm8, %v6282_v0, %v6290_v34  ;;  %v5011_v26 = vor.u32 %v5010_v37, %v5007_v50  ;;  %v4635_v22 = vor.u32 %v4634_v62, %v4631_v54  ;;  %v6396_v8 = vshrl.u32 %v4769_v9, 16  ;;  %v13945_v52 = vpop.f32.mrf.mxu0  ;;  %15266 = vst [vmem:[#allocation58_spill] sm:$0xff] %v13947_v53 }
 0x396   : > { %8624 = vmatmul.mubr.bf16.gmra.mxu0 %v6291_v63  ;;  %v6390_v17 = vrot.slane %v6388_v6, 3  ;;  %v6393_v55 = vrot.slane %v6391_v5, 4  ;;  %15265 = vst [vmem:[#allocation57_spill] sm:$0xff] %v13945_v52  ;;  %v6399_v51 = vshll.u32 %v4769_v9, 16  ;;  %v9900_v54 = vcombine.low %v4014_v24, %v4015_v58  ;;  %v13953_v6 = vld [vmem:[#allocation2 + $0xc8] sm:$0xf] }
 0x397   : > { %v6422_v4 = vshrl.u32 %v5011_v26, 16  ;;  %v6425_v18 = vshll.u32 %v5011_v26, 16  ;;  %v6250_v61 = vshrl.u32 %v4635_v22, 16  ;;  %v6253_v11 = vshll.u32 %v4635_v22, 16  ;;  %v13949_v0 = vpop.f32.mrf.mxu0  ;;  %v13957_v26 = vpop.f32.mrf.mxu1  ;;  %v4017_v52 = vld [vmem:[#allocation2 + $0xc0] sm:$0x8] }
 0x398   : > { %v6398_v47 = vrot.slane %v6396_v8, 3  ;;  %15267 = vst [vmem:[#allocation59_spill] sm:$0xff] %v13949_v0  ;;  %v6401_v63 = vrot.slane %v6399_v51, 4  ;;  %v6394_v38 = vor.u32 %v6393_v55, %v6390_v17  ;;  %v9901_v62 = vcombine.low %v13920_v46, %v13920_v46  ;;  %15269 = vst [vmem:[#allocation61_spill] sm:$0xff] %v13957_v26 }
 0x399   : > { %v6424_v34 = vrot.slane %v6422_v4, 3  ;;  %v6427_v31 = vrot.slane %v6425_v18, 4  ;;  %v6252_v50 = vrot.slane %v6250_v61, 3  ;;  %v6255_v37 = vrot.slane %v6253_v11, 4  ;;  %v13955_v5 = vpop.f32.mrf.mxu0  ;;  %v4018_v61 = vld [vmem:[#allocation2 + $0xc4] sm:$0xf] }
 0x39a   : > { %15268 = vst [vmem:[#allocation60_spill] sm:$0xff] %v13955_v5  ;;  %v6402_v22 = vor.u32 %v6401_v63, %v6398_v47  ;;  %v6405_v8 = vshrl.u32 %v9900_v54, 16  ;;  %v6408_v0 = vshll.u32 %v9900_v54, 16  ;;  %v11369_v4 = vld [vmem:[#allocation2 + $0xbc] ss:$0 sps:$4 sm:$0x11]   ;;  %v13962_v55 = vcombine.low %v4018_v61, %v13953_v6 }
 0x39b   : > { %v6428_v9 = vor.u32 %v6427_v31, %v6424_v34  ;;  %v6256_v18 = vor.u32 %v6255_v37, %v6252_v50  ;;  %v6413_v51 = vshrl.u32 %v9901_v62, 16  ;;  %v6416_v58 = vshll.u32 %v9901_v62, 16  ;;  %v13959_v11 = vpop.f32.mrf.mxu0 }
 0x39c   : > { %15270 = vst [vmem:[#allocation62_spill] sm:$0xff] %v13959_v11  ;;  %v6407_v17 = vrot.slane %v6405_v8, 3  ;;  %v6410_v46 = vrot.slane %v6408_v0, 4  ;;  %v6403_v24 = vsel %vm5156_vm8, %v6394_v38, %v6402_v22  ;;  %v4637_v31 = vshrl.u32 %v13522_v39, 16 }
 0x39d   : > { %8631 = vmatprep.mubr.bf16.mxu0 %v6428_v9  ;;  %8463 = vmatmul.mubr.bf16.gmra.mxu1 %v6256_v18  ;;  %v6415_v34 = vrot.slane %v6413_v51, 3  ;;  %v6418_v47 = vrot.slane %v6416_v58, 4  ;;  %v5013_v50 = vshrl.u32 %v13962_v55, 16  ;;  %v5016_v37 = vshll.u32 %v13962_v55, 16  ;;  %v13972_v38 = vpop.f32.mrf.mxu0 }
 0x39e   : > { %v13966_v63 = vpop.f32.mrf.mxu1  ;;  %8470 = vmatprep.mubr.bf16.mxu1 %v6403_v24  ;;  %v6411_v54 = vor.u32 %v6410_v46, %v6407_v17  ;;  %v4640_v0 = vshll.u32 %v13522_v39, 16  ;;  %v4639_v9 = vrot.slane %v4637_v31, 4  ;;  %v4770_v8 = vrot.slane %v13549_v32, 5  ;;  %15272 = vst [vmem:[#allocation64_spill] sm:$0xff] %v13972_v38 }
 0x39f   : > { %15271 = vst [vmem:[#allocation63_spill] sm:$0xff] %v13966_v63  ;;  %v6419_v62 = vor.u32 %v6418_v47, %v6415_v34  ;;  %v4771_v18 = vrot.slane %v11369_v4, 5  ;;  %v5015_v51 = vrot.slane %v5013_v50, 4  ;;  %v5018_v58 = vrot.slane %v5016_v37, 5  ;;  %v13978_v38 = vpop.f32.mrf.mxu0 }
 0x3a0   : > { %v13974_v22 = vpop.f32.mrf.mxu1  ;;  %v4642_v11 = vrot.slane %v4640_v0, 5  ;;  %v6517_v24 = vshrl.u32 %v4770_v8, 16  ;;  %v6520_v5 = vshll.u32 %v4770_v8, 16  ;;  %15274 = vst [vmem:[#allocation66_spill] sm:$0xff] %v13978_v38 }
 0x3a1   : > { %15273 = vst [vmem:[#allocation65_spill] sm:$0xff] %v13974_v22  ;;  %v6420_v17 = vsel %vm5156_vm8, %v6411_v54, %v6419_v62  ;;  %v4772_v46 = vsel %vm4371_vm9, %v4770_v8, %v4771_v18  ;;  %v5019_v39 = vor.u32 %v5018_v58, %v5015_v51  ;;  %v9902_v8 = vcombine.low %v4017_v52, %v4018_v61 }
 0x3a2   : > { %8632 = vmatmul.mubr.bf16.gmra.mxu0 %v6420_v17  ;;  %v4643_v34 = vor.u32 %v4642_v11, %v4639_v9  ;;  %v6525_v47 = vshrl.u32 %v4772_v46, 16  ;;  %v6528_v31 = vshll.u32 %v4772_v46, 16  ;;  %v6519_v4 = vrot.slane %v6517_v24, 3  ;;  %v13980_v22 = vpop.f32.mrf.mxu1  ;;  %v13982_v17 = vld [vmem:[#allocation2 + $0xd8] sm:$0xf] }
 0x3a3   : > { %v6522_v63 = vrot.slane %v6520_v5, 4  ;;  %15275 = vst [vmem:[#allocation67_spill] sm:$0xff] %v13980_v22  ;;  %v6551_v50 = vshrl.u32 %v5019_v39, 16  ;;  %v6554_v37 = vshll.u32 %v5019_v39, 16  ;;  %v9903_v5 = vcombine.low %v13953_v6, %v13953_v6  ;;  %v4021_v22 = vld [vmem:[#allocation2 + $0xd4] sm:$0xf]  ;;  %v13986_v39 = vpop.f32.mrf.mxu0 }
 0x3a4   : > { %v6379_v0 = vshrl.u32 %v4643_v34, 16  ;;  %v6382_v54 = vshll.u32 %v4643_v34, 16  ;;  %v6527_v18 = vrot.slane %v6525_v47, 3  ;;  %v6530_v26 = vrot.slane %v6528_v31, 4  ;;  %15276 = vst [vmem:[#allocation68_spill] sm:$0xff] %v13986_v39  ;;  %v13988_v34 = vpop.f32.mrf.mxu1 }
 0x3a5   : > { %v6523_v62 = vor.u32 %v6522_v63, %v6519_v4  ;;  %v6553_v11 = vrot.slane %v6551_v50, 3  ;;  %v6556_v9 = vrot.slane %v6554_v37, 4  ;;  %v6534_v24 = vshrl.u32 %v9902_v8, 16  ;;  %15277 = vst [vmem:[#allocation69_spill] sm:$0xff] %v13988_v34 }
 0x3a6   : > { %v6381_v51 = vrot.slane %v6379_v0, 3  ;;  %v6384_v58 = vrot.slane %v6382_v54, 4  ;;  %v6531_v46 = vor.u32 %v6530_v26, %v6527_v18  ;;  %v6537_v38 = vshll.u32 %v9902_v8, 16  ;;  %v11374_v26 = vld [vmem:[#allocation2 + $0xcc] ss:$0 sps:$4 sm:$0x11]  }
 0x3a7   : > { %v6557_v63 = vor.u32 %v6556_v9, %v6553_v11  ;;  %v13991_v52 = vcombine.low %v4021_v22, %v13982_v17  ;;  %v6536_v31 = vrot.slane %v6534_v24, 3  ;;  %v6542_v4 = vshrl.u32 %v9903_v5, 16 }
 0x3a8   : > { %v6385_v47 = vor.u32 %v6384_v58, %v6381_v51  ;;  %v6532_v61 = vsel %vm5156_vm8, %v6523_v62, %v6531_v46  ;;  %v6539_v6 = vrot.slane %v6537_v38, 4  ;;  %v6545_v50 = vshll.u32 %v9903_v5, 16 }
 0x3a9   : > { %8639 = vmatprep.mubr.bf16.mxu0 %v6557_v63  ;;  %v5021_v37 = vshrl.u32 %v13991_v52, 16  ;;  %v5024_v0 = vshll.u32 %v13991_v52, 16  ;;  %v6544_v54 = vrot.slane %v6542_v4, 3  ;;  %v4645_v18 = vshrl.u32 %v13549_v32, 16 }
 0x3aa   : > { %8471 = vmatmul.mubr.bf16.gmra.mxu1 %v6385_v47  ;;  %v13997_v8 = vpop.f32.mrf.mxu0  ;;  %v6547_v62 = vrot.slane %v6545_v50, 4  ;;  %v4648_v58 = vshll.u32 %v13549_v32, 16  ;;  %v4773_v38 = vrot.slane %v13561_v36, 5  ;;  %v4774_v5 = vrot.slane %v11374_v26, 5  ;;  %v4020_v26 = vld [vmem:[#allocation2 + $0xd0] sm:$0x8] }
 0x3ab   : > { %8478 = vmatprep.mubr.bf16.mxu1 %v6532_v61  ;;  %15278 = vst [vmem:[#allocation70_spill] sm:$0xff] %v13997_v8  ;;  %v13999_v11 = vpop.f32.mrf.mxu1  ;;  %v5023_v9 = vrot.slane %v5021_v37, 4  ;;  %v5026_v51 = vrot.slane %v5024_v0, 5  ;;  %v4647_v46 = vrot.slane %v4645_v18, 4  ;;  %v6540_v63 = vor.u32 %v6539_v6, %v6536_v31 }
 0x3ac   : > { %15279 = vst [vmem:[#allocation71_spill] sm:$0xff] %v13999_v11  ;;  %v6548_v47 = vor.u32 %v6547_v62, %v6544_v54  ;;  %v4650_v4 = vrot.slane %v4648_v58, 5  ;;  %v4775_v39 = vsel %vm4371_vm9, %v4773_v38, %v4774_v5  ;;  %v6646_v8 = vshrl.u32 %v4773_v38, 16  ;;  %v14006_v11 = vpop.f32.mrf.mxu0 }
 0x3ad   : > { %v14003_v24 = vpop.f32.mrf.mxu1  ;;  %v5027_v61 = vor.u32 %v5026_v51, %v5023_v9  ;;  %v6649_v34 = vshll.u32 %v4773_v38, 16  ;;  %15281 = vst [vmem:[#allocation73_spill] sm:$0xff] %v14006_v11  ;;  %v6654_v6 = vshrl.u32 %v4775_v39, 16  ;;  %v6657_v54 = vshll.u32 %v4775_v39, 16 }
 0x3ae   : > { %15280 = vst [vmem:[#allocation72_spill] sm:$0xff] %v14003_v24  ;;  %v6549_v32 = vsel %vm5156_vm8, %v6540_v63, %v6548_v47  ;;  %v4651_v18 = vor.u32 %v4650_v4, %v4647_v46  ;;  %v6648_v24 = vrot.slane %v6646_v8, 3  ;;  %v9904_v53 = vcombine.low %v4020_v26, %v4021_v22  ;;  %v14013_v63 = vld [vmem:[#allocation2 + $0xe8] sm:$0xf]  ;;  %v14015_v47 = vpop.f32.mrf.mxu0 }
 0x3af   : > { %v14008_v50 = vpop.f32.mrf.mxu1  ;;  %v6680_v37 = vshrl.u32 %v5027_v61, 16  ;;  %v6683_v0 = vshll.u32 %v5027_v61, 16  ;;  %8640 = vmatmul.mubr.bf16.gmra.mxu0 %v6549_v32  ;;  %v6651_v31 = vrot.slane %v6649_v34, 4  ;;  %v6656_v11 = vrot.slane %v6654_v6, 3  ;;  %15284 = vst [vmem:[#allocation76_spill] sm:$0xff] %v14015_v47 }
 0x3b0   : > { %15282 = vst [vmem:[#allocation74_spill] sm:$0xff] %v14008_v50  ;;  %v6508_v51 = vshrl.u32 %v4651_v18, 16  ;;  %v6511_v58 = vshll.u32 %v4651_v18, 16  ;;  %v6659_v50 = vrot.slane %v6657_v54, 4  ;;  %v9905_v39 = vcombine.low %v13982_v17, %v13982_v17 }
 0x3b1   : > { %v6682_v62 = vrot.slane %v6680_v37, 3  ;;  %v6685_v9 = vrot.slane %v6683_v0, 4  ;;  %v14011_v38 = vpop.f32.mrf.mxu1  ;;  %v6652_v5 = vor.u32 %v6651_v31, %v6648_v24  ;;  %v6663_v4 = vshrl.u32 %v9904_v53, 16  ;;  %v4024_v37 = vld [vmem:[#allocation2 + $0xe4] sm:$0xf] }
 0x3b2   : > { %15283 = vst [vmem:[#allocation75_spill] sm:$0xff] %v14011_v38  ;;  %v6510_v61 = vrot.slane %v6508_v51, 3  ;;  %v6513_v8 = vrot.slane %v6511_v58, 4  ;;  %v6660_v34 = vor.u32 %v6659_v50, %v6656_v11  ;;  %v6666_v32 = vshll.u32 %v9904_v53, 16  ;;  %v364_v38 = vld [vmem:[#allocation2 + $0x10c] sm:$0x1] }
 0x3b3   : > { %v6686_v46 = vor.u32 %v6685_v9, %v6682_v62  ;;  %v6671_v24 = vshrl.u32 %v9905_v39, 16  ;;  %v6674_v18 = vshll.u32 %v9905_v39, 16  ;;  %v14020_v22 = vcombine.low %v4024_v37, %v14013_v63  ;;  %v11378_v62 = vld [vmem:[#allocation2 + $0xdc] ss:$0 sps:$4 sm:$0x11]   ;;  %v14025_v9 = vpop.f32.mrf.mxu0 }
 0x3b4   : > { %v6514_v0 = vor.u32 %v6513_v8, %v6510_v61  ;;  %v6661_v31 = vsel %vm5156_vm8, %v6652_v5, %v6660_v34  ;;  %v6665_v6 = vrot.slane %v6663_v4, 3  ;;  %v6668_v54 = vrot.slane %v6666_v32, 4  ;;  %15286 = vst [vmem:[#allocation78_spill] sm:$0xff] %v14025_v9 }
 0x3b5   : > { %8647 = vmatprep.mubr.bf16.mxu0 %v6686_v46  ;;  %v6673_v17 = vrot.slane %v6671_v24, 3  ;;  %v6676_v53 = vrot.slane %v6674_v18, 4  ;;  %v5029_v11 = vshrl.u32 %v14020_v22, 16  ;;  %v5032_v50 = vshll.u32 %v14020_v22, 16 }
 0x3b6   : > { %8479 = vmatmul.mubr.bf16.gmra.mxu1 %v6514_v0  ;;  %v6669_v58 = vor.u32 %v6668_v54, %v6665_v6  ;;  %v4653_v46 = vshrl.u32 %v13561_v36, 16  ;;  %v4656_v5 = vshll.u32 %v13561_v36, 16  ;;  %v4776_v34 = vrot.slane %v13576_v21, 5 }
 0x3b7   : > { %v14022_v26 = vpop.f32.mrf.mxu1  ;;  %8486 = vmatprep.mubr.bf16.mxu1 %v6661_v31  ;;  %v6677_v61 = vor.u32 %v6676_v53, %v6673_v17  ;;  %v5031_v8 = vrot.slane %v5029_v11, 4  ;;  %v5034_v39 = vrot.slane %v5032_v50, 5  ;;  %v4777_v0 = vrot.slane %v11378_v62, 5  ;;  %v4023_v17 = vld [vmem:[#allocation2 + $0xe0] sm:$0x8] }
 0x3b8   : > { %15285 = vst [vmem:[#allocation77_spill] sm:$0xff] %v14022_v26  ;;  %v4655_v4 = vrot.slane %v4653_v46, 4  ;;  %v4658_v32 = vrot.slane %v4656_v5, 5  ;;  %v6775_v47 = vshrl.u32 %v4776_v34, 16  ;;  %v6778_v31 = vshll.u32 %v4776_v34, 16 }
 0x3b9   : > { %v14029_v51 = vpop.f32.mrf.mxu1  ;;  %v6678_v18 = vsel %vm5156_vm8, %v6669_v58, %v6677_v61  ;;  %v5035_v9 = vor.u32 %v5034_v39, %v5031_v8  ;;  %v4778_v36 = vsel %vm4371_vm9, %v4776_v34, %v4777_v0  ;;  %v9906_v26 = vcombine.low %v4023_v17, %v4024_v37  ;;  %v11383_v17 = vld [vmem:[#allocation2 + $0xec] ss:$0 sps:$4 sm:$0x11]  }
 0x3ba   : > { %15287 = vst [vmem:[#allocation79_spill] sm:$0xff] %v14029_v51  ;;  %8648 = vmatmul.mubr.bf16.gmra.mxu0 %v6678_v18  ;;  %v4659_v54 = vor.u32 %v4658_v32, %v4655_v4  ;;  %v6777_v46 = vrot.slane %v6775_v47, 3  ;;  %v6780_v62 = vrot.slane %v6778_v31, 4  ;;  %v6783_v51 = vshrl.u32 %v4778_v36, 16 }
 0x3bb   : > { %v14034_v24 = vpop.f32.mrf.mxu0  ;;  %v14037_v6 = vpop.f32.mrf.mxu1  ;;  %v6809_v11 = vshrl.u32 %v5035_v9, 16  ;;  %v6812_v50 = vshll.u32 %v5035_v9, 16  ;;  %v6786_v58 = vshll.u32 %v4778_v36, 16  ;;  %v9907_v31 = vcombine.low %v14013_v63, %v14013_v63 }
 0x3bc   : > { %15288 = vst [vmem:[#allocation80_spill] sm:$0xff] %v14034_v24  ;;  %15289 = vst [vmem:[#allocation81_spill] sm:$0xff] %v14037_v6  ;;  %v6637_v5 = vshrl.u32 %v4659_v54, 16  ;;  %v6640_v24 = vshll.u32 %v4659_v54, 16  ;;  %v6781_v39 = vor.u32 %v6780_v62, %v6777_v46  ;;  %v14042_v6 = vld [vmem:[#allocation2 + $0xf8] sm:$0xf] }
 0x3bd   : > { %v14040_v53 = vpop.f32.mrf.mxu0  ;;  %v6811_v61 = vrot.slane %v6809_v11, 3  ;;  %v6814_v8 = vrot.slane %v6812_v50, 4  ;;  %v14046_v34 = vpop.f32.mrf.mxu1  ;;  %v6785_v18 = vrot.slane %v6783_v51, 3  ;;  %v6788_v9 = vrot.slane %v6786_v58, 4  ;;  %v4027_v11 = vld [vmem:[#allocation2 + $0xf4] sm:$0xf] }
 0x3be   : > { %15290 = vst [vmem:[#allocation82_spill] sm:$0xff] %v14040_v53  ;;  %15292 = vst [vmem:[#allocation84_spill] sm:$0xff] %v14046_v34  ;;  %v6639_v32 = vrot.slane %v6637_v5, 3  ;;  %v6642_v0 = vrot.slane %v6640_v24, 4  ;;  %v6792_v54 = vshrl.u32 %v9906_v26, 16  ;;  %v6795_v36 = vshll.u32 %v9906_v26, 16 }
 0x3bf   : > { %v14044_v4 = vpop.f32.mrf.mxu0  ;;  %v6815_v47 = vor.u32 %v6814_v8, %v6811_v61  ;;  %v6789_v46 = vor.u32 %v6788_v9, %v6785_v18  ;;  %v14051_v37 = vcombine.low %v4027_v11, %v14042_v6  ;;  %v6800_v5 = vshrl.u32 %v9907_v31, 16 }
 0x3c0   : > { %15291 = vst [vmem:[#allocation83_spill] sm:$0xff] %v14044_v4  ;;  %v6643_v50 = vor.u32 %v6642_v0, %v6639_v32  ;;  %v6794_v62 = vrot.slane %v6792_v54, 3  ;;  %v6797_v4 = vrot.slane %v6795_v36, 4  ;;  %v6803_v24 = vshll.u32 %v9907_v31, 16 }
 0x3c1   : > { %8655 = vmatprep.mubr.bf16.mxu0 %v6815_v47  ;;  %v14053_v51 = vpop.f32.mrf.mxu0  ;;  %v6790_v63 = vsel %vm5156_vm8, %v6781_v39, %v6789_v46  ;;  %v5037_v26 = vshrl.u32 %v14051_v37, 16  ;;  %v5040_v61 = vshll.u32 %v14051_v37, 16  ;;  %v6802_v8 = vrot.slane %v6800_v5, 3 }
 0x3c2   : > { %15293 = vst [vmem:[#allocation85_spill] sm:$0xff] %v14053_v51  ;;  %8487 = vmatmul.mubr.bf16.gmra.mxu1 %v6643_v50  ;;  %v6805_v32 = vrot.slane %v6803_v24, 4  ;;  %v4661_v47 = vshrl.u32 %v13576_v21, 16  ;;  %v4664_v31 = vshll.u32 %v13576_v21, 16  ;;  %v6798_v54 = vor.u32 %v6797_v4, %v6794_v62 }
 0x3c3   : > { %8494 = vmatprep.mubr.bf16.mxu1 %v6790_v63  ;;  %v5039_v18 = vrot.slane %v5037_v26, 4  ;;  %v5042_v9 = vrot.slane %v5040_v61, 5  ;;  %v4779_v50 = vrot.slane %v13597_v57, 5  ;;  %v4780_v39 = vrot.slane %v11383_v17, 5 }
 0x3c4   : > { %v6806_v36 = vor.u32 %v6805_v32, %v6802_v8  ;;  %v4663_v53 = vrot.slane %v4661_v47, 4  ;;  %v4666_v63 = vrot.slane %v4664_v31, 5  ;;  %v4026_v32 = vld [vmem:[#allocation2 + $0xf0] sm:$0x8] }
 0x3c5   : > { %v14055_v58 = vpop.f32.mrf.mxu1  ;;  %v5043_v51 = vor.u32 %v5042_v9, %v5039_v18  ;;  %v4781_v24 = vsel %vm4371_vm9, %v4779_v50, %v4780_v39  ;;  %v6904_v26 = vshrl.u32 %v4779_v50, 16  ;;  %v6907_v61 = vshll.u32 %v4779_v50, 16 }
 0x3c6   : > { %15294 = vst [vmem:[#allocation86_spill] sm:$0xff] %v14055_v58  ;;  %v6807_v5 = vsel %vm5156_vm8, %v6798_v54, %v6806_v36  ;;  %v4667_v62 = vor.u32 %v4666_v63, %v4663_v53  ;;  %v6912_v8 = vshrl.u32 %v4781_v24, 16  ;;  %v6915_v9 = vshll.u32 %v4781_v24, 16 }
 0x3c7   : > { %v14060_v0 = vpop.f32.mrf.mxu1  ;;  %8656 = vmatmul.mubr.bf16.gmra.mxu0 %v6807_v5  ;;  %v6938_v21 = vshrl.u32 %v5043_v51, 16  ;;  %v6941_v4 = vshll.u32 %v5043_v51, 16  ;;  %v6909_v18 = vrot.slane %v6907_v61, 4  ;;  %v9908_v34 = vcombine.low %v4026_v32, %v4027_v11 }
 0x3c8   : > { %15295 = vst [vmem:[#allocation87_spill] sm:$0xff] %v14060_v0  ;;  %v14065_v46 = vpop.f32.mrf.mxu0  ;;  %v6766_v54 = vshrl.u32 %v4667_v62, 16  ;;  %v6769_v36 = vshll.u32 %v4667_v62, 16  ;;  %v6914_v58 = vrot.slane %v6912_v8, 3  ;;  %v6917_v50 = vrot.slane %v6915_v9, 4 }
 0x3c9   : > { %15296 = vst [vmem:[#allocation88_spill] sm:$0xff] %v14065_v46  ;;  %v14069_v0 = vpop.f32.mrf.mxu1  ;;  %v6906_v46 = vrot.slane %v6904_v26, 3  ;;  %v6940_v47 = vrot.slane %v6938_v21, 3  ;;  %v6943_v31 = vrot.slane %v6941_v4, 4  ;;  %v9909_v26 = vcombine.low %v14042_v6, %v14042_v6  ;;  %v4030_v62 = vld [vmem:[#allocation2 + $0x104] sm:$0xf] }
 0x3ca   : > { %15297 = vst [vmem:[#allocation89_spill] sm:$0xff] %v14069_v0  ;;  %v14071_v17 = vpop.f32.mrf.mxu0  ;;  %v14073_v0 = vld [vmem:[#allocation2 + $0x108] sm:$0xf]  ;;  %v6768_v51 = vrot.slane %v6766_v54, 3  ;;  %v6771_v63 = vrot.slane %v6769_v36, 4  ;;  %v6918_v24 = vor.u32 %v6917_v50, %v6914_v58  ;;  %v6921_v21 = vshrl.u32 %v9908_v34, 16 }
 0x3cb   : > { %15298 = vst [vmem:[#allocation90_spill] sm:$0xff] %v14071_v17  ;;  %v6910_v39 = vor.u32 %v6909_v18, %v6906_v46  ;;  %v14075_v5 = vpop.f32.mrf.mxu1  ;;  %v6944_v53 = vor.u32 %v6943_v31, %v6940_v47  ;;  %v6924_v4 = vshll.u32 %v9908_v34, 16  ;;  %v6929_v8 = vshrl.u32 %v9909_v26, 16  ;;  %v11387_v31 = vld [vmem:[#allocation2 + $0xfc] ss:$0 sps:$4 sm:$0x11]  }
 0x3cc   : > { %15299 = vst [vmem:[#allocation91_spill] sm:$0xff] %v14075_v5  ;;  %v14079_v61 = vpop.f32.mrf.mxu0  ;;  %v6772_v46 = vor.u32 %v6771_v63, %v6768_v51  ;;  %v6932_v11 = vshll.u32 %v9909_v26, 16  ;;  %v14082_v32 = vcombine.low %v4030_v62, %v14073_v0  ;;  %v6923_v9 = vrot.slane %v6921_v21, 3 }
 0x3cd   : > { %15300 = vst [vmem:[#allocation92_spill] sm:$0xff] %v14079_v61  ;;  %8663 = vmatprep.mubr.bf16.mxu0 %v6944_v53  ;;  %v6919_v18 = vsel %vm5156_vm8, %v6910_v39, %v6918_v24  ;;  %v6926_v47 = vrot.slane %v6924_v4, 4  ;;  %v6931_v6 = vrot.slane %v6929_v8, 3  ;;  %v4669_v51 = vshrl.u32 %v13597_v57, 16 }
 0x3ce   : > { %8495 = vmatmul.mubr.bf16.gmra.mxu1 %v6772_v46  ;;  %v6934_v58 = vrot.slane %v6932_v11, 4  ;;  %v5045_v34 = vshrl.u32 %v14082_v32, 16  ;;  %v5048_v36 = vshll.u32 %v14082_v32, 16  ;;  %v14089_v50 = vpop.f32.mrf.mxu0  ;;  %v4672_v39 = vshll.u32 %v13597_v57, 16 }
 0x3cf   : > { %15302 = vst [vmem:[#allocation94_spill] sm:$0xff] %v14089_v50  ;;  %8502 = vmatprep.mubr.bf16.mxu1 %v6919_v18  ;;  %v6927_v53 = vor.u32 %v6926_v47, %v6923_v9  ;;  %v4782_v21 = vrot.slane %v13618_v59, 5  ;;  %v4671_v4 = vrot.slane %v4669_v51, 4  ;;  %v4783_v8 = vrot.slane %v11387_v31, 5 }
 0x3d0   : > { %v6935_v63 = vor.u32 %v6934_v58, %v6931_v6  ;;  %v5047_v26 = vrot.slane %v5045_v34, 4  ;;  %v5050_v24 = vrot.slane %v5048_v36, 5  ;;  %v4674_v46 = vrot.slane %v4672_v39, 5  ;;  %v4029_v6 = vld [vmem:[#allocation2 + $0x100] sm:$0x8] }
 0x3d1   : > { %v7033_v50 = vshrl.u32 %v4782_v21, 16  ;;  %v7036_v18 = vshll.u32 %v4782_v21, 16  ;;  %v4784_v57 = vsel %vm4371_vm9, %v4782_v21, %v4783_v8 }
 0x3d2   : > { %v14085_v54 = vpop.f32.mrf.mxu1  ;;  %v6936_v61 = vsel %vm5156_vm8, %v6927_v53, %v6935_v63  ;;  %v5051_v17 = vor.u32 %v5050_v24, %v5047_v26  ;;  %v4675_v47 = vor.u32 %v4674_v46, %v4671_v4  ;;  %v9910_v24 = vcombine.low %v4029_v6, %v4030_v62 }
 0x3d3   : > { %15301 = vst [vmem:[#allocation93_spill] sm:$0xff] %v14085_v54  ;;  %8664 = vmatmul.mubr.bf16.gmra.mxu0 %v6936_v61  ;;  %v7035_v36 = vrot.slane %v7033_v50, 3  ;;  %v7038_v51 = vrot.slane %v7036_v18, 4  ;;  %v7041_v54 = vshrl.u32 %v4784_v57, 16 }
 0x3d4   : > { %v14094_v11 = vpop.f32.mrf.mxu1  ;;  %v7067_v58 = vshrl.u32 %v5051_v17, 16  ;;  %v7070_v34 = vshll.u32 %v5051_v17, 16  ;;  %v6895_v39 = vshrl.u32 %v4675_v47, 16  ;;  %v6898_v31 = vshll.u32 %v4675_v47, 16 }
 0x3d5   : > { %15303 = vst [vmem:[#allocation95_spill] sm:$0xff] %v14094_v11  ;;  %v7044_v11 = vshll.u32 %v4784_v57, 16  ;;  %v7039_v26 = vor.u32 %v7038_v51, %v7035_v36  ;;  %v7043_v21 = vrot.slane %v7041_v54, 3  ;;  %v9911_v17 = vcombine.low %v14073_v0, %v14073_v0 }
 0x3d6   : > { %v14100_v5 = vpop.f32.mrf.mxu1  ;;  %v7069_v53 = vrot.slane %v7067_v58, 3  ;;  %v7072_v63 = vrot.slane %v7070_v34, 4  ;;  %v6897_v61 = vrot.slane %v6895_v39, 3  ;;  %v6900_v4 = vrot.slane %v6898_v31, 4 }
 0x3d7   : > { %15305 = vst [vmem:[#allocation97_spill] sm:$0xff] %v14100_v5  ;;  %v7046_v46 = vrot.slane %v7044_v11, 4  ;;  %v7050_v50 = vshrl.u32 %v9910_v24, 16  ;;  %v7053_v18 = vshll.u32 %v9910_v24, 16  ;;  %v7058_v6 = vshrl.u32 %v9911_v17, 16 }
 0x3d8   : > { %v14097_v9 = vpop.f32.mrf.mxu0  ;;  %v7073_v8 = vor.u32 %v7072_v63, %v7069_v53  ;;  %v6901_v47 = vor.u32 %v6900_v4, %v6897_v61  ;;  %v14106_v5 = vpop.f32.mrf.mxu1  ;;  %v7061_v34 = vshll.u32 %v9911_v17, 16  ;;  %v4677_v11 = vshrl.u32 %v13618_v59, 16 }
 0x3d9   : > { %15304 = vst [vmem:[#allocation96_spill] sm:$0xff] %v14097_v9  ;;  %v7047_v57 = vor.u32 %v7046_v46, %v7043_v21  ;;  %15307 = vst [vmem:[#allocation99_spill] sm:$0xff] %v14106_v5  ;;  %v7052_v58 = vrot.slane %v7050_v50, 3  ;;  %v7055_v62 = vrot.slane %v7053_v18, 4  ;;  %v4680_v0 = vshll.u32 %v13618_v59, 16 }
 0x3da   : > { %v14102_v9 = vpop.f32.mrf.mxu0  ;;  %8671 = vmatprep.mubr.bf16.mxu0 %v7073_v8  ;;  %8503 = vmatmul.mubr.bf16.gmra.mxu1 %v6901_v47  ;;  %v7060_v51 = vrot.slane %v7058_v6, 3  ;;  %v7063_v39 = vrot.slane %v7061_v34, 4  ;;  %v365_v31 = vsel %vm13058_vm7, 0, %v364_v38  ;;  %v4679_v53 = vrot.slane %v4677_v11, 4  ;;  %v14120_v50 = vld [vmem:[#allocation2 + $0x114] sm:$0xf] }
 0x3db   : > { %15306 = vst [vmem:[#allocation98_spill] sm:$0xff] %v14102_v9  ;;  %v7048_v54 = vsel %vm5156_vm8, %v7039_v26, %v7047_v57  ;;  %v4682_v63 = vrot.slane %v4680_v0, 5  ;;  %366 = vst [vmem:[#allocation2 + $0x10c] sm:$0x1] %v365_v31  ;;  %v4785_v24 = vrot.slane %v13643_v40, 5  ;;  %v7056_v4 = vor.u32 %v7055_v62, %v7052_v58 }
 0x3dc   : > { %v14108_v36 = vpop.f32.mrf.mxu0  ;;  %8510 = vmatprep.mubr.bf16.mxu1 %v7048_v54  ;;  %v7064_v21 = vor.u32 %v7063_v39, %v7060_v51  ;;  %v11393_v26 = vld [vmem:[#allocation2 + $0x2c] ss:$0 sps:$4 sm:$0x11]   ;;  %v4034_v18 = vld [vmem:[#allocation2 + $0x118] sm:$0xf]  ;;  %v4685_v57 = vshrl.u32 %v13643_v40, 16 }
 0x3dd   : > { %15308 = vst [vmem:[#allocation100_spill] sm:$0xff] %v14108_v36  ;;  %v4683_v8 = vor.u32 %v4682_v63, %v4679_v53  ;;  %v7162_v59 = vshrl.u32 %v4785_v24, 16  ;;  %v7165_v17 = vshll.u32 %v4785_v24, 16  ;;  %v4688_v6 = vshll.u32 %v13643_v40, 16 }
 0x3de   : > { %v14118_v46 = vpop.f32.mrf.mxu0  ;;  %v7065_v38 = vsel %vm5156_vm8, %v7056_v4, %v7064_v21  ;;  %v4687_v11 = vrot.slane %v4685_v57, 4  ;;  %v14132_v51 = vcombine.low %v14120_v50, %v4034_v18  ;;  %v5108_v39 = vrot.slane %v13666_v7, 5 }
 0x3df   : > { %15310 = vst [vmem:[#allocation102_spill] sm:$0xff] %v14118_v46  ;;  %8672 = vmatmul.mubr.bf16.gmra.mxu0 %v7065_v38  ;;  %v7024_v58 = vshrl.u32 %v4683_v8, 16  ;;  %v7027_v62 = vshll.u32 %v4683_v8, 16  ;;  %v14127_v34 = vrot.slane %v7162_v59, 3  ;;  %v4690_v0 = vrot.slane %v4688_v6, 5 }
 0x3e0   : > { %v7167_v4 = vrot.slane %v7165_v17, 4  ;;  %v5109_v40 = vrot.slane %v11393_v26, 5  ;;  %v5053_v8 = vshrl.u32 %v14132_v51, 16  ;;  %v5056_v57 = vshll.u32 %v14132_v51, 16 }
 0x3e1   : > { %v14135_v31 = vpop.f32.mrf.mxu0  ;;  %v7026_v53 = vrot.slane %v7024_v58, 3  ;;  %v7029_v63 = vrot.slane %v7027_v62, 4  ;;  %v4691_v38 = vor.u32 %v4690_v0, %v4687_v11  ;;  %v5273_v62 = vshll.u32 %v5108_v39, 16 }
 0x3e2   : > { %15313 = vst [vmem:[#allocation105_spill] sm:$0xff] %v14135_v31  ;;  %v11391_v21 = vld [vmem:[#allocation2 + $0x10c] ss:$0 sps:$4 sm:$0x11]   ;;  %v5110_v6 = vsel %vm4371_vm9, %v5108_v39, %v5109_v40  ;;  %v5055_v31 = vrot.slane %v5053_v8, 4  ;;  %v7168_v26 = vor.u32 %v7167_v4, %v14127_v34  ;;  %v5058_v17 = vrot.slane %v5056_v57, 5 }
 0x3e3   : > { %v14116_v61 = vpop.f32.mrf.mxu1  ;;  %v4786_v46 = vrot.slane %v11391_v21, 5  ;;  %v7153_v7 = vshrl.u32 %v4691_v38, 16  ;;  %v7156_v36 = vshll.u32 %v4691_v38, 16  ;;  %v14142_v58 = vpop.f32.mrf.mxu0  ;;  %v5278_v11 = vshrl.u32 %v5110_v6, 16  ;;  %v310_v8 = vld [vmem:[#allocation2 + $0x110] sm:$0x8] }
 0x3e4   : > { %15309 = vst [vmem:[#allocation101_spill] sm:$0xff] %v14116_v61  ;;  %v5270_v61 = vshrl.u32 %v5108_v39, 16  ;;  %15315 = vst [vmem:[#allocation107_spill] sm:$0xff] %v14142_v58  ;;  %v9913_v9 = vcombine.low %v4034_v18, %v4034_v18  ;;  %v5275_v38 = vrot.slane %v5273_v62, 4 }
 0x3e5   : > { %v14122_v47 = vpop.f32.mrf.mxu1  ;;  %v4787_v0 = vsel %vm4371_vm9, %v4785_v24, %v4786_v46  ;;  %v7155_v5 = vrot.slane %v7153_v7, 3  ;;  %v7158_v58 = vrot.slane %v7156_v36, 4  ;;  %v14148_v34 = vpop.f32.mrf.mxu0 }
 0x3e6   : > { %15311 = vst [vmem:[#allocation103_spill] sm:$0xff] %v14122_v47  ;;  %v7030_v47 = vor.u32 %v7029_v63, %v7026_v53  ;;  %v5272_v53 = vrot.slane %v5270_v61, 3  ;;  %v5281_v63 = vshll.u32 %v5110_v6, 16  ;;  %v7170_v40 = vshrl.u32 %v4787_v0, 16  ;;  %15317 = vst [vmem:[#allocation109_spill] sm:$0xff] %v14148_v34 }
 0x3e7   : > { %v14129_v54 = vpop.f32.mrf.mxu1  ;;  %v7173_v21 = vshll.u32 %v4787_v0, 16  ;;  %v311_v6 = vsel %vm13028_vm4, 0, %v310_v8  ;;  %v7190_v0 = vshll.u32 %v9913_v9, 16  ;;  %v14156_v34 = vpop.f32.mrf.mxu0 }
 0x3e8   : > { %15312 = vst [vmem:[#allocation104_spill] sm:$0xff] %v14129_v54  ;;  %8511 = vmatmul.mubr.bf16.gmra.mxu1 %v7030_v47  ;;  %v5059_v54 = vor.u32 %v5058_v17, %v5055_v31  ;;  %v5280_v47 = vrot.slane %v5278_v11, 3  ;;  %v5283_v35 = vrot.slane %v5281_v63, 4  ;;  %v7172_v4 = vrot.slane %v7170_v40, 3  ;;  %312 = vst [vmem:[#allocation2 + $0x110] sm:$0x8] %v311_v6 }
 0x3e9   : > { %v14138_v59 = vpop.f32.mrf.mxu1  ;;  %v7175_v24 = vrot.slane %v7173_v21, 4  ;;  %v5276_v18 = vor.u32 %v5275_v38, %v5272_v53  ;;  %v7187_v31 = vshrl.u32 %v9913_v9, 16  ;;  %v11395_v17 = vld [vmem:[#allocation2 + $0x3c] ss:$0 sps:$4 sm:$0x11]   ;;  %15319 = vst [vmem:[#allocation111_spill] sm:$0xff] %v14156_v34 }
 0x3ea   : > { %15314 = vst [vmem:[#allocation106_spill] sm:$0xff] %v14138_v59  ;;  %v7196_v61 = vshrl.u32 %v5059_v54, 16  ;;  %v7199_v46 = vshll.u32 %v5059_v54, 16  ;;  %v5284_v57 = vor.u32 %v5283_v35, %v5280_v47  ;;  %v11396_v63 = vld [vmem:[#allocation2 + $0x4c] ss:$0 sps:$4 sm:$0x11]   ;;  %v7159_v54 = vor.u32 %v7158_v58, %v7155_v5 }
 0x3eb   : > { %v7176_v36 = vor.u32 %v7175_v24, %v7172_v4  ;;  %v5112_v21 = vrot.slane %v11395_v17, 5  ;;  %v5114_v38 = vrot.slane %v13742_v33, 5  ;;  %v7189_v9 = vrot.slane %v7187_v31, 3 }
 0x3ec   : > { %v7198_v7 = vrot.slane %v7196_v61, 3  ;;  %v7201_v11 = vrot.slane %v7199_v46, 4  ;;  %v5285_v8 = vsel %vm5156_vm8, %v5276_v18, %v5284_v57  ;;  %v7192_v47 = vrot.slane %v7190_v0, 4 }
 0x3ed   : > { %v7177_v40 = vsel %vm5156_vm8, %v7168_v26, %v7176_v36  ;;  %v5115_v4 = vrot.slane %v11396_v63, 5  ;;  %v5113_v26 = vsel %vm4371_vm9, %v5111_v3, %v5112_v21  ;;  %v5399_v5 = vshrl.u32 %v5111_v3, 16 }
 0x3ee   : > { %v14146_v59 = vpop.f32.mrf.mxu1  ;;  %v7202_v53 = vor.u32 %v7201_v11, %v7198_v7  ;;  %8518 = vmatprep.mubr.bf16.mxu1 %v7177_v40  ;;  %v5402_v58 = vshll.u32 %v5111_v3, 16  ;;  %v5528_v24 = vshrl.u32 %v5114_v38, 16  ;;  %v5407_v46 = vshrl.u32 %v5113_v26, 16 }
 0x3ef   : > { %15316 = vst [vmem:[#allocation108_spill] sm:$0xff] %v14146_v59  ;;  %v5410_v23 = vshll.u32 %v5113_v26, 16  ;;  %v5116_v6 = vsel %vm4371_vm9, %v5114_v38, %v5115_v4  ;;  %v5531_v33 = vshll.u32 %v5114_v38, 16  ;;  %v4032_v36 = vld [vmem:[#allocation2 + $0x110] sm:$0x8]  ;;  %v5401_v18 = vrot.slane %v5399_v5, 3 }
 0x3f0   : > { %v14150_v39 = vpop.f32.mrf.mxu1  ;;  %8519 = vmatmul.mubr.bf16.gmra.mxu1 %v7159_v54  ;;  %8679 = vmatprep.mubr.bf16.mxu0 %v7202_v53  ;;  %v5404_v57 = vrot.slane %v5402_v58, 4  ;;  %v5530_v31 = vrot.slane %v5528_v24, 3  ;;  %v5536_v7 = vshrl.u32 %v5116_v6, 16  ;;  %v9912_v11 = vcombine.low %v4032_v36, %v14120_v50  ;;  %v11397_v54 = vld [vmem:[#allocation2 + $0x5c] ss:$0 sps:$4 sm:$0x11]  }
 0x3f1   : > { %15318 = vst [vmem:[#allocation110_spill] sm:$0xff] %v14150_v39  ;;  %10871 = vmatprep.mubr.bf16.mxu1 %v5285_v8  ;;  %v5409_v0 = vrot.slane %v5407_v46, 3  ;;  %v5412_v63 = vrot.slane %v5410_v23, 4  ;;  %v5533_v40 = vrot.slane %v5531_v33, 4  ;;  %v5539_v21 = vshll.u32 %v5116_v6, 16 }
 0x3f2   : > { %v14154_v62 = vpop.f32.mrf.mxu1  ;;  %v5405_v53 = vor.u32 %v5404_v57, %v5401_v18  ;;  %v5538_v3 = vrot.slane %v5536_v7, 3  ;;  %v7179_v38 = vshrl.u32 %v9912_v11, 16  ;;  %v7182_v26 = vshll.u32 %v9912_v11, 16  ;;  %v11398_v5 = vld [vmem:[#allocation2 + $0x6c] ss:$0 sps:$4 sm:$0x11]  }
 0x3f3   : > { %v14165_v61 = vpop.f32.mrf.mxu0  ;;  %v5413_v34 = vor.u32 %v5412_v63, %v5409_v0  ;;  %v7193_v58 = vor.u32 %v7192_v47, %v7189_v9  ;;  %v5534_v24 = vor.u32 %v5533_v40, %v5530_v31  ;;  %v5541_v39 = vrot.slane %v5539_v21, 4 }
 0x3f4   : > { %v14159_v35 = vpop.f32.mrf.mxu1  ;;  %v5117_v50 = vrot.slane %v13773_v43, 5  ;;  %v7181_v46 = vrot.slane %v7179_v38, 3  ;;  %v7184_v23 = vrot.slane %v7182_v26, 4  ;;  %v5118_v36 = vrot.slane %v11397_v54, 5 }
 0x3f5   : > { %v14171_v8 = vpop.f32.mrf.mxu0  ;;  %v5414_v33 = vsel %vm5156_vm8, %v5405_v53, %v5413_v34  ;;  %v5542_v6 = vor.u32 %v5541_v39, %v5538_v3  ;;  %v5120_v47 = vrot.slane %v13798_v20, 5  ;;  %v5121_v31 = vrot.slane %v11398_v5, 5  ;;  %v11399_v26 = vld [vmem:[#allocation2 + $0x7c] ss:$0 sps:$4 sm:$0x11]  }
 0x3f6   : > { %v5657_v18 = vshrl.u32 %v5117_v50, 16  ;;  %v5660_v57 = vshll.u32 %v5117_v50, 16  ;;  %v7185_v11 = vor.u32 %v7184_v23, %v7181_v46  ;;  %v5119_v9 = vsel %vm4371_vm9, %v5117_v50, %v5118_v36 }
 0x3f7   : > { %v14177_v7 = vpop.f32.mrf.mxu0  ;;  %v5543_v43 = vsel %vm5156_vm8, %v5534_v24, %v5542_v6  ;;  %v5665_v34 = vshrl.u32 %v5119_v9, 16  ;;  %v5668_v39 = vshll.u32 %v5119_v9, 16  ;;  %v5122_v54 = vsel %vm4371_vm9, %v5120_v47, %v5121_v31 }
 0x3f8   : > { %v14168_v17 = vpop.f32.mrf.mxu1  ;;  %10872 = vmatmul.mubr.bf16.vlgmr.msra.gmra.mxu1 %v5414_v33  ;;  %v5659_v0 = vrot.slane %v5657_v18, 3  ;;  %v5662_v63 = vrot.slane %v5660_v57, 4  ;;  %v7194_v40 = vsel %vm5156_vm8, %v7185_v11, %v7193_v58  ;;  %v5786_v53 = vshrl.u32 %v5120_v47, 16  ;;  %v11400_v33 = vld [vmem:[#allocation2 + $0x8c] ss:$0 sps:$4 sm:$0x11]  }
 0x3f9   : > { %10875 = vmatprep.mubr.bf16.mxu1 %v5543_v43  ;;  %8680 = vmatmul.mubr.bf16.gmra.mxu0 %v7194_v40  ;;  %v5667_v3 = vrot.slane %v5665_v34, 3  ;;  %v5789_v21 = vshll.u32 %v5120_v47, 16  ;;  %v5794_v38 = vshrl.u32 %v5122_v54, 16  ;;  %v14186_v50 = vpop.f32.mrf.mxu0  ;;  %v5670_v24 = vrot.slane %v5668_v39, 4 }
 0x3fa   : > { %v14173_v4 = vpop.f32.mrf.mxu1  ;;  %v5663_v5 = vor.u32 %v5662_v63, %v5659_v0  ;;  %v5788_v46 = vrot.slane %v5786_v53, 3  ;;  %v5797_v23 = vshll.u32 %v5122_v54, 16  ;;  %v5123_v11 = vrot.slane %v13825_v42, 5 }
 0x3fb   : > { %v5791_v58 = vrot.slane %v5789_v21, 4  ;;  %v5796_v36 = vrot.slane %v5794_v38, 3  ;;  %v5671_v6 = vor.u32 %v5670_v24, %v5667_v3  ;;  %v5124_v9 = vrot.slane %v11399_v26, 5  ;;  %v14191_v47 = vpop.f32.mrf.mxu0  ;;  %v11401_v26 = vld [vmem:[#allocation2 + $0x9c] ss:$0 sps:$4 sm:$0x11]  }
 0x3fc   : > { %v14179_v59 = vpop.f32.mrf.mxu1  ;;  %v5799_v18 = vrot.slane %v5797_v23, 4  ;;  %15320 = vst [vmem:[#allocation112_spill] sm:$0xff] %v14191_v47  ;;  %v5126_v0 = vrot.slane %v13849_v2, 5  ;;  %v5127_v63 = vrot.slane %v11400_v33, 5  ;;  %v5915_v39 = vshrl.u32 %v5123_v11, 16 }
 0x3fd   : > { %v5792_v57 = vor.u32 %v5791_v58, %v5788_v46  ;;  %v5672_v43 = vsel %vm5156_vm8, %v5663_v5, %v5671_v6  ;;  %v5125_v40 = vsel %vm4371_vm9, %v5123_v11, %v5124_v9  ;;  %v5918_v54 = vshll.u32 %v5123_v11, 16  ;;  %v14202_v23 = vpop.f32.mrf.mxu0 }
 0x3fe   : > { %v14188_v20 = vpop.f32.mrf.mxu1  ;;  %v5800_v34 = vor.u32 %v5799_v18, %v5796_v36  ;;  %v5923_v3 = vshrl.u32 %v5125_v40, 16  ;;  %v5926_v21 = vshll.u32 %v5125_v40, 16  ;;  %v5128_v38 = vsel %vm4371_vm9, %v5126_v0, %v5127_v63  ;;  %15321 = vst [vmem:[#allocation113_spill] sm:$0xff] %v14202_v23 }
 0x3ff   : > { %v5917_v5 = vrot.slane %v5915_v39, 3  ;;  %v5920_v24 = vrot.slane %v5918_v54, 4  ;;  %v6044_v46 = vshrl.u32 %v5126_v0, 16  ;;  %v6047_v2 = vshll.u32 %v5126_v0, 16  ;;  %v14207_v54 = vpop.f32.mrf.mxu0 }
 0x400   : > { %10876 = vmatmul.mubr.bf16.gmra.mxu1 %v5672_v43  ;;  %v5801_v42 = vsel %vm5156_vm8, %v5792_v57, %v5800_v34  ;;  %v5925_v58 = vrot.slane %v5923_v3, 3  ;;  %v5928_v36 = vrot.slane %v5926_v21, 4  ;;  %v6052_v6 = vshrl.u32 %v5128_v38, 16  ;;  %v11402_v43 = vld [vmem:[#allocation2 + $0xac] ss:$0 sps:$4 sm:$0x11]  }
 0x401   : > { %10879 = vmatprep.mubr.bf16.mxu1 %v5801_v42  ;;  %v6055_v18 = vshll.u32 %v5128_v38, 16  ;;  %v5921_v11 = vor.u32 %v5920_v24, %v5917_v5  ;;  %v6046_v57 = vrot.slane %v6044_v46, 3  ;;  %v6049_v9 = vrot.slane %v6047_v2, 4  ;;  %15322 = vst [vmem:[#allocation114_spill] sm:$0xff] %v14207_v54 }
 0x402   : > { %v5929_v34 = vor.u32 %v5928_v36, %v5925_v58  ;;  %v6054_v63 = vrot.slane %v6052_v6, 3  ;;  %v5129_v39 = vrot.slane %v13876_v25, 5  ;;  %v5130_v21 = vrot.slane %v11401_v26, 5 }
 0x403   : > { %v6057_v40 = vrot.slane %v6055_v18, 4  ;;  %v6050_v42 = vor.u32 %v6049_v9, %v6046_v57  ;;  %v5132_v38 = vrot.slane %v13900_v30, 5  ;;  %v5133_v46 = vrot.slane %v11402_v43, 5  ;;  %v11403_v43 = vld [vmem:[#allocation2 + $0xbc] ss:$0 sps:$4 sm:$0x11]  }
 0x404   : > { %v5930_v23 = vsel %vm5156_vm8, %v5921_v11, %v5929_v34  ;;  %v6173_v5 = vshrl.u32 %v5129_v39, 16  ;;  %v6176_v24 = vshll.u32 %v5129_v39, 16  ;;  %v5131_v58 = vsel %vm4371_vm9, %v5129_v39, %v5130_v21  ;;  %v14215_v11 = vpop.f32.mrf.mxu0 }
 0x405   : > { %v6058_v3 = vor.u32 %v6057_v40, %v6054_v63  ;;  %v6302_v36 = vshrl.u32 %v5132_v38, 16  ;;  %v6305_v25 = vshll.u32 %v5132_v38, 16  ;;  %v6181_v57 = vshrl.u32 %v5131_v58, 16  ;;  %15323 = vst [vmem:[#allocation115_spill] sm:$0xff] %v14215_v11 }
 0x406   : > { %v6175_v6 = vrot.slane %v6173_v5, 3  ;;  %v6178_v18 = vrot.slane %v6176_v24, 4  ;;  %v6184_v9 = vshll.u32 %v5131_v58, 16  ;;  %v5134_v30 = vsel %vm4371_vm9, %v5132_v38, %v5133_v46  ;;  %v14222_v54 = vpop.f32.mrf.mxu0 }
 0x407   : > { %v6059_v2 = vsel %vm5156_vm8, %v6050_v42, %v6058_v3  ;;  %v6307_v34 = vrot.slane %v6305_v25, 4  ;;  %v6183_v40 = vrot.slane %v6181_v57, 3  ;;  %v6310_v39 = vshrl.u32 %v5134_v30, 16  ;;  %v11404_v3 = vld [vmem:[#allocation2 + $0xcc] ss:$0 sps:$4 sm:$0x11]  }
 0x408   : > { %v14193_v31 = vpop.f32.mrf.mxu1  ;;  %10880 = vmatmul.mubr.bf16.gmra.mxu1 %v5930_v23  ;;  %v6304_v23 = vrot.slane %v6302_v36, 3  ;;  %v6179_v63 = vor.u32 %v6178_v18, %v6175_v6  ;;  %v6186_v42 = vrot.slane %v6184_v9, 4  ;;  %v6313_v5 = vshll.u32 %v5134_v30, 16  ;;  %15324 = vst [vmem:[#allocation116_spill] sm:$0xff] %v14222_v54 }
 0x409   : > { %10883 = vmatprep.mubr.bf16.mxu1 %v6059_v2  ;;  %v6312_v58 = vrot.slane %v6310_v39, 3  ;;  %v5135_v38 = vrot.slane %v13927_v13, 5  ;;  %v5136_v46 = vrot.slane %v11403_v43, 5  ;;  %v5138_v36 = vrot.slane %v13962_v55, 5  ;;  %v14231_v39 = vpop.f32.mrf.mxu0 }
 0x40a   : > { %v14198_v53 = vpop.f32.mrf.mxu1  ;;  %v6187_v24 = vor.u32 %v6186_v42, %v6183_v40  ;;  %v6308_v2 = vor.u32 %v6307_v34, %v6304_v23  ;;  %v6315_v47 = vrot.slane %v6313_v5, 4  ;;  %v5139_v6 = vrot.slane %v11404_v3, 5  ;;  %15325 = vst [vmem:[#allocation117_spill] sm:$0xff] %v14231_v39  ;;  %v11405_v5 = vld [vmem:[#allocation2 + $0xdc] ss:$0 sps:$4 sm:$0x11]  }
 0x40b   : > { %v5137_v57 = vsel %vm4371_vm9, %v5135_v38, %v5136_v46  ;;  %v6431_v9 = vshrl.u32 %v5135_v38, 16  ;;  %v6434_v30 = vshll.u32 %v5135_v38, 16  ;;  %v6560_v42 = vshrl.u32 %v5138_v36, 16  ;;  %v14236_v39 = vpop.f32.mrf.mxu0 }
 0x40c   : > { %v14204_v33 = vpop.f32.mrf.mxu1  ;;  %v6188_v25 = vsel %vm5156_vm8, %v6179_v63, %v6187_v24  ;;  %v6316_v18 = vor.u32 %v6315_v47, %v6312_v58  ;;  %v6439_v23 = vshrl.u32 %v5137_v57, 16  ;;  %v6442_v34 = vshll.u32 %v5137_v57, 16  ;;  %15326 = vst [vmem:[#allocation118_spill] sm:$0xff] %v14236_v39 }
 0x40d   : > { %v5140_v40 = vsel %vm4371_vm9, %v5138_v36, %v5139_v6  ;;  %v6433_v43 = vrot.slane %v6431_v9, 3  ;;  %v6436_v63 = vrot.slane %v6434_v30, 4  ;;  %v6563_v3 = vshll.u32 %v5138_v36, 16  ;;  %v11406_v6 = vld [vmem:[#allocation2 + $0xec] ss:$0 sps:$4 sm:$0x11]  }
 0x40e   : > { %v14209_v0 = vpop.f32.mrf.mxu1  ;;  %v6317_v55 = vsel %vm5156_vm8, %v6308_v2, %v6316_v18  ;;  %v6441_v47 = vrot.slane %v6439_v23, 3  ;;  %v6444_v24 = vrot.slane %v6442_v34, 4  ;;  %v6562_v58 = vrot.slane %v6560_v42, 3 }
 0x40f   : > { %v6568_v38 = vshrl.u32 %v5140_v40, 16  ;;  %v6437_v46 = vor.u32 %v6436_v63, %v6433_v43  ;;  %v6571_v57 = vshll.u32 %v5140_v40, 16  ;;  %v5141_v36 = vrot.slane %v13991_v52, 5 }
 0x410   : > { %10884 = vmatmul.mubr.bf16.gmra.mxu1 %v6188_v25  ;;  %v6565_v25 = vrot.slane %v6563_v3, 4  ;;  %v6445_v54 = vor.u32 %v6444_v24, %v6441_v47  ;;  %v5142_v30 = vrot.slane %v11405_v5, 5  ;;  %v5144_v23 = vrot.slane %v14020_v22, 5  ;;  %v14246_v24 = vpop.f32.mrf.mxu0 }
 0x411   : > { %10887 = vmatprep.mubr.bf16.mxu1 %v6317_v55  ;;  %v6570_v28 = vrot.slane %v6568_v38, 3  ;;  %v6573_v18 = vrot.slane %v6571_v57, 4  ;;  %v6689_v42 = vshrl.u32 %v5141_v36, 16  ;;  %v6692_v55 = vshll.u32 %v5141_v36, 16  ;;  %15327 = vst [vmem:[#allocation119_spill] sm:$0xff] %v14246_v24 }
 0x412   : > { %v6566_v2 = vor.u32 %v6565_v25, %v6562_v58  ;;  %v6446_v9 = vsel %vm5156_vm8, %v6437_v46, %v6445_v54  ;;  %v5145_v43 = vrot.slane %v11406_v6, 5  ;;  %v5143_v63 = vsel %vm4371_vm9, %v5141_v36, %v5142_v30  ;;  %v11407_v57 = vld [vmem:[#allocation2 + $0xfc] ss:$0 sps:$4 sm:$0x11]   ;;  %v14252_v39 = vpop.f32.mrf.mxu0 }
 0x413   : > { %v6574_v40 = vor.u32 %v6573_v18, %v6570_v28  ;;  %v6818_v3 = vshrl.u32 %v5144_v23, 16  ;;  %v6821_v47 = vshll.u32 %v5144_v23, 16  ;;  %v6691_v54 = vrot.slane %v6689_v42, 3 }
 0x414   : > { %v14217_v26 = vpop.f32.mrf.mxu1  ;;  %v6694_v5 = vrot.slane %v6692_v55, 4  ;;  %v6697_v22 = vshrl.u32 %v5143_v63, 16  ;;  %v6700_v38 = vshll.u32 %v5143_v63, 16  ;;  %v5146_v28 = vsel %vm4371_vm9, %v5144_v23, %v5145_v43 }
 0x415   : > { %v6575_v52 = vsel %vm5156_vm8, %v6566_v2, %v6574_v40  ;;  %v6820_v46 = vrot.slane %v6818_v3, 3  ;;  %v6823_v25 = vrot.slane %v6821_v47, 4  ;;  %v6826_v18 = vshrl.u32 %v5146_v28, 16 }
 0x416   : > { %v14220_v21 = vpop.f32.mrf.mxu1  ;;  %v6699_v6 = vrot.slane %v6697_v22, 3  ;;  %v6829_v36 = vshll.u32 %v5146_v28, 16  ;;  %v6695_v30 = vor.u32 %v6694_v5, %v6691_v54  ;;  %v6702_v24 = vrot.slane %v6700_v38, 4  ;;  %v14260_v38 = vpop.f32.mrf.mxu0 }
 0x417   : > { %v6824_v2 = vor.u32 %v6823_v25, %v6820_v46  ;;  %v6828_v40 = vrot.slane %v6826_v18, 3  ;;  %v5147_v63 = vrot.slane %v14051_v37, 5  ;;  %v5148_v23 = vrot.slane %v11407_v57, 5  ;;  %15328 = vst [vmem:[#allocation120_spill] sm:$0xff] %v14260_v38 }
 0x418   : > { %v14224_v11 = vpop.f32.mrf.mxu1  ;;  %10888 = vmatmul.mubr.bf16.gmra.mxu1 %v6446_v9  ;;  %v11408_v9 = vld [vmem:[#allocation2 + $0x10c] ss:$0 sps:$4 sm:$0x11]   ;;  %v6831_v42 = vrot.slane %v6829_v36, 4  ;;  %v6703_v55 = vor.u32 %v6702_v24, %v6699_v6  ;;  %v5150_v43 = vrot.slane %v14082_v32, 5  ;;  %v14264_v38 = vpop.f32.mrf.mxu0  ;;  %v14283_v29 = vadd.f32 %v14173_v4, %v14168_v17 }
 0x419   : > { %10891 = vmatprep.mubr.bf16.mxu1 %v6575_v52  ;;  %v5151_v47 = vrot.slane %v11408_v9, 5  ;;  %v5149_v54 = vsel %vm4371_vm9, %v5147_v63, %v5148_v23  ;;  %v6947_v5 = vshrl.u32 %v5147_v63, 16  ;;  %v6950_v22 = vshll.u32 %v5147_v63, 16 }
 0x41a   : > { %v14233_v13 = vpop.f32.mrf.mxu1  ;;  %v6832_v3 = vor.u32 %v6831_v42, %v6828_v40  ;;  %v6704_v52 = vsel %vm5156_vm8, %v6695_v30, %v6703_v55  ;;  %v6955_v24 = vshrl.u32 %v5149_v54, 16  ;;  %v6958_v25 = vshll.u32 %v5149_v54, 16  ;;  %v367_v55 = vld [vmem:[#allocation2 + $0x11c] sm:$0x1] }
 0x41b   : > { %v5152_v37 = vsel %vm4371_vm9, %v5150_v43, %v5151_v47  ;;  %v6949_v32 = vrot.slane %v6947_v5, 3  ;;  %v6952_v57 = vrot.slane %v6950_v22, 4  ;;  %v7076_v6 = vshrl.u32 %v5150_v43, 16 }
 0x41c   : > { %v6833_v46 = vsel %vm5156_vm8, %v6824_v2, %v6832_v3  ;;  %v7079_v18 = vshll.u32 %v5150_v43, 16  ;;  %v6957_v9 = vrot.slane %v6955_v24, 3  ;;  %v6960_v30 = vrot.slane %v6958_v25, 4 }
 0x41d   : > { %v7084_v40 = vshrl.u32 %v5152_v37, 16  ;;  %v7087_v42 = vshll.u32 %v5152_v37, 16  ;;  %v6953_v63 = vor.u32 %v6952_v57, %v6949_v32  ;;  %v7078_v23 = vrot.slane %v7076_v6, 3  ;;  %v14277_v32 = vpop.f32.mrf.mxu0 }
 0x41e   : > { %v6961_v3 = vor.u32 %v6960_v30, %v6957_v9  ;;  %v14268_v5 = vadd.f32 %v14171_v8, %v14165_v61  ;;  %v368_v43 = vsel %vm13058_vm7, 0, %v367_v55  ;;  %v10554_v25 = vadd.f32 %v14186_v50, %v14177_v7 }
 0x41f   : > { %v7086_v54 = vrot.slane %v7084_v40, 3  ;;  %v7089_v47 = vrot.slane %v7087_v42, 4  ;;  %369 = vst [vmem:[#allocation2 + $0x11c] sm:$0x1] %v368_v43  ;;  %v10442_v37 = vadd.f32 %v14159_v35, %v14154_v62  ;;  %v5153_v8 = vrot.slane %v14132_v51, 5  ;;  %v14293_v35 = vpop.f32.mrf.mxu0 }
 0x420   : > { %v14238_v10 = vpop.f32.mrf.mxu1  ;;  %10892 = vmatmul.mubr.bf16.gmra.mxu1 %v6704_v52  ;;  %v7081_v52 = vrot.slane %v7079_v18, 4  ;;  %15329 = vst [vmem:[#allocation121_spill] sm:$0xff] %v14268_v5  ;;  %v6962_v24 = vsel %vm5156_vm8, %v6953_v63, %v6961_v3  ;;  %v14287_v6 = vadd.f32 %v14188_v20, %v14179_v59  ;;  %v14291_v62 = vadd.f32 %v14198_v53, %v14193_v31 }
 0x421   : > { %10895 = vmatprep.mubr.bf16.mxu1 %v6833_v46  ;;  %v7090_v22 = vor.u32 %v7089_v47, %v7086_v54  ;;  %v7205_v50 = vshrl.u32 %v5153_v8, 16  ;;  %v7208_v18 = vshll.u32 %v5153_v8, 16  ;;  %v14297_v51 = vadd.f32 %v14209_v0, %v14204_v33  ;;  %v14307_v31 = vpop.f32.mrf.mxu0 }
 0x422   : > { %v14243_v34 = vpop.f32.mrf.mxu1  ;;  %v7082_v46 = vor.u32 %v7081_v52, %v7078_v23  ;;  %v14301_v4 = vadd.f32 %v14220_v21, %v14217_v26  ;;  %v14305_v59 = vadd.f32 %v14233_v13, %v14224_v11 }
 0x423   : > { %v7207_v30 = vrot.slane %v7205_v50, 3  ;;  %v7210_v40 = vrot.slane %v7208_v18, 4  ;;  %v14311_v42 = vadd.f32 %v14243_v34, %v14238_v10  ;;  %v14318_v11 = vpop.f32.mrf.mxu0 }
 0x424   : > { %v14248_v58 = vpop.f32.mrf.mxu1  ;;  %v7091_v61 = vsel %vm5156_vm8, %v7082_v46, %v7090_v22 }
 0x425   : > { %v7211_v63 = vor.u32 %v7210_v40, %v7207_v30  ;;  %v14328_v47 = vpop.f32.mrf.mxu0 }
 0x426   : > { %v14254_v48 = vpop.f32.mrf.mxu1  ;;  %v11409_v9 = vld [vmem:[#allocation2 + $0x11c] ss:$0 sps:$4 sm:$0x11]  }
 0x427   : > { %v5154_v20 = vrot.slane %v11409_v9, 5  ;;  %v14316_v0 = vadd.f32 %v14254_v48, %v14248_v58  ;;  %v14333_v58 = vld [vmem:[%s15151_s4] ss:$0 sm:$0xff]  ;;  %v14339_v43 = vpop.f32.mrf.mxu0 }
 0x428   : > { %10896 = vmatmul.mubr.bf16.gmra.mxu1 %v6962_v24 }
 0x429   : > { %10899 = vmatprep.mubr.bf16.mxu1 %v7091_v61  ;;  %v5155_v33 = vsel %vm4371_vm9, %v5153_v8, %v5154_v20  ;;  %v14345_v8 = vpop.f32.mrf.mxu0 }
 0x42a   : > { %v7213_v26 = vshrl.u32 %v5155_v33, 16  ;;  %v7216_v21 = vshll.u32 %v5155_v33, 16 }
 0x42c   : > { %v10595_v28 = vpop.f32.mrf.mxu1  ;;  %v7215_v23 = vrot.slane %v7213_v26, 3  ;;  %v7218_v52 = vrot.slane %v7216_v21, 4 }
 0x42e   : > { %v10596_v36 = vpop.f32.mrf.mxu1  ;;  %v7219_v34 = vor.u32 %v7218_v52, %v7215_v23 }
 0x42f   : > { %v14320_v13 = vadd.f32 %v10596_v36, %v10595_v28  ;;  %v8202_v36 = vadd.f32 %v10442_v37, %v14333_v58 }
 0x430   : > { %v10598_v2 = vpop.f32.mrf.mxu1  ;;  %v7220_v28 = vsel %vm5156_vm8, %v7211_v63, %v7219_v34 }
 0x431   : > { %15330 = vst [vmem:[#allocation122_spill] sm:$0xff] %v14320_v13  ;;  %10900 = vmatmul.mubr.bf16.gmra.mxu1 %v7220_v28  ;;  %v15466_v13 = vld [vmem:[#allocation87_spill] sm:$0xff] }
 0x432   : > { %v10599_v57 = vpop.f32.mrf.mxu1 }
 0x433   : > { %v14322_v3 = vadd.f32 %v10599_v57, %v10598_v2  ;;  %v14341_v57 = vadd.f32 %v10554_v25, %v8202_v36 }
 0x435   : > { %15331 = vst [vmem:[#allocation123_spill] sm:$0xff] %v14322_v3  ;;  %15335 = vst [vmem:[#allocation127_spill] sm:$0xff] %v14341_v57 }
 0x438   : > { %v10601_v7 = vpop.f32.mrf.mxu1 }
 0x43a   : > { %v10602_v17 = vpop.f32.mrf.mxu1 }
 0x43b   : > { %v14324_v10 = vadd.f32 %v10602_v17, %v10601_v7  ;;  %v14347_v7 = vpop.f32.mrf.mxu0 }
 0x43c   : > { %v10604_v53 = vpop.f32.mrf.mxu1 }
 0x43d   : > { %15332 = vst [vmem:[#allocation124_spill] sm:$0xff] %v14324_v10  ;;  %v14351_v37 = vpop.f32.mrf.mxu0  ;;  %v15401_v10 = vld [vmem:[#allocation49_spill] sm:$0xff] }
 0x43e   : > { %v10605_v55 = vpop.f32.mrf.mxu1 }
 0x43f   : > { %v14326_v54 = vadd.f32 %v10605_v55, %v10604_v53  ;;  %v14355_v30 = vpop.f32.mrf.mxu0 }
 0x440   : > { %15339 = vst [vmem:[#allocation131_spill] sm:$0xff] %v14355_v30  ;;  %v15422_v30 = vld [vmem:[#allocation46_spill] sm:$0xff] }
 0x441   : > { %15333 = vst [vmem:[#allocation125_spill] sm:$0xff] %v14326_v54  ;;  %v14357_v25 = vpop.f32.mrf.mxu0  ;;  %v15397_v54 = vld [vmem:[#allocation41_spill] sm:$0xff] }
 0x442   : > { %15340 = vst [vmem:[#allocation132_spill] sm:$0xff] %v14357_v25  ;;  %v15420_v25 = vld [vmem:[#allocation44_spill] sm:$0xff] }
 0x443   : > { %v14359_v33 = vpop.f32.mrf.mxu0 }
 0x444   : > { %v10607_v48 = vpop.f32.mrf.mxu1  ;;  %15341 = vst [vmem:[#allocation133_spill] sm:$0xff] %v14359_v33  ;;  %v15417_v33 = vld [vmem:[#allocation55_spill] sm:$0xff] }
 0x445   : > { %v14363_v63 = vpop.f32.mrf.mxu0 }
 0x446   : > { %v10608_v2 = vpop.f32.mrf.mxu1  ;;  %15343 = vst [vmem:[#allocation135_spill] sm:$0xff] %v14363_v63 }
 0x447   : > { %v14337_v46 = vadd.f32 %v10608_v2, %v10607_v48  ;;  %v14367_v34 = vpop.f32.mrf.mxu0 }
 0x448   : > { %v10610_v22 = vpop.f32.mrf.mxu1  ;;  %15345 = vst [vmem:[#allocation137_spill] sm:$0xff] %v14367_v34 }
 0x449   : > { %15334 = vst [vmem:[#allocation126_spill] sm:$0xff] %v14337_v46  ;;  %v14369_v28 = vpop.f32.mrf.mxu0 }
 0x44a   : > { %v10611_v24 = vpop.f32.mrf.mxu1  ;;  %15346 = vst [vmem:[#allocation138_spill] sm:$0xff] %v14369_v28 }
 0x44b   : > { %v14343_v61 = vadd.f32 %v10611_v24, %v10610_v22  ;;  %v14373_v24 = vpop.f32.mrf.mxu0 }
 0x44c   : > { %15348 = vst [vmem:[#allocation140_spill] sm:$0xff] %v14373_v24  ;;  %v15396_v24 = vld [vmem:[#allocation40_spill] sm:$0xff] }
 0x44d   : > { %15336 = vst [vmem:[#allocation128_spill] sm:$0xff] %v14343_v61  ;;  %v15384_v61 = vld [vmem:[#allocation34_spill] sm:$0xff]  ;;  %v10385_v28 = vadd.f32 %v15397_v54, %v15396_v24 }
 0x450   : > { %v10613_v50 = vpop.f32.mrf.mxu1 }
 0x452   : > { %v10614_v18 = vpop.f32.mrf.mxu1 }
 0x453   : > { %v14349_v9 = vadd.f32 %v10614_v18, %v10613_v50 }
 0x454   : > { %v10616_v17 = vpop.f32.mrf.mxu1 }
 0x455   : > { %15337 = vst [vmem:[#allocation129_spill] sm:$0xff] %v14349_v9 }
 0x456   : > { %v10617_v20 = vpop.f32.mrf.mxu1 }
 0x457   : > { %v14353_v53 = vadd.f32 %v10617_v20, %v10616_v17  ;;  %v14377_v17 = vpop.f32.mrf.mxu0 }
 0x458   : > { %15350 = vst [vmem:[#allocation142_spill] sm:$0xff] %v14377_v17 }
 0x459   : > { %15338 = vst [vmem:[#allocation130_spill] sm:$0xff] %v14353_v53  ;;  %v14379_v20 = vpop.f32.mrf.mxu0 }
 0x45a   : > { %15351 = vst [vmem:[#allocation143_spill] sm:$0xff] %v14379_v20  ;;  %v15383_v20 = vld [vmem:[#allocation32_spill] sm:$0xff] }
 0x45b   : > { %v10379_v5 = vadd.f32 %v15384_v61, %v15383_v20  ;;  %v15390_v61 = vld [vmem:[#allocation21_spill] sm:$0xff]  ;;  %v15391_v20 = vld [vmem:[#allocation22_spill] sm:$0xff] }
 0x45d   : > { %v10619_v40 = vpop.f32.mrf.mxu1  ;;  %v14514_v54 = vadd.f32 %v10379_v5, %v14333_v58  ;;  %v15419_v5 = vld [vmem:[#allocation42_spill] sm:$0xff] }
 0x45f   : > { %v10620_v26 = vpop.f32.mrf.mxu1 }
 0x460   : > { %v14361_v21 = vadd.f32 %v10620_v26, %v10619_v40 }
 0x461   : > { %v10622_v55 = vpop.f32.mrf.mxu1 }
 0x462   : > { %15342 = vst [vmem:[#allocation134_spill] sm:$0xff] %v14361_v21 }
 0x463   : > { %v10623_v23 = vpop.f32.mrf.mxu1 }
 0x464   : > { %v14365_v52 = vadd.f32 %v10623_v23, %v10622_v55  ;;  %v14381_v55 = vpop.f32.mrf.mxu0 }
 0x465   : > { %15352 = vst [vmem:[#allocation144_spill] sm:$0xff] %v14381_v55 }
 0x466   : > { %15344 = vst [vmem:[#allocation136_spill] sm:$0xff] %v14365_v52 }
 0x46a   : > { %v10625_v48 = vpop.f32.mrf.mxu1 }
 0x46c   : > { %v10626_v36 = vpop.f32.mrf.mxu1 }
 0x46d   : > { %v14371_v2 = vadd.f32 %v10626_v36, %v10625_v48  ;;  %v14385_v48 = vpop.f32.mrf.mxu0 }
 0x46e   : > { %v10628_v22 = vpop.f32.mrf.mxu1  ;;  %15354 = vst [vmem:[#allocation146_spill] sm:$0xff] %v14385_v48  ;;  %v15382_v48 = vld [vmem:[#allocation30_spill] sm:$0xff] }
 0x46f   : > { %15347 = vst [vmem:[#allocation139_spill] sm:$0xff] %v14371_v2  ;;  %v14389_v2 = vpop.f32.mrf.mxu0 }
 0x470   : > { %v10629_v50 = vpop.f32.mrf.mxu1  ;;  %15356 = vst [vmem:[#allocation148_spill] sm:$0xff] %v14389_v2  ;;  %v15380_v2 = vld [vmem:[#allocation26_spill] sm:$0xff] }
 0x471   : > { %v14375_v18 = vadd.f32 %v10629_v50, %v10628_v22  ;;  %v14391_v50 = vpop.f32.mrf.mxu0 }
 0x472   : > { %15357 = vst [vmem:[#allocation149_spill] sm:$0xff] %v14391_v50 }
 0x473   : > { %15349 = vst [vmem:[#allocation141_spill] sm:$0xff] %v14375_v18  ;;  %v14395_v57 = vpop.f32.mrf.mxu0 }
 0x474   : > { %15359 = vst [vmem:[#allocation151_spill] sm:$0xff] %v14395_v57 }
 0x476   : > { %v10631_v40 = vpop.f32.mrf.mxu1 }
 0x478   : > { %v10632_v26 = vpop.f32.mrf.mxu1 }
 0x479   : > { %v14383_v23 = vadd.f32 %v10632_v26, %v10631_v40  ;;  %v14399_v26 = vpop.f32.mrf.mxu0 }
 0x47a   : > { %v10634_v52 = vpop.f32.mrf.mxu1  ;;  %15361 = vst [vmem:[#allocation153_spill] sm:$0xff] %v14399_v26 }
 0x47b   : > { %15353 = vst [vmem:[#allocation145_spill] sm:$0xff] %v14383_v23 }
 0x47c   : > { %v10635_v21 = vpop.f32.mrf.mxu1 }
 0x47d   : > { %v14387_v36 = vadd.f32 %v10635_v21, %v10634_v52  ;;  %v10349_v21 = vadd.f32 %v13682_v56, %v13663_v12  ;;  %v10352_v52 = vadd.f32 %v13703_v44, %v13696_v15  ;;  %v14419_v56 = vpop.f32.mrf.mxu0 }
 0x47f   : > { %15355 = vst [vmem:[#allocation147_spill] sm:$0xff] %v14387_v36  ;;  %v10355_v36 = vadd.f32 %v13721_v27, %v13709_v45  ;;  %v14422_v44 = vadd.f32 %v10349_v21, %v14333_v58  ;;  %v14425_v45 = vadd.f32 %v10352_v52, %v14333_v58  ;;  %v15364_v27 = vld [vmem:[#allocation12_spill] sm:$0xff]  ;;  %v15373_v52 = vld [vmem:[#allocation23_spill] sm:$0xff] }
 0x482   : > { %v10637_v22 = vpop.f32.mrf.mxu1 }
 0x484   : > { %v10638_v18 = vpop.f32.mrf.mxu1 }
 0x485   : > { %v14393_v53 = vadd.f32 %v10638_v18, %v10637_v22  ;;  %v10358_v18 = vadd.f32 %v13747_v16, %v13735_v1  ;;  %v14411_v22 = vadd.f32 %v13657_v41, %v13654_v60  ;;  %v15365_v1 = vld [vmem:[#allocation14_spill] sm:$0xff]  ;;  %v15366_v41 = vld [vmem:[#allocation16_spill] sm:$0xff] }
 0x486   : > { %v10640_v9 = vpop.f32.mrf.mxu1  ;;  %v10364_v60 = vadd.f32 %v15365_v1, %v15364_v27  ;;  %v15367_v16 = vld [vmem:[#allocation18_spill] sm:$0xff]  ;;  %v15374_v1 = vld [vmem:[#allocation7_spill] sm:$0xff] }
 0x487   : > { %15358 = vst [vmem:[#allocation150_spill] sm:$0xff] %v14393_v53  ;;  %v15371_v53 = vld [vmem:[#allocation5_spill] sm:$0xff]  ;;  %v14445_v27 = vadd.f32 %v10358_v18, %v14333_v58 }
 0x488   : > { %v10641_v55 = vpop.f32.mrf.mxu1 }
 0x489   : > { %v14397_v40 = vadd.f32 %v10641_v55, %v10640_v9  ;;  %v14415_v9 = vadd.f32 %v13688_v19, %v13671_v14  ;;  %v15362_v55 = vld [vmem:[#allocation10_spill] sm:$0xff]  ;;  %v15368_v14 = vld [vmem:[#allocation4_spill] sm:$0xff]  ;;  %v15369_v19 = vld [vmem:[#allocation3_spill] sm:$0xff] }
 0x48a   : > { %v10361_v12 = vadd.f32 %v15362_v55, %v13760_v49  ;;  %15363 = vst [vmem:[#allocation10_spill] sm:$0xff] %v14419_v56  ;;  %v14433_v23 = vadd.f32 %v15369_v19, %v15368_v14  ;;  %v14436_v49 = vadd.f32 %v10355_v36, %v14333_v58  ;;  %v15370_v55 = vld [vmem:[#allocation6_spill] sm:$0xff]  ;;  %v15372_v56 = vld [vmem:[#allocation20_spill] sm:$0xff]  ;;  %v15376_v14 = vld [vmem:[#allocation9_spill] sm:$0xff] }
 0x48b   : > { %15360 = vst [vmem:[#allocation152_spill] sm:$0xff] %v14397_v40  ;;  %v10367_v40 = vadd.f32 %v15367_v16, %v15366_v41  ;;  %v14440_v21 = vadd.f32 %v15371_v53, %v15370_v55  ;;  %v10370_v26 = vadd.f32 %v15373_v52, %v15372_v56  ;;  %v15375_v41 = vld [vmem:[#allocation8_spill] sm:$0xff]  ;;  %v15377_v19 = vld [vmem:[#allocation11_spill] sm:$0xff]  ;;  %v15379_v55 = vld [vmem:[#allocation25_spill] sm:$0xff] }
 0x48c   : > { %v14449_v16 = vadd.f32 %v15375_v41, %v15374_v1  ;;  %v14453_v50 = vadd.f32 %v15377_v19, %v15376_v14  ;;  %v14458_v53 = vadd.f32 %v10361_v12, %v14333_v58  ;;  %v10373_v56 = vadd.f32 %v15380_v2, %v15379_v55  ;;  %v15381_v52 = vld [vmem:[#allocation28_spill] sm:$0xff]  ;;  %v14466_v1 = vpop.f32.mrf.mxu0  ;;  %v15388_v2 = vld [vmem:[#allocation17_spill] sm:$0xff]  ;;  %v15389_v55 = vld [vmem:[#allocation19_spill] sm:$0xff]  ;;  %15406 = vst [vmem:[#allocation4_spill] sm:$0xff] %v14514_v54 }
 0x48d   : > { %v10376_v18 = vadd.f32 %v15382_v48, %v15381_v52  ;;  %15385 = vst [vmem:[#allocation14_spill] sm:$0xff] %v14466_v1  ;;  %v14469_v14 = vadd.f32 %v10364_v60, %v14333_v58  ;;  %v14476_v12 = vadd.f32 %v10367_v40, %v14333_v58  ;;  %v14483_v48 = vadd.f32 %v10370_v26, %v14333_v58  ;;  %v15392_v60 = vld [vmem:[#allocation24_spill] sm:$0xff]  ;;  %v15393_v1 = vld [vmem:[#allocation27_spill] sm:$0xff] }
 0x48e   : > { %v10643_v15 = vpop.f32.mrf.mxu1  ;;  %v14487_v52 = vadd.f32 %v15391_v20, %v15390_v61  ;;  %v14491_v46 = vadd.f32 %v15393_v1, %v15392_v60  ;;  %v15400_v26 = vld [vmem:[#allocation47_spill] sm:$0xff]  ;;  %v14504_v61 = vadd.f32 %v10373_v56, %v14333_v58  ;;  %v15403_v20 = vld [vmem:[#allocation29_spill] sm:$0xff]  ;;  %v14516_v24 = vpop.f32.mrf.mxu0 }
 0x48f   : > { %v10391_v3 = vadd.f32 %v15401_v10, %v15400_v26  ;;  %v14507_v1 = vadd.f32 %v10376_v18, %v14333_v58  ;;  %v15404_v60 = vld [vmem:[#allocation31_spill] sm:$0xff]  ;;  %15407 = vst [vmem:[#allocation3_spill] sm:$0xff] %v14516_v24  ;;  %v15415_v18 = vld [vmem:[#allocation52_spill] sm:$0xff]  ;;  %v14535_v24 = vadd.f32 %v15420_v25, %v15419_v5  ;;  %v15433_v5 = vld [vmem:[#allocation53_spill] sm:$0xff] }
 0x490   : > { %v10644_v57 = vpop.f32.mrf.mxu1 }
 0x491   : > { %v14455_v36 = vadd.f32 %v10644_v57, %v10643_v15  ;;  %v15386_v57 = vld [vmem:[#allocation13_spill] sm:$0xff]  ;;  %v15387_v15 = vld [vmem:[#allocation15_spill] sm:$0xff]  ;;  %15421 = vst [vmem:[#allocation23_spill] sm:$0xff] %v14535_v24 }
 0x492   : > { %v10646_v41 = vpop.f32.mrf.mxu1  ;;  %v14473_v19 = vadd.f32 %v15387_v15, %v15386_v57  ;;  %v15394_v57 = vld [vmem:[#allocation36_spill] sm:$0xff]  ;;  %v15395_v15 = vld [vmem:[#allocation38_spill] sm:$0xff] }
 0x493   : > { %15378 = vst [vmem:[#allocation12_spill] sm:$0xff] %v14455_v36  ;;  %v14480_v36 = vadd.f32 %v15389_v55, %v15388_v2  ;;  %v10382_v17 = vadd.f32 %v15395_v15, %v15394_v57  ;;  %v15398_v2 = vld [vmem:[#allocation43_spill] sm:$0xff]  ;;  %v15399_v55 = vld [vmem:[#allocation45_spill] sm:$0xff]  ;;  %v14511_v57 = vadd.f32 %v15404_v60, %v15403_v20 }
 0x494   : > { %v10647_v40 = vpop.f32.mrf.mxu1  ;;  %v10388_v34 = vadd.f32 %v15399_v55, %v15398_v2  ;;  %v15408_v15 = vld [vmem:[#allocation33_spill] sm:$0xff]  ;;  %v15409_v2 = vld [vmem:[#allocation35_spill] sm:$0xff]  ;;  %v15414_v55 = vld [vmem:[#allocation50_spill] sm:$0xff] }
 0x495   : > { %v14501_v63 = vadd.f32 %v10647_v40, %v10646_v41  ;;  %15405 = vst [vmem:[#allocation18_spill] sm:$0xff] %v14511_v57  ;;  %v14520_v10 = vadd.f32 %v15409_v2, %v15408_v15  ;;  %v15411_v41 = vld [vmem:[#allocation37_spill] sm:$0xff]  ;;  %v15412_v40 = vld [vmem:[#allocation39_spill] sm:$0xff]  ;;  %v10394_v26 = vadd.f32 %v15415_v18, %v15414_v55  ;;  %v14531_v60 = vadd.f32 %v10382_v17, %v14333_v58  ;;  %v15423_v15 = vld [vmem:[#allocation48_spill] sm:$0xff] }
 0x496   : > { %v14524_v56 = vadd.f32 %v15412_v40, %v15411_v41  ;;  %v14539_v2 = vadd.f32 %v15423_v15, %v15422_v30  ;;  %v15426_v41 = vld [vmem:[#allocation61_spill] sm:$0xff]  ;;  %v14547_v55 = vadd.f32 %v10388_v34, %v14333_v58  ;;  %v15432_v18 = vld [vmem:[#allocation51_spill] sm:$0xff]  ;;  %v15435_v30 = vld [vmem:[#allocation56_spill] sm:$0xff] }
 0x497   : > { %15402 = vst [vmem:[#allocation16_spill] sm:$0xff] %v14501_v63  ;;  %15410 = vst [vmem:[#allocation6_spill] sm:$0xff] %v14520_v10  ;;  %v15416_v63 = vld [vmem:[#allocation54_spill] sm:$0xff]  ;;  %v15431_v17 = vld [vmem:[#allocation65_spill] sm:$0xff]  ;;  %v14556_v24 = vadd.f32 %v15433_v5, %v15432_v18 }
 0x498   : > { %15413 = vst [vmem:[#allocation5_spill] sm:$0xff] %v14524_v56  ;;  %v10397_v20 = vadd.f32 %v15417_v33, %v15416_v63  ;;  %15418 = vst [vmem:[#allocation20_spill] sm:$0xff] %v14531_v60  ;;  %v15425_v10 = vld [vmem:[#allocation58_spill] sm:$0xff]  ;;  %v14544_v56 = vadd.f32 %v10385_v28, %v14333_v58  ;;  %v14550_v33 = vadd.f32 %v10391_v3, %v14333_v58  ;;  %v15430_v63 = vld [vmem:[#allocation63_spill] sm:$0xff]  ;;  %v14566_v60 = vpop.f32.mrf.mxu0 }
 0x499   : > { %15424 = vst [vmem:[#allocation7_spill] sm:$0xff] %v14539_v2  ;;  %v10400_v40 = vadd.f32 %v15426_v41, %v15425_v10  ;;  %15428 = vst [vmem:[#allocation9_spill] sm:$0xff] %v14547_v55  ;;  %v10403_v25 = vadd.f32 %v15431_v17, %v15430_v63  ;;  %v15436_v15 = vld [vmem:[#allocation57_spill] sm:$0xff]  ;;  %v15438_v10 = vld [vmem:[#allocation67_spill] sm:$0xff]  ;;  %v14569_v3 = vadd.f32 %v10394_v26, %v14333_v58 }
 0x49a   : > { %15427 = vst [vmem:[#allocation8_spill] sm:$0xff] %v14544_v56  ;;  %15429 = vst [vmem:[#allocation11_spill] sm:$0xff] %v14550_v33  ;;  %v14560_v2 = vadd.f32 %v15436_v15, %v15435_v30  ;;  %v15439_v28 = vld [vmem:[#allocation69_spill] sm:$0xff]  ;;  %v15440_v56 = vld [vmem:[#allocation71_spill] sm:$0xff]  ;;  %v14572_v63 = vadd.f32 %v10397_v20, %v14333_v58 }
 0x49b   : > { %15434 = vst [vmem:[#allocation25_spill] sm:$0xff] %v14556_v24  ;;  %v10406_v41 = vadd.f32 %v15439_v28, %v15438_v10  ;;  %v15441_v34 = vld [vmem:[#allocation72_spill] sm:$0xff]  ;;  %15442 = vst [vmem:[#allocation28_spill] sm:$0xff] %v14566_v60  ;;  %v15445_v17 = vld [vmem:[#allocation59_spill] sm:$0xff]  ;;  %v10649_v10 = vpop.f32.mrf.mxu1  ;;  %v14583_v28 = vadd.f32 %v10400_v40, %v14333_v58 }
 0x49c   : > { %15437 = vst [vmem:[#allocation26_spill] sm:$0xff] %v14560_v2  ;;  %v10409_v55 = vadd.f32 %v15441_v34, %v15440_v56  ;;  %15443 = vst [vmem:[#allocation30_spill] sm:$0xff] %v14569_v3  ;;  %v15446_v18 = vld [vmem:[#allocation60_spill] sm:$0xff]  ;;  %v15448_v30 = vld [vmem:[#allocation62_spill] sm:$0xff] }
 0x49d   : > { %15444 = vst [vmem:[#allocation32_spill] sm:$0xff] %v14572_v63  ;;  %v14576_v5 = vadd.f32 %v15446_v18, %v15445_v17  ;;  %v15449_v15 = vld [vmem:[#allocation64_spill] sm:$0xff]  ;;  %15451 = vst [vmem:[#allocation15_spill] sm:$0xff] %v14583_v28  ;;  %v15452_v56 = vld [vmem:[#allocation66_spill] sm:$0xff]  ;;  %v14594_v17 = vadd.f32 %v10403_v25, %v14333_v58 }
 0x49e   : > { %v14580_v2 = vadd.f32 %v15449_v15, %v15448_v30  ;;  %v15453_v34 = vld [vmem:[#allocation68_spill] sm:$0xff]  ;;  %v15455_v26 = vld [vmem:[#allocation74_spill] sm:$0xff]  ;;  %v15456_v24 = vld [vmem:[#allocation75_spill] sm:$0xff] }
 0x49f   : > { %15447 = vst [vmem:[#allocation34_spill] sm:$0xff] %v14576_v5  ;;  %v14587_v60 = vadd.f32 %v15453_v34, %v15452_v56  ;;  %v10412_v20 = vadd.f32 %v15456_v24, %v15455_v26  ;;  %v15457_v63 = vld [vmem:[#allocation77_spill] sm:$0xff]  ;;  %v15458_v3 = vld [vmem:[#allocation79_spill] sm:$0xff]  ;;  %15459 = vst [vmem:[#allocation19_spill] sm:$0xff] %v14594_v17  ;;  %v10650_v34 = vpop.f32.mrf.mxu1  ;;  %v14608_v24 = vadd.f32 %v10409_v55, %v14333_v58  ;;  %v14612_v26 = vpop.f32.mrf.mxu0 }
 0x4a0   : > { %15450 = vst [vmem:[#allocation13_spill] sm:$0xff] %v14580_v2  ;;  %v10415_v33 = vadd.f32 %v15458_v3, %v15457_v63  ;;  %v15460_v18 = vld [vmem:[#allocation70_spill] sm:$0xff]  ;;  %v15461_v30 = vld [vmem:[#allocation73_spill] sm:$0xff]  ;;  %v15464_v40 = vld [vmem:[#allocation84_spill] sm:$0xff] }
 0x4a1   : > { %15454 = vst [vmem:[#allocation17_spill] sm:$0xff] %v14587_v60  ;;  %v14598_v15 = vadd.f32 %v15461_v30, %v15460_v18  ;;  %v15463_v2 = vld [vmem:[#allocation81_spill] sm:$0xff]  ;;  %v15465_v28 = vld [vmem:[#allocation86_spill] sm:$0xff]  ;;  %v14605_v60 = vadd.f32 %v10406_v41, %v14333_v58  ;;  %15468 = vst [vmem:[#allocation24_spill] sm:$0xff] %v14608_v24  ;;  %v14614_v18 = vadd.f32 %v10650_v34, %v10649_v10  ;;  %v10652_v54 = vpop.f32.mrf.mxu1 }
 0x4a2   : > { %v10418_v5 = vadd.f32 %v15464_v40, %v15463_v2  ;;  %v10421_v56 = vadd.f32 %v15466_v13, %v15465_v28  ;;  %v15469_v3 = vld [vmem:[#allocation89_spill] sm:$0xff]  ;;  %v15470_v25 = vld [vmem:[#allocation91_spill] sm:$0xff]  ;;  %15471 = vst [vmem:[#allocation27_spill] sm:$0xff] %v14612_v26  ;;  %v15473_v30 = vld [vmem:[#allocation76_spill] sm:$0xff]  ;;  %v14632_v10 = vadd.f32 %v10415_v33, %v14333_v58 }
 0x4a3   : > { %15462 = vst [vmem:[#allocation21_spill] sm:$0xff] %v14598_v15  ;;  %15467 = vst [vmem:[#allocation22_spill] sm:$0xff] %v14605_v60  ;;  %v10424_v63 = vadd.f32 %v15470_v25, %v15469_v3  ;;  %v15474_v15 = vld [vmem:[#allocation78_spill] sm:$0xff]  ;;  %v15475_v40 = vld [vmem:[#allocation80_spill] sm:$0xff]  ;;  %v14629_v3 = vadd.f32 %v10412_v20, %v14333_v58 }
 0x4a4   : > { %15472 = vst [vmem:[#allocation36_spill] sm:$0xff] %v14614_v18  ;;  %v14618_v2 = vadd.f32 %v15474_v15, %v15473_v30  ;;  %v15476_v13 = vld [vmem:[#allocation82_spill] sm:$0xff]  ;;  %v15478_v41 = vld [vmem:[#allocation93_spill] sm:$0xff]  ;;  %v15479_v60 = vld [vmem:[#allocation95_spill] sm:$0xff]  ;;  %v14641_v18 = vadd.f32 %v10418_v5, %v14333_v58  ;;  %v14648_v20 = vadd.f32 %v10421_v56, %v14333_v58 }
 0x4a5   : > { %v14622_v28 = vadd.f32 %v15476_v13, %v15475_v40  ;;  %v10427_v17 = vadd.f32 %v15479_v60, %v15478_v41  ;;  %v15480_v55 = vld [vmem:[#allocation97_spill] sm:$0xff]  ;;  %v15481_v24 = vld [vmem:[#allocation99_spill] sm:$0xff]  ;;  %15482 = vst [vmem:[#allocation40_spill] sm:$0xff] %v14632_v10  ;;  %v15486_v30 = vld [vmem:[#allocation104_spill] sm:$0xff] }
 0x4a6   : > { %v10430_v57 = vadd.f32 %v15481_v24, %v15480_v55  ;;  %v15483_v34 = vld [vmem:[#allocation83_spill] sm:$0xff]  ;;  %v15484_v15 = vld [vmem:[#allocation85_spill] sm:$0xff]  ;;  %v15487_v40 = vld [vmem:[#allocation106_spill] sm:$0xff] }
 0x4a7   : > { %15477 = vst [vmem:[#allocation38_spill] sm:$0xff] %v14622_v28  ;;  %v14636_v25 = vadd.f32 %v15484_v15, %v15483_v34  ;;  %v10436_v13 = vadd.f32 %v15487_v40, %v15486_v30  ;;  %v15488_v60 = vld [vmem:[#allocation88_spill] sm:$0xff]  ;;  %v15489_v41 = vld [vmem:[#allocation90_spill] sm:$0xff]  ;;  %v10653_v28 = vpop.f32.mrf.mxu1  ;;  %v14657_v30 = vadd.f32 %v10424_v63, %v14333_v58  ;;  %v14668_v56 = vadd.f32 %v10427_v17, %v14333_v58 }
 0x4a8   : > { %v14645_v24 = vadd.f32 %v15489_v41, %v15488_v60  ;;  %v15491_v55 = vld [vmem:[#allocation108_spill] sm:$0xff]  ;;  %v15492_v33 = vld [vmem:[#allocation110_spill] sm:$0xff]  ;;  %v14663_v60 = vpop.f32.mrf.mxu0  ;;  %v14665_v41 = vadd.f32 %v10653_v28, %v10652_v54  ;;  %v8240_v63 = vadd.f32 %v14411_v22, %v14422_v44  ;;  %v15504_v28 = vld [vmem:[#allocation113_spill] sm:$0xff]  ;;  %v8243_v17 = vadd.f32 %v14415_v9, %v14425_v45 }
 0x4a9   : > { %15485 = vst [vmem:[#allocation41_spill] sm:$0xff] %v14636_v25  ;;  %v10439_v26 = vadd.f32 %v15492_v33, %v15491_v55  ;;  %v15493_v10 = vld [vmem:[#allocation92_spill] sm:$0xff]  ;;  %v15494_v34 = vld [vmem:[#allocation94_spill] sm:$0xff]  ;;  %15497 = vst [vmem:[#allocation45_spill] sm:$0xff] %v14663_v60  ;;  %v8194_v60 = vadd.f32 %v10436_v13, %v14333_v58  ;;  %v8248_v13 = vadd.f32 %v14433_v23, %v14436_v49 }
 0x4aa   : > { %15490 = vst [vmem:[#allocation43_spill] sm:$0xff] %v14645_v24  ;;  %v14654_v15 = vadd.f32 %v15494_v34, %v15493_v10  ;;  %v15495_v5 = vld [vmem:[#allocation96_spill] sm:$0xff]  ;;  %v15496_v40 = vld [vmem:[#allocation98_spill] sm:$0xff]  ;;  %15498 = vst [vmem:[#allocation47_spill] sm:$0xff] %v14665_v41  ;;  %v14675_v10 = vadd.f32 %v10430_v57, %v14333_v58  ;;  %v14692_v57 = vadd.f32 %v14283_v29, %v8240_v63 }
 0x4ab   : > { %v14661_v25 = vadd.f32 %v15496_v40, %v15495_v5  ;;  %v15499_v55 = vld [vmem:[#allocation100_spill] sm:$0xff]  ;;  %v15500_v33 = vld [vmem:[#allocation102_spill] sm:$0xff]  ;;  %v15501_v34 = vld [vmem:[#allocation109_spill] sm:$0xff]  ;;  %v8251_v29 = vadd.f32 %v14440_v21, %v14445_v27  ;;  %v14716_v63 = vadd.f32 %v14291_v62, %v8248_v13  ;;  %v8256_v49 = vadd.f32 %v14449_v16, %v14458_v53 }
 0x4ac   : > { %v14672_v24 = vadd.f32 %v15500_v33, %v15499_v55  ;;  %v15502_v5 = vld [vmem:[#allocation111_spill] sm:$0xff]  ;;  %v15503_v54 = vld [vmem:[#allocation112_spill] sm:$0xff]  ;;  %v14689_v55 = vadd.f32 %v10439_v26, %v14333_v58  ;;  %v15505_v33 = vld [vmem:[#allocation114_spill] sm:$0xff]  ;;  %v14713_v26 = vpop.f32.mrf.mxu0  ;;  %v14731_v21 = vadd.f32 %v14277_v32, %v14264_v38  ;;  %v14735_v62 = vadd.f32 %v14307_v31, %v14293_v35 }
 0x4ad   : > { %v10548_v40 = vadd.f32 %v15502_v5, %v15501_v34  ;;  %v14684_v41 = vadd.f32 %v15504_v28, %v15503_v54  ;;  %v15506_v22 = vld [vmem:[#allocation115_spill] sm:$0xff]  ;;  %v14701_v34 = vadd.f32 %v14287_v6, %v8243_v17  ;;  %v15507_v5 = vld [vmem:[#allocation116_spill] sm:$0xff]  ;;  %v15508_v54 = vld [vmem:[#allocation117_spill] sm:$0xff]  ;;  %v8259_v17 = vadd.f32 %v14453_v50, %v14469_v14 }
 0x4ae   : > { %v14696_v44 = vadd.f32 %v15506_v22, %v15505_v33  ;;  %v14705_v28 = vadd.f32 %v15508_v54, %v15507_v5  ;;  %v15509_v9 = vld [vmem:[#allocation118_spill] sm:$0xff]  ;;  %v15510_v58 = vld [vmem:[#allocation119_spill] sm:$0xff]  ;;  %v15511_v23 = vld [vmem:[#allocation120_spill] sm:$0xff]  ;;  %v10655_v33 = vpop.f32.mrf.mxu1  ;;  %v14727_v22 = vadd.f32 %v14297_v51, %v8251_v29  ;;  %v14740_v27 = vadd.f32 %v14301_v4, %v8256_v49 }
 0x4af   : > { %v14709_v45 = vadd.f32 %v15510_v58, %v15509_v9  ;;  %v14720_v6 = vadd.f32 %v15511_v23, %v14252_v39  ;;  %v8264_v39 = vadd.f32 %v14473_v19, %v14476_v12  ;;  %v14743_v50 = vadd.f32 %v14305_v59, %v8259_v17  ;;  %v14760_v59 = vpop.f32.mrf.mxu0  ;;  %v15516_v14 = vld [vmem:[#allocation122_spill] sm:$0xff]  ;;  %v15517_v12 = vld [vmem:[#allocation131_spill] sm:$0xff]  ;;  %v15525_v58 = vld [vmem:[#allocation137_spill] sm:$0xff] }
 0x4b0   : > { %v14747_v51 = vadd.f32 %v14328_v47, %v14318_v11  ;;  %v8267_v38 = vadd.f32 %v14480_v36, %v14483_v48  ;;  %v10656_v32 = vpop.f32.mrf.mxu1  ;;  %v14756_v31 = vadd.f32 %v14345_v8, %v14339_v43  ;;  %v8272_v4 = vadd.f32 %v14487_v52, %v14504_v61  ;;  %15512 = vst [vmem:[#allocation49_spill] sm:$0xff] %v14760_v59  ;;  %v15514_v36 = vld [vmem:[#allocation4_spill] sm:$0xff]  ;;  %v15515_v43 = vld [vmem:[#allocation18_spill] sm:$0xff]  ;;  %v15520_v61 = vld [vmem:[#allocation135_spill] sm:$0xff] }
 0x4b1   : > { %v14752_v35 = vadd.f32 %v14311_v42, %v8264_v39  ;;  %v14762_v16 = vadd.f32 %v10656_v32, %v10655_v33  ;;  %v14769_v47 = vadd.f32 %v14351_v37, %v14347_v7  ;;  %v8275_v42 = vadd.f32 %v14491_v46, %v14507_v1  ;;  %v15518_v48 = vld [vmem:[#allocation132_spill] sm:$0xff]  ;;  %v15522_v37 = vld [vmem:[#allocation6_spill] sm:$0xff]  ;;  %v15523_v54 = vld [vmem:[#allocation123_spill] sm:$0xff] }
 0x4b2   : > { %v14765_v11 = vadd.f32 %v14316_v0, %v8267_v38  ;;  %v8280_v8 = vadd.f32 %v15515_v43, %v15514_v36  ;;  %v10658_v53 = vpop.f32.mrf.mxu1  ;;  %v14776_v19 = vadd.f32 %v15516_v14, %v8272_v4  ;;  %v14780_v52 = vadd.f32 %v15518_v48, %v15517_v12  ;;  %v15519_v0 = vld [vmem:[#allocation133_spill] sm:$0xff]  ;;  %v15521_v7 = vld [vmem:[#allocation20_spill] sm:$0xff]  ;;  %v15526_v29 = vld [vmem:[#allocation138_spill] sm:$0xff] }
 0x4b3   : > { %15513 = vst [vmem:[#allocation29_spill] sm:$0xff] %v14762_v16  ;;  %v14784_v13 = vadd.f32 %v15520_v61, %v15519_v0  ;;  %v8283_v5 = vadd.f32 %v15522_v37, %v15521_v7  ;;  %v14789_v46 = vadd.f32 %v15523_v54, %v8275_v42  ;;  %v15524_v1 = vld [vmem:[#allocation124_spill] sm:$0xff]  ;;  %v14796_v23 = vadd.f32 %v15526_v29, %v15525_v58  ;;  %v15528_v17 = vld [vmem:[#allocation5_spill] sm:$0xff]  ;;  %v15531_v36 = vld [vmem:[#allocation23_spill] sm:$0xff]  ;;  %v14805_v42 = vpop.f32.mrf.mxu0 }
 0x4b4   : > { %v14792_v9 = vadd.f32 %v15524_v1, %v8280_v8  ;;  %v15527_v49 = vld [vmem:[#allocation8_spill] sm:$0xff]  ;;  %v10659_v39 = vpop.f32.mrf.mxu1  ;;  %v15529_v38 = vld [vmem:[#allocation125_spill] sm:$0xff]  ;;  %15532 = vst [vmem:[#allocation31_spill] sm:$0xff] %v14805_v42  ;;  %v8355_v14 = vadd.f32 %v10548_v40, %v8194_v60  ;;  %v15534_v48 = vld [vmem:[#allocation142_spill] sm:$0xff] }
 0x4b5   : > { %v8288_v33 = vadd.f32 %v15528_v17, %v15527_v49  ;;  %v14801_v32 = vadd.f32 %v15529_v38, %v8283_v5  ;;  %v15530_v4 = vld [vmem:[#allocation9_spill] sm:$0xff]  ;;  %v10660_v8 = vadd.f32 %v10659_v39, %v10658_v53  ;;  %v15533_v12 = vld [vmem:[#allocation140_spill] sm:$0xff]  ;;  %v15535_v61 = vld [vmem:[#allocation11_spill] sm:$0xff] }
 0x4b6   : > { %v8291_v43 = vadd.f32 %v15531_v36, %v15530_v4  ;;  %v14809_v0 = vadd.f32 %v15534_v48, %v15533_v12  ;;  %v15536_v7 = vld [vmem:[#allocation7_spill] sm:$0xff]  ;;  %v15537_v54 = vld [vmem:[#allocation30_spill] sm:$0xff]  ;;  %v15538_v1 = vld [vmem:[#allocation25_spill] sm:$0xff] }
 0x4b7   : > { %v14813_v37 = vadd.f32 %v15536_v7, %v15535_v61  ;;  %v14817_v5 = vadd.f32 %v15538_v1, %v15537_v54  ;;  %v15539_v58 = vld [vmem:[#allocation32_spill] sm:$0xff]  ;;  %v15540_v29 = vld [vmem:[#allocation26_spill] sm:$0xff]  ;;  %v15541_v17 = vld [vmem:[#allocation15_spill] sm:$0xff]  ;;  %v14835_v48 = vadd.f32 %v10660_v8, %v8355_v14  ;;  %v10661_v14 = vpop.f32.mrf.mxu1 }
 0x4b8   : > { %v14821_v49 = vadd.f32 %v15540_v29, %v15539_v58  ;;  %v15542_v60 = vld [vmem:[#allocation34_spill] sm:$0xff]  ;;  %v15543_v53 = vld [vmem:[#allocation19_spill] sm:$0xff]  ;;  %v15544_v39 = vld [vmem:[#allocation13_spill] sm:$0xff]  ;;  %v14844_v58 = vadd.f32 %v14618_v2, %v14629_v3  ;;  %v14866_v3 = vadd.f32 %v14654_v15, %v14657_v30  ;;  %v8570_v30 = vadd.f32 %v14705_v28, %v14716_v63 }
 0x4b9   : > { %v14825_v40 = vadd.f32 %v15542_v60, %v15541_v17  ;;  %v14829_v38 = vadd.f32 %v15544_v39, %v15543_v53  ;;  %v15545_v4 = vld [vmem:[#allocation22_spill] sm:$0xff]  ;;  %v15546_v36 = vld [vmem:[#allocation17_spill] sm:$0xff]  ;;  %15547 = vst [vmem:[#allocation33_spill] sm:$0xff] %v14835_v48  ;;  %v9949_v61 = vld [vmem:[%s11598_s11 + $0x24] sm:$0xff]  }
 0x4ba   : > { %v14833_v12 = vadd.f32 %v15546_v36, %v15545_v4  ;;  %v15548_v7 = vld [vmem:[#allocation24_spill] sm:$0xff]  ;;  %v15549_v54 = vld [vmem:[#allocation21_spill] sm:$0xff]  ;;  %15550 = vst [vmem:[#allocation35_spill] sm:$0xff] %v14844_v58  ;;  %v15552_v17 = vld [vmem:[#allocation38_spill] sm:$0xff]  ;;  %v7417_v48 = vunpack.c.h.bf16 %v9949_v61 }
 0x4bb   : > { %v14840_v1 = vadd.f32 %v15549_v54, %v15548_v7  ;;  %v15551_v29 = vld [vmem:[#allocation40_spill] sm:$0xff]  ;;  %v15553_v53 = vld [vmem:[#allocation41_spill] sm:$0xff]  ;;  %v10282_v8 = vld [vmem:[%s11598_s11 + $0x18] sm:$0xff]   ;;  %v14858_v7 = vpop.f32.mrf.mxu0  ;;  %15558 = vst [vmem:[#allocation50_spill] sm:$0xff] %v14866_v3 }
 0x4bc   : > { %v14848_v60 = vadd.f32 %v15552_v17, %v15551_v29  ;;  %v14852_v39 = vadd.f32 %v15553_v53, %v14641_v18  ;;  %v15555_v4 = vld [vmem:[#allocation126_spill] sm:$0xff]  ;;  %v15556_v54 = vld [vmem:[#allocation43_spill] sm:$0xff]  ;;  %v14870_v18 = vadd.f32 %v14661_v25, %v14668_v56  ;;  %v9951_v29 = vld [vmem:[%s11598_s11 + $0x2c] sm:$0x1]  ;;  %v10172_v25 = vunpack.c.l.bf16 %v10282_v8 }
 0x4bd   : > { %v14856_v36 = vadd.f32 %v15555_v4, %v8288_v33  ;;  %v14862_v2 = vadd.f32 %v15556_v54, %v14648_v20  ;;  %v9948_v17 = vld [vmem:[%s11598_s11 + $0x20] sm:$0x1]  ;;  %v14876_v33 = vadd.f32 %v14672_v24, %v14675_v10  ;;  %v15561_v53 = vld [vmem:[#allocation121_spill] sm:$0xff]  ;;  %v10662_v20 = vpop.f32.mrf.mxu1  ;;  %v7416_v54 = vunpack.c.l.bf16 %v9949_v61 }
 0x4be   : > { %15554 = vst [vmem:[#allocation37_spill] sm:$0xff] %v14852_v39  ;;  %15559 = vst [vmem:[#allocation52_spill] sm:$0xff] %v14870_v18  ;;  %v8360_v4 = vadd.f32 %v15561_v53, %v14689_v55  ;;  %v9955_v16 = vld [vmem:[%s11598_s11 + $0x3c] sm:$0xff]   ;;  %v10663_v15 = vadd.f32 %v10662_v20, %v10661_v14  ;;  %v10173_v56 = vunpack.c.h.bf16 %v10282_v8  ;;  %v10283_v3 = vld [vmem:[%s11598_s11 + $0x30] sm:$0xff]   ;;  %v8562_v24 = vadd.f32 %v14684_v41, %v14692_v57  ;;  %v14892_v14 = vpop.f32.mrf.mxu0 }
 0x4bf   : > { %15557 = vst [vmem:[#allocation39_spill] sm:$0xff] %v14862_v2  ;;  %15560 = vst [vmem:[#allocation54_spill] sm:$0xff] %v14876_v33  ;;  %v10664_v2 = vpop.f32.mrf.mxu1  ;;  %v7418_v10 = vunpack.c.l.bf16 %v9951_v29  ;;  %v8573_v33 = vadd.f32 %v14709_v45, %v14727_v22  ;;  %v7415_v55 = vunpack.c.l.bf16 %v9948_v17  ;;  %v9957_v53 = vld [vmem:[%s11598_s11 + $0x44] sm:$0x1]  ;;  %v15562_v18 = vld [vmem:[#allocation128_spill] sm:$0xff]  ;;  %v7422_v28 = vunpack.c.l.bf16 %v9955_v16 }
 0x4c0   : > { %v14890_v61 = vadd.f32 %v15562_v18, %v8291_v43  ;;  %v14894_v20 = vadd.f32 %v10663_v15, %v8360_v4  ;;  %v7423_v63 = vunpack.c.h.bf16 %v9955_v16  ;;  %v8903_v58 = vrot.slane %v7416_v54, 1  ;;  %v15564_v22 = vld [vmem:[#allocation143_spill] sm:$0xff]  ;;  %v15565_v17 = vld [vmem:[#allocation144_spill] sm:$0xff]  ;;  %v14902_v15 = vpop.f32.mrf.mxu0 }
 0x4c1   : > { %v10665_v8 = vpop.f32.mrf.mxu1  ;;  %v8904_v39 = vrot.slane %v7417_v48, 1  ;;  %v10176_v42 = vunpack.c.l.bf16 %v10283_v3  ;;  %v10177_v41 = vunpack.c.h.bf16 %v10283_v3  ;;  %v8898_v29 = vrot.slane %v10172_v25, 1  ;;  %v15566_v48 = vld [vmem:[#allocation127_spill] sm:$0xff] }
 0x4c2   : > { %15563 = vst [vmem:[#allocation55_spill] sm:$0xff] %v14894_v20  ;;  %v10666_v57 = vadd.f32 %v10665_v8, %v10664_v2  ;;  %v8899_v59 = vrot.slane %v10173_v56, 1  ;;  %v7424_v45 = vunpack.c.l.bf16 %v9957_v53  ;;  %v14898_v43 = vadd.f32 %v15565_v17, %v15564_v22  ;;  %v9961_v8 = vld [vmem:[%s11598_s11 + $0x54] sm:$0xff]  }
 0x4c3   : > { %v8906_v18 = vrot.slane %v7418_v10, 1  ;;  %v8565_v4 = vadd.f32 %v14696_v44, %v14701_v34  ;;  %v8901_v16 = vrot.slane %v7415_v55, 1  ;;  %v10873_v2 = vpop.f32.mrf.mxu1  ;;  %v8586_v3 = vadd.f32 %v14735_v62, %v14752_v35  ;;  %v9954_v55 = vld [vmem:[%s11598_s11 + $0x38] sm:$0x1] }
 0x4c4   : > { %v14905_v54 = vadd.f32 %v10666_v57, %v15566_v48  ;;  %v8913_v25 = vrot.slane %v7422_v28, 1  ;;  %v8914_v56 = vrot.slane %v7423_v63, 1  ;;  %v8731_v53 = vadd.f32 %v10873_v2, %v8570_v30  ;;  %v15568_v22 = vld [vmem:[#allocation146_spill] sm:$0xff]  ;;  %v15569_v57 = vld [vmem:[#allocation148_spill] sm:$0xff]  ;;  %v15570_v2 = vld [vmem:[#allocation129_spill] sm:$0xff] }
 0x4c5   : > { %v14911_v10 = vadd.f32 %v14720_v6, %v14740_v27  ;;  %v8908_v44 = vrot.slane %v10176_v42, 1  ;;  %v8909_v34 = vrot.slane %v10177_v41, 1  ;;  %v14917_v17 = vadd.f32 %v15569_v57, %v15568_v22  ;;  %v8722_v62 = vpop.f32.mrf.mxu1  ;;  %v10284_v42 = vld [vmem:[%s11598_s11 + $0x48] sm:$0xff]   ;;  %v9963_v41 = vld [vmem:[%s11598_s11 + $0x5c] sm:$0x1] }
 0x4c6   : > { %15567 = vst [vmem:[#allocation42_spill] sm:$0xff] %v14905_v54  ;;  %v8905_v48 = vsel %vm1048_vm1, %v8903_v58, %v8904_v39  ;;  %v8900_v35 = vsel %vm1048_vm1, %v8898_v29, %v8899_v59  ;;  %v8916_v28 = vrot.slane %v7424_v45, 1  ;;  %v8723_v30 = vadd.f32 %v8722_v62, %v8562_v24  ;;  %v14933_v58 = vpop.f32.mrf.mxu0 }
 0x4c7   : > { %v8907_v63 = vsel %vm1048_vm1, %v8904_v39, %v8906_v18  ;;  %v8902_v6 = vsel %vm1048_vm1, %v8899_v59, %v8901_v16  ;;  %v14925_v27 = vadd.f32 %v14747_v51, %v14765_v11  ;;  %v14931_v22 = vadd.f32 %v15570_v2, %v14813_v37  ;;  %15571 = vst [vmem:[#allocation44_spill] sm:$0xff] %v14933_v58  ;;  %v10874_v29 = vpop.f32.mrf.mxu1 }
 0x4c8   : > { %v8915_v24 = vsel %vm1048_vm1, %v8913_v25, %v8914_v56  ;;  %v7421_v45 = vunpack.c.l.bf16 %v9954_v55  ;;  %v7428_v39 = vunpack.c.l.bf16 %v9961_v8  ;;  %v9012_v18 = vadd.f32 %v8905_v48, %v8731_v53  ;;  %v15572_v53 = vld [vmem:[#allocation130_spill] sm:$0xff]  ;;  %v15573_v55 = vld [vmem:[#allocation149_spill] sm:$0xff]  ;;  %v14947_v48 = vpop.f32.mrf.mxu0 }
 0x4c9   : > { %v8734_v59 = vadd.f32 %v10874_v29, %v8573_v33  ;;  %v8910_v16 = vsel %vm1048_vm1, %v8908_v44, %v8909_v34  ;;  %v7429_v51 = vunpack.c.h.bf16 %v9961_v8  ;;  %v8725_v11 = vpop.f32.mrf.mxu1  ;;  %v8917_v57 = vsel %vm1048_vm1, %v8914_v56, %v8916_v28  ;;  %v15574_v44 = vld [vmem:[#allocation151_spill] sm:$0xff] }
 0x4ca   : > { %v10180_v62 = vunpack.c.l.bf16 %v10284_v42  ;;  %v10181_v54 = vunpack.c.h.bf16 %v10284_v42  ;;  %v7430_v37 = vunpack.c.l.bf16 %v9963_v41  ;;  %v9010_v2 = vadd.f32 %v8900_v35, %v8723_v30 }
 0x4cb   : > { %v9013_v20 = vadd.f32 %v8907_v63, %v8734_v59  ;;  %v8726_v58 = vadd.f32 %v8725_v11, %v8565_v4  ;;  %v8581_v25 = vadd.f32 %v14731_v21, %v14743_v50  ;;  %v8460_v33 = vadd.f32 %v15572_v53, %v14817_v5  ;;  %v9960_v4 = vld [vmem:[%s11598_s11 + $0x50] sm:$0x1]  ;;  %v10877_v21 = vpop.f32.mrf.mxu1 }
 0x4cc   : > { %v14945_v8 = vadd.f32 %v15574_v44, %v15573_v55  ;;  %v8911_v56 = vrot.slane %v7421_v45, 1  ;;  %v8923_v28 = vrot.slane %v7428_v39, 1  ;;  %v9044_v42 = vmax.f32 %v9012_v18, 0.0  ;;  %v14958_v18 = vpop.f32.mrf.mxu0  ;;  %v15575_v11 = vld [vmem:[#allocation153_spill] sm:$0xff]  ;;  %v10285_v55 = vld [vmem:[%s11598_s11 + $0x60] sm:$0xff]  }
 0x4cd   : > { %v9045_v35 = vmax.f32 %v9013_v20, 0.0  ;;  %v9011_v30 = vadd.f32 %v8902_v6, %v8726_v58  ;;  %v8924_v63 = vrot.slane %v7429_v51, 1  ;;  %v8602_v50 = vadd.f32 %v14780_v52, %v14792_v9  ;;  %v9967_v58 = vld [vmem:[%s11598_s11 + $0x6c] sm:$0xff]   ;;  %v8738_v59 = vpop.f32.mrf.mxu1 }
 0x4ce   : > { %v8918_v5 = vrot.slane %v10180_v62, 1  ;;  %v8919_v41 = vrot.slane %v10181_v54, 1  ;;  %v8926_v29 = vrot.slane %v7430_v37, 1  ;;  %v9042_v45 = vmax.f32 %v9010_v2, 0.0  ;;  %v15576_v62 = vld [vmem:[#allocation10_spill] sm:$0xff] }
 0x4cf   : > { %v10210_v39 = vpack.c.bf16 %v9045_v35, %v9044_v42  ;;  %v9043_v20 = vmax.f32 %v9011_v30, 0.0  ;;  %v8747_v6 = vadd.f32 %v10877_v21, %v8586_v3  ;;  %v8912_v51 = vsel %vm1048_vm1, %v8909_v34, %v8911_v56  ;;  %v9969_v34 = vld [vmem:[%s11598_s11 + $0x74] sm:$0x1]  ;;  %v10878_v44 = vpop.f32.mrf.mxu1 }
 0x4d0   : > { %v8594_v52 = vadd.f32 %v14756_v31, %v14776_v19  ;;  %v8605_v9 = vadd.f32 %v14784_v13, %v14801_v32  ;;  %v7427_v54 = vunpack.c.l.bf16 %v9960_v4  ;;  %v14967_v37 = vadd.f32 %v15576_v62, %v15575_v11  ;;  %v9973_v62 = vld [vmem:[%s11598_s11 + $0x84] sm:$0xff]  }
 0x4d1   : > { %10290 = vst [vmem:[%s14953_s22 + $0x8] sm:$0xff] %v10210_v39   ;;  %v10205_v3 = vpack.c.bf16 %v9043_v20, %v9042_v45  ;;  %v8739_v2 = vadd.f32 %v8738_v59, %v14911_v10  ;;  %v8925_v53 = vsel %vm1048_vm1, %v8923_v28, %v8924_v63  ;;  %v8920_v56 = vsel %vm1048_vm1, %v8918_v5, %v8919_v41  ;;  %v14984_v28 = vpop.f32.mrf.mxu0  ;;  %v8741_v30 = vpop.f32.mrf.mxu1 }
 0x4d2   : > { %v8927_v31 = vsel %vm1048_vm1, %v8924_v63, %v8926_v29  ;;  %v7434_v19 = vunpack.c.l.bf16 %v9967_v58  ;;  %v7435_v13 = vunpack.c.h.bf16 %v9967_v58  ;;  %v9016_v32 = vadd.f32 %v8915_v24, %v8747_v6  ;;  %v9966_v58 = vld [vmem:[%s11598_s11 + $0x68] sm:$0x1] }
 0x4d3   : > { %10206 = vst [vmem:[%s14953_s22] sm:$0xff] %v10205_v3   ;;  %v8750_v42 = vadd.f32 %v10878_v44, %v14925_v27  ;;  %v8597_v35 = vadd.f32 %v14769_v47, %v14789_v46  ;;  %v14982_v10 = vadd.f32 %v14898_v43, %v14931_v22  ;;  %v8921_v4 = vrot.slane %v7427_v54, 1  ;;  %v15577_v47 = vld [vmem:[#allocation134_spill] sm:$0xff]  ;;  %v10881_v43 = vpop.f32.mrf.mxu1  ;;  %v14998_v59 = vpop.f32.mrf.mxu0  ;;  %v15580_v44 = vld [vmem:[#allocation3_spill] sm:$0xff] }
 0x4d4   : > { %v10184_v21 = vunpack.c.l.bf16 %v10285_v55  ;;  %v10185_v63 = vunpack.c.h.bf16 %v10285_v55  ;;  %v7436_v5 = vunpack.c.l.bf16 %v9969_v34  ;;  %v9014_v29 = vadd.f32 %v8910_v16, %v8739_v2  ;;  %v10286_v55 = vld [vmem:[%s11598_s11 + $0x78] sm:$0xff]  }
 0x4d5   : > { %v9017_v45 = vadd.f32 %v8917_v57, %v8750_v42  ;;  %v8742_v24 = vadd.f32 %v8741_v30, %v8581_v25  ;;  %v14988_v27 = vadd.f32 %v14796_v23, %v14856_v36  ;;  %v14992_v46 = vadd.f32 %v15577_v47, %v14821_v49  ;;  %v8754_v23 = vpop.f32.mrf.mxu1  ;;  %v15579_v34 = vld [vmem:[#allocation14_spill] sm:$0xff]  ;;  %v9975_v42 = vld [vmem:[%s11598_s11 + $0x8c] sm:$0x1] }
 0x4d6   : > { %v8933_v22 = vrot.slane %v7434_v19, 1  ;;  %v8934_v39 = vrot.slane %v7435_v13, 1  ;;  %v14995_v20 = vadd.f32 %v14917_v17, %v8460_v33  ;;  %v9048_v6 = vmax.f32 %v9016_v32, 0.0 }
 0x4d7   : > { %v9049_v16 = vmax.f32 %v9017_v45, 0.0  ;;  %v9015_v57 = vadd.f32 %v8912_v51, %v8742_v24  ;;  %v8763_v25 = vadd.f32 %v10881_v43, %v8602_v50  ;;  %v8922_v49 = vsel %vm1048_vm1, %v8919_v41, %v8921_v4  ;;  %v15578_v51 = vld [vmem:[#allocation136_spill] sm:$0xff]  ;;  %v10882_v41 = vpop.f32.mrf.mxu1 }
 0x4d8   : > { %v8928_v36 = vrot.slane %v10184_v21, 1  ;;  %v8929_v54 = vrot.slane %v10185_v63, 1  ;;  %v8936_v11 = vrot.slane %v7436_v5, 1  ;;  %v9046_v3 = vmax.f32 %v9014_v29, 0.0  ;;  %v15014_v63 = vpop.f32.mrf.mxu0 }
 0x4d9   : > { %v10220_v17 = vpack.c.bf16 %v9049_v16, %v9048_v6  ;;  %v9047_v33 = vmax.f32 %v9015_v57, 0.0  ;;  %v8755_v2 = vadd.f32 %v8754_v23, %v8594_v52  ;;  %v15005_v50 = vadd.f32 %v15578_v51, %v14825_v40  ;;  %v8757_v5 = vpop.f32.mrf.mxu1  ;;  %v15581_v16 = vld [vmem:[#allocation28_spill] sm:$0xff]  ;;  %v15582_v57 = vld [vmem:[#allocation27_spill] sm:$0xff] }
 0x4da   : > { %v15009_v19 = vadd.f32 %v15580_v44, %v15579_v34  ;;  %v8935_v13 = vsel %vm1048_vm1, %v8933_v22, %v8934_v39  ;;  %v7433_v32 = vunpack.c.l.bf16 %v9966_v58  ;;  %v9020_v4 = vadd.f32 %v8925_v53, %v8763_v25 }
 0x4db   : > { %10292 = vst [vmem:[%s14953_s22 + $0x18] sm:$0xff] %v10220_v17   ;;  %v10215_v30 = vpack.c.bf16 %v9047_v33, %v9046_v3  ;;  %v8766_v21 = vadd.f32 %v10882_v41, %v8605_v9  ;;  %v7440_v52 = vunpack.c.l.bf16 %v9973_v62  ;;  %v8930_v40 = vsel %vm1048_vm1, %v8928_v36, %v8929_v54  ;;  %v10885_v3 = vpop.f32.mrf.mxu1 }
 0x4dc   : > { %v7441_v29 = vunpack.c.h.bf16 %v9973_v62  ;;  %v10188_v45 = vunpack.c.l.bf16 %v10286_v55  ;;  %v10189_v24 = vunpack.c.h.bf16 %v10286_v55  ;;  %v9018_v47 = vadd.f32 %v8920_v56, %v8755_v2  ;;  %v15023_v56 = vpop.f32.mrf.mxu0  ;;  %v9972_v55 = vld [vmem:[%s11598_s11 + $0x80] sm:$0x1] }
 0x4dd   : > { %10291 = vst [vmem:[%s14953_s22 + $0x10] sm:$0xff] %v10215_v30   ;;  %v9021_v43 = vadd.f32 %v8927_v31, %v8766_v21  ;;  %v8758_v6 = vadd.f32 %v8757_v5, %v8597_v35  ;;  %v7442_v22 = vunpack.c.l.bf16 %v9975_v42  ;;  %v10742_v53 = vadd.f32 %v15582_v57, %v15581_v16  ;;  %v10287_v42 = vld [vmem:[%s11598_s11 + $0x90] sm:$0xff]  }
 0x4de   : > { %v8937_v9 = vsel %vm1048_vm1, %v8934_v39, %v8936_v11  ;;  %v8613_v25 = vadd.f32 %v14809_v0, %v14890_v61  ;;  %v8931_v58 = vrot.slane %v7433_v32, 1  ;;  %v9052_v23 = vmax.f32 %v9020_v4, 0.0  ;;  %v9979_v39 = vld [vmem:[%s11598_s11 + $0x9c] sm:$0xff]   ;;  %v8770_v61 = vpop.f32.mrf.mxu1 }
 0x4df   : > { %v9053_v36 = vmax.f32 %v9021_v43, 0.0  ;;  %v9019_v62 = vadd.f32 %v8922_v49, %v8758_v6  ;;  %v8943_v17 = vrot.slane %v7440_v52, 1  ;;  %v8779_v31 = vadd.f32 %v10885_v3, %v14982_v10  ;;  %v15583_v49 = vld [vmem:[#allocation139_spill] sm:$0xff] }
 0x4e0   : > { %v8944_v35 = vrot.slane %v7441_v29, 1  ;;  %v8938_v33 = vrot.slane %v10188_v45, 1  ;;  %v8939_v2 = vrot.slane %v10189_v24, 1  ;;  %v9050_v11 = vmax.f32 %v9018_v47, 0.0  ;;  %v10886_v4 = vpop.f32.mrf.mxu1  ;;  %v15036_v29 = vpop.f32.mrf.mxu0  ;;  %v15584_v24 = vld [vmem:[#allocation141_spill] sm:$0xff] }
 0x4e1   : > { %v10230_v51 = vpack.c.bf16 %v9053_v36, %v9052_v23  ;;  %v9051_v0 = vmax.f32 %v9019_v62, 0.0  ;;  %v8946_v34 = vrot.slane %v7442_v22, 1  ;;  %v8473_v44 = vadd.f32 %v15583_v49, %v14829_v38 }
 0x4e2   : > { %v8771_v41 = vadd.f32 %v8770_v61, %v14988_v27  ;;  %v8932_v32 = vsel %vm1048_vm1, %v8929_v54, %v8931_v58  ;;  %v8626_v10 = vadd.f32 %v14945_v8, %v14992_v46  ;;  %v7439_v21 = vunpack.c.l.bf16 %v9972_v55  ;;  %v8773_v46 = vpop.f32.mrf.mxu1  ;;  %v15049_v3 = vpop.f32.mrf.mxu0  ;;  %v9978_v55 = vld [vmem:[%s11598_s11 + $0x98] sm:$0x1] }
 0x4e3   : > { %10294 = vst [vmem:[%s14953_s22 + $0x28] sm:$0xff] %v10230_v51   ;;  %v10225_v30 = vpack.c.bf16 %v9051_v0, %v9050_v11  ;;  %v7446_v52 = vunpack.c.l.bf16 %v9979_v39  ;;  %v7447_v5 = vunpack.c.h.bf16 %v9979_v39  ;;  %v9024_v45 = vadd.f32 %v8935_v13, %v8779_v31  ;;  %v15585_v0 = vld [vmem:[#allocation45_spill] sm:$0xff] }
 0x4e4   : > { %v8782_v38 = vadd.f32 %v10886_v4, %v14995_v20  ;;  %v8945_v27 = vsel %vm1048_vm1, %v8943_v17, %v8944_v35  ;;  %v8940_v54 = vsel %vm1048_vm1, %v8938_v33, %v8939_v2  ;;  %v8476_v8 = vadd.f32 %v15584_v24, %v14833_v12  ;;  %v9981_v20 = vld [vmem:[%s11598_s11 + $0xa4] sm:$0x1]  ;;  %v10889_v58 = vpop.f32.mrf.mxu1 }
 0x4e5   : > { %10293 = vst [vmem:[%s14953_s22 + $0x20] sm:$0xff] %v10225_v30   ;;  %v8947_v47 = vsel %vm1048_vm1, %v8944_v35, %v8946_v34  ;;  %v10192_v43 = vunpack.c.l.bf16 %v10287_v42  ;;  %v10193_v6 = vunpack.c.h.bf16 %v10287_v42  ;;  %v9022_v22 = vadd.f32 %v8930_v40, %v8771_v41  ;;  %v15586_v34 = vld [vmem:[#allocation150_spill] sm:$0xff]  ;;  %v15589_v24 = vld [vmem:[#allocation31_spill] sm:$0xff] }
 0x4e6   : > { %v9025_v16 = vadd.f32 %v8937_v9, %v8782_v38  ;;  %v8774_v57 = vadd.f32 %v8773_v46, %v8613_v25  ;;  %v8634_v13 = vadd.f32 %v15009_v19, %v8473_v44  ;;  %v8629_v23 = vadd.f32 %v14967_v37, %v15005_v50  ;;  %v8786_v40 = vpop.f32.mrf.mxu1  ;;  %v15588_v38 = vld [vmem:[#allocation49_spill] sm:$0xff] }
 0x4e7   : > { %v8941_v36 = vrot.slane %v7439_v21, 1  ;;  %v8953_v62 = vrot.slane %v7446_v52, 1  ;;  %v8954_v12 = vrot.slane %v7447_v5, 1  ;;  %v9056_v17 = vmax.f32 %v9024_v45, 0.0  ;;  %v9985_v21 = vld [vmem:[%s11598_s11 + $0xb4] sm:$0xff]  }
 0x4e8   : > { %v9057_v31 = vmax.f32 %v9025_v16, 0.0  ;;  %v9023_v35 = vadd.f32 %v8932_v32, %v8774_v57  ;;  %v8795_v33 = vadd.f32 %v10889_v58, %v8634_v13  ;;  %v8637_v9 = vadd.f32 %v10742_v53, %v8476_v8  ;;  %v10890_v44 = vpop.f32.mrf.mxu1  ;;  %v15057_v53 = vpop.f32.mrf.mxu0  ;;  %v15590_v13 = vld [vmem:[#allocation37_spill] sm:$0xff] }
 0x4e9   : > { %v8948_v25 = vrot.slane %v10192_v43, 1  ;;  %v8949_v19 = vrot.slane %v10193_v6, 1  ;;  %v7448_v39 = vunpack.c.l.bf16 %v9981_v20  ;;  %v9054_v11 = vmax.f32 %v9022_v22, 0.0  ;;  %v10288_v6 = vld [vmem:[%s11598_s11 + $0xa8] sm:$0xff]  }
 0x4ea   : > { %v10240_v51 = vpack.c.bf16 %v9057_v31, %v9056_v17  ;;  %v9055_v37 = vmax.f32 %v9023_v35, 0.0  ;;  %v8787_v50 = vadd.f32 %v8786_v40, %v8626_v10  ;;  %v10745_v61 = vadd.f32 %v14713_v26, %v15585_v0  ;;  %v15587_v26 = vld [vmem:[#allocation145_spill] sm:$0xff]  ;;  %v8789_v5 = vpop.f32.mrf.mxu1  ;;  %v15591_v20 = vld [vmem:[#allocation152_spill] sm:$0xff]  ;;  %v9987_v17 = vld [vmem:[%s11598_s11 + $0xbc] sm:$0x1] }
 0x4eb   : > { %v8489_v49 = vadd.f32 %v15586_v34, %v14848_v60  ;;  %v8942_v41 = vsel %vm1048_vm1, %v8939_v2, %v8941_v36  ;;  %v7445_v32 = vunpack.c.l.bf16 %v9978_v55  ;;  %v9028_v30 = vadd.f32 %v8945_v27, %v8795_v33  ;;  %v15592_v31 = vld [vmem:[#allocation35_spill] sm:$0xff] }
 0x4ec   : > { %10296 = vst [vmem:[%s14953_s22 + $0x38] sm:$0xff] %v10240_v51   ;;  %v10235_v42 = vpack.c.bf16 %v9055_v37, %v9054_v11  ;;  %v8798_v4 = vadd.f32 %v10890_v44, %v8637_v9  ;;  %v8955_v10 = vsel %vm1048_vm1, %v8953_v62, %v8954_v12  ;;  %v8481_v52 = vadd.f32 %v15587_v26, %v14840_v1  ;;  %v15593_v35 = vld [vmem:[#allocation147_spill] sm:$0xff]  ;;  %v15596_v44 = vld [vmem:[#allocation36_spill] sm:$0xff] }
 0x4ed   : > { %v10751_v60 = vadd.f32 %v14892_v14, %v14858_v7  ;;  %v8950_v2 = vsel %vm1048_vm1, %v8948_v25, %v8949_v19  ;;  %v8956_v45 = vrot.slane %v7448_v39, 1  ;;  %v10748_v8 = vadd.f32 %v15589_v24, %v15588_v38  ;;  %v15073_v14 = vpop.f32.mrf.mxu0 }
 0x4ee   : > { %10295 = vst [vmem:[%s14953_s22 + $0x30] sm:$0xff] %v10235_v42   ;;  %v9026_v27 = vadd.f32 %v8940_v54, %v8787_v50  ;;  %v9029_v46 = vadd.f32 %v8947_v47, %v8798_v4  ;;  %v8790_v43 = vadd.f32 %v8789_v5, %v8629_v23  ;;  %v8951_v16 = vrot.slane %v7445_v32, 1  ;;  %v15594_v54 = vld [vmem:[#allocation44_spill] sm:$0xff]  ;;  %v10893_v23 = vpop.f32.mrf.mxu1  ;;  %v15597_v4 = vld [vmem:[#allocation39_spill] sm:$0xff] }
 0x4ef   : > { %v8650_v22 = vadd.f32 %v10751_v60, %v8489_v49  ;;  %v7452_v57 = vunpack.c.l.bf16 %v9985_v21  ;;  %v7453_v1 = vunpack.c.h.bf16 %v9985_v21  ;;  %v8492_v7 = vadd.f32 %v15591_v20, %v15590_v13  ;;  %v15595_v49 = vld [vmem:[#allocation52_spill] sm:$0xff] }
 0x4f0   : > { %v9060_v58 = vmax.f32 %v9028_v30, 0.0  ;;  %v9061_v36 = vmax.f32 %v9029_v46, 0.0  ;;  %v9027_v62 = vadd.f32 %v8942_v41, %v8790_v43  ;;  %v8484_v33 = vadd.f32 %v15593_v35, %v15592_v31  ;;  %v8802_v51 = vpop.f32.mrf.mxu1  ;;  %v9984_v30 = vld [vmem:[%s11598_s11 + $0xb0] sm:$0x1]  ;;  %v15598_v21 = vld [vmem:[#allocation12_spill] sm:$0xff]  ;;  %v15599_v46 = vld [vmem:[#allocation54_spill] sm:$0xff] }
 0x4f1   : > { %v10754_v47 = vadd.f32 %v15594_v54, %v14902_v15  ;;  %v8642_v55 = vadd.f32 %v10745_v61, %v8481_v52  ;;  %v10196_v40 = vunpack.c.l.bf16 %v10288_v6  ;;  %v9058_v9 = vmax.f32 %v9026_v27, 0.0  ;;  %v15084_v15 = vpop.f32.mrf.mxu0  ;;  %v15600_v43 = vld [vmem:[#allocation47_spill] sm:$0xff] }
 0x4f2   : > { %v10250_v25 = vpack.c.bf16 %v9061_v36, %v9060_v58  ;;  %v9059_v39 = vmax.f32 %v9027_v62, 0.0  ;;  %v8811_v11 = vadd.f32 %v10893_v23, %v8650_v22  ;;  %v8957_v37 = vsel %vm1048_vm1, %v8954_v12, %v8956_v45  ;;  %v10894_v52 = vpop.f32.mrf.mxu1 }
 0x4f3   : > { %v8952_v50 = vsel %vm1048_vm1, %v8949_v19, %v8951_v16  ;;  %v10197_v0 = vunpack.c.h.bf16 %v10288_v6  ;;  %v7454_v34 = vunpack.c.l.bf16 %v9987_v17  ;;  %v8505_v41 = vadd.f32 %v15596_v44, %v15595_v49  ;;  %v15097_v20 = vpop.f32.mrf.mxu0 }
 0x4f4   : > { %10298 = vst [vmem:[%s14953_s22 + $0x48] sm:$0xff] %v10250_v25   ;;  %v10245_v61 = vpack.c.bf16 %v9059_v39, %v9058_v9  ;;  %v8803_v32 = vadd.f32 %v8802_v51, %v8642_v55  ;;  %v8653_v42 = vadd.f32 %v10754_v47, %v8492_v7  ;;  %v8497_v26 = vadd.f32 %v15598_v21, %v15597_v4  ;;  %v8805_v22 = vpop.f32.mrf.mxu1  ;;  %v15603_v25 = vld [vmem:[#allocation101_spill] sm:$0xff]  ;;  %v15604_v39 = vld [vmem:[#allocation103_spill] sm:$0xff] }
 0x4f5   : > { %v8963_v12 = vrot.slane %v7452_v57, 1  ;;  %v8964_v60 = vrot.slane %v7453_v1, 1  ;;  %v8958_v19 = vrot.slane %v10196_v40, 1  ;;  %v10763_v5 = vadd.f32 %v15023_v56, %v15014_v63  ;;  %v15601_v63 = vld [vmem:[#allocation50_spill] sm:$0xff]  ;;  %v15602_v56 = vld [vmem:[#allocation16_spill] sm:$0xff]  ;;  %v10773_v62 = vpop.f32.mrf.mxu0 }
 0x4f6   : > { %10297 = vst [vmem:[%s14953_s22 + $0x40] sm:$0xff] %v10245_v61   ;;  %v9032_v45 = vadd.f32 %v8955_v10, %v8811_v11  ;;  %v8814_v38 = vadd.f32 %v10894_v52, %v8653_v42  ;;  %v8645_v24 = vadd.f32 %v10748_v8, %v8484_v33  ;;  %v10757_v27 = vadd.f32 %v14958_v18, %v14947_v48  ;;  %v10897_v36 = vpop.f32.mrf.mxu1  ;;  %v11450_v4 = vld [vmem:[%s15151_s4] ss:$0 sm:$0xff] }
 0x4f7   : > { %v8508_v6 = vadd.f32 %v15600_v43, %v15599_v46  ;;  %v8959_v16 = vrot.slane %v10197_v0, 1  ;;  %v7451_v13 = vunpack.c.l.bf16 %v9984_v30  ;;  %v9030_v57 = vadd.f32 %v8950_v2, %v8803_v32  ;;  %v9991_v30 = vld [vmem:[%s11598_s11 + $0xcc] sm:$0xff]  }
 0x4f8   : > { %v9033_v1 = vadd.f32 %v8957_v37, %v8814_v38  ;;  %v8806_v7 = vadd.f32 %v8805_v22, %v8645_v24  ;;  %v8666_v58 = vadd.f32 %v10763_v5, %v8505_v41  ;;  %v8500_v10 = vadd.f32 %v15602_v56, %v15601_v63  ;;  %v8818_v47 = vpop.f32.mrf.mxu1  ;;  %v15606_v5 = vld [vmem:[#allocation107_spill] sm:$0xff] }
 0x4f9   : > { %v10766_v8 = vadd.f32 %v15049_v3, %v15036_v29  ;;  %v8658_v48 = vadd.f32 %v10757_v27, %v8497_v26  ;;  %v8966_v18 = vrot.slane %v7454_v34, 1  ;;  %v9064_v17 = vmax.f32 %v9032_v45, 0.0  ;;  %v10289_v24 = vld [vmem:[%s11598_s11 + $0xc0] sm:$0xff]   ;;  %v9993_v27 = vld [vmem:[%s11598_s11 + $0xd4] sm:$0x1] }
 0x4fa   : > { %v9065_v31 = vmax.f32 %v9033_v1, 0.0  ;;  %v9031_v35 = vadd.f32 %v8952_v50, %v8806_v7  ;;  %v8827_v33 = vadd.f32 %v10897_v36, %v8666_v58  ;;  %v10760_v2 = vadd.f32 %v14998_v59, %v14984_v28  ;;  %v10898_v37 = vpop.f32.mrf.mxu1  ;;  %v10774_v28 = vpop.f32.mrf.mxu0 }
 0x4fb   : > { %v8965_v54 = vsel %vm1048_vm1, %v8963_v12, %v8964_v60  ;;  %v8669_v23 = vadd.f32 %v10766_v8, %v8508_v6  ;;  %v8961_v55 = vrot.slane %v7451_v13, 1  ;;  %v9062_v40 = vmax.f32 %v9030_v57, 0.0  ;;  %v9990_v57 = vld [vmem:[%s11598_s11 + $0xc8] sm:$0x1] }
 0x4fc   : > { %v10260_v29 = vpack.c.bf16 %v9065_v31, %v9064_v17  ;;  %v9063_v3 = vmax.f32 %v9031_v35, 0.0  ;;  %v8819_v9 = vadd.f32 %v8818_v47, %v8658_v48  ;;  %v10433_v11 = vadd.f32 %v15604_v39, %v15603_v25  ;;  %v8821_v44 = vpop.f32.mrf.mxu1  ;;  %v10776_v26 = vpop.f32.mrf.mxu0  ;;  %v15608_v35 = vld [vmem:[#allocation55_spill] sm:$0xff]  ;;  %v15609_v39 = vld [vmem:[#allocation42_spill] sm:$0xff] }
 0x4fd   : > { %v8960_v51 = vsel %vm1048_vm1, %v8958_v19, %v8959_v16  ;;  %v8967_v50 = vsel %vm1048_vm1, %v8964_v60, %v8966_v18  ;;  %v9036_v0 = vadd.f32 %v8965_v54, %v8827_v33  ;;  %v8830_v34 = vadd.f32 %v10898_v37, %v8669_v23  ;;  %v15605_v19 = vld [vmem:[#allocation105_spill] sm:$0xff] }
 0x4fe   : > { %10300 = vst [vmem:[%s14953_s22 + $0x58] sm:$0xff] %v10260_v29   ;;  %v10255_v59 = vpack.c.bf16 %v9063_v3, %v9062_v40  ;;  %v8661_v49 = vadd.f32 %v10760_v2, %v8500_v10  ;;  %v8962_v41 = vsel %vm1048_vm1, %v8959_v16, %v8961_v55  ;;  %v9034_v61 = vadd.f32 %v8960_v51, %v8819_v9  ;;  %v10777_v1 = vpop.f32.mrf.mxu0  ;;  %v15607_v10 = vld [vmem:[#allocation29_spill] sm:$0xff] }
 0x4ff   : > { %v9037_v32 = vadd.f32 %v8967_v50, %v8830_v34  ;;  %v8191_v21 = vadd.f32 %v11450_v4, %v10433_v11  ;;  %v9068_v52 = vmax.f32 %v9036_v0, 0.0  ;;  %v10545_v45 = vadd.f32 %v15606_v5, %v15605_v19 }
 0x500   : > { %10299 = vst [vmem:[%s14953_s22 + $0x50] sm:$0xff] %v10255_v59   ;;  %v8822_v42 = vadd.f32 %v8821_v44, %v8661_v49  ;;  %v7458_v38 = vunpack.c.l.bf16 %v9991_v30  ;;  %v9066_v46 = vmax.f32 %v9034_v61, 0.0  ;;  %v7459_v22 = vunpack.c.h.bf16 %v9991_v30 }
 0x501   : > { %v9069_v12 = vmax.f32 %v9037_v32, 0.0  ;;  %v8352_v16 = vadd.f32 %v10545_v45, %v8191_v21  ;;  %v10775_v13 = vadd.f32 %v10774_v28, %v10773_v62  ;;  %v10200_v58 = vunpack.c.l.bf16 %v10289_v24  ;;  %v10901_v62 = vpop.f32.mrf.mxu1  ;;  %v15610_v28 = vld [vmem:[#allocation33_spill] sm:$0xff] }
 0x502   : > { %v9035_v60 = vadd.f32 %v8962_v41, %v8822_v42  ;;  %v10201_v63 = vunpack.c.h.bf16 %v10289_v24  ;;  %v7460_v56 = vunpack.c.l.bf16 %v9993_v27  ;;  %v8973_v36 = vrot.slane %v7458_v38, 1 }
 0x503   : > { %v10270_v43 = vpack.c.bf16 %v9069_v12, %v9068_v52  ;;  %v8513_v8 = vadd.f32 %v15607_v10, %v8352_v16  ;;  %v8974_v48 = vrot.slane %v7459_v22, 1  ;;  %v7457_v18 = vunpack.c.l.bf16 %v9990_v57  ;;  %v8834_v29 = vpop.f32.mrf.mxu1 }
 0x504   : > { %v9067_v6 = vmax.f32 %v9035_v60, 0.0  ;;  %v10769_v17 = vadd.f32 %v15073_v14, %v15057_v53  ;;  %v10778_v31 = vadd.f32 %v10777_v1, %v10776_v26  ;;  %v8682_v33 = vadd.f32 %v10775_v13, %v15608_v35 }
 0x505   : > { %10302 = vst [vmem:[%s14953_s22 + $0x68] sm:$0xff] %v10270_v43   ;;  %v8968_v2 = vrot.slane %v10200_v58, 1  ;;  %v8969_v54 = vrot.slane %v10201_v63, 1  ;;  %v8976_v47 = vrot.slane %v7460_v56, 1  ;;  %v8975_v40 = vsel %vm1048_vm1, %v8973_v36, %v8974_v48  ;;  %v10902_v14 = vpop.f32.mrf.mxu1 }
 0x506   : > { %v10265_v7 = vpack.c.bf16 %v9067_v6, %v9066_v46  ;;  %v8843_v23 = vadd.f32 %v10901_v62, %v8682_v33  ;;  %v8674_v55 = vadd.f32 %v10769_v17, %v8513_v8  ;;  %v8971_v3 = vrot.slane %v7457_v18, 1 }
 0x507   : > { %v10772_v9 = vadd.f32 %v15097_v20, %v15084_v15  ;;  %v8685_v11 = vadd.f32 %v10778_v31, %v15609_v39  ;;  %v8970_v53 = vsel %vm1048_vm1, %v8968_v2, %v8969_v54  ;;  %v8977_v51 = vsel %vm1048_vm1, %v8974_v48, %v8976_v47  ;;  %v8837_v0 = vpop.f32.mrf.mxu1 }
 0x508   : > { %10301 = vst [vmem:[%s14953_s22 + $0x60] sm:$0xff] %v10265_v7   ;;  %v8835_v25 = vadd.f32 %v8834_v29, %v8674_v55  ;;  %v9040_v37 = vadd.f32 %v8975_v40, %v8843_v23  ;;  %v8972_v34 = vsel %vm1048_vm1, %v8969_v54, %v8971_v3 }
 0x509   : > { %v8846_v50 = vadd.f32 %v10902_v14, %v8685_v11  ;;  %v8677_v59 = vadd.f32 %v10772_v9, %v15610_v28 }
 0x50a   : > { %v9038_v49 = vadd.f32 %v8970_v53, %v8835_v25  ;;  %v9072_v20 = vmax.f32 %v9040_v37, 0.0 }
 0x50b   : > { %v9041_v44 = vadd.f32 %v8977_v51, %v8846_v50  ;;  %v8838_v15 = vadd.f32 %v8837_v0, %v8677_v59 }
 0x50c   : > { %v9070_v32 = vmax.f32 %v9038_v49, 0.0 }
 0x50d   : > { %v9073_v41 = vmax.f32 %v9041_v44, 0.0  ;;  %v9039_v61 = vadd.f32 %v8972_v34, %v8838_v15 }
 0x50f   : > { %v10280_v42 = vpack.c.bf16 %v9073_v41, %v9072_v20  ;;  %v9071_v30 = vmax.f32 %v9039_v61, 0.0 }
 0x511   : > { %10304 = vst [vmem:[%s14953_s22 + $0x78] sm:$0xff] %v10280_v42   ;;  %v10275_v4 = vpack.c.bf16 %v9071_v30, %v9070_v32 }
 0x513   : > { %10303 = vst [vmem:[%s14953_s22 + $0x70] sm:$0xff] %v10275_v4  }
 0x514 PF: > { %s15_s20 = sadd.s32 1, %s11473_s20   ;;  %s15611_s18 = smov %s11469_s19 }
 0x515   : > { %p12_p5 = scmp.ge.s32.totalorder %s15_s20, 4   ;;  %s15612_s19 = smov %s15614_s21 }
 0x517   :  { %14 = sbr.rel (!%p12_p5) target bundleno = 2 (0x2), region = 84 }

</bundles_post_ra>
